<compile_context>
chip_gen: v7x
topology: tpu7x:2x2x1
jax: 0.10.0
libtpu: 0.0.40
codegen_flags: <defaults>
</compile_context>

<pallas_src>
import functools
import math

import jax
import jax.numpy as jnp
import numpy as np
from jax.experimental import pallas as pl
from jax.experimental.pallas import tpu as pltpu


def _round_up(v, m):
    return (v + m - 1) // m * m


def _pool_out(n):
    # MaxPool2d(kernel_size=3, stride=2), VALID
    return (n - 3) // 2 + 1


# ----------------------------------------------------------------------------
# Fused kernel: one grid step == one image, everything resident in VMEM.
# ----------------------------------------------------------------------------
def _feature_extractor_kernel(
    x1_ref, w1_ref, s1_ref, b1_ref,        # conv1: pre-built patches + weights + BN affine
    w2_ref, s2_ref, b2_ref,                 # conv2: per-tap weights + BN affine
    w3_ref, b3_ref,                          # conv3: per-tap weights + bias
    o_ref,                                   # (1, OH3*OW3, OC3) f32 output
    c1_scr, p1_scr, p2_scr,                  # VMEM scratch
    *, dims,
):
    (OH1, OW1, OW1P, K1, OC1,
     PH1, PW1,
     KH2, KW2, OH2, OW2, OC2,
     PH2, PW2,
     KH3, KW3, OH3, OW3, OC3) = dims
    f32 = jnp.float32

    # -------------------- stage 1: conv1 (patches already im2col'd) ---------
    # Row-blocked single matmuls into the flat (OH1*OW1P, OC1) scratch; the BN
    # scale/bias + ReLU epilogue is applied (in f32) when rows are re-read for pooling.
    r0 = 0
    while r0 < OH1:
        nr = min(8, OH1 - r0)
        lhs = x1_ref[0, r0:r0 + nr, :, :].reshape(nr * OW1P, K1)      # bf16, layout-preserving
        c1_scr[r0 * OW1P:(r0 + nr) * OW1P, :] = jnp.dot(
            lhs, w1_ref[...], preferred_element_type=f32)
        r0 += nr

    scale1 = s1_ref[...]     # (1, OC1) f32
    bias1 = b1_ref[...]

    # -------------------- pool1 (3x3 / stride 2) fused with BN + ReLU -------
    for p in range(PH1):
        rows = None
        for di in range(3):
            h = 2 * p + di
            row = c1_scr[h * OW1P:h * OW1P + OW1P, :] * scale1 + bias1
            row = jnp.maximum(row, 0.0)
            rows = row if rows is None else jnp.maximum(rows, row)
        for q in range(PW1):
            w = 2 * q
            win = jnp.maximum(
                jnp.maximum(rows[w:w + 1, :], rows[w + 1:w + 2, :]),
                rows[w + 2:w + 3, :])
            p1_scr[p, q:q + 1, :] = win

    # -------------------- stage 2: conv2 with in-kernel im2col --------------
    # Per-tap (KH2*KW2) matmuls on VMEM-resident pooled activations; bf16 MXU
    # inputs, f32 register accumulator (fits in a handful of vregs).
    acc2 = None
    for t in range(KH2 * KW2):
        ki, kj = t // KW2, t % KW2
        lhs = p1_scr[ki:ki + OH2, kj:kj + OW2, :]                     # (OH2, OW2, OC1) f32
        lhs = lhs.reshape(OH2 * OW2, OC1).astype(jnp.bfloat16)
        d = jnp.dot(lhs, w2_ref[t], preferred_element_type=f32)
        acc2 = d if acc2 is None else acc2 + d

    scale2 = s2_ref[...]
    bias2 = b2_ref[...]

    # -------------------- pool2 fused with BN + (Dropout2d=id) + ReLU -------
    for p in range(PH2):
        rows = None
        for di in range(3):
            h = 2 * p + di
            row = acc2[h * OW2:(h + 1) * OW2, :] * scale2 + bias2
            row = jnp.maximum(row, 0.0)
            rows = row if rows is None else jnp.maximum(rows, row)
        for q in range(PW2):
            w = 2 * q
            win = jnp.maximum(
                jnp.maximum(rows[w:w + 1, :], rows[w + 1:w + 2, :]),
                rows[w + 2:w + 3, :])
            p2_scr[p, q:q + 1, :] = win

    # -------------------- stage 3: conv3 (no BN / ReLU) ----------------------
    acc3 = None
    for t in range(KH3 * KW3):
        ki, kj = t // KW3, t % KW3
        lhs = p2_scr[ki:ki + OH3, kj:kj + OW3, :]
        lhs = lhs.reshape(OH3 * OW3, OC2).astype(jnp.bfloat16)
        d = jnp.dot(lhs, w3_ref[t], preferred_element_type=f32)
        acc3 = d if acc3 is None else acc3 + d

    o_ref[0] = (acc3 + b3_ref[...]).astype(o_ref.dtype)


# ----------------------------------------------------------------------------
# Wrapper: parameter folding, conv1 patch assembly, pallas_call.
# ----------------------------------------------------------------------------
def feature_extractor_forward(x_nchw, params, eps=1e-5):
    x = jnp.transpose(x_nchw, (0, 2, 3, 1)).astype(jnp.float32)   # -> NHWC
    N, H, W, Cin = x.shape

    w1, b1c = params["conv1_w"], params["conv1_b"]
    w2, b2c = params["conv2_w"], params["conv2_b"]
    w3, b3c = params["conv3_w"], params["conv3_b"]
    OC1, _, KH1, KW1 = w1.shape
    OC2, C2in, KH2, KW2 = w2.shape
    OC3, C3in, KH3, KW3 = w3.shape

    OH1, OW1 = H - KH1 + 1, W - KW1 + 1
    PH1, PW1 = _pool_out(OH1), _pool_out(OW1)
    OH2, OW2 = PH1 - KH2 + 1, PW1 - KW2 + 1
    PH2, PW2 = _pool_out(OH2), _pool_out(OW2)
    OH3, OW3 = PH2 - KH3 + 1, PW2 - KW3 + 1
    assert OH3 >= 1 and OW3 >= 1, "input too small for this network"

    OW1P = _round_up(OW1, 16)          # bf16 sublane tile -> free in-kernel flatten
    K1 = KH1 * KW1 * Cin

    # conv1 im2col patches built here (tiny in HBM, written directly as bf16);
    # conv2/conv3 patches are built inside the kernel from VMEM-resident activations.
    cols = [x[:, i:i + OH1, j:j + OW1, :] for i in range(KH1) for j in range(KW1)]
    a1 = jnp.concatenate(cols, axis=-1)                              # (N, OH1, OW1, K1)
    a1 = jnp.pad(a1, ((0, 0), (0, 0), (0, OW1P - OW1), (0, 0)))
    a1 = a1.astype(jnp.bfloat16)

    def fold_bn(conv_b, bn):
        gamma, beta, mean, var = bn
        scale = gamma / jnp.sqrt(var + eps)
        bias = beta + (conv_b - mean) * scale
        return (scale.reshape(1, -1).astype(jnp.float32),
                bias.reshape(1, -1).astype(jnp.float32))

    s1, bb1 = fold_bn(b1c, params["bn1"])
    s2, bb2 = fold_bn(b2c, params["bn2"])
    bb3 = b3c.reshape(1, -1).astype(jnp.float32)

    # Weights: bf16, unscaled (BN scale stays in the f32 epilogue).
    w1mat = jnp.transpose(w1, (2, 3, 1, 0)).reshape(K1, OC1).astype(jnp.bfloat16)
    w2taps = jnp.transpose(w2, (2, 3, 1, 0)).reshape(KH2 * KW2, C2in, OC2).astype(jnp.bfloat16)
    w3taps = jnp.transpose(w3, (2, 3, 1, 0)).reshape(KH3 * KW3, C3in, OC3).astype(jnp.bfloat16)

    dims = (OH1, OW1, OW1P, K1, OC1, PH1, PW1,
            KH2, KW2, OH2, OW2, OC2, PH2, PW2,
            KH3, KW3, OH3, OW3, OC3)
    kernel = functools.partial(_feature_extractor_kernel, dims=dims)

    out = pl.pallas_call(
        kernel,
        out_shape=jax.ShapeDtypeStruct((N, OH3 * OW3, OC3), jnp.float32),
        grid=(N,),
        in_specs=[
            pl.BlockSpec((1, OH1, OW1P, K1), lambda n: (n, 0, 0, 0)),
            pl.BlockSpec((K1, OC1), lambda n: (0, 0)),
            pl.BlockSpec((1, OC1), lambda n: (0, 0)),
            pl.BlockSpec((1, OC1), lambda n: (0, 0)),
            pl.BlockSpec((KH2 * KW2, C2in, OC2), lambda n: (0, 0, 0)),
            pl.BlockSpec((1, OC2), lambda n: (0, 0)),
            pl.BlockSpec((1, OC2), lambda n: (0, 0)),
            pl.BlockSpec((KH3 * KW3, C3in, OC3), lambda n: (0, 0, 0)),
            pl.BlockSpec((1, OC3), lambda n: (0, 0)),
        ],
        out_specs=pl.BlockSpec((1, OH3 * OW3, OC3), lambda n: (n, 0, 0)),
        scratch_shapes=[
            pltpu.VMEM((OH1 * OW1P, OC1), jnp.float32),   # conv1 raw output (flat rows)
            pltpu.VMEM((PH1, PW1, OC1), jnp.float32),     # pooled stage-1 activations
            pltpu.VMEM((PH2, PW2, OC2), jnp.float32),     # pooled stage-2 activations
        ],
        compiler_params=pltpu.CompilerParams(
            dimension_semantics=("parallel",),
            vmem_limit_bytes=32 * 1024 * 1024,
        ),
    )(a1, w1mat, s1, bb1, w2taps, s2, bb2, w3taps, bb3)

    # Match PyTorch: NCHW-contiguous reshape(-1, 128)
    feat = out.reshape(N, OH3, OW3, OC3)
    feat = jnp.transpose(feat, (0, 3, 1, 2)).reshape(-1, OC3)
    return feat


# ----------------------------------------------------------------------------
# Parameters (deterministic, PyTorch-like shapes)
# ----------------------------------------------------------------------------
def init_params(key, in_chans=3):
    ks = jax.random.split(key, 12)

    def u(k, shape, fan_in):
        bound = 1.0 / math.sqrt(fan_in)
        return jax.random.uniform(k, shape, jnp.float32, -bound, bound)

    def bn(k, c):
        k1, k2, k3 = jax.random.split(k, 3)
        gamma = 1.0 + 0.1 * jax.random.normal(k1, (c,), jnp.float32)
        beta = 0.1 * jax.random.normal(k2, (c,), jnp.float32)
        mean = 0.1 * jax.random.normal(k3, (c,), jnp.float32)
        var = jnp.ones((c,), jnp.float32) * 1.2
        return (gamma, beta, mean, var)

    p = {}
    p["conv1_w"] = u(ks[0], (64, in_chans, 4, 4), in_chans * 16)
    p["conv1_b"] = u(ks[1], (64,), in_chans * 16)
    p["bn1"] = bn(ks[2], 64)
    p["conv2_w"] = u(ks[3], (64, 64, 5, 5), 64 * 25)
    p["conv2_b"] = u(ks[4], (64,), 64 * 25)
    p["bn2"] = bn(ks[5], 64)
    p["conv3_w"] = u(ks[6], (128, 64, 3, 3), 64 * 9)
    p["conv3_b"] = u(ks[7], (128,), 64 * 9)
    return p


# ----------------------------------------------------------------------------
# Pure-JAX reference (eval semantics)
# ----------------------------------------------------------------------------
def reference_forward(x_nchw, params, eps=1e-5):
    x = jnp.transpose(x_nchw, (0, 2, 3, 1)).astype(jnp.float32)

    def conv(x, w, b):
        wt = jnp.transpose(w, (2, 3, 1, 0))
        y = jax.lax.conv_general_dilated(
            x, wt, (1, 1), "VALID",
            dimension_numbers=("NHWC", "HWIO", "NHWC"))
        return y + b

    def bn(x, p):
        gamma, beta, mean, var = p
        return gamma * (x - mean) / jnp.sqrt(var + eps) + beta

    def pool(x):
        return jax.lax.reduce_window(
            x, -jnp.inf, jax.lax.max, (1, 3, 3, 1), (1, 2, 2, 1), "VALID")

    x = jax.nn.relu(bn(conv(x, params["conv1_w"], params["conv1_b"]), params["bn1"]))
    x = pool(x)
    x = jax.nn.relu(bn(conv(x, params["conv2_w"], params["conv2_b"]), params["bn2"]))
    x = pool(x)
    x = conv(x, params["conv3_w"], params["conv3_b"])
    return jnp.transpose(x, (0, 3, 1, 2)).reshape(-1, 128)


if __name__ == "__main__":
    key = jax.random.PRNGKey(0)
    kx, kp = jax.random.split(key)

    batch, in_chans, spatial = 2, 3, 28   # 28x28 -> final 1x1x128 feature map
    x = jax.random.normal(kx, (batch, in_chans, spatial, spatial), jnp.float32)
    params = init_params(kp, in_chans=in_chans)

    fwd = jax.jit(feature_extractor_forward)
    out = jax.block_until_ready(fwd(x, params))

    ref = jax.block_until_ready(reference_forward(x, params))
    assert out.shape == (batch, 128), out.shape
    # Tolerance accounts for bf16 matmul inputs (f32 accumulation) vs. the f32 reference.
    assert np.allclose(np.asarray(out), np.asarray(ref), rtol=3e-2, atol=3e-2)

    print("KERNEL_OK")
</pallas_src>

<mosaic_0001>
module attributes {stable_mosaic.version = 11 : i64} {
  func.func @_feature_extractor_kernel(%arg0: i32, %arg1: memref<1x25x32x48xbf16, #tpu.memory_space<vmem>>, %arg2: memref<48x64xbf16, #tpu.memory_space<vmem>>, %arg3: memref<1x64xf32, #tpu.memory_space<vmem>>, %arg4: memref<1x64xf32, #tpu.memory_space<vmem>>, %arg5: memref<25x64x64xbf16, #tpu.memory_space<vmem>>, %arg6: memref<1x64xf32, #tpu.memory_space<vmem>>, %arg7: memref<1x64xf32, #tpu.memory_space<vmem>>, %arg8: memref<9x64x128xbf16, #tpu.memory_space<vmem>>, %arg9: memref<1x128xf32, #tpu.memory_space<vmem>>, %arg10: memref<1x1x128xf32, #tpu.memory_space<vmem>>, %arg11: memref<800x64xf32, #tpu.memory_space<vmem>>, %arg12: memref<12x12x64xf32, #tpu.memory_space<vmem>>, %arg13: memref<3x3x64xf32, #tpu.memory_space<vmem>>) attributes {dimension_semantics = [#tpu.dimension_semantics<parallel>], iteration_bounds = array<i64: 2>, scalar_prefetch = 0 : i64, scratch_operands = 3 : i64, tpu.core_type = #tpu.core_type<tc>, window_params = [{transform_indices = @transform_0, window_bounds = array<i64: 1, 25, 32, 48>}, {pipeline_mode = #tpu.pipeline_mode<synchronous>, transform_indices = @transform_1, window_bounds = array<i64: 48, 64>}, {pipeline_mode = #tpu.pipeline_mode<synchronous>, transform_indices = @transform_2, window_bounds = array<i64: 1, 64>}, {pipeline_mode = #tpu.pipeline_mode<synchronous>, transform_indices = @transform_3, window_bounds = array<i64: 1, 64>}, {pipeline_mode = #tpu.pipeline_mode<synchronous>, transform_indices = @transform_4, window_bounds = array<i64: 25, 64, 64>}, {pipeline_mode = #tpu.pipeline_mode<synchronous>, transform_indices = @transform_5, window_bounds = array<i64: 1, 64>}, {pipeline_mode = #tpu.pipeline_mode<synchronous>, transform_indices = @transform_6, window_bounds = array<i64: 1, 64>}, {pipeline_mode = #tpu.pipeline_mode<synchronous>, transform_indices = @transform_7, window_bounds = array<i64: 9, 64, 128>}, {pipeline_mode = #tpu.pipeline_mode<synchronous>, transform_indices = @transform_8, window_bounds = array<i64: 1, 128>}, {transform_indices = @transform_9, window_bounds = array<i64: 1, 1, 128>}]} {
    %c0 = arith.constant 0 : index
    %c0_0 = arith.constant 0 : index
    %c0_1 = arith.constant 0 : index
    %c0_2 = arith.constant 0 : index
    %0 = vector.load %arg1[%c0, %c0_0, %c0_1, %c0_2] : memref<1x25x32x48xbf16, #tpu.memory_space<vmem>>, vector<1x8x32x48xbf16>
    %1 = vector.shape_cast %0 : vector<1x8x32x48xbf16> to vector<8x32x48xbf16>
    %2 = vector.shape_cast %1 : vector<8x32x48xbf16> to vector<256x48xbf16>
    %c0_3 = arith.constant 0 : index
    %c0_4 = arith.constant 0 : index
    %3 = vector.load %arg2[%c0_3, %c0_4] : memref<48x64xbf16, #tpu.memory_space<vmem>>, vector<48x64xbf16>
    %cst = arith.constant dense<0.000000e+00> : vector<256x64xf32>
    %4 = tpu.matmul %2, %3, %cst {dimension_numbers = #tpu.dot_dimension_numbers<[1], [0], [0], [1], [0, 0, 1, 1], [], []>} : vector<256x48xbf16>, vector<48x64xbf16>, vector<256x64xf32> -> vector<256x64xf32>
    %c0_5 = arith.constant 0 : index
    %c0_6 = arith.constant 0 : index
    %5 = vector.load %arg11[%c0_5, %c0_6] : memref<800x64xf32, #tpu.memory_space<vmem>>, vector<256x64xf32>
    tpu.vector_store %arg11[%c0_5, %c0_6], %4 {strides = array<i32>} : memref<800x64xf32, #tpu.memory_space<vmem>>, vector<256x64xf32>,
    %c0_7 = arith.constant 0 : index
    %c8 = arith.constant 8 : index
    %c0_8 = arith.constant 0 : index
    %c0_9 = arith.constant 0 : index
    %6 = vector.load %arg1[%c0_7, %c8, %c0_8, %c0_9] : memref<1x25x32x48xbf16, #tpu.memory_space<vmem>>, vector<1x8x32x48xbf16>
    %7 = vector.shape_cast %6 : vector<1x8x32x48xbf16> to vector<8x32x48xbf16>
    %8 = vector.shape_cast %7 : vector<8x32x48xbf16> to vector<256x48xbf16>
    %c0_10 = arith.constant 0 : index
    %c0_11 = arith.constant 0 : index
    %9 = vector.load %arg2[%c0_10, %c0_11] : memref<48x64xbf16, #tpu.memory_space<vmem>>, vector<48x64xbf16>
    %cst_12 = arith.constant dense<0.000000e+00> : vector<256x64xf32>
    %10 = tpu.matmul %8, %9, %cst_12 {dimension_numbers = #tpu.dot_dimension_numbers<[1], [0], [0], [1], [0, 0, 1, 1], [], []>} : vector<256x48xbf16>, vector<48x64xbf16>, vector<256x64xf32> -> vector<256x64xf32>
    %c256 = arith.constant 256 : index
    %c0_13 = arith.constant 0 : index
    %11 = vector.load %arg11[%c256, %c0_13] : memref<800x64xf32, #tpu.memory_space<vmem>>, vector<256x64xf32>
    tpu.vector_store %arg11[%c256, %c0_13], %10 {strides = array<i32>} : memref<800x64xf32, #tpu.memory_space<vmem>>, vector<256x64xf32>,
    %c0_14 = arith.constant 0 : index
    %c16 = arith.constant 16 : index
    %c0_15 = arith.constant 0 : index
    %c0_16 = arith.constant 0 : index
    %12 = vector.load %arg1[%c0_14, %c16, %c0_15, %c0_16] : memref<1x25x32x48xbf16, #tpu.memory_space<vmem>>, vector<1x8x32x48xbf16>
    %13 = vector.shape_cast %12 : vector<1x8x32x48xbf16> to vector<8x32x48xbf16>
    %14 = vector.shape_cast %13 : vector<8x32x48xbf16> to vector<256x48xbf16>
    %c0_17 = arith.constant 0 : index
    %c0_18 = arith.constant 0 : index
    %15 = vector.load %arg2[%c0_17, %c0_18] : memref<48x64xbf16, #tpu.memory_space<vmem>>, vector<48x64xbf16>
    %cst_19 = arith.constant dense<0.000000e+00> : vector<256x64xf32>
    %16 = tpu.matmul %14, %15, %cst_19 {dimension_numbers = #tpu.dot_dimension_numbers<[1], [0], [0], [1], [0, 0, 1, 1], [], []>} : vector<256x48xbf16>, vector<48x64xbf16>, vector<256x64xf32> -> vector<256x64xf32>
    %c512 = arith.constant 512 : index
    %c0_20 = arith.constant 0 : index
    %17 = vector.load %arg11[%c512, %c0_20] : memref<800x64xf32, #tpu.memory_space<vmem>>, vector<256x64xf32>
    tpu.vector_store %arg11[%c512, %c0_20], %16 {strides = array<i32>} : memref<800x64xf32, #tpu.memory_space<vmem>>, vector<256x64xf32>,
    %c0_21 = arith.constant 0 : index
    %c24 = arith.constant 24 : index
    %c0_22 = arith.constant 0 : index
    %c0_23 = arith.constant 0 : index
    %18 = vector.load %arg1[%c0_21, %c24, %c0_22, %c0_23] : memref<1x25x32x48xbf16, #tpu.memory_space<vmem>>, vector<1x1x32x48xbf16>
    %19 = vector.shape_cast %18 : vector<1x1x32x48xbf16> to vector<1x32x48xbf16>
    %20 = vector.shape_cast %19 : vector<1x32x48xbf16> to vector<32x48xbf16>
    %c0_24 = arith.constant 0 : index
    %c0_25 = arith.constant 0 : index
    %21 = vector.load %arg2[%c0_24, %c0_25] : memref<48x64xbf16, #tpu.memory_space<vmem>>, vector<48x64xbf16>
    %cst_26 = arith.constant dense<0.000000e+00> : vector<32x64xf32>
    %22 = tpu.matmul %20, %21, %cst_26 {dimension_numbers = #tpu.dot_dimension_numbers<[1], [0], [0], [1], [0, 0, 1, 1], [], []>} : vector<32x48xbf16>, vector<48x64xbf16>, vector<32x64xf32> -> vector<32x64xf32>
    %c768 = arith.constant 768 : index
    %c0_27 = arith.constant 0 : index
    %23 = vector.load %arg11[%c768, %c0_27] : memref<800x64xf32, #tpu.memory_space<vmem>>, vector<32x64xf32>
    tpu.vector_store %arg11[%c768, %c0_27], %22 {strides = array<i32>} : memref<800x64xf32, #tpu.memory_space<vmem>>, vector<32x64xf32>,
    %c0_28 = arith.constant 0 : index
    %c0_29 = arith.constant 0 : index
    %24 = vector.load %arg3[%c0_28, %c0_29] : memref<1x64xf32, #tpu.memory_space<vmem>>, vector<1x64xf32>
    %c0_30 = arith.constant 0 : index
    %c0_31 = arith.constant 0 : index
    %25 = vector.load %arg4[%c0_30, %c0_31] : memref<1x64xf32, #tpu.memory_space<vmem>>, vector<1x64xf32>
    %c0_32 = arith.constant 0 : index
    %c0_33 = arith.constant 0 : index
    %26 = vector.load %arg11[%c0_32, %c0_33] : memref<800x64xf32, #tpu.memory_space<vmem>>, vector<32x64xf32>
    %27 = vector.broadcast %24 : vector<1x64xf32> to vector<32x64xf32>
    %28 = arith.mulf %26, %27 : vector<32x64xf32>
    %29 = vector.broadcast %25 : vector<1x64xf32> to vector<32x64xf32>
    %30 = arith.addf %28, %29 : vector<32x64xf32>
    %cst_34 = arith.constant 0.000000e+00 : f32
    %31 = vector.broadcast %cst_34 : f32 to vector<32x64xf32>
    %32 = arith.maximumf %30, %31 : vector<32x64xf32>
    %c32 = arith.constant 32 : index
    %c0_35 = arith.constant 0 : index
    %33 = vector.load %arg11[%c32, %c0_35] : memref<800x64xf32, #tpu.memory_space<vmem>>, vector<32x64xf32>
    %34 = vector.broadcast %24 : vector<1x64xf32> to vector<32x64xf32>
    %35 = arith.mulf %33, %34 : vector<32x64xf32>
    %36 = vector.broadcast %25 : vector<1x64xf32> to vector<32x64xf32>
    %37 = arith.addf %35, %36 : vector<32x64xf32>
    %cst_36 = arith.constant 0.000000e+00 : f32
    %38 = vector.broadcast %cst_36 : f32 to vector<32x64xf32>
    %39 = arith.maximumf %37, %38 : vector<32x64xf32>
    %40 = arith.maximumf %32, %39 : vector<32x64xf32>
    %c64 = arith.constant 64 : index
    %c0_37 = arith.constant 0 : index
    %41 = vector.load %arg11[%c64, %c0_37] : memref<800x64xf32, #tpu.memory_space<vmem>>, vector<32x64xf32>
    %42 = vector.broadcast %24 : vector<1x64xf32> to vector<32x64xf32>
    %43 = arith.mulf %41, %42 : vector<32x64xf32>
    %44 = vector.broadcast %25 : vector<1x64xf32> to vector<32x64xf32>
    %45 = arith.addf %43, %44 : vector<32x64xf32>
    %cst_38 = arith.constant 0.000000e+00 : f32
    %46 = vector.broadcast %cst_38 : f32 to vector<32x64xf32>
    %47 = arith.maximumf %45, %46 : vector<32x64xf32>
    %48 = arith.maximumf %40, %47 : vector<32x64xf32>
    %49 = vector.extract_strided_slice %48 {offsets = [0, 0], sizes = [1, 64], strides = [1, 1]} : vector<32x64xf32> to vector<1x64xf32>
    %50 = vector.extract_strided_slice %48 {offsets = [1, 0], sizes = [1, 64], strides = [1, 1]} : vector<32x64xf32> to vector<1x64xf32>
    %51 = arith.maximumf %49, %50 : vector<1x64xf32>
    %52 = vector.extract_strided_slice %48 {offsets = [2, 0], sizes = [1, 64], strides = [1, 1]} : vector<32x64xf32> to vector<1x64xf32>
    %53 = arith.maximumf %51, %52 : vector<1x64xf32>
    %c0_39 = arith.constant 0 : index
    %c0_40 = arith.constant 0 : index
    %c0_41 = arith.constant 0 : index
    %54 = vector.load %arg12[%c0_39, %c0_40, %c0_41] : memref<12x12x64xf32, #tpu.memory_space<vmem>>, vector<1x1x64xf32>
    %55 = vector.shape_cast %54 : vector<1x1x64xf32> to vector<1x64xf32>
    %56 = vector.shape_cast %53 : vector<1x64xf32> to vector<1x1x64xf32>
    tpu.vector_store %arg12[%c0_39, %c0_40, %c0_41], %56 {strides = array<i32>} : memref<12x12x64xf32, #tpu.memory_space<vmem>>, vector<1x1x64xf32>,
    %57 = vector.extract_strided_slice %48 {offsets = [2, 0], sizes = [1, 64], strides = [1, 1]} : vector<32x64xf32> to vector<1x64xf32>
    %58 = vector.extract_strided_slice %48 {offsets = [3, 0], sizes = [1, 64], strides = [1, 1]} : vector<32x64xf32> to vector<1x64xf32>
    %59 = arith.maximumf %57, %58 : vector<1x64xf32>
    %60 = vector.extract_strided_slice %48 {offsets = [4, 0], sizes = [1, 64], strides = [1, 1]} : vector<32x64xf32> to vector<1x64xf32>
    %61 = arith.maximumf %59, %60 : vector<1x64xf32>
    %c0_42 = arith.constant 0 : index
    %c1 = arith.constant 1 : index
    %c0_43 = arith.constant 0 : index
    %62 = vector.load %arg12[%c0_42, %c1, %c0_43] : memref<12x12x64xf32, #tpu.memory_space<vmem>>, vector<1x1x64xf32>
    %63 = vector.shape_cast %62 : vector<1x1x64xf32> to vector<1x64xf32>
    %64 = vector.shape_cast %61 : vector<1x64xf32> to vector<1x1x64xf32>
    tpu.vector_store %arg12[%c0_42, %c1, %c0_43], %64 {strides = array<i32>} : memref<12x12x64xf32, #tpu.memory_space<vmem>>, vector<1x1x64xf32>,
    %65 = vector.extract_strided_slice %48 {offsets = [4, 0], sizes = [1, 64], strides = [1, 1]} : vector<32x64xf32> to vector<1x64xf32>
    %66 = vector.extract_strided_slice %48 {offsets = [5, 0], sizes = [1, 64], strides = [1, 1]} : vector<32x64xf32> to vector<1x64xf32>
    %67 = arith.maximumf %65, %66 : vector<1x64xf32>
    %68 = vector.extract_strided_slice %48 {offsets = [6, 0], sizes = [1, 64], strides = [1, 1]} : vector<32x64xf32> to vector<1x64xf32>
    %69 = arith.maximumf %67, %68 : vector<1x64xf32>
    %c0_44 = arith.constant 0 : index
    %c2 = arith.constant 2 : index
    %c0_45 = arith.constant 0 : index
    %70 = vector.load %arg12[%c0_44, %c2, %c0_45] : memref<12x12x64xf32, #tpu.memory_space<vmem>>, vector<1x1x64xf32>
    %71 = vector.shape_cast %70 : vector<1x1x64xf32> to vector<1x64xf32>
    %72 = vector.shape_cast %69 : vector<1x64xf32> to vector<1x1x64xf32>
    tpu.vector_store %arg12[%c0_44, %c2, %c0_45], %72 {strides = array<i32>} : memref<12x12x64xf32, #tpu.memory_space<vmem>>, vector<1x1x64xf32>,
    %73 = vector.extract_strided_slice %48 {offsets = [6, 0], sizes = [1, 64], strides = [1, 1]} : vector<32x64xf32> to vector<1x64xf32>
    %74 = vector.extract_strided_slice %48 {offsets = [7, 0], sizes = [1, 64], strides = [1, 1]} : vector<32x64xf32> to vector<1x64xf32>
    %75 = arith.maximumf %73, %74 : vector<1x64xf32>
    %76 = vector.extract_strided_slice %48 {offsets = [8, 0], sizes = [1, 64], strides = [1, 1]} : vector<32x64xf32> to vector<1x64xf32>
    %77 = arith.maximumf %75, %76 : vector<1x64xf32>
    %c0_46 = arith.constant 0 : index
    %c3 = arith.constant 3 : index
    %c0_47 = arith.constant 0 : index
    %78 = vector.load %arg12[%c0_46, %c3, %c0_47] : memref<12x12x64xf32, #tpu.memory_space<vmem>>, vector<1x1x64xf32>
    %79 = vector.shape_cast %78 : vector<1x1x64xf32> to vector<1x64xf32>
    %80 = vector.shape_cast %77 : vector<1x64xf32> to vector<1x1x64xf32>
    tpu.vector_store %arg12[%c0_46, %c3, %c0_47], %80 {strides = array<i32>} : memref<12x12x64xf32, #tpu.memory_space<vmem>>, vector<1x1x64xf32>,
    %81 = vector.extract_strided_slice %48 {offsets = [8, 0], sizes = [1, 64], strides = [1, 1]} : vector<32x64xf32> to vector<1x64xf32>
    %82 = vector.extract_strided_slice %48 {offsets = [9, 0], sizes = [1, 64], strides = [1, 1]} : vector<32x64xf32> to vector<1x64xf32>
    %83 = arith.maximumf %81, %82 : vector<1x64xf32>
    %84 = vector.extract_strided_slice %48 {offsets = [10, 0], sizes = [1, 64], strides = [1, 1]} : vector<32x64xf32> to vector<1x64xf32>
    %85 = arith.maximumf %83, %84 : vector<1x64xf32>
    %c0_48 = arith.constant 0 : index
    %c4 = arith.constant 4 : index
    %c0_49 = arith.constant 0 : index
    %86 = vector.load %arg12[%c0_48, %c4, %c0_49] : memref<12x12x64xf32, #tpu.memory_space<vmem>>, vector<1x1x64xf32>
    %87 = vector.shape_cast %86 : vector<1x1x64xf32> to vector<1x64xf32>
    %88 = vector.shape_cast %85 : vector<1x64xf32> to vector<1x1x64xf32>
    tpu.vector_store %arg12[%c0_48, %c4, %c0_49], %88 {strides = array<i32>} : memref<12x12x64xf32, #tpu.memory_space<vmem>>, vector<1x1x64xf32>,
    %89 = vector.extract_strided_slice %48 {offsets = [10, 0], sizes = [1, 64], strides = [1, 1]} : vector<32x64xf32> to vector<1x64xf32>
    %90 = vector.extract_strided_slice %48 {offsets = [11, 0], sizes = [1, 64], strides = [1, 1]} : vector<32x64xf32> to vector<1x64xf32>
    %91 = arith.maximumf %89, %90 : vector<1x64xf32>
    %92 = vector.extract_strided_slice %48 {offsets = [12, 0], sizes = [1, 64], strides = [1, 1]} : vector<32x64xf32> to vector<1x64xf32>
    %93 = arith.maximumf %91, %92 : vector<1x64xf32>
    %c0_50 = arith.constant 0 : index
    %c5 = arith.constant 5 : index
    %c0_51 = arith.constant 0 : index
    %94 = vector.load %arg12[%c0_50, %c5, %c0_51] : memref<12x12x64xf32, #tpu.memory_space<vmem>>, vector<1x1x64xf32>
    %95 = vector.shape_cast %94 : vector<1x1x64xf32> to vector<1x64xf32>
    %96 = vector.shape_cast %93 : vector<1x64xf32> to vector<1x1x64xf32>
    tpu.vector_store %arg12[%c0_50, %c5, %c0_51], %96 {strides = array<i32>} : memref<12x12x64xf32, #tpu.memory_space<vmem>>, vector<1x1x64xf32>,
    %97 = vector.extract_strided_slice %48 {offsets = [12, 0], sizes = [1, 64], strides = [1, 1]} : vector<32x64xf32> to vector<1x64xf32>
    %98 = vector.extract_strided_slice %48 {offsets = [13, 0], sizes = [1, 64], strides = [1, 1]} : vector<32x64xf32> to vector<1x64xf32>
    %99 = arith.maximumf %97, %98 : vector<1x64xf32>
    %100 = vector.extract_strided_slice %48 {offsets = [14, 0], sizes = [1, 64], strides = [1, 1]} : vector<32x64xf32> to vector<1x64xf32>
    %101 = arith.maximumf %99, %100 : vector<1x64xf32>
    %c0_52 = arith.constant 0 : index
    %c6 = arith.constant 6 : index
    %c0_53 = arith.constant 0 : index
    %102 = vector.load %arg12[%c0_52, %c6, %c0_53] : memref<12x12x64xf32, #tpu.memory_space<vmem>>, vector<1x1x64xf32>
    %103 = vector.shape_cast %102 : vector<1x1x64xf32> to vector<1x64xf32>
    %104 = vector.shape_cast %101 : vector<1x64xf32> to vector<1x1x64xf32>
    tpu.vector_store %arg12[%c0_52, %c6, %c0_53], %104 {strides = array<i32>} : memref<12x12x64xf32, #tpu.memory_space<vmem>>, vector<1x1x64xf32>,
    %105 = vector.extract_strided_slice %48 {offsets = [14, 0], sizes = [1, 64], strides = [1, 1]} : vector<32x64xf32> to vector<1x64xf32>
    %106 = vector.extract_strided_slice %48 {offsets = [15, 0], sizes = [1, 64], strides = [1, 1]} : vector<32x64xf32> to vector<1x64xf32>
    %107 = arith.maximumf %105, %106 : vector<1x64xf32>
    %108 = vector.extract_strided_slice %48 {offsets = [16, 0], sizes = [1, 64], strides = [1, 1]} : vector<32x64xf32> to vector<1x64xf32>
    %109 = arith.maximumf %107, %108 : vector<1x64xf32>
    %c0_54 = arith.constant 0 : index
    %c7 = arith.constant 7 : index
    %c0_55 = arith.constant 0 : index
    %110 = vector.load %arg12[%c0_54, %c7, %c0_55] : memref<12x12x64xf32, #tpu.memory_space<vmem>>, vector<1x1x64xf32>
    %111 = vector.shape_cast %110 : vector<1x1x64xf32> to vector<1x64xf32>
    %112 = vector.shape_cast %109 : vector<1x64xf32> to vector<1x1x64xf32>
    tpu.vector_store %arg12[%c0_54, %c7, %c0_55], %112 {strides = array<i32>} : memref<12x12x64xf32, #tpu.memory_space<vmem>>, vector<1x1x64xf32>,
    %113 = vector.extract_strided_slice %48 {offsets = [16, 0], sizes = [1, 64], strides = [1, 1]} : vector<32x64xf32> to vector<1x64xf32>
    %114 = vector.extract_strided_slice %48 {offsets = [17, 0], sizes = [1, 64], strides = [1, 1]} : vector<32x64xf32> to vector<1x64xf32>
    %115 = arith.maximumf %113, %114 : vector<1x64xf32>
    %116 = vector.extract_strided_slice %48 {offsets = [18, 0], sizes = [1, 64], strides = [1, 1]} : vector<32x64xf32> to vector<1x64xf32>
    %117 = arith.maximumf %115, %116 : vector<1x64xf32>
    %c0_56 = arith.constant 0 : index
    %c8_57 = arith.constant 8 : index
    %c0_58 = arith.constant 0 : index
    %118 = vector.load %arg12[%c0_56, %c8_57, %c0_58] : memref<12x12x64xf32, #tpu.memory_space<vmem>>, vector<1x1x64xf32>
    %119 = vector.shape_cast %118 : vector<1x1x64xf32> to vector<1x64xf32>
    %120 = vector.shape_cast %117 : vector<1x64xf32> to vector<1x1x64xf32>
    tpu.vector_store %arg12[%c0_56, %c8_57, %c0_58], %120 {strides = array<i32>} : memref<12x12x64xf32, #tpu.memory_space<vmem>>, vector<1x1x64xf32>,
    %121 = vector.extract_strided_slice %48 {offsets = [18, 0], sizes = [1, 64], strides = [1, 1]} : vector<32x64xf32> to vector<1x64xf32>
    %122 = vector.extract_strided_slice %48 {offsets = [19, 0], sizes = [1, 64], strides = [1, 1]} : vector<32x64xf32> to vector<1x64xf32>
    %123 = arith.maximumf %121, %122 : vector<1x64xf32>
    %124 = vector.extract_strided_slice %48 {offsets = [20, 0], sizes = [1, 64], strides = [1, 1]} : vector<32x64xf32> to vector<1x64xf32>
    %125 = arith.maximumf %123, %124 : vector<1x64xf32>
    %c0_59 = arith.constant 0 : index
    %c9 = arith.constant 9 : index
    %c0_60 = arith.constant 0 : index
    %126 = vector.load %arg12[%c0_59, %c9, %c0_60] : memref<12x12x64xf32, #tpu.memory_space<vmem>>, vector<1x1x64xf32>
    %127 = vector.shape_cast %126 : vector<1x1x64xf32> to vector<1x64xf32>
    %128 = vector.shape_cast %125 : vector<1x64xf32> to vector<1x1x64xf32>
    tpu.vector_store %arg12[%c0_59, %c9, %c0_60], %128 {strides = array<i32>} : memref<12x12x64xf32, #tpu.memory_space<vmem>>, vector<1x1x64xf32>,
    %129 = vector.extract_strided_slice %48 {offsets = [20, 0], sizes = [1, 64], strides = [1, 1]} : vector<32x64xf32> to vector<1x64xf32>
    %130 = vector.extract_strided_slice %48 {offsets = [21, 0], sizes = [1, 64], strides = [1, 1]} : vector<32x64xf32> to vector<1x64xf32>
    %131 = arith.maximumf %129, %130 : vector<1x64xf32>
    %132 = vector.extract_strided_slice %48 {offsets = [22, 0], sizes = [1, 64], strides = [1, 1]} : vector<32x64xf32> to vector<1x64xf32>
    %133 = arith.maximumf %131, %132 : vector<1x64xf32>
    %c0_61 = arith.constant 0 : index
    %c10 = arith.constant 10 : index
    %c0_62 = arith.constant 0 : index
    %134 = vector.load %arg12[%c0_61, %c10, %c0_62] : memref<12x12x64xf32, #tpu.memory_space<vmem>>, vector<1x1x64xf32>
    %135 = vector.shape_cast %134 : vector<1x1x64xf32> to vector<1x64xf32>
    %136 = vector.shape_cast %133 : vector<1x64xf32> to vector<1x1x64xf32>
    tpu.vector_store %arg12[%c0_61, %c10, %c0_62], %136 {strides = array<i32>} : memref<12x12x64xf32, #tpu.memory_space<vmem>>, vector<1x1x64xf32>,
    %137 = vector.extract_strided_slice %48 {offsets = [22, 0], sizes = [1, 64], strides = [1, 1]} : vector<32x64xf32> to vector<1x64xf32>
    %138 = vector.extract_strided_slice %48 {offsets = [23, 0], sizes = [1, 64], strides = [1, 1]} : vector<32x64xf32> to vector<1x64xf32>
    %139 = arith.maximumf %137, %138 : vector<1x64xf32>
    %140 = vector.extract_strided_slice %48 {offsets = [24, 0], sizes = [1, 64], strides = [1, 1]} : vector<32x64xf32> to vector<1x64xf32>
    %141 = arith.maximumf %139, %140 : vector<1x64xf32>
    %c0_63 = arith.constant 0 : index
    %c11 = arith.constant 11 : index
    %c0_64 = arith.constant 0 : index
    %142 = vector.load %arg12[%c0_63, %c11, %c0_64] : memref<12x12x64xf32, #tpu.memory_space<vmem>>, vector<1x1x64xf32>
    %143 = vector.shape_cast %142 : vector<1x1x64xf32> to vector<1x64xf32>
    %144 = vector.shape_cast %141 : vector<1x64xf32> to vector<1x1x64xf32>
    tpu.vector_store %arg12[%c0_63, %c11, %c0_64], %144 {strides = array<i32>} : memref<12x12x64xf32, #tpu.memory_space<vmem>>, vector<1x1x64xf32>,
    %c64_65 = arith.constant 64 : index
    %c0_66 = arith.constant 0 : index
    %145 = vector.load %arg11[%c64_65, %c0_66] : memref<800x64xf32, #tpu.memory_space<vmem>>, vector<32x64xf32>
    %146 = vector.broadcast %24 : vector<1x64xf32> to vector<32x64xf32>
    %147 = arith.mulf %145, %146 : vector<32x64xf32>
    %148 = vector.broadcast %25 : vector<1x64xf32> to vector<32x64xf32>
    %149 = arith.addf %147, %148 : vector<32x64xf32>
    %cst_67 = arith.constant 0.000000e+00 : f32
    %150 = vector.broadcast %cst_67 : f32 to vector<32x64xf32>
    %151 = arith.maximumf %149, %150 : vector<32x64xf32>
    %c96 = arith.constant 96 : index
    %c0_68 = arith.constant 0 : index
    %152 = vector.load %arg11[%c96, %c0_68] : memref<800x64xf32, #tpu.memory_space<vmem>>, vector<32x64xf32>
    %153 = vector.broadcast %24 : vector<1x64xf32> to vector<32x64xf32>
    %154 = arith.mulf %152, %153 : vector<32x64xf32>
    %155 = vector.broadcast %25 : vector<1x64xf32> to vector<32x64xf32>
    %156 = arith.addf %154, %155 : vector<32x64xf32>
    %cst_69 = arith.constant 0.000000e+00 : f32
    %157 = vector.broadcast %cst_69 : f32 to vector<32x64xf32>
    %158 = arith.maximumf %156, %157 : vector<32x64xf32>
    %159 = arith.maximumf %151, %158 : vector<32x64xf32>
    %c128 = arith.constant 128 : index
    %c0_70 = arith.constant 0 : index
    %160 = vector.load %arg11[%c128, %c0_70] : memref<800x64xf32, #tpu.memory_space<vmem>>, vector<32x64xf32>
    %161 = vector.broadcast %24 : vector<1x64xf32> to vector<32x64xf32>
    %162 = arith.mulf %160, %161 : vector<32x64xf32>
    %163 = vector.broadcast %25 : vector<1x64xf32> to vector<32x64xf32>
    %164 = arith.addf %162, %163 : vector<32x64xf32>
    %cst_71 = arith.constant 0.000000e+00 : f32
    %165 = vector.broadcast %cst_71 : f32 to vector<32x64xf32>
    %166 = arith.maximumf %164, %165 : vector<32x64xf32>
    %167 = arith.maximumf %159, %166 : vector<32x64xf32>
    %168 = vector.extract_strided_slice %167 {offsets = [0, 0], sizes = [1, 64], strides = [1, 1]} : vector<32x64xf32> to vector<1x64xf32>
    %169 = vector.extract_strided_slice %167 {offsets = [1, 0], sizes = [1, 64], strides = [1, 1]} : vector<32x64xf32> to vector<1x64xf32>
    %170 = arith.maximumf %168, %169 : vector<1x64xf32>
    %171 = vector.extract_strided_slice %167 {offsets = [2, 0], sizes = [1, 64], strides = [1, 1]} : vector<32x64xf32> to vector<1x64xf32>
    %172 = arith.maximumf %170, %171 : vector<1x64xf32>
    %c1_72 = arith.constant 1 : index
    %c0_73 = arith.constant 0 : index
    %c0_74 = arith.constant 0 : index
    %173 = vector.load %arg12[%c1_72, %c0_73, %c0_74] : memref<12x12x64xf32, #tpu.memory_space<vmem>>, vector<1x1x64xf32>
    %174 = vector.shape_cast %173 : vector<1x1x64xf32> to vector<1x64xf32>
    %175 = vector.shape_cast %172 : vector<1x64xf32> to vector<1x1x64xf32>
    tpu.vector_store %arg12[%c1_72, %c0_73, %c0_74], %175 {strides = array<i32>} : memref<12x12x64xf32, #tpu.memory_space<vmem>>, vector<1x1x64xf32>,
    %176 = vector.extract_strided_slice %167 {offsets = [2, 0], sizes = [1, 64], strides = [1, 1]} : vector<32x64xf32> to vector<1x64xf32>
    %177 = vector.extract_strided_slice %167 {offsets = [3, 0], sizes = [1, 64], strides = [1, 1]} : vector<32x64xf32> to vector<1x64xf32>
    %178 = arith.maximumf %176, %177 : vector<1x64xf32>
    %179 = vector.extract_strided_slice %167 {offsets = [4, 0], sizes = [1, 64], strides = [1, 1]} : vector<32x64xf32> to vector<1x64xf32>
    %180 = arith.maximumf %178, %179 : vector<1x64xf32>
    %c1_75 = arith.constant 1 : index
    %c1_76 = arith.constant 1 : index
    %c0_77 = arith.constant 0 : index
    %181 = vector.load %arg12[%c1_75, %c1_76, %c0_77] : memref<12x12x64xf32, #tpu.memory_space<vmem>>, vector<1x1x64xf32>
    %182 = vector.shape_cast %181 : vector<1x1x64xf32> to vector<1x64xf32>
    %183 = vector.shape_cast %180 : vector<1x64xf32> to vector<1x1x64xf32>
    tpu.vector_store %arg12[%c1_75, %c1_76, %c0_77], %183 {strides = array<i32>} : memref<12x12x64xf32, #tpu.memory_space<vmem>>, vector<1x1x64xf32>,
    %184 = vector.extract_strided_slice %167 {offsets = [4, 0], sizes = [1, 64], strides = [1, 1]} : vector<32x64xf32> to vector<1x64xf32>
    %185 = vector.extract_strided_slice %167 {offsets = [5, 0], sizes = [1, 64], strides = [1, 1]} : vector<32x64xf32> to vector<1x64xf32>
    %186 = arith.maximumf %184, %185 : vector<1x64xf32>
    %187 = vector.extract_strided_slice %167 {offsets = [6, 0], sizes = [1, 64], strides = [1, 1]} : vector<32x64xf32> to vector<1x64xf32>
    %188 = arith.maximumf %186, %187 : vector<1x64xf32>
    %c1_78 = arith.constant 1 : index
    %c2_79 = arith.constant 2 : index
    %c0_80 = arith.constant 0 : index
    %189 = vector.load %arg12[%c1_78, %c2_79, %c0_80] : memref<12x12x64xf32, #tpu.memory_space<vmem>>, vector<1x1x64xf32>
    %190 = vector.shape_cast %189 : vector<1x1x64xf32> to vector<1x64xf32>
    %191 = vector.shape_cast %188 : vector<1x64xf32> to vector<1x1x64xf32>
    tpu.vector_store %arg12[%c1_78, %c2_79, %c0_80], %191 {strides = array<i32>} : memref<12x12x64xf32, #tpu.memory_space<vmem>>, vector<1x1x64xf32>,
    %192 = vector.extract_strided_slice %167 {offsets = [6, 0], sizes = [1, 64], strides = [1, 1]} : vector<32x64xf32> to vector<1x64xf32>
    %193 = vector.extract_strided_slice %167 {offsets = [7, 0], sizes = [1, 64], strides = [1, 1]} : vector<32x64xf32> to vector<1x64xf32>
    %194 = arith.maximumf %192, %193 : vector<1x64xf32>
    %195 = vector.extract_strided_slice %167 {offsets = [8, 0], sizes = [1, 64], strides = [1, 1]} : vector<32x64xf32> to vector<1x64xf32>
    %196 = arith.maximumf %194, %195 : vector<1x64xf32>
    %c1_81 = arith.constant 1 : index
    %c3_82 = arith.constant 3 : index
    %c0_83 = arith.constant 0 : index
    %197 = vector.load %arg12[%c1_81, %c3_82, %c0_83] : memref<12x12x64xf32, #tpu.memory_space<vmem>>, vector<1x1x64xf32>
    %198 = vector.shape_cast %197 : vector<1x1x64xf32> to vector<1x64xf32>
    %199 = vector.shape_cast %196 : vector<1x64xf32> to vector<1x1x64xf32>
    tpu.vector_store %arg12[%c1_81, %c3_82, %c0_83], %199 {strides = array<i32>} : memref<12x12x64xf32, #tpu.memory_space<vmem>>, vector<1x1x64xf32>,
    %200 = vector.extract_strided_slice %167 {offsets = [8, 0], sizes = [1, 64], strides = [1, 1]} : vector<32x64xf32> to vector<1x64xf32>
    %201 = vector.extract_strided_slice %167 {offsets = [9, 0], sizes = [1, 64], strides = [1, 1]} : vector<32x64xf32> to vector<1x64xf32>
    %202 = arith.maximumf %200, %201 : vector<1x64xf32>
    %203 = vector.extract_strided_slice %167 {offsets = [10, 0], sizes = [1, 64], strides = [1, 1]} : vector<32x64xf32> to vector<1x64xf32>
    %204 = arith.maximumf %202, %203 : vector<1x64xf32>
    %c1_84 = arith.constant 1 : index
    %c4_85 = arith.constant 4 : index
    %c0_86 = arith.constant 0 : index
    %205 = vector.load %arg12[%c1_84, %c4_85, %c0_86] : memref<12x12x64xf32, #tpu.memory_space<vmem>>, vector<1x1x64xf32>
    %206 = vector.shape_cast %205 : vector<1x1x64xf32> to vector<1x64xf32>
    %207 = vector.shape_cast %204 : vector<1x64xf32> to vector<1x1x64xf32>
    tpu.vector_store %arg12[%c1_84, %c4_85, %c0_86], %207 {strides = array<i32>} : memref<12x12x64xf32, #tpu.memory_space<vmem>>, vector<1x1x64xf32>,
    %208 = vector.extract_strided_slice %167 {offsets = [10, 0], sizes = [1, 64], strides = [1, 1]} : vector<32x64xf32> to vector<1x64xf32>
    %209 = vector.extract_strided_slice %167 {offsets = [11, 0], sizes = [1, 64], strides = [1, 1]} : vector<32x64xf32> to vector<1x64xf32>
    %210 = arith.maximumf %208, %209 : vector<1x64xf32>
    %211 = vector.extract_strided_slice %167 {offsets = [12, 0], sizes = [1, 64], strides = [1, 1]} : vector<32x64xf32> to vector<1x64xf32>
    %212 = arith.maximumf %210, %211 : vector<1x64xf32>
    %c1_87 = arith.constant 1 : index
    %c5_88 = arith.constant 5 : index
    %c0_89 = arith.constant 0 : index
    %213 = vector.load %arg12[%c1_87, %c5_88, %c0_89] : memref<12x12x64xf32, #tpu.memory_space<vmem>>, vector<1x1x64xf32>
    %214 = vector.shape_cast %213 : vector<1x1x64xf32> to vector<1x64xf32>
    %215 = vector.shape_cast %212 : vector<1x64xf32> to vector<1x1x64xf32>
    tpu.vector_store %arg12[%c1_87, %c5_88, %c0_89], %215 {strides = array<i32>} : memref<12x12x64xf32, #tpu.memory_space<vmem>>, vector<1x1x64xf32>,
    %216 = vector.extract_strided_slice %167 {offsets = [12, 0], sizes = [1, 64], strides = [1, 1]} : vector<32x64xf32> to vector<1x64xf32>
    %217 = vector.extract_strided_slice %167 {offsets = [13, 0], sizes = [1, 64], strides = [1, 1]} : vector<32x64xf32> to vector<1x64xf32>
    %218 = arith.maximumf %216, %217 : vector<1x64xf32>
    %219 = vector.extract_strided_slice %167 {offsets = [14, 0], sizes = [1, 64], strides = [1, 1]} : vector<32x64xf32> to vector<1x64xf32>
    %220 = arith.maximumf %218, %219 : vector<1x64xf32>
    %c1_90 = arith.constant 1 : index
    %c6_91 = arith.constant 6 : index
    %c0_92 = arith.constant 0 : index
    %221 = vector.load %arg12[%c1_90, %c6_91, %c0_92] : memref<12x12x64xf32, #tpu.memory_space<vmem>>, vector<1x1x64xf32>
    %222 = vector.shape_cast %221 : vector<1x1x64xf32> to vector<1x64xf32>
    %223 = vector.shape_cast %220 : vector<1x64xf32> to vector<1x1x64xf32>
    tpu.vector_store %arg12[%c1_90, %c6_91, %c0_92], %223 {strides = array<i32>} : memref<12x12x64xf32, #tpu.memory_space<vmem>>, vector<1x1x64xf32>,
    %224 = vector.extract_strided_slice %167 {offsets = [14, 0], sizes = [1, 64], strides = [1, 1]} : vector<32x64xf32> to vector<1x64xf32>
    %225 = vector.extract_strided_slice %167 {offsets = [15, 0], sizes = [1, 64], strides = [1, 1]} : vector<32x64xf32> to vector<1x64xf32>
    %226 = arith.maximumf %224, %225 : vector<1x64xf32>
    %227 = vector.extract_strided_slice %167 {offsets = [16, 0], sizes = [1, 64], strides = [1, 1]} : vector<32x64xf32> to vector<1x64xf32>
    %228 = arith.maximumf %226, %227 : vector<1x64xf32>
    %c1_93 = arith.constant 1 : index
    %c7_94 = arith.constant 7 : index
    %c0_95 = arith.constant 0 : index
    %229 = vector.load %arg12[%c1_93, %c7_94, %c0_95] : memref<12x12x64xf32, #tpu.memory_space<vmem>>, vector<1x1x64xf32>
    %230 = vector.shape_cast %229 : vector<1x1x64xf32> to vector<1x64xf32>
    %231 = vector.shape_cast %228 : vector<1x64xf32> to vector<1x1x64xf32>
    tpu.vector_store %arg12[%c1_93, %c7_94, %c0_95], %231 {strides = array<i32>} : memref<12x12x64xf32, #tpu.memory_space<vmem>>, vector<1x1x64xf32>,
    %232 = vector.extract_strided_slice %167 {offsets = [16, 0], sizes = [1, 64], strides = [1, 1]} : vector<32x64xf32> to vector<1x64xf32>
    %233 = vector.extract_strided_slice %167 {offsets = [17, 0], sizes = [1, 64], strides = [1, 1]} : vector<32x64xf32> to vector<1x64xf32>
    %234 = arith.maximumf %232, %233 : vector<1x64xf32>
    %235 = vector.extract_strided_slice %167 {offsets = [18, 0], sizes = [1, 64], strides = [1, 1]} : vector<32x64xf32> to vector<1x64xf32>
    %236 = arith.maximumf %234, %235 : vector<1x64xf32>
    %c1_96 = arith.constant 1 : index
    %c8_97 = arith.constant 8 : index
    %c0_98 = arith.constant 0 : index
    %237 = vector.load %arg12[%c1_96, %c8_97, %c0_98] : memref<12x12x64xf32, #tpu.memory_space<vmem>>, vector<1x1x64xf32>
    %238 = vector.shape_cast %237 : vector<1x1x64xf32> to vector<1x64xf32>
    %239 = vector.shape_cast %236 : vector<1x64xf32> to vector<1x1x64xf32>
    tpu.vector_store %arg12[%c1_96, %c8_97, %c0_98], %239 {strides = array<i32>} : memref<12x12x64xf32, #tpu.memory_space<vmem>>, vector<1x1x64xf32>,
    %240 = vector.extract_strided_slice %167 {offsets = [18, 0], sizes = [1, 64], strides = [1, 1]} : vector<32x64xf32> to vector<1x64xf32>
    %241 = vector.extract_strided_slice %167 {offsets = [19, 0], sizes = [1, 64], strides = [1, 1]} : vector<32x64xf32> to vector<1x64xf32>
    %242 = arith.maximumf %240, %241 : vector<1x64xf32>
    %243 = vector.extract_strided_slice %167 {offsets = [20, 0], sizes = [1, 64], strides = [1, 1]} : vector<32x64xf32> to vector<1x64xf32>
    %244 = arith.maximumf %242, %243 : vector<1x64xf32>
    %c1_99 = arith.constant 1 : index
    %c9_100 = arith.constant 9 : index
    %c0_101 = arith.constant 0 : index
    %245 = vector.load %arg12[%c1_99, %c9_100, %c0_101] : memref<12x12x64xf32, #tpu.memory_space<vmem>>, vector<1x1x64xf32>
    %246 = vector.shape_cast %245 : vector<1x1x64xf32> to vector<1x64xf32>
    %247 = vector.shape_cast %244 : vector<1x64xf32> to vector<1x1x64xf32>
    tpu.vector_store %arg12[%c1_99, %c9_100, %c0_101], %247 {strides = array<i32>} : memref<12x12x64xf32, #tpu.memory_space<vmem>>, vector<1x1x64xf32>,
    %248 = vector.extract_strided_slice %167 {offsets = [20, 0], sizes = [1, 64], strides = [1, 1]} : vector<32x64xf32> to vector<1x64xf32>
    %249 = vector.extract_strided_slice %167 {offsets = [21, 0], sizes = [1, 64], strides = [1, 1]} : vector<32x64xf32> to vector<1x64xf32>
    %250 = arith.maximumf %248, %249 : vector<1x64xf32>
    %251 = vector.extract_strided_slice %167 {offsets = [22, 0], sizes = [1, 64], strides = [1, 1]} : vector<32x64xf32> to vector<1x64xf32>
    %252 = arith.maximumf %250, %251 : vector<1x64xf32>
    %c1_102 = arith.constant 1 : index
    %c10_103 = arith.constant 10 : index
    %c0_104 = arith.constant 0 : index
    %253 = vector.load %arg12[%c1_102, %c10_103, %c0_104] : memref<12x12x64xf32, #tpu.memory_space<vmem>>, vector<1x1x64xf32>
    %254 = vector.shape_cast %253 : vector<1x1x64xf32> to vector<1x64xf32>
    %255 = vector.shape_cast %252 : vector<1x64xf32> to vector<1x1x64xf32>
    tpu.vector_store %arg12[%c1_102, %c10_103, %c0_104], %255 {strides = array<i32>} : memref<12x12x64xf32, #tpu.memory_space<vmem>>, vector<1x1x64xf32>,
    %256 = vector.extract_strided_slice %167 {offsets = [22, 0], sizes = [1, 64], strides = [1, 1]} : vector<32x64xf32> to vector<1x64xf32>
    %257 = vector.extract_strided_slice %167 {offsets = [23, 0], sizes = [1, 64], strides = [1, 1]} : vector<32x64xf32> to vector<1x64xf32>
    %258 = arith.maximumf %256, %257 : vector<1x64xf32>
    %259 = vector.extract_strided_slice %167 {offsets = [24, 0], sizes = [1, 64], strides = [1, 1]} : vector<32x64xf32> to vector<1x64xf32>
    %260 = arith.maximumf %258, %259 : vector<1x64xf32>
    %c1_105 = arith.constant 1 : index
    %c11_106 = arith.constant 11 : index
    %c0_107 = arith.constant 0 : index
    %261 = vector.load %arg12[%c1_105, %c11_106, %c0_107] : memref<12x12x64xf32, #tpu.memory_space<vmem>>, vector<1x1x64xf32>
    %262 = vector.shape_cast %261 : vector<1x1x64xf32> to vector<1x64xf32>
    %263 = vector.shape_cast %260 : vector<1x64xf32> to vector<1x1x64xf32>
    tpu.vector_store %arg12[%c1_105, %c11_106, %c0_107], %263 {strides = array<i32>} : memref<12x12x64xf32, #tpu.memory_space<vmem>>, vector<1x1x64xf32>,
    %c128_108 = arith.constant 128 : index
    %c0_109 = arith.constant 0 : index
    %264 = vector.load %arg11[%c128_108, %c0_109] : memref<800x64xf32, #tpu.memory_space<vmem>>, vector<32x64xf32>
    %265 = vector.broadcast %24 : vector<1x64xf32> to vector<32x64xf32>
    %266 = arith.mulf %264, %265 : vector<32x64xf32>
    %267 = vector.broadcast %25 : vector<1x64xf32> to vector<32x64xf32>
    %268 = arith.addf %266, %267 : vector<32x64xf32>
    %cst_110 = arith.constant 0.000000e+00 : f32
    %269 = vector.broadcast %cst_110 : f32 to vector<32x64xf32>
    %270 = arith.maximumf %268, %269 : vector<32x64xf32>
    %c160 = arith.constant 160 : index
    %c0_111 = arith.constant 0 : index
    %271 = vector.load %arg11[%c160, %c0_111] : memref<800x64xf32, #tpu.memory_space<vmem>>, vector<32x64xf32>
    %272 = vector.broadcast %24 : vector<1x64xf32> to vector<32x64xf32>
    %273 = arith.mulf %271, %272 : vector<32x64xf32>
    %274 = vector.broadcast %25 : vector<1x64xf32> to vector<32x64xf32>
    %275 = arith.addf %273, %274 : vector<32x64xf32>
    %cst_112 = arith.constant 0.000000e+00 : f32
    %276 = vector.broadcast %cst_112 : f32 to vector<32x64xf32>
    %277 = arith.maximumf %275, %276 : vector<32x64xf32>
    %278 = arith.maximumf %270, %277 : vector<32x64xf32>
    %c192 = arith.constant 192 : index
    %c0_113 = arith.constant 0 : index
    %279 = vector.load %arg11[%c192, %c0_113] : memref<800x64xf32, #tpu.memory_space<vmem>>, vector<32x64xf32>
    %280 = vector.broadcast %24 : vector<1x64xf32> to vector<32x64xf32>
    %281 = arith.mulf %279, %280 : vector<32x64xf32>
    %282 = vector.broadcast %25 : vector<1x64xf32> to vector<32x64xf32>
    %283 = arith.addf %281, %282 : vector<32x64xf32>
    %cst_114 = arith.constant 0.000000e+00 : f32
    %284 = vector.broadcast %cst_114 : f32 to vector<32x64xf32>
    %285 = arith.maximumf %283, %284 : vector<32x64xf32>
    %286 = arith.maximumf %278, %285 : vector<32x64xf32>
    %287 = vector.extract_strided_slice %286 {offsets = [0, 0], sizes = [1, 64], strides = [1, 1]} : vector<32x64xf32> to vector<1x64xf32>
    %288 = vector.extract_strided_slice %286 {offsets = [1, 0], sizes = [1, 64], strides = [1, 1]} : vector<32x64xf32> to vector<1x64xf32>
    %289 = arith.maximumf %287, %288 : vector<1x64xf32>
    %290 = vector.extract_strided_slice %286 {offsets = [2, 0], sizes = [1, 64], strides = [1, 1]} : vector<32x64xf32> to vector<1x64xf32>
    %291 = arith.maximumf %289, %290 : vector<1x64xf32>
    %c2_115 = arith.constant 2 : index
    %c0_116 = arith.constant 0 : index
    %c0_117 = arith.constant 0 : index
    %292 = vector.load %arg12[%c2_115, %c0_116, %c0_117] : memref<12x12x64xf32, #tpu.memory_space<vmem>>, vector<1x1x64xf32>
    %293 = vector.shape_cast %292 : vector<1x1x64xf32> to vector<1x64xf32>
    %294 = vector.shape_cast %291 : vector<1x64xf32> to vector<1x1x64xf32>
    tpu.vector_store %arg12[%c2_115, %c0_116, %c0_117], %294 {strides = array<i32>} : memref<12x12x64xf32, #tpu.memory_space<vmem>>, vector<1x1x64xf32>,
    %295 = vector.extract_strided_slice %286 {offsets = [2, 0], sizes = [1, 64], strides = [1, 1]} : vector<32x64xf32> to vector<1x64xf32>
    %296 = vector.extract_strided_slice %286 {offsets = [3, 0], sizes = [1, 64], strides = [1, 1]} : vector<32x64xf32> to vector<1x64xf32>
    %297 = arith.maximumf %295, %296 : vector<1x64xf32>
    %298 = vector.extract_strided_slice %286 {offsets = [4, 0], sizes = [1, 64], strides = [1, 1]} : vector<32x64xf32> to vector<1x64xf32>
    %299 = arith.maximumf %297, %298 : vector<1x64xf32>
    %c2_118 = arith.constant 2 : index
    %c1_119 = arith.constant 1 : index
    %c0_120 = arith.constant 0 : index
    %300 = vector.load %arg12[%c2_118, %c1_119, %c0_120] : memref<12x12x64xf32, #tpu.memory_space<vmem>>, vector<1x1x64xf32>
    %301 = vector.shape_cast %300 : vector<1x1x64xf32> to vector<1x64xf32>
    %302 = vector.shape_cast %299 : vector<1x64xf32> to vector<1x1x64xf32>
    tpu.vector_store %arg12[%c2_118, %c1_119, %c0_120], %302 {strides = array<i32>} : memref<12x12x64xf32, #tpu.memory_space<vmem>>, vector<1x1x64xf32>,
    %303 = vector.extract_strided_slice %286 {offsets = [4, 0], sizes = [1, 64], strides = [1, 1]} : vector<32x64xf32> to vector<1x64xf32>
    %304 = vector.extract_strided_slice %286 {offsets = [5, 0], sizes = [1, 64], strides = [1, 1]} : vector<32x64xf32> to vector<1x64xf32>
    %305 = arith.maximumf %303, %304 : vector<1x64xf32>
    %306 = vector.extract_strided_slice %286 {offsets = [6, 0], sizes = [1, 64], strides = [1, 1]} : vector<32x64xf32> to vector<1x64xf32>
    %307 = arith.maximumf %305, %306 : vector<1x64xf32>
    %c2_121 = arith.constant 2 : index
    %c2_122 = arith.constant 2 : index
    %c0_123 = arith.constant 0 : index
    %308 = vector.load %arg12[%c2_121, %c2_122, %c0_123] : memref<12x12x64xf32, #tpu.memory_space<vmem>>, vector<1x1x64xf32>
    %309 = vector.shape_cast %308 : vector<1x1x64xf32> to vector<1x64xf32>
    %310 = vector.shape_cast %307 : vector<1x64xf32> to vector<1x1x64xf32>
    tpu.vector_store %arg12[%c2_121, %c2_122, %c0_123], %310 {strides = array<i32>} : memref<12x12x64xf32, #tpu.memory_space<vmem>>, vector<1x1x64xf32>,
    %311 = vector.extract_strided_slice %286 {offsets = [6, 0], sizes = [1, 64], strides = [1, 1]} : vector<32x64xf32> to vector<1x64xf32>
    %312 = vector.extract_strided_slice %286 {offsets = [7, 0], sizes = [1, 64], strides = [1, 1]} : vector<32x64xf32> to vector<1x64xf32>
    %313 = arith.maximumf %311, %312 : vector<1x64xf32>
    %314 = vector.extract_strided_slice %286 {offsets = [8, 0], sizes = [1, 64], strides = [1, 1]} : vector<32x64xf32> to vector<1x64xf32>
    %315 = arith.maximumf %313, %314 : vector<1x64xf32>
    %c2_124 = arith.constant 2 : index
    %c3_125 = arith.constant 3 : index
    %c0_126 = arith.constant 0 : index
    %316 = vector.load %arg12[%c2_124, %c3_125, %c0_126] : memref<12x12x64xf32, #tpu.memory_space<vmem>>, vector<1x1x64xf32>
    %317 = vector.shape_cast %316 : vector<1x1x64xf32> to vector<1x64xf32>
    %318 = vector.shape_cast %315 : vector<1x64xf32> to vector<1x1x64xf32>
    tpu.vector_store %arg12[%c2_124, %c3_125, %c0_126], %318 {strides = array<i32>} : memref<12x12x64xf32, #tpu.memory_space<vmem>>, vector<1x1x64xf32>,
    %319 = vector.extract_strided_slice %286 {offsets = [8, 0], sizes = [1, 64], strides = [1, 1]} : vector<32x64xf32> to vector<1x64xf32>
    %320 = vector.extract_strided_slice %286 {offsets = [9, 0], sizes = [1, 64], strides = [1, 1]} : vector<32x64xf32> to vector<1x64xf32>
    %321 = arith.maximumf %319, %320 : vector<1x64xf32>
    %322 = vector.extract_strided_slice %286 {offsets = [10, 0], sizes = [1, 64], strides = [1, 1]} : vector<32x64xf32> to vector<1x64xf32>
    %323 = arith.maximumf %321, %322 : vector<1x64xf32>
    %c2_127 = arith.constant 2 : index
    %c4_128 = arith.constant 4 : index
    %c0_129 = arith.constant 0 : index
    %324 = vector.load %arg12[%c2_127, %c4_128, %c0_129] : memref<12x12x64xf32, #tpu.memory_space<vmem>>, vector<1x1x64xf32>
    %325 = vector.shape_cast %324 : vector<1x1x64xf32> to vector<1x64xf32>
    %326 = vector.shape_cast %323 : vector<1x64xf32> to vector<1x1x64xf32>
    tpu.vector_store %arg12[%c2_127, %c4_128, %c0_129], %326 {strides = array<i32>} : memref<12x12x64xf32, #tpu.memory_space<vmem>>, vector<1x1x64xf32>,
    %327 = vector.extract_strided_slice %286 {offsets = [10, 0], sizes = [1, 64], strides = [1, 1]} : vector<32x64xf32> to vector<1x64xf32>
    %328 = vector.extract_strided_slice %286 {offsets = [11, 0], sizes = [1, 64], strides = [1, 1]} : vector<32x64xf32> to vector<1x64xf32>
    %329 = arith.maximumf %327, %328 : vector<1x64xf32>
    %330 = vector.extract_strided_slice %286 {offsets = [12, 0], sizes = [1, 64], strides = [1, 1]} : vector<32x64xf32> to vector<1x64xf32>
    %331 = arith.maximumf %329, %330 : vector<1x64xf32>
    %c2_130 = arith.constant 2 : index
    %c5_131 = arith.constant 5 : index
    %c0_132 = arith.constant 0 : index
    %332 = vector.load %arg12[%c2_130, %c5_131, %c0_132] : memref<12x12x64xf32, #tpu.memory_space<vmem>>, vector<1x1x64xf32>
    %333 = vector.shape_cast %332 : vector<1x1x64xf32> to vector<1x64xf32>
    %334 = vector.shape_cast %331 : vector<1x64xf32> to vector<1x1x64xf32>
    tpu.vector_store %arg12[%c2_130, %c5_131, %c0_132], %334 {strides = array<i32>} : memref<12x12x64xf32, #tpu.memory_space<vmem>>, vector<1x1x64xf32>,
    %335 = vector.extract_strided_slice %286 {offsets = [12, 0], sizes = [1, 64], strides = [1, 1]} : vector<32x64xf32> to vector<1x64xf32>
    %336 = vector.extract_strided_slice %286 {offsets = [13, 0], sizes = [1, 64], strides = [1, 1]} : vector<32x64xf32> to vector<1x64xf32>
    %337 = arith.maximumf %335, %336 : vector<1x64xf32>
    %338 = vector.extract_strided_slice %286 {offsets = [14, 0], sizes = [1, 64], strides = [1, 1]} : vector<32x64xf32> to vector<1x64xf32>
    %339 = arith.maximumf %337, %338 : vector<1x64xf32>
    %c2_133 = arith.constant 2 : index
    %c6_134 = arith.constant 6 : index
    %c0_135 = arith.constant 0 : index
    %340 = vector.load %arg12[%c2_133, %c6_134, %c0_135] : memref<12x12x64xf32, #tpu.memory_space<vmem>>, vector<1x1x64xf32>
    %341 = vector.shape_cast %340 : vector<1x1x64xf32> to vector<1x64xf32>
    %342 = vector.shape_cast %339 : vector<1x64xf32> to vector<1x1x64xf32>
    tpu.vector_store %arg12[%c2_133, %c6_134, %c0_135], %342 {strides = array<i32>} : memref<12x12x64xf32, #tpu.memory_space<vmem>>, vector<1x1x64xf32>,
    %343 = vector.extract_strided_slice %286 {offsets = [14, 0], sizes = [1, 64], strides = [1, 1]} : vector<32x64xf32> to vector<1x64xf32>
    %344 = vector.extract_strided_slice %286 {offsets = [15, 0], sizes = [1, 64], strides = [1, 1]} : vector<32x64xf32> to vector<1x64xf32>
    %345 = arith.maximumf %343, %344 : vector<1x64xf32>
    %346 = vector.extract_strided_slice %286 {offsets = [16, 0], sizes = [1, 64], strides = [1, 1]} : vector<32x64xf32> to vector<1x64xf32>
    %347 = arith.maximumf %345, %346 : vector<1x64xf32>
    %c2_136 = arith.constant 2 : index
    %c7_137 = arith.constant 7 : index
    %c0_138 = arith.constant 0 : index
    %348 = vector.load %arg12[%c2_136, %c7_137, %c0_138] : memref<12x12x64xf32, #tpu.memory_space<vmem>>, vector<1x1x64xf32>
    %349 = vector.shape_cast %348 : vector<1x1x64xf32> to vector<1x64xf32>
    %350 = vector.shape_cast %347 : vector<1x64xf32> to vector<1x1x64xf32>
    tpu.vector_store %arg12[%c2_136, %c7_137, %c0_138], %350 {strides = array<i32>} : memref<12x12x64xf32, #tpu.memory_space<vmem>>, vector<1x1x64xf32>,
    %351 = vector.extract_strided_slice %286 {offsets = [16, 0], sizes = [1, 64], strides = [1, 1]} : vector<32x64xf32> to vector<1x64xf32>
    %352 = vector.extract_strided_slice %286 {offsets = [17, 0], sizes = [1, 64], strides = [1, 1]} : vector<32x64xf32> to vector<1x64xf32>
    %353 = arith.maximumf %351, %352 : vector<1x64xf32>
    %354 = vector.extract_strided_slice %286 {offsets = [18, 0], sizes = [1, 64], strides = [1, 1]} : vector<32x64xf32> to vector<1x64xf32>
    %355 = arith.maximumf %353, %354 : vector<1x64xf32>
    %c2_139 = arith.constant 2 : index
    %c8_140 = arith.constant 8 : index
    %c0_141 = arith.constant 0 : index
    %356 = vector.load %arg12[%c2_139, %c8_140, %c0_141] : memref<12x12x64xf32, #tpu.memory_space<vmem>>, vector<1x1x64xf32>
    %357 = vector.shape_cast %356 : vector<1x1x64xf32> to vector<1x64xf32>
    %358 = vector.shape_cast %355 : vector<1x64xf32> to vector<1x1x64xf32>
    tpu.vector_store %arg12[%c2_139, %c8_140, %c0_141], %358 {strides = array<i32>} : memref<12x12x64xf32, #tpu.memory_space<vmem>>, vector<1x1x64xf32>,
    %359 = vector.extract_strided_slice %286 {offsets = [18, 0], sizes = [1, 64], strides = [1, 1]} : vector<32x64xf32> to vector<1x64xf32>
    %360 = vector.extract_strided_slice %286 {offsets = [19, 0], sizes = [1, 64], strides = [1, 1]} : vector<32x64xf32> to vector<1x64xf32>
    %361 = arith.maximumf %359, %360 : vector<1x64xf32>
    %362 = vector.extract_strided_slice %286 {offsets = [20, 0], sizes = [1, 64], strides = [1, 1]} : vector<32x64xf32> to vector<1x64xf32>
    %363 = arith.maximumf %361, %362 : vector<1x64xf32>
    %c2_142 = arith.constant 2 : index
    %c9_143 = arith.constant 9 : index
    %c0_144 = arith.constant 0 : index
    %364 = vector.load %arg12[%c2_142, %c9_143, %c0_144] : memref<12x12x64xf32, #tpu.memory_space<vmem>>, vector<1x1x64xf32>
    %365 = vector.shape_cast %364 : vector<1x1x64xf32> to vector<1x64xf32>
    %366 = vector.shape_cast %363 : vector<1x64xf32> to vector<1x1x64xf32>
    tpu.vector_store %arg12[%c2_142, %c9_143, %c0_144], %366 {strides = array<i32>} : memref<12x12x64xf32, #tpu.memory_space<vmem>>, vector<1x1x64xf32>,
    %367 = vector.extract_strided_slice %286 {offsets = [20, 0], sizes = [1, 64], strides = [1, 1]} : vector<32x64xf32> to vector<1x64xf32>
    %368 = vector.extract_strided_slice %286 {offsets = [21, 0], sizes = [1, 64], strides = [1, 1]} : vector<32x64xf32> to vector<1x64xf32>
    %369 = arith.maximumf %367, %368 : vector<1x64xf32>
    %370 = vector.extract_strided_slice %286 {offsets = [22, 0], sizes = [1, 64], strides = [1, 1]} : vector<32x64xf32> to vector<1x64xf32>
    %371 = arith.maximumf %369, %370 : vector<1x64xf32>
    %c2_145 = arith.constant 2 : index
    %c10_146 = arith.constant 10 : index
    %c0_147 = arith.constant 0 : index
    %372 = vector.load %arg12[%c2_145, %c10_146, %c0_147] : memref<12x12x64xf32, #tpu.memory_space<vmem>>, vector<1x1x64xf32>
    %373 = vector.shape_cast %372 : vector<1x1x64xf32> to vector<1x64xf32>
    %374 = vector.shape_cast %371 : vector<1x64xf32> to vector<1x1x64xf32>
    tpu.vector_store %arg12[%c2_145, %c10_146, %c0_147], %374 {strides = array<i32>} : memref<12x12x64xf32, #tpu.memory_space<vmem>>, vector<1x1x64xf32>,
    %375 = vector.extract_strided_slice %286 {offsets = [22, 0], sizes = [1, 64], strides = [1, 1]} : vector<32x64xf32> to vector<1x64xf32>
    %376 = vector.extract_strided_slice %286 {offsets = [23, 0], sizes = [1, 64], strides = [1, 1]} : vector<32x64xf32> to vector<1x64xf32>
    %377 = arith.maximumf %375, %376 : vector<1x64xf32>
    %378 = vector.extract_strided_slice %286 {offsets = [24, 0], sizes = [1, 64], strides = [1, 1]} : vector<32x64xf32> to vector<1x64xf32>
    %379 = arith.maximumf %377, %378 : vector<1x64xf32>
    %c2_148 = arith.constant 2 : index
    %c11_149 = arith.constant 11 : index
    %c0_150 = arith.constant 0 : index
    %380 = vector.load %arg12[%c2_148, %c11_149, %c0_150] : memref<12x12x64xf32, #tpu.memory_space<vmem>>, vector<1x1x64xf32>
    %381 = vector.shape_cast %380 : vector<1x1x64xf32> to vector<1x64xf32>
    %382 = vector.shape_cast %379 : vector<1x64xf32> to vector<1x1x64xf32>
    tpu.vector_store %arg12[%c2_148, %c11_149, %c0_150], %382 {strides = array<i32>} : memref<12x12x64xf32, #tpu.memory_space<vmem>>, vector<1x1x64xf32>,
    %c192_151 = arith.constant 192 : index
    %c0_152 = arith.constant 0 : index
    %383 = vector.load %arg11[%c192_151, %c0_152] : memref<800x64xf32, #tpu.memory_space<vmem>>, vector<32x64xf32>
    %384 = vector.broadcast %24 : vector<1x64xf32> to vector<32x64xf32>
    %385 = arith.mulf %383, %384 : vector<32x64xf32>
    %386 = vector.broadcast %25 : vector<1x64xf32> to vector<32x64xf32>
    %387 = arith.addf %385, %386 : vector<32x64xf32>
    %cst_153 = arith.constant 0.000000e+00 : f32
    %388 = vector.broadcast %cst_153 : f32 to vector<32x64xf32>
    %389 = arith.maximumf %387, %388 : vector<32x64xf32>
    %c224 = arith.constant 224 : index
    %c0_154 = arith.constant 0 : index
    %390 = vector.load %arg11[%c224, %c0_154] : memref<800x64xf32, #tpu.memory_space<vmem>>, vector<32x64xf32>
    %391 = vector.broadcast %24 : vector<1x64xf32> to vector<32x64xf32>
    %392 = arith.mulf %390, %391 : vector<32x64xf32>
    %393 = vector.broadcast %25 : vector<1x64xf32> to vector<32x64xf32>
    %394 = arith.addf %392, %393 : vector<32x64xf32>
    %cst_155 = arith.constant 0.000000e+00 : f32
    %395 = vector.broadcast %cst_155 : f32 to vector<32x64xf32>
    %396 = arith.maximumf %394, %395 : vector<32x64xf32>
    %397 = arith.maximumf %389, %396 : vector<32x64xf32>
    %c256_156 = arith.constant 256 : index
    %c0_157 = arith.constant 0 : index
    %398 = vector.load %arg11[%c256_156, %c0_157] : memref<800x64xf32, #tpu.memory_space<vmem>>, vector<32x64xf32>
    %399 = vector.broadcast %24 : vector<1x64xf32> to vector<32x64xf32>
    %400 = arith.mulf %398, %399 : vector<32x64xf32>
    %401 = vector.broadcast %25 : vector<1x64xf32> to vector<32x64xf32>
    %402 = arith.addf %400, %401 : vector<32x64xf32>
    %cst_158 = arith.constant 0.000000e+00 : f32
    %403 = vector.broadcast %cst_158 : f32 to vector<32x64xf32>
    %404 = arith.maximumf %402, %403 : vector<32x64xf32>
    %405 = arith.maximumf %397, %404 : vector<32x64xf32>
    %406 = vector.extract_strided_slice %405 {offsets = [0, 0], sizes = [1, 64], strides = [1, 1]} : vector<32x64xf32> to vector<1x64xf32>
    %407 = vector.extract_strided_slice %405 {offsets = [1, 0], sizes = [1, 64], strides = [1, 1]} : vector<32x64xf32> to vector<1x64xf32>
    %408 = arith.maximumf %406, %407 : vector<1x64xf32>
    %409 = vector.extract_strided_slice %405 {offsets = [2, 0], sizes = [1, 64], strides = [1, 1]} : vector<32x64xf32> to vector<1x64xf32>
    %410 = arith.maximumf %408, %409 : vector<1x64xf32>
    %c3_159 = arith.constant 3 : index
    %c0_160 = arith.constant 0 : index
    %c0_161 = arith.constant 0 : index
    %411 = vector.load %arg12[%c3_159, %c0_160, %c0_161] : memref<12x12x64xf32, #tpu.memory_space<vmem>>, vector<1x1x64xf32>
    %412 = vector.shape_cast %411 : vector<1x1x64xf32> to vector<1x64xf32>
    %413 = vector.shape_cast %410 : vector<1x64xf32> to vector<1x1x64xf32>
    tpu.vector_store %arg12[%c3_159, %c0_160, %c0_161], %413 {strides = array<i32>} : memref<12x12x64xf32, #tpu.memory_space<vmem>>, vector<1x1x64xf32>,
    %414 = vector.extract_strided_slice %405 {offsets = [2, 0], sizes = [1, 64], strides = [1, 1]} : vector<32x64xf32> to vector<1x64xf32>
    %415 = vector.extract_strided_slice %405 {offsets = [3, 0], sizes = [1, 64], strides = [1, 1]} : vector<32x64xf32> to vector<1x64xf32>
    %416 = arith.maximumf %414, %415 : vector<1x64xf32>
    %417 = vector.extract_strided_slice %405 {offsets = [4, 0], sizes = [1, 64], strides = [1, 1]} : vector<32x64xf32> to vector<1x64xf32>
    %418 = arith.maximumf %416, %417 : vector<1x64xf32>
    %c3_162 = arith.constant 3 : index
    %c1_163 = arith.constant 1 : index
    %c0_164 = arith.constant 0 : index
    %419 = vector.load %arg12[%c3_162, %c1_163, %c0_164] : memref<12x12x64xf32, #tpu.memory_space<vmem>>, vector<1x1x64xf32>
    %420 = vector.shape_cast %419 : vector<1x1x64xf32> to vector<1x64xf32>
    %421 = vector.shape_cast %418 : vector<1x64xf32> to vector<1x1x64xf32>
    tpu.vector_store %arg12[%c3_162, %c1_163, %c0_164], %421 {strides = array<i32>} : memref<12x12x64xf32, #tpu.memory_space<vmem>>, vector<1x1x64xf32>,
    %422 = vector.extract_strided_slice %405 {offsets = [4, 0], sizes = [1, 64], strides = [1, 1]} : vector<32x64xf32> to vector<1x64xf32>
    %423 = vector.extract_strided_slice %405 {offsets = [5, 0], sizes = [1, 64], strides = [1, 1]} : vector<32x64xf32> to vector<1x64xf32>
    %424 = arith.maximumf %422, %423 : vector<1x64xf32>
    %425 = vector.extract_strided_slice %405 {offsets = [6, 0], sizes = [1, 64], strides = [1, 1]} : vector<32x64xf32> to vector<1x64xf32>
    %426 = arith.maximumf %424, %425 : vector<1x64xf32>
    %c3_165 = arith.constant 3 : index
    %c2_166 = arith.constant 2 : index
    %c0_167 = arith.constant 0 : index
    %427 = vector.load %arg12[%c3_165, %c2_166, %c0_167] : memref<12x12x64xf32, #tpu.memory_space<vmem>>, vector<1x1x64xf32>
    %428 = vector.shape_cast %427 : vector<1x1x64xf32> to vector<1x64xf32>
    %429 = vector.shape_cast %426 : vector<1x64xf32> to vector<1x1x64xf32>
    tpu.vector_store %arg12[%c3_165, %c2_166, %c0_167], %429 {strides = array<i32>} : memref<12x12x64xf32, #tpu.memory_space<vmem>>, vector<1x1x64xf32>,
    %430 = vector.extract_strided_slice %405 {offsets = [6, 0], sizes = [1, 64], strides = [1, 1]} : vector<32x64xf32> to vector<1x64xf32>
    %431 = vector.extract_strided_slice %405 {offsets = [7, 0], sizes = [1, 64], strides = [1, 1]} : vector<32x64xf32> to vector<1x64xf32>
    %432 = arith.maximumf %430, %431 : vector<1x64xf32>
    %433 = vector.extract_strided_slice %405 {offsets = [8, 0], sizes = [1, 64], strides = [1, 1]} : vector<32x64xf32> to vector<1x64xf32>
    %434 = arith.maximumf %432, %433 : vector<1x64xf32>
    %c3_168 = arith.constant 3 : index
    %c3_169 = arith.constant 3 : index
    %c0_170 = arith.constant 0 : index
    %435 = vector.load %arg12[%c3_168, %c3_169, %c0_170] : memref<12x12x64xf32, #tpu.memory_space<vmem>>, vector<1x1x64xf32>
    %436 = vector.shape_cast %435 : vector<1x1x64xf32> to vector<1x64xf32>
    %437 = vector.shape_cast %434 : vector<1x64xf32> to vector<1x1x64xf32>
    tpu.vector_store %arg12[%c3_168, %c3_169, %c0_170], %437 {strides = array<i32>} : memref<12x12x64xf32, #tpu.memory_space<vmem>>, vector<1x1x64xf32>,
    %438 = vector.extract_strided_slice %405 {offsets = [8, 0], sizes = [1, 64], strides = [1, 1]} : vector<32x64xf32> to vector<1x64xf32>
    %439 = vector.extract_strided_slice %405 {offsets = [9, 0], sizes = [1, 64], strides = [1, 1]} : vector<32x64xf32> to vector<1x64xf32>
    %440 = arith.maximumf %438, %439 : vector<1x64xf32>
    %441 = vector.extract_strided_slice %405 {offsets = [10, 0], sizes = [1, 64], strides = [1, 1]} : vector<32x64xf32> to vector<1x64xf32>
    %442 = arith.maximumf %440, %441 : vector<1x64xf32>
    %c3_171 = arith.constant 3 : index
    %c4_172 = arith.constant 4 : index
    %c0_173 = arith.constant 0 : index
    %443 = vector.load %arg12[%c3_171, %c4_172, %c0_173] : memref<12x12x64xf32, #tpu.memory_space<vmem>>, vector<1x1x64xf32>
    %444 = vector.shape_cast %443 : vector<1x1x64xf32> to vector<1x64xf32>
    %445 = vector.shape_cast %442 : vector<1x64xf32> to vector<1x1x64xf32>
    tpu.vector_store %arg12[%c3_171, %c4_172, %c0_173], %445 {strides = array<i32>} : memref<12x12x64xf32, #tpu.memory_space<vmem>>, vector<1x1x64xf32>,
    %446 = vector.extract_strided_slice %405 {offsets = [10, 0], sizes = [1, 64], strides = [1, 1]} : vector<32x64xf32> to vector<1x64xf32>
    %447 = vector.extract_strided_slice %405 {offsets = [11, 0], sizes = [1, 64], strides = [1, 1]} : vector<32x64xf32> to vector<1x64xf32>
    %448 = arith.maximumf %446, %447 : vector<1x64xf32>
    %449 = vector.extract_strided_slice %405 {offsets = [12, 0], sizes = [1, 64], strides = [1, 1]} : vector<32x64xf32> to vector<1x64xf32>
    %450 = arith.maximumf %448, %449 : vector<1x64xf32>
    %c3_174 = arith.constant 3 : index
    %c5_175 = arith.constant 5 : index
    %c0_176 = arith.constant 0 : index
    %451 = vector.load %arg12[%c3_174, %c5_175, %c0_176] : memref<12x12x64xf32, #tpu.memory_space<vmem>>, vector<1x1x64xf32>
    %452 = vector.shape_cast %451 : vector<1x1x64xf32> to vector<1x64xf32>
    %453 = vector.shape_cast %450 : vector<1x64xf32> to vector<1x1x64xf32>
    tpu.vector_store %arg12[%c3_174, %c5_175, %c0_176], %453 {strides = array<i32>} : memref<12x12x64xf32, #tpu.memory_space<vmem>>, vector<1x1x64xf32>,
    %454 = vector.extract_strided_slice %405 {offsets = [12, 0], sizes = [1, 64], strides = [1, 1]} : vector<32x64xf32> to vector<1x64xf32>
    %455 = vector.extract_strided_slice %405 {offsets = [13, 0], sizes = [1, 64], strides = [1, 1]} : vector<32x64xf32> to vector<1x64xf32>
    %456 = arith.maximumf %454, %455 : vector<1x64xf32>
    %457 = vector.extract_strided_slice %405 {offsets = [14, 0], sizes = [1, 64], strides = [1, 1]} : vector<32x64xf32> to vector<1x64xf32>
    %458 = arith.maximumf %456, %457 : vector<1x64xf32>
    %c3_177 = arith.constant 3 : index
    %c6_178 = arith.constant 6 : index
    %c0_179 = arith.constant 0 : index
    %459 = vector.load %arg12[%c3_177, %c6_178, %c0_179] : memref<12x12x64xf32, #tpu.memory_space<vmem>>, vector<1x1x64xf32>
    %460 = vector.shape_cast %459 : vector<1x1x64xf32> to vector<1x64xf32>
    %461 = vector.shape_cast %458 : vector<1x64xf32> to vector<1x1x64xf32>
    tpu.vector_store %arg12[%c3_177, %c6_178, %c0_179], %461 {strides = array<i32>} : memref<12x12x64xf32, #tpu.memory_space<vmem>>, vector<1x1x64xf32>,
    %462 = vector.extract_strided_slice %405 {offsets = [14, 0], sizes = [1, 64], strides = [1, 1]} : vector<32x64xf32> to vector<1x64xf32>
    %463 = vector.extract_strided_slice %405 {offsets = [15, 0], sizes = [1, 64], strides = [1, 1]} : vector<32x64xf32> to vector<1x64xf32>
    %464 = arith.maximumf %462, %463 : vector<1x64xf32>
    %465 = vector.extract_strided_slice %405 {offsets = [16, 0], sizes = [1, 64], strides = [1, 1]} : vector<32x64xf32> to vector<1x64xf32>
    %466 = arith.maximumf %464, %465 : vector<1x64xf32>
    %c3_180 = arith.constant 3 : index
    %c7_181 = arith.constant 7 : index
    %c0_182 = arith.constant 0 : index
    %467 = vector.load %arg12[%c3_180, %c7_181, %c0_182] : memref<12x12x64xf32, #tpu.memory_space<vmem>>, vector<1x1x64xf32>
    %468 = vector.shape_cast %467 : vector<1x1x64xf32> to vector<1x64xf32>
    %469 = vector.shape_cast %466 : vector<1x64xf32> to vector<1x1x64xf32>
    tpu.vector_store %arg12[%c3_180, %c7_181, %c0_182], %469 {strides = array<i32>} : memref<12x12x64xf32, #tpu.memory_space<vmem>>, vector<1x1x64xf32>,
    %470 = vector.extract_strided_slice %405 {offsets = [16, 0], sizes = [1, 64], strides = [1, 1]} : vector<32x64xf32> to vector<1x64xf32>
    %471 = vector.extract_strided_slice %405 {offsets = [17, 0], sizes = [1, 64], strides = [1, 1]} : vector<32x64xf32> to vector<1x64xf32>
    %472 = arith.maximumf %470, %471 : vector<1x64xf32>
    %473 = vector.extract_strided_slice %405 {offsets = [18, 0], sizes = [1, 64], strides = [1, 1]} : vector<32x64xf32> to vector<1x64xf32>
    %474 = arith.maximumf %472, %473 : vector<1x64xf32>
    %c3_183 = arith.constant 3 : index
    %c8_184 = arith.constant 8 : index
    %c0_185 = arith.constant 0 : index
    %475 = vector.load %arg12[%c3_183, %c8_184, %c0_185] : memref<12x12x64xf32, #tpu.memory_space<vmem>>, vector<1x1x64xf32>
    %476 = vector.shape_cast %475 : vector<1x1x64xf32> to vector<1x64xf32>
    %477 = vector.shape_cast %474 : vector<1x64xf32> to vector<1x1x64xf32>
    tpu.vector_store %arg12[%c3_183, %c8_184, %c0_185], %477 {strides = array<i32>} : memref<12x12x64xf32, #tpu.memory_space<vmem>>, vector<1x1x64xf32>,
    %478 = vector.extract_strided_slice %405 {offsets = [18, 0], sizes = [1, 64], strides = [1, 1]} : vector<32x64xf32> to vector<1x64xf32>
    %479 = vector.extract_strided_slice %405 {offsets = [19, 0], sizes = [1, 64], strides = [1, 1]} : vector<32x64xf32> to vector<1x64xf32>
    %480 = arith.maximumf %478, %479 : vector<1x64xf32>
    %481 = vector.extract_strided_slice %405 {offsets = [20, 0], sizes = [1, 64], strides = [1, 1]} : vector<32x64xf32> to vector<1x64xf32>
    %482 = arith.maximumf %480, %481 : vector<1x64xf32>
    %c3_186 = arith.constant 3 : index
    %c9_187 = arith.constant 9 : index
    %c0_188 = arith.constant 0 : index
    %483 = vector.load %arg12[%c3_186, %c9_187, %c0_188] : memref<12x12x64xf32, #tpu.memory_space<vmem>>, vector<1x1x64xf32>
    %484 = vector.shape_cast %483 : vector<1x1x64xf32> to vector<1x64xf32>
    %485 = vector.shape_cast %482 : vector<1x64xf32> to vector<1x1x64xf32>
    tpu.vector_store %arg12[%c3_186, %c9_187, %c0_188], %485 {strides = array<i32>} : memref<12x12x64xf32, #tpu.memory_space<vmem>>, vector<1x1x64xf32>,
    %486 = vector.extract_strided_slice %405 {offsets = [20, 0], sizes = [1, 64], strides = [1, 1]} : vector<32x64xf32> to vector<1x64xf32>
    %487 = vector.extract_strided_slice %405 {offsets = [21, 0], sizes = [1, 64], strides = [1, 1]} : vector<32x64xf32> to vector<1x64xf32>
    %488 = arith.maximumf %486, %487 : vector<1x64xf32>
    %489 = vector.extract_strided_slice %405 {offsets = [22, 0], sizes = [1, 64], strides = [1, 1]} : vector<32x64xf32> to vector<1x64xf32>
    %490 = arith.maximumf %488, %489 : vector<1x64xf32>
    %c3_189 = arith.constant 3 : index
    %c10_190 = arith.constant 10 : index
    %c0_191 = arith.constant 0 : index
    %491 = vector.load %arg12[%c3_189, %c10_190, %c0_191] : memref<12x12x64xf32, #tpu.memory_space<vmem>>, vector<1x1x64xf32>
    %492 = vector.shape_cast %491 : vector<1x1x64xf32> to vector<1x64xf32>
    %493 = vector.shape_cast %490 : vector<1x64xf32> to vector<1x1x64xf32>
    tpu.vector_store %arg12[%c3_189, %c10_190, %c0_191], %493 {strides = array<i32>} : memref<12x12x64xf32, #tpu.memory_space<vmem>>, vector<1x1x64xf32>,
    %494 = vector.extract_strided_slice %405 {offsets = [22, 0], sizes = [1, 64], strides = [1, 1]} : vector<32x64xf32> to vector<1x64xf32>
    %495 = vector.extract_strided_slice %405 {offsets = [23, 0], sizes = [1, 64], strides = [1, 1]} : vector<32x64xf32> to vector<1x64xf32>
    %496 = arith.maximumf %494, %495 : vector<1x64xf32>
    %497 = vector.extract_strided_slice %405 {offsets = [24, 0], sizes = [1, 64], strides = [1, 1]} : vector<32x64xf32> to vector<1x64xf32>
    %498 = arith.maximumf %496, %497 : vector<1x64xf32>
    %c3_192 = arith.constant 3 : index
    %c11_193 = arith.constant 11 : index
    %c0_194 = arith.constant 0 : index
    %499 = vector.load %arg12[%c3_192, %c11_193, %c0_194] : memref<12x12x64xf32, #tpu.memory_space<vmem>>, vector<1x1x64xf32>
    %500 = vector.shape_cast %499 : vector<1x1x64xf32> to vector<1x64xf32>
    %501 = vector.shape_cast %498 : vector<1x64xf32> to vector<1x1x64xf32>
    tpu.vector_store %arg12[%c3_192, %c11_193, %c0_194], %501 {strides = array<i32>} : memref<12x12x64xf32, #tpu.memory_space<vmem>>, vector<1x1x64xf32>,
    %c256_195 = arith.constant 256 : index
    %c0_196 = arith.constant 0 : index
    %502 = vector.load %arg11[%c256_195, %c0_196] : memref<800x64xf32, #tpu.memory_space<vmem>>, vector<32x64xf32>
    %503 = vector.broadcast %24 : vector<1x64xf32> to vector<32x64xf32>
    %504 = arith.mulf %502, %503 : vector<32x64xf32>
    %505 = vector.broadcast %25 : vector<1x64xf32> to vector<32x64xf32>
    %506 = arith.addf %504, %505 : vector<32x64xf32>
    %cst_197 = arith.constant 0.000000e+00 : f32
    %507 = vector.broadcast %cst_197 : f32 to vector<32x64xf32>
    %508 = arith.maximumf %506, %507 : vector<32x64xf32>
    %c288 = arith.constant 288 : index
    %c0_198 = arith.constant 0 : index
    %509 = vector.load %arg11[%c288, %c0_198] : memref<800x64xf32, #tpu.memory_space<vmem>>, vector<32x64xf32>
    %510 = vector.broadcast %24 : vector<1x64xf32> to vector<32x64xf32>
    %511 = arith.mulf %509, %510 : vector<32x64xf32>
    %512 = vector.broadcast %25 : vector<1x64xf32> to vector<32x64xf32>
    %513 = arith.addf %511, %512 : vector<32x64xf32>
    %cst_199 = arith.constant 0.000000e+00 : f32
    %514 = vector.broadcast %cst_199 : f32 to vector<32x64xf32>
    %515 = arith.maximumf %513, %514 : vector<32x64xf32>
    %516 = arith.maximumf %508, %515 : vector<32x64xf32>
    %c320 = arith.constant 320 : index
    %c0_200 = arith.constant 0 : index
    %517 = vector.load %arg11[%c320, %c0_200] : memref<800x64xf32, #tpu.memory_space<vmem>>, vector<32x64xf32>
    %518 = vector.broadcast %24 : vector<1x64xf32> to vector<32x64xf32>
    %519 = arith.mulf %517, %518 : vector<32x64xf32>
    %520 = vector.broadcast %25 : vector<1x64xf32> to vector<32x64xf32>
    %521 = arith.addf %519, %520 : vector<32x64xf32>
    %cst_201 = arith.constant 0.000000e+00 : f32
    %522 = vector.broadcast %cst_201 : f32 to vector<32x64xf32>
    %523 = arith.maximumf %521, %522 : vector<32x64xf32>
    %524 = arith.maximumf %516, %523 : vector<32x64xf32>
    %525 = vector.extract_strided_slice %524 {offsets = [0, 0], sizes = [1, 64], strides = [1, 1]} : vector<32x64xf32> to vector<1x64xf32>
    %526 = vector.extract_strided_slice %524 {offsets = [1, 0], sizes = [1, 64], strides = [1, 1]} : vector<32x64xf32> to vector<1x64xf32>
    %527 = arith.maximumf %525, %526 : vector<1x64xf32>
    %528 = vector.extract_strided_slice %524 {offsets = [2, 0], sizes = [1, 64], strides = [1, 1]} : vector<32x64xf32> to vector<1x64xf32>
    %529 = arith.maximumf %527, %528 : vector<1x64xf32>
    %c4_202 = arith.constant 4 : index
    %c0_203 = arith.constant 0 : index
    %c0_204 = arith.constant 0 : index
    %530 = vector.load %arg12[%c4_202, %c0_203, %c0_204] : memref<12x12x64xf32, #tpu.memory_space<vmem>>, vector<1x1x64xf32>
    %531 = vector.shape_cast %530 : vector<1x1x64xf32> to vector<1x64xf32>
    %532 = vector.shape_cast %529 : vector<1x64xf32> to vector<1x1x64xf32>
    tpu.vector_store %arg12[%c4_202, %c0_203, %c0_204], %532 {strides = array<i32>} : memref<12x12x64xf32, #tpu.memory_space<vmem>>, vector<1x1x64xf32>,
    %533 = vector.extract_strided_slice %524 {offsets = [2, 0], sizes = [1, 64], strides = [1, 1]} : vector<32x64xf32> to vector<1x64xf32>
    %534 = vector.extract_strided_slice %524 {offsets = [3, 0], sizes = [1, 64], strides = [1, 1]} : vector<32x64xf32> to vector<1x64xf32>
    %535 = arith.maximumf %533, %534 : vector<1x64xf32>
    %536 = vector.extract_strided_slice %524 {offsets = [4, 0], sizes = [1, 64], strides = [1, 1]} : vector<32x64xf32> to vector<1x64xf32>
    %537 = arith.maximumf %535, %536 : vector<1x64xf32>
    %c4_205 = arith.constant 4 : index
    %c1_206 = arith.constant 1 : index
    %c0_207 = arith.constant 0 : index
    %538 = vector.load %arg12[%c4_205, %c1_206, %c0_207] : memref<12x12x64xf32, #tpu.memory_space<vmem>>, vector<1x1x64xf32>
    %539 = vector.shape_cast %538 : vector<1x1x64xf32> to vector<1x64xf32>
    %540 = vector.shape_cast %537 : vector<1x64xf32> to vector<1x1x64xf32>
    tpu.vector_store %arg12[%c4_205, %c1_206, %c0_207], %540 {strides = array<i32>} : memref<12x12x64xf32, #tpu.memory_space<vmem>>, vector<1x1x64xf32>,
    %541 = vector.extract_strided_slice %524 {offsets = [4, 0], sizes = [1, 64], strides = [1, 1]} : vector<32x64xf32> to vector<1x64xf32>
    %542 = vector.extract_strided_slice %524 {offsets = [5, 0], sizes = [1, 64], strides = [1, 1]} : vector<32x64xf32> to vector<1x64xf32>
    %543 = arith.maximumf %541, %542 : vector<1x64xf32>
    %544 = vector.extract_strided_slice %524 {offsets = [6, 0], sizes = [1, 64], strides = [1, 1]} : vector<32x64xf32> to vector<1x64xf32>
    %545 = arith.maximumf %543, %544 : vector<1x64xf32>
    %c4_208 = arith.constant 4 : index
    %c2_209 = arith.constant 2 : index
    %c0_210 = arith.constant 0 : index
    %546 = vector.load %arg12[%c4_208, %c2_209, %c0_210] : memref<12x12x64xf32, #tpu.memory_space<vmem>>, vector<1x1x64xf32>
    %547 = vector.shape_cast %546 : vector<1x1x64xf32> to vector<1x64xf32>
    %548 = vector.shape_cast %545 : vector<1x64xf32> to vector<1x1x64xf32>
    tpu.vector_store %arg12[%c4_208, %c2_209, %c0_210], %548 {strides = array<i32>} : memref<12x12x64xf32, #tpu.memory_space<vmem>>, vector<1x1x64xf32>,
    %549 = vector.extract_strided_slice %524 {offsets = [6, 0], sizes = [1, 64], strides = [1, 1]} : vector<32x64xf32> to vector<1x64xf32>
    %550 = vector.extract_strided_slice %524 {offsets = [7, 0], sizes = [1, 64], strides = [1, 1]} : vector<32x64xf32> to vector<1x64xf32>
    %551 = arith.maximumf %549, %550 : vector<1x64xf32>
    %552 = vector.extract_strided_slice %524 {offsets = [8, 0], sizes = [1, 64], strides = [1, 1]} : vector<32x64xf32> to vector<1x64xf32>
    %553 = arith.maximumf %551, %552 : vector<1x64xf32>
    %c4_211 = arith.constant 4 : index
    %c3_212 = arith.constant 3 : index
    %c0_213 = arith.constant 0 : index
    %554 = vector.load %arg12[%c4_211, %c3_212, %c0_213] : memref<12x12x64xf32, #tpu.memory_space<vmem>>, vector<1x1x64xf32>
    %555 = vector.shape_cast %554 : vector<1x1x64xf32> to vector<1x64xf32>
    %556 = vector.shape_cast %553 : vector<1x64xf32> to vector<1x1x64xf32>
    tpu.vector_store %arg12[%c4_211, %c3_212, %c0_213], %556 {strides = array<i32>} : memref<12x12x64xf32, #tpu.memory_space<vmem>>, vector<1x1x64xf32>,
    %557 = vector.extract_strided_slice %524 {offsets = [8, 0], sizes = [1, 64], strides = [1, 1]} : vector<32x64xf32> to vector<1x64xf32>
    %558 = vector.extract_strided_slice %524 {offsets = [9, 0], sizes = [1, 64], strides = [1, 1]} : vector<32x64xf32> to vector<1x64xf32>
    %559 = arith.maximumf %557, %558 : vector<1x64xf32>
    %560 = vector.extract_strided_slice %524 {offsets = [10, 0], sizes = [1, 64], strides = [1, 1]} : vector<32x64xf32> to vector<1x64xf32>
    %561 = arith.maximumf %559, %560 : vector<1x64xf32>
    %c4_214 = arith.constant 4 : index
    %c4_215 = arith.constant 4 : index
    %c0_216 = arith.constant 0 : index
    %562 = vector.load %arg12[%c4_214, %c4_215, %c0_216] : memref<12x12x64xf32, #tpu.memory_space<vmem>>, vector<1x1x64xf32>
    %563 = vector.shape_cast %562 : vector<1x1x64xf32> to vector<1x64xf32>
    %564 = vector.shape_cast %561 : vector<1x64xf32> to vector<1x1x64xf32>
    tpu.vector_store %arg12[%c4_214, %c4_215, %c0_216], %564 {strides = array<i32>} : memref<12x12x64xf32, #tpu.memory_space<vmem>>, vector<1x1x64xf32>,
    %565 = vector.extract_strided_slice %524 {offsets = [10, 0], sizes = [1, 64], strides = [1, 1]} : vector<32x64xf32> to vector<1x64xf32>
    %566 = vector.extract_strided_slice %524 {offsets = [11, 0], sizes = [1, 64], strides = [1, 1]} : vector<32x64xf32> to vector<1x64xf32>
    %567 = arith.maximumf %565, %566 : vector<1x64xf32>
    %568 = vector.extract_strided_slice %524 {offsets = [12, 0], sizes = [1, 64], strides = [1, 1]} : vector<32x64xf32> to vector<1x64xf32>
    %569 = arith.maximumf %567, %568 : vector<1x64xf32>
    %c4_217 = arith.constant 4 : index
    %c5_218 = arith.constant 5 : index
    %c0_219 = arith.constant 0 : index
    %570 = vector.load %arg12[%c4_217, %c5_218, %c0_219] : memref<12x12x64xf32, #tpu.memory_space<vmem>>, vector<1x1x64xf32>
    %571 = vector.shape_cast %570 : vector<1x1x64xf32> to vector<1x64xf32>
    %572 = vector.shape_cast %569 : vector<1x64xf32> to vector<1x1x64xf32>
    tpu.vector_store %arg12[%c4_217, %c5_218, %c0_219], %572 {strides = array<i32>} : memref<12x12x64xf32, #tpu.memory_space<vmem>>, vector<1x1x64xf32>,
    %573 = vector.extract_strided_slice %524 {offsets = [12, 0], sizes = [1, 64], strides = [1, 1]} : vector<32x64xf32> to vector<1x64xf32>
    %574 = vector.extract_strided_slice %524 {offsets = [13, 0], sizes = [1, 64], strides = [1, 1]} : vector<32x64xf32> to vector<1x64xf32>
    %575 = arith.maximumf %573, %574 : vector<1x64xf32>
    %576 = vector.extract_strided_slice %524 {offsets = [14, 0], sizes = [1, 64], strides = [1, 1]} : vector<32x64xf32> to vector<1x64xf32>
    %577 = arith.maximumf %575, %576 : vector<1x64xf32>
    %c4_220 = arith.constant 4 : index
    %c6_221 = arith.constant 6 : index
    %c0_222 = arith.constant 0 : index
    %578 = vector.load %arg12[%c4_220, %c6_221, %c0_222] : memref<12x12x64xf32, #tpu.memory_space<vmem>>, vector<1x1x64xf32>
    %579 = vector.shape_cast %578 : vector<1x1x64xf32> to vector<1x64xf32>
    %580 = vector.shape_cast %577 : vector<1x64xf32> to vector<1x1x64xf32>
    tpu.vector_store %arg12[%c4_220, %c6_221, %c0_222], %580 {strides = array<i32>} : memref<12x12x64xf32, #tpu.memory_space<vmem>>, vector<1x1x64xf32>,
    %581 = vector.extract_strided_slice %524 {offsets = [14, 0], sizes = [1, 64], strides = [1, 1]} : vector<32x64xf32> to vector<1x64xf32>
    %582 = vector.extract_strided_slice %524 {offsets = [15, 0], sizes = [1, 64], strides = [1, 1]} : vector<32x64xf32> to vector<1x64xf32>
    %583 = arith.maximumf %581, %582 : vector<1x64xf32>
    %584 = vector.extract_strided_slice %524 {offsets = [16, 0], sizes = [1, 64], strides = [1, 1]} : vector<32x64xf32> to vector<1x64xf32>
    %585 = arith.maximumf %583, %584 : vector<1x64xf32>
    %c4_223 = arith.constant 4 : index
    %c7_224 = arith.constant 7 : index
    %c0_225 = arith.constant 0 : index
    %586 = vector.load %arg12[%c4_223, %c7_224, %c0_225] : memref<12x12x64xf32, #tpu.memory_space<vmem>>, vector<1x1x64xf32>
    %587 = vector.shape_cast %586 : vector<1x1x64xf32> to vector<1x64xf32>
    %588 = vector.shape_cast %585 : vector<1x64xf32> to vector<1x1x64xf32>
    tpu.vector_store %arg12[%c4_223, %c7_224, %c0_225], %588 {strides = array<i32>} : memref<12x12x64xf32, #tpu.memory_space<vmem>>, vector<1x1x64xf32>,
    %589 = vector.extract_strided_slice %524 {offsets = [16, 0], sizes = [1, 64], strides = [1, 1]} : vector<32x64xf32> to vector<1x64xf32>
    %590 = vector.extract_strided_slice %524 {offsets = [17, 0], sizes = [1, 64], strides = [1, 1]} : vector<32x64xf32> to vector<1x64xf32>
    %591 = arith.maximumf %589, %590 : vector<1x64xf32>
    %592 = vector.extract_strided_slice %524 {offsets = [18, 0], sizes = [1, 64], strides = [1, 1]} : vector<32x64xf32> to vector<1x64xf32>
    %593 = arith.maximumf %591, %592 : vector<1x64xf32>
    %c4_226 = arith.constant 4 : index
    %c8_227 = arith.constant 8 : index
    %c0_228 = arith.constant 0 : index
    %594 = vector.load %arg12[%c4_226, %c8_227, %c0_228] : memref<12x12x64xf32, #tpu.memory_space<vmem>>, vector<1x1x64xf32>
    %595 = vector.shape_cast %594 : vector<1x1x64xf32> to vector<1x64xf32>
    %596 = vector.shape_cast %593 : vector<1x64xf32> to vector<1x1x64xf32>
    tpu.vector_store %arg12[%c4_226, %c8_227, %c0_228], %596 {strides = array<i32>} : memref<12x12x64xf32, #tpu.memory_space<vmem>>, vector<1x1x64xf32>,
    %597 = vector.extract_strided_slice %524 {offsets = [18, 0], sizes = [1, 64], strides = [1, 1]} : vector<32x64xf32> to vector<1x64xf32>
    %598 = vector.extract_strided_slice %524 {offsets = [19, 0], sizes = [1, 64], strides = [1, 1]} : vector<32x64xf32> to vector<1x64xf32>
    %599 = arith.maximumf %597, %598 : vector<1x64xf32>
    %600 = vector.extract_strided_slice %524 {offsets = [20, 0], sizes = [1, 64], strides = [1, 1]} : vector<32x64xf32> to vector<1x64xf32>
    %601 = arith.maximumf %599, %600 : vector<1x64xf32>
    %c4_229 = arith.constant 4 : index
    %c9_230 = arith.constant 9 : index
    %c0_231 = arith.constant 0 : index
    %602 = vector.load %arg12[%c4_229, %c9_230, %c0_231] : memref<12x12x64xf32, #tpu.memory_space<vmem>>, vector<1x1x64xf32>
    %603 = vector.shape_cast %602 : vector<1x1x64xf32> to vector<1x64xf32>
    %604 = vector.shape_cast %601 : vector<1x64xf32> to vector<1x1x64xf32>
    tpu.vector_store %arg12[%c4_229, %c9_230, %c0_231], %604 {strides = array<i32>} : memref<12x12x64xf32, #tpu.memory_space<vmem>>, vector<1x1x64xf32>,
    %605 = vector.extract_strided_slice %524 {offsets = [20, 0], sizes = [1, 64], strides = [1, 1]} : vector<32x64xf32> to vector<1x64xf32>
    %606 = vector.extract_strided_slice %524 {offsets = [21, 0], sizes = [1, 64], strides = [1, 1]} : vector<32x64xf32> to vector<1x64xf32>
    %607 = arith.maximumf %605, %606 : vector<1x64xf32>
    %608 = vector.extract_strided_slice %524 {offsets = [22, 0], sizes = [1, 64], strides = [1, 1]} : vector<32x64xf32> to vector<1x64xf32>
    %609 = arith.maximumf %607, %608 : vector<1x64xf32>
    %c4_232 = arith.constant 4 : index
    %c10_233 = arith.constant 10 : index
    %c0_234 = arith.constant 0 : index
    %610 = vector.load %arg12[%c4_232, %c10_233, %c0_234] : memref<12x12x64xf32, #tpu.memory_space<vmem>>, vector<1x1x64xf32>
    %611 = vector.shape_cast %610 : vector<1x1x64xf32> to vector<1x64xf32>
    %612 = vector.shape_cast %609 : vector<1x64xf32> to vector<1x1x64xf32>
    tpu.vector_store %arg12[%c4_232, %c10_233, %c0_234], %612 {strides = array<i32>} : memref<12x12x64xf32, #tpu.memory_space<vmem>>, vector<1x1x64xf32>,
    %613 = vector.extract_strided_slice %524 {offsets = [22, 0], sizes = [1, 64], strides = [1, 1]} : vector<32x64xf32> to vector<1x64xf32>
    %614 = vector.extract_strided_slice %524 {offsets = [23, 0], sizes = [1, 64], strides = [1, 1]} : vector<32x64xf32> to vector<1x64xf32>
    %615 = arith.maximumf %613, %614 : vector<1x64xf32>
    %616 = vector.extract_strided_slice %524 {offsets = [24, 0], sizes = [1, 64], strides = [1, 1]} : vector<32x64xf32> to vector<1x64xf32>
    %617 = arith.maximumf %615, %616 : vector<1x64xf32>
    %c4_235 = arith.constant 4 : index
    %c11_236 = arith.constant 11 : index
    %c0_237 = arith.constant 0 : index
    %618 = vector.load %arg12[%c4_235, %c11_236, %c0_237] : memref<12x12x64xf32, #tpu.memory_space<vmem>>, vector<1x1x64xf32>
    %619 = vector.shape_cast %618 : vector<1x1x64xf32> to vector<1x64xf32>
    %620 = vector.shape_cast %617 : vector<1x64xf32> to vector<1x1x64xf32>
    tpu.vector_store %arg12[%c4_235, %c11_236, %c0_237], %620 {strides = array<i32>} : memref<12x12x64xf32, #tpu.memory_space<vmem>>, vector<1x1x64xf32>,
    %c320_238 = arith.constant 320 : index
    %c0_239 = arith.constant 0 : index
    %621 = vector.load %arg11[%c320_238, %c0_239] : memref<800x64xf32, #tpu.memory_space<vmem>>, vector<32x64xf32>
    %622 = vector.broadcast %24 : vector<1x64xf32> to vector<32x64xf32>
    %623 = arith.mulf %621, %622 : vector<32x64xf32>
    %624 = vector.broadcast %25 : vector<1x64xf32> to vector<32x64xf32>
    %625 = arith.addf %623, %624 : vector<32x64xf32>
    %cst_240 = arith.constant 0.000000e+00 : f32
    %626 = vector.broadcast %cst_240 : f32 to vector<32x64xf32>
    %627 = arith.maximumf %625, %626 : vector<32x64xf32>
    %c352 = arith.constant 352 : index
    %c0_241 = arith.constant 0 : index
    %628 = vector.load %arg11[%c352, %c0_241] : memref<800x64xf32, #tpu.memory_space<vmem>>, vector<32x64xf32>
    %629 = vector.broadcast %24 : vector<1x64xf32> to vector<32x64xf32>
    %630 = arith.mulf %628, %629 : vector<32x64xf32>
    %631 = vector.broadcast %25 : vector<1x64xf32> to vector<32x64xf32>
    %632 = arith.addf %630, %631 : vector<32x64xf32>
    %cst_242 = arith.constant 0.000000e+00 : f32
    %633 = vector.broadcast %cst_242 : f32 to vector<32x64xf32>
    %634 = arith.maximumf %632, %633 : vector<32x64xf32>
    %635 = arith.maximumf %627, %634 : vector<32x64xf32>
    %c384 = arith.constant 384 : index
    %c0_243 = arith.constant 0 : index
    %636 = vector.load %arg11[%c384, %c0_243] : memref<800x64xf32, #tpu.memory_space<vmem>>, vector<32x64xf32>
    %637 = vector.broadcast %24 : vector<1x64xf32> to vector<32x64xf32>
    %638 = arith.mulf %636, %637 : vector<32x64xf32>
    %639 = vector.broadcast %25 : vector<1x64xf32> to vector<32x64xf32>
    %640 = arith.addf %638, %639 : vector<32x64xf32>
    %cst_244 = arith.constant 0.000000e+00 : f32
    %641 = vector.broadcast %cst_244 : f32 to vector<32x64xf32>
    %642 = arith.maximumf %640, %641 : vector<32x64xf32>
    %643 = arith.maximumf %635, %642 : vector<32x64xf32>
    %644 = vector.extract_strided_slice %643 {offsets = [0, 0], sizes = [1, 64], strides = [1, 1]} : vector<32x64xf32> to vector<1x64xf32>
    %645 = vector.extract_strided_slice %643 {offsets = [1, 0], sizes = [1, 64], strides = [1, 1]} : vector<32x64xf32> to vector<1x64xf32>
    %646 = arith.maximumf %644, %645 : vector<1x64xf32>
    %647 = vector.extract_strided_slice %643 {offsets = [2, 0], sizes = [1, 64], strides = [1, 1]} : vector<32x64xf32> to vector<1x64xf32>
    %648 = arith.maximumf %646, %647 : vector<1x64xf32>
    %c5_245 = arith.constant 5 : index
    %c0_246 = arith.constant 0 : index
    %c0_247 = arith.constant 0 : index
    %649 = vector.load %arg12[%c5_245, %c0_246, %c0_247] : memref<12x12x64xf32, #tpu.memory_space<vmem>>, vector<1x1x64xf32>
    %650 = vector.shape_cast %649 : vector<1x1x64xf32> to vector<1x64xf32>
    %651 = vector.shape_cast %648 : vector<1x64xf32> to vector<1x1x64xf32>
    tpu.vector_store %arg12[%c5_245, %c0_246, %c0_247], %651 {strides = array<i32>} : memref<12x12x64xf32, #tpu.memory_space<vmem>>, vector<1x1x64xf32>,
    %652 = vector.extract_strided_slice %643 {offsets = [2, 0], sizes = [1, 64], strides = [1, 1]} : vector<32x64xf32> to vector<1x64xf32>
    %653 = vector.extract_strided_slice %643 {offsets = [3, 0], sizes = [1, 64], strides = [1, 1]} : vector<32x64xf32> to vector<1x64xf32>
    %654 = arith.maximumf %652, %653 : vector<1x64xf32>
    %655 = vector.extract_strided_slice %643 {offsets = [4, 0], sizes = [1, 64], strides = [1, 1]} : vector<32x64xf32> to vector<1x64xf32>
    %656 = arith.maximumf %654, %655 : vector<1x64xf32>
    %c5_248 = arith.constant 5 : index
    %c1_249 = arith.constant 1 : index
    %c0_250 = arith.constant 0 : index
    %657 = vector.load %arg12[%c5_248, %c1_249, %c0_250] : memref<12x12x64xf32, #tpu.memory_space<vmem>>, vector<1x1x64xf32>
    %658 = vector.shape_cast %657 : vector<1x1x64xf32> to vector<1x64xf32>
    %659 = vector.shape_cast %656 : vector<1x64xf32> to vector<1x1x64xf32>
    tpu.vector_store %arg12[%c5_248, %c1_249, %c0_250], %659 {strides = array<i32>} : memref<12x12x64xf32, #tpu.memory_space<vmem>>, vector<1x1x64xf32>,
    %660 = vector.extract_strided_slice %643 {offsets = [4, 0], sizes = [1, 64], strides = [1, 1]} : vector<32x64xf32> to vector<1x64xf32>
    %661 = vector.extract_strided_slice %643 {offsets = [5, 0], sizes = [1, 64], strides = [1, 1]} : vector<32x64xf32> to vector<1x64xf32>
    %662 = arith.maximumf %660, %661 : vector<1x64xf32>
    %663 = vector.extract_strided_slice %643 {offsets = [6, 0], sizes = [1, 64], strides = [1, 1]} : vector<32x64xf32> to vector<1x64xf32>
    %664 = arith.maximumf %662, %663 : vector<1x64xf32>
    %c5_251 = arith.constant 5 : index
    %c2_252 = arith.constant 2 : index
    %c0_253 = arith.constant 0 : index
    %665 = vector.load %arg12[%c5_251, %c2_252, %c0_253] : memref<12x12x64xf32, #tpu.memory_space<vmem>>, vector<1x1x64xf32>
    %666 = vector.shape_cast %665 : vector<1x1x64xf32> to vector<1x64xf32>
    %667 = vector.shape_cast %664 : vector<1x64xf32> to vector<1x1x64xf32>
    tpu.vector_store %arg12[%c5_251, %c2_252, %c0_253], %667 {strides = array<i32>} : memref<12x12x64xf32, #tpu.memory_space<vmem>>, vector<1x1x64xf32>,
    %668 = vector.extract_strided_slice %643 {offsets = [6, 0], sizes = [1, 64], strides = [1, 1]} : vector<32x64xf32> to vector<1x64xf32>
    %669 = vector.extract_strided_slice %643 {offsets = [7, 0], sizes = [1, 64], strides = [1, 1]} : vector<32x64xf32> to vector<1x64xf32>
    %670 = arith.maximumf %668, %669 : vector<1x64xf32>
    %671 = vector.extract_strided_slice %643 {offsets = [8, 0], sizes = [1, 64], strides = [1, 1]} : vector<32x64xf32> to vector<1x64xf32>
    %672 = arith.maximumf %670, %671 : vector<1x64xf32>
    %c5_254 = arith.constant 5 : index
    %c3_255 = arith.constant 3 : index
    %c0_256 = arith.constant 0 : index
    %673 = vector.load %arg12[%c5_254, %c3_255, %c0_256] : memref<12x12x64xf32, #tpu.memory_space<vmem>>, vector<1x1x64xf32>
    %674 = vector.shape_cast %673 : vector<1x1x64xf32> to vector<1x64xf32>
    %675 = vector.shape_cast %672 : vector<1x64xf32> to vector<1x1x64xf32>
    tpu.vector_store %arg12[%c5_254, %c3_255, %c0_256], %675 {strides = array<i32>} : memref<12x12x64xf32, #tpu.memory_space<vmem>>, vector<1x1x64xf32>,
    %676 = vector.extract_strided_slice %643 {offsets = [8, 0], sizes = [1, 64], strides = [1, 1]} : vector<32x64xf32> to vector<1x64xf32>
    %677 = vector.extract_strided_slice %643 {offsets = [9, 0], sizes = [1, 64], strides = [1, 1]} : vector<32x64xf32> to vector<1x64xf32>
    %678 = arith.maximumf %676, %677 : vector<1x64xf32>
    %679 = vector.extract_strided_slice %643 {offsets = [10, 0], sizes = [1, 64], strides = [1, 1]} : vector<32x64xf32> to vector<1x64xf32>
    %680 = arith.maximumf %678, %679 : vector<1x64xf32>
    %c5_257 = arith.constant 5 : index
    %c4_258 = arith.constant 4 : index
    %c0_259 = arith.constant 0 : index
    %681 = vector.load %arg12[%c5_257, %c4_258, %c0_259] : memref<12x12x64xf32, #tpu.memory_space<vmem>>, vector<1x1x64xf32>
    %682 = vector.shape_cast %681 : vector<1x1x64xf32> to vector<1x64xf32>
    %683 = vector.shape_cast %680 : vector<1x64xf32> to vector<1x1x64xf32>
    tpu.vector_store %arg12[%c5_257, %c4_258, %c0_259], %683 {strides = array<i32>} : memref<12x12x64xf32, #tpu.memory_space<vmem>>, vector<1x1x64xf32>,
    %684 = vector.extract_strided_slice %643 {offsets = [10, 0], sizes = [1, 64], strides = [1, 1]} : vector<32x64xf32> to vector<1x64xf32>
    %685 = vector.extract_strided_slice %643 {offsets = [11, 0], sizes = [1, 64], strides = [1, 1]} : vector<32x64xf32> to vector<1x64xf32>
    %686 = arith.maximumf %684, %685 : vector<1x64xf32>
    %687 = vector.extract_strided_slice %643 {offsets = [12, 0], sizes = [1, 64], strides = [1, 1]} : vector<32x64xf32> to vector<1x64xf32>
    %688 = arith.maximumf %686, %687 : vector<1x64xf32>
    %c5_260 = arith.constant 5 : index
    %c5_261 = arith.constant 5 : index
    %c0_262 = arith.constant 0 : index
    %689 = vector.load %arg12[%c5_260, %c5_261, %c0_262] : memref<12x12x64xf32, #tpu.memory_space<vmem>>, vector<1x1x64xf32>
    %690 = vector.shape_cast %689 : vector<1x1x64xf32> to vector<1x64xf32>
    %691 = vector.shape_cast %688 : vector<1x64xf32> to vector<1x1x64xf32>
    tpu.vector_store %arg12[%c5_260, %c5_261, %c0_262], %691 {strides = array<i32>} : memref<12x12x64xf32, #tpu.memory_space<vmem>>, vector<1x1x64xf32>,
    %692 = vector.extract_strided_slice %643 {offsets = [12, 0], sizes = [1, 64], strides = [1, 1]} : vector<32x64xf32> to vector<1x64xf32>
    %693 = vector.extract_strided_slice %643 {offsets = [13, 0], sizes = [1, 64], strides = [1, 1]} : vector<32x64xf32> to vector<1x64xf32>
    %694 = arith.maximumf %692, %693 : vector<1x64xf32>
    %695 = vector.extract_strided_slice %643 {offsets = [14, 0], sizes = [1, 64], strides = [1, 1]} : vector<32x64xf32> to vector<1x64xf32>
    %696 = arith.maximumf %694, %695 : vector<1x64xf32>
    %c5_263 = arith.constant 5 : index
    %c6_264 = arith.constant 6 : index
    %c0_265 = arith.constant 0 : index
    %697 = vector.load %arg12[%c5_263, %c6_264, %c0_265] : memref<12x12x64xf32, #tpu.memory_space<vmem>>, vector<1x1x64xf32>
    %698 = vector.shape_cast %697 : vector<1x1x64xf32> to vector<1x64xf32>
    %699 = vector.shape_cast %696 : vector<1x64xf32> to vector<1x1x64xf32>
    tpu.vector_store %arg12[%c5_263, %c6_264, %c0_265], %699 {strides = array<i32>} : memref<12x12x64xf32, #tpu.memory_space<vmem>>, vector<1x1x64xf32>,
    %700 = vector.extract_strided_slice %643 {offsets = [14, 0], sizes = [1, 64], strides = [1, 1]} : vector<32x64xf32> to vector<1x64xf32>
    %701 = vector.extract_strided_slice %643 {offsets = [15, 0], sizes = [1, 64], strides = [1, 1]} : vector<32x64xf32> to vector<1x64xf32>
    %702 = arith.maximumf %700, %701 : vector<1x64xf32>
    %703 = vector.extract_strided_slice %643 {offsets = [16, 0], sizes = [1, 64], strides = [1, 1]} : vector<32x64xf32> to vector<1x64xf32>
    %704 = arith.maximumf %702, %703 : vector<1x64xf32>
    %c5_266 = arith.constant 5 : index
    %c7_267 = arith.constant 7 : index
    %c0_268 = arith.constant 0 : index
    %705 = vector.load %arg12[%c5_266, %c7_267, %c0_268] : memref<12x12x64xf32, #tpu.memory_space<vmem>>, vector<1x1x64xf32>
    %706 = vector.shape_cast %705 : vector<1x1x64xf32> to vector<1x64xf32>
    %707 = vector.shape_cast %704 : vector<1x64xf32> to vector<1x1x64xf32>
    tpu.vector_store %arg12[%c5_266, %c7_267, %c0_268], %707 {strides = array<i32>} : memref<12x12x64xf32, #tpu.memory_space<vmem>>, vector<1x1x64xf32>,
    %708 = vector.extract_strided_slice %643 {offsets = [16, 0], sizes = [1, 64], strides = [1, 1]} : vector<32x64xf32> to vector<1x64xf32>
    %709 = vector.extract_strided_slice %643 {offsets = [17, 0], sizes = [1, 64], strides = [1, 1]} : vector<32x64xf32> to vector<1x64xf32>
    %710 = arith.maximumf %708, %709 : vector<1x64xf32>
    %711 = vector.extract_strided_slice %643 {offsets = [18, 0], sizes = [1, 64], strides = [1, 1]} : vector<32x64xf32> to vector<1x64xf32>
    %712 = arith.maximumf %710, %711 : vector<1x64xf32>
    %c5_269 = arith.constant 5 : index
    %c8_270 = arith.constant 8 : index
    %c0_271 = arith.constant 0 : index
    %713 = vector.load %arg12[%c5_269, %c8_270, %c0_271] : memref<12x12x64xf32, #tpu.memory_space<vmem>>, vector<1x1x64xf32>
    %714 = vector.shape_cast %713 : vector<1x1x64xf32> to vector<1x64xf32>
    %715 = vector.shape_cast %712 : vector<1x64xf32> to vector<1x1x64xf32>
    tpu.vector_store %arg12[%c5_269, %c8_270, %c0_271], %715 {strides = array<i32>} : memref<12x12x64xf32, #tpu.memory_space<vmem>>, vector<1x1x64xf32>,
    %716 = vector.extract_strided_slice %643 {offsets = [18, 0], sizes = [1, 64], strides = [1, 1]} : vector<32x64xf32> to vector<1x64xf32>
    %717 = vector.extract_strided_slice %643 {offsets = [19, 0], sizes = [1, 64], strides = [1, 1]} : vector<32x64xf32> to vector<1x64xf32>
    %718 = arith.maximumf %716, %717 : vector<1x64xf32>
    %719 = vector.extract_strided_slice %643 {offsets = [20, 0], sizes = [1, 64], strides = [1, 1]} : vector<32x64xf32> to vector<1x64xf32>
    %720 = arith.maximumf %718, %719 : vector<1x64xf32>
    %c5_272 = arith.constant 5 : index
    %c9_273 = arith.constant 9 : index
    %c0_274 = arith.constant 0 : index
    %721 = vector.load %arg12[%c5_272, %c9_273, %c0_274] : memref<12x12x64xf32, #tpu.memory_space<vmem>>, vector<1x1x64xf32>
    %722 = vector.shape_cast %721 : vector<1x1x64xf32> to vector<1x64xf32>
    %723 = vector.shape_cast %720 : vector<1x64xf32> to vector<1x1x64xf32>
    tpu.vector_store %arg12[%c5_272, %c9_273, %c0_274], %723 {strides = array<i32>} : memref<12x12x64xf32, #tpu.memory_space<vmem>>, vector<1x1x64xf32>,
    %724 = vector.extract_strided_slice %643 {offsets = [20, 0], sizes = [1, 64], strides = [1, 1]} : vector<32x64xf32> to vector<1x64xf32>
    %725 = vector.extract_strided_slice %643 {offsets = [21, 0], sizes = [1, 64], strides = [1, 1]} : vector<32x64xf32> to vector<1x64xf32>
    %726 = arith.maximumf %724, %725 : vector<1x64xf32>
    %727 = vector.extract_strided_slice %643 {offsets = [22, 0], sizes = [1, 64], strides = [1, 1]} : vector<32x64xf32> to vector<1x64xf32>
    %728 = arith.maximumf %726, %727 : vector<1x64xf32>
    %c5_275 = arith.constant 5 : index
    %c10_276 = arith.constant 10 : index
    %c0_277 = arith.constant 0 : index
    %729 = vector.load %arg12[%c5_275, %c10_276, %c0_277] : memref<12x12x64xf32, #tpu.memory_space<vmem>>, vector<1x1x64xf32>
    %730 = vector.shape_cast %729 : vector<1x1x64xf32> to vector<1x64xf32>
    %731 = vector.shape_cast %728 : vector<1x64xf32> to vector<1x1x64xf32>
    tpu.vector_store %arg12[%c5_275, %c10_276, %c0_277], %731 {strides = array<i32>} : memref<12x12x64xf32, #tpu.memory_space<vmem>>, vector<1x1x64xf32>,
    %732 = vector.extract_strided_slice %643 {offsets = [22, 0], sizes = [1, 64], strides = [1, 1]} : vector<32x64xf32> to vector<1x64xf32>
    %733 = vector.extract_strided_slice %643 {offsets = [23, 0], sizes = [1, 64], strides = [1, 1]} : vector<32x64xf32> to vector<1x64xf32>
    %734 = arith.maximumf %732, %733 : vector<1x64xf32>
    %735 = vector.extract_strided_slice %643 {offsets = [24, 0], sizes = [1, 64], strides = [1, 1]} : vector<32x64xf32> to vector<1x64xf32>
    %736 = arith.maximumf %734, %735 : vector<1x64xf32>
    %c5_278 = arith.constant 5 : index
    %c11_279 = arith.constant 11 : index
    %c0_280 = arith.constant 0 : index
    %737 = vector.load %arg12[%c5_278, %c11_279, %c0_280] : memref<12x12x64xf32, #tpu.memory_space<vmem>>, vector<1x1x64xf32>
    %738 = vector.shape_cast %737 : vector<1x1x64xf32> to vector<1x64xf32>
    %739 = vector.shape_cast %736 : vector<1x64xf32> to vector<1x1x64xf32>
    tpu.vector_store %arg12[%c5_278, %c11_279, %c0_280], %739 {strides = array<i32>} : memref<12x12x64xf32, #tpu.memory_space<vmem>>, vector<1x1x64xf32>,
    %c384_281 = arith.constant 384 : index
    %c0_282 = arith.constant 0 : index
    %740 = vector.load %arg11[%c384_281, %c0_282] : memref<800x64xf32, #tpu.memory_space<vmem>>, vector<32x64xf32>
    %741 = vector.broadcast %24 : vector<1x64xf32> to vector<32x64xf32>
    %742 = arith.mulf %740, %741 : vector<32x64xf32>
    %743 = vector.broadcast %25 : vector<1x64xf32> to vector<32x64xf32>
    %744 = arith.addf %742, %743 : vector<32x64xf32>
    %cst_283 = arith.constant 0.000000e+00 : f32
    %745 = vector.broadcast %cst_283 : f32 to vector<32x64xf32>
    %746 = arith.maximumf %744, %745 : vector<32x64xf32>
    %c416 = arith.constant 416 : index
    %c0_284 = arith.constant 0 : index
    %747 = vector.load %arg11[%c416, %c0_284] : memref<800x64xf32, #tpu.memory_space<vmem>>, vector<32x64xf32>
    %748 = vector.broadcast %24 : vector<1x64xf32> to vector<32x64xf32>
    %749 = arith.mulf %747, %748 : vector<32x64xf32>
    %750 = vector.broadcast %25 : vector<1x64xf32> to vector<32x64xf32>
    %751 = arith.addf %749, %750 : vector<32x64xf32>
    %cst_285 = arith.constant 0.000000e+00 : f32
    %752 = vector.broadcast %cst_285 : f32 to vector<32x64xf32>
    %753 = arith.maximumf %751, %752 : vector<32x64xf32>
    %754 = arith.maximumf %746, %753 : vector<32x64xf32>
    %c448 = arith.constant 448 : index
    %c0_286 = arith.constant 0 : index
    %755 = vector.load %arg11[%c448, %c0_286] : memref<800x64xf32, #tpu.memory_space<vmem>>, vector<32x64xf32>
    %756 = vector.broadcast %24 : vector<1x64xf32> to vector<32x64xf32>
    %757 = arith.mulf %755, %756 : vector<32x64xf32>
    %758 = vector.broadcast %25 : vector<1x64xf32> to vector<32x64xf32>
    %759 = arith.addf %757, %758 : vector<32x64xf32>
    %cst_287 = arith.constant 0.000000e+00 : f32
    %760 = vector.broadcast %cst_287 : f32 to vector<32x64xf32>
    %761 = arith.maximumf %759, %760 : vector<32x64xf32>
    %762 = arith.maximumf %754, %761 : vector<32x64xf32>
    %763 = vector.extract_strided_slice %762 {offsets = [0, 0], sizes = [1, 64], strides = [1, 1]} : vector<32x64xf32> to vector<1x64xf32>
    %764 = vector.extract_strided_slice %762 {offsets = [1, 0], sizes = [1, 64], strides = [1, 1]} : vector<32x64xf32> to vector<1x64xf32>
    %765 = arith.maximumf %763, %764 : vector<1x64xf32>
    %766 = vector.extract_strided_slice %762 {offsets = [2, 0], sizes = [1, 64], strides = [1, 1]} : vector<32x64xf32> to vector<1x64xf32>
    %767 = arith.maximumf %765, %766 : vector<1x64xf32>
    %c6_288 = arith.constant 6 : index
    %c0_289 = arith.constant 0 : index
    %c0_290 = arith.constant 0 : index
    %768 = vector.load %arg12[%c6_288, %c0_289, %c0_290] : memref<12x12x64xf32, #tpu.memory_space<vmem>>, vector<1x1x64xf32>
    %769 = vector.shape_cast %768 : vector<1x1x64xf32> to vector<1x64xf32>
    %770 = vector.shape_cast %767 : vector<1x64xf32> to vector<1x1x64xf32>
    tpu.vector_store %arg12[%c6_288, %c0_289, %c0_290], %770 {strides = array<i32>} : memref<12x12x64xf32, #tpu.memory_space<vmem>>, vector<1x1x64xf32>,
    %771 = vector.extract_strided_slice %762 {offsets = [2, 0], sizes = [1, 64], strides = [1, 1]} : vector<32x64xf32> to vector<1x64xf32>
    %772 = vector.extract_strided_slice %762 {offsets = [3, 0], sizes = [1, 64], strides = [1, 1]} : vector<32x64xf32> to vector<1x64xf32>
    %773 = arith.maximumf %771, %772 : vector<1x64xf32>
    %774 = vector.extract_strided_slice %762 {offsets = [4, 0], sizes = [1, 64], strides = [1, 1]} : vector<32x64xf32> to vector<1x64xf32>
    %775 = arith.maximumf %773, %774 : vector<1x64xf32>
    %c6_291 = arith.constant 6 : index
    %c1_292 = arith.constant 1 : index
    %c0_293 = arith.constant 0 : index
    %776 = vector.load %arg12[%c6_291, %c1_292, %c0_293] : memref<12x12x64xf32, #tpu.memory_space<vmem>>, vector<1x1x64xf32>
    %777 = vector.shape_cast %776 : vector<1x1x64xf32> to vector<1x64xf32>
    %778 = vector.shape_cast %775 : vector<1x64xf32> to vector<1x1x64xf32>
    tpu.vector_store %arg12[%c6_291, %c1_292, %c0_293], %778 {strides = array<i32>} : memref<12x12x64xf32, #tpu.memory_space<vmem>>, vector<1x1x64xf32>,
    %779 = vector.extract_strided_slice %762 {offsets = [4, 0], sizes = [1, 64], strides = [1, 1]} : vector<32x64xf32> to vector<1x64xf32>
    %780 = vector.extract_strided_slice %762 {offsets = [5, 0], sizes = [1, 64], strides = [1, 1]} : vector<32x64xf32> to vector<1x64xf32>
    %781 = arith.maximumf %779, %780 : vector<1x64xf32>
    %782 = vector.extract_strided_slice %762 {offsets = [6, 0], sizes = [1, 64], strides = [1, 1]} : vector<32x64xf32> to vector<1x64xf32>
    %783 = arith.maximumf %781, %782 : vector<1x64xf32>
    %c6_294 = arith.constant 6 : index
    %c2_295 = arith.constant 2 : index
    %c0_296 = arith.constant 0 : index
    %784 = vector.load %arg12[%c6_294, %c2_295, %c0_296] : memref<12x12x64xf32, #tpu.memory_space<vmem>>, vector<1x1x64xf32>
    %785 = vector.shape_cast %784 : vector<1x1x64xf32> to vector<1x64xf32>
    %786 = vector.shape_cast %783 : vector<1x64xf32> to vector<1x1x64xf32>
    tpu.vector_store %arg12[%c6_294, %c2_295, %c0_296], %786 {strides = array<i32>} : memref<12x12x64xf32, #tpu.memory_space<vmem>>, vector<1x1x64xf32>,
    %787 = vector.extract_strided_slice %762 {offsets = [6, 0], sizes = [1, 64], strides = [1, 1]} : vector<32x64xf32> to vector<1x64xf32>
    %788 = vector.extract_strided_slice %762 {offsets = [7, 0], sizes = [1, 64], strides = [1, 1]} : vector<32x64xf32> to vector<1x64xf32>
    %789 = arith.maximumf %787, %788 : vector<1x64xf32>
    %790 = vector.extract_strided_slice %762 {offsets = [8, 0], sizes = [1, 64], strides = [1, 1]} : vector<32x64xf32> to vector<1x64xf32>
    %791 = arith.maximumf %789, %790 : vector<1x64xf32>
    %c6_297 = arith.constant 6 : index
    %c3_298 = arith.constant 3 : index
    %c0_299 = arith.constant 0 : index
    %792 = vector.load %arg12[%c6_297, %c3_298, %c0_299] : memref<12x12x64xf32, #tpu.memory_space<vmem>>, vector<1x1x64xf32>
    %793 = vector.shape_cast %792 : vector<1x1x64xf32> to vector<1x64xf32>
    %794 = vector.shape_cast %791 : vector<1x64xf32> to vector<1x1x64xf32>
    tpu.vector_store %arg12[%c6_297, %c3_298, %c0_299], %794 {strides = array<i32>} : memref<12x12x64xf32, #tpu.memory_space<vmem>>, vector<1x1x64xf32>,
    %795 = vector.extract_strided_slice %762 {offsets = [8, 0], sizes = [1, 64], strides = [1, 1]} : vector<32x64xf32> to vector<1x64xf32>
    %796 = vector.extract_strided_slice %762 {offsets = [9, 0], sizes = [1, 64], strides = [1, 1]} : vector<32x64xf32> to vector<1x64xf32>
    %797 = arith.maximumf %795, %796 : vector<1x64xf32>
    %798 = vector.extract_strided_slice %762 {offsets = [10, 0], sizes = [1, 64], strides = [1, 1]} : vector<32x64xf32> to vector<1x64xf32>
    %799 = arith.maximumf %797, %798 : vector<1x64xf32>
    %c6_300 = arith.constant 6 : index
    %c4_301 = arith.constant 4 : index
    %c0_302 = arith.constant 0 : index
    %800 = vector.load %arg12[%c6_300, %c4_301, %c0_302] : memref<12x12x64xf32, #tpu.memory_space<vmem>>, vector<1x1x64xf32>
    %801 = vector.shape_cast %800 : vector<1x1x64xf32> to vector<1x64xf32>
    %802 = vector.shape_cast %799 : vector<1x64xf32> to vector<1x1x64xf32>
    tpu.vector_store %arg12[%c6_300, %c4_301, %c0_302], %802 {strides = array<i32>} : memref<12x12x64xf32, #tpu.memory_space<vmem>>, vector<1x1x64xf32>,
    %803 = vector.extract_strided_slice %762 {offsets = [10, 0], sizes = [1, 64], strides = [1, 1]} : vector<32x64xf32> to vector<1x64xf32>
    %804 = vector.extract_strided_slice %762 {offsets = [11, 0], sizes = [1, 64], strides = [1, 1]} : vector<32x64xf32> to vector<1x64xf32>
    %805 = arith.maximumf %803, %804 : vector<1x64xf32>
    %806 = vector.extract_strided_slice %762 {offsets = [12, 0], sizes = [1, 64], strides = [1, 1]} : vector<32x64xf32> to vector<1x64xf32>
    %807 = arith.maximumf %805, %806 : vector<1x64xf32>
    %c6_303 = arith.constant 6 : index
    %c5_304 = arith.constant 5 : index
    %c0_305 = arith.constant 0 : index
    %808 = vector.load %arg12[%c6_303, %c5_304, %c0_305] : memref<12x12x64xf32, #tpu.memory_space<vmem>>, vector<1x1x64xf32>
    %809 = vector.shape_cast %808 : vector<1x1x64xf32> to vector<1x64xf32>
    %810 = vector.shape_cast %807 : vector<1x64xf32> to vector<1x1x64xf32>
    tpu.vector_store %arg12[%c6_303, %c5_304, %c0_305], %810 {strides = array<i32>} : memref<12x12x64xf32, #tpu.memory_space<vmem>>, vector<1x1x64xf32>,
    %811 = vector.extract_strided_slice %762 {offsets = [12, 0], sizes = [1, 64], strides = [1, 1]} : vector<32x64xf32> to vector<1x64xf32>
    %812 = vector.extract_strided_slice %762 {offsets = [13, 0], sizes = [1, 64], strides = [1, 1]} : vector<32x64xf32> to vector<1x64xf32>
    %813 = arith.maximumf %811, %812 : vector<1x64xf32>
    %814 = vector.extract_strided_slice %762 {offsets = [14, 0], sizes = [1, 64], strides = [1, 1]} : vector<32x64xf32> to vector<1x64xf32>
    %815 = arith.maximumf %813, %814 : vector<1x64xf32>
    %c6_306 = arith.constant 6 : index
    %c6_307 = arith.constant 6 : index
    %c0_308 = arith.constant 0 : index
    %816 = vector.load %arg12[%c6_306, %c6_307, %c0_308] : memref<12x12x64xf32, #tpu.memory_space<vmem>>, vector<1x1x64xf32>
    %817 = vector.shape_cast %816 : vector<1x1x64xf32> to vector<1x64xf32>
    %818 = vector.shape_cast %815 : vector<1x64xf32> to vector<1x1x64xf32>
    tpu.vector_store %arg12[%c6_306, %c6_307, %c0_308], %818 {strides = array<i32>} : memref<12x12x64xf32, #tpu.memory_space<vmem>>, vector<1x1x64xf32>,
    %819 = vector.extract_strided_slice %762 {offsets = [14, 0], sizes = [1, 64], strides = [1, 1]} : vector<32x64xf32> to vector<1x64xf32>
    %820 = vector.extract_strided_slice %762 {offsets = [15, 0], sizes = [1, 64], strides = [1, 1]} : vector<32x64xf32> to vector<1x64xf32>
    %821 = arith.maximumf %819, %820 : vector<1x64xf32>
    %822 = vector.extract_strided_slice %762 {offsets = [16, 0], sizes = [1, 64], strides = [1, 1]} : vector<32x64xf32> to vector<1x64xf32>
    %823 = arith.maximumf %821, %822 : vector<1x64xf32>
    %c6_309 = arith.constant 6 : index
    %c7_310 = arith.constant 7 : index
    %c0_311 = arith.constant 0 : index
    %824 = vector.load %arg12[%c6_309, %c7_310, %c0_311] : memref<12x12x64xf32, #tpu.memory_space<vmem>>, vector<1x1x64xf32>
    %825 = vector.shape_cast %824 : vector<1x1x64xf32> to vector<1x64xf32>
    %826 = vector.shape_cast %823 : vector<1x64xf32> to vector<1x1x64xf32>
    tpu.vector_store %arg12[%c6_309, %c7_310, %c0_311], %826 {strides = array<i32>} : memref<12x12x64xf32, #tpu.memory_space<vmem>>, vector<1x1x64xf32>,
    %827 = vector.extract_strided_slice %762 {offsets = [16, 0], sizes = [1, 64], strides = [1, 1]} : vector<32x64xf32> to vector<1x64xf32>
    %828 = vector.extract_strided_slice %762 {offsets = [17, 0], sizes = [1, 64], strides = [1, 1]} : vector<32x64xf32> to vector<1x64xf32>
    %829 = arith.maximumf %827, %828 : vector<1x64xf32>
    %830 = vector.extract_strided_slice %762 {offsets = [18, 0], sizes = [1, 64], strides = [1, 1]} : vector<32x64xf32> to vector<1x64xf32>
    %831 = arith.maximumf %829, %830 : vector<1x64xf32>
    %c6_312 = arith.constant 6 : index
    %c8_313 = arith.constant 8 : index
    %c0_314 = arith.constant 0 : index
    %832 = vector.load %arg12[%c6_312, %c8_313, %c0_314] : memref<12x12x64xf32, #tpu.memory_space<vmem>>, vector<1x1x64xf32>
    %833 = vector.shape_cast %832 : vector<1x1x64xf32> to vector<1x64xf32>
    %834 = vector.shape_cast %831 : vector<1x64xf32> to vector<1x1x64xf32>
    tpu.vector_store %arg12[%c6_312, %c8_313, %c0_314], %834 {strides = array<i32>} : memref<12x12x64xf32, #tpu.memory_space<vmem>>, vector<1x1x64xf32>,
    %835 = vector.extract_strided_slice %762 {offsets = [18, 0], sizes = [1, 64], strides = [1, 1]} : vector<32x64xf32> to vector<1x64xf32>
    %836 = vector.extract_strided_slice %762 {offsets = [19, 0], sizes = [1, 64], strides = [1, 1]} : vector<32x64xf32> to vector<1x64xf32>
    %837 = arith.maximumf %835, %836 : vector<1x64xf32>
    %838 = vector.extract_strided_slice %762 {offsets = [20, 0], sizes = [1, 64], strides = [1, 1]} : vector<32x64xf32> to vector<1x64xf32>
    %839 = arith.maximumf %837, %838 : vector<1x64xf32>
    %c6_315 = arith.constant 6 : index
    %c9_316 = arith.constant 9 : index
    %c0_317 = arith.constant 0 : index
    %840 = vector.load %arg12[%c6_315, %c9_316, %c0_317] : memref<12x12x64xf32, #tpu.memory_space<vmem>>, vector<1x1x64xf32>
    %841 = vector.shape_cast %840 : vector<1x1x64xf32> to vector<1x64xf32>
    %842 = vector.shape_cast %839 : vector<1x64xf32> to vector<1x1x64xf32>
    tpu.vector_store %arg12[%c6_315, %c9_316, %c0_317], %842 {strides = array<i32>} : memref<12x12x64xf32, #tpu.memory_space<vmem>>, vector<1x1x64xf32>,
    %843 = vector.extract_strided_slice %762 {offsets = [20, 0], sizes = [1, 64], strides = [1, 1]} : vector<32x64xf32> to vector<1x64xf32>
    %844 = vector.extract_strided_slice %762 {offsets = [21, 0], sizes = [1, 64], strides = [1, 1]} : vector<32x64xf32> to vector<1x64xf32>
    %845 = arith.maximumf %843, %844 : vector<1x64xf32>
    %846 = vector.extract_strided_slice %762 {offsets = [22, 0], sizes = [1, 64], strides = [1, 1]} : vector<32x64xf32> to vector<1x64xf32>
    %847 = arith.maximumf %845, %846 : vector<1x64xf32>
    %c6_318 = arith.constant 6 : index
    %c10_319 = arith.constant 10 : index
    %c0_320 = arith.constant 0 : index
    %848 = vector.load %arg12[%c6_318, %c10_319, %c0_320] : memref<12x12x64xf32, #tpu.memory_space<vmem>>, vector<1x1x64xf32>
    %849 = vector.shape_cast %848 : vector<1x1x64xf32> to vector<1x64xf32>
    %850 = vector.shape_cast %847 : vector<1x64xf32> to vector<1x1x64xf32>
    tpu.vector_store %arg12[%c6_318, %c10_319, %c0_320], %850 {strides = array<i32>} : memref<12x12x64xf32, #tpu.memory_space<vmem>>, vector<1x1x64xf32>,
    %851 = vector.extract_strided_slice %762 {offsets = [22, 0], sizes = [1, 64], strides = [1, 1]} : vector<32x64xf32> to vector<1x64xf32>
    %852 = vector.extract_strided_slice %762 {offsets = [23, 0], sizes = [1, 64], strides = [1, 1]} : vector<32x64xf32> to vector<1x64xf32>
    %853 = arith.maximumf %851, %852 : vector<1x64xf32>
    %854 = vector.extract_strided_slice %762 {offsets = [24, 0], sizes = [1, 64], strides = [1, 1]} : vector<32x64xf32> to vector<1x64xf32>
    %855 = arith.maximumf %853, %854 : vector<1x64xf32>
    %c6_321 = arith.constant 6 : index
    %c11_322 = arith.constant 11 : index
    %c0_323 = arith.constant 0 : index
    %856 = vector.load %arg12[%c6_321, %c11_322, %c0_323] : memref<12x12x64xf32, #tpu.memory_space<vmem>>, vector<1x1x64xf32>
    %857 = vector.shape_cast %856 : vector<1x1x64xf32> to vector<1x64xf32>
    %858 = vector.shape_cast %855 : vector<1x64xf32> to vector<1x1x64xf32>
    tpu.vector_store %arg12[%c6_321, %c11_322, %c0_323], %858 {strides = array<i32>} : memref<12x12x64xf32, #tpu.memory_space<vmem>>, vector<1x1x64xf32>,
    %c448_324 = arith.constant 448 : index
    %c0_325 = arith.constant 0 : index
    %859 = vector.load %arg11[%c448_324, %c0_325] : memref<800x64xf32, #tpu.memory_space<vmem>>, vector<32x64xf32>
    %860 = vector.broadcast %24 : vector<1x64xf32> to vector<32x64xf32>
    %861 = arith.mulf %859, %860 : vector<32x64xf32>
    %862 = vector.broadcast %25 : vector<1x64xf32> to vector<32x64xf32>
    %863 = arith.addf %861, %862 : vector<32x64xf32>
    %cst_326 = arith.constant 0.000000e+00 : f32
    %864 = vector.broadcast %cst_326 : f32 to vector<32x64xf32>
    %865 = arith.maximumf %863, %864 : vector<32x64xf32>
    %c480 = arith.constant 480 : index
    %c0_327 = arith.constant 0 : index
    %866 = vector.load %arg11[%c480, %c0_327] : memref<800x64xf32, #tpu.memory_space<vmem>>, vector<32x64xf32>
    %867 = vector.broadcast %24 : vector<1x64xf32> to vector<32x64xf32>
    %868 = arith.mulf %866, %867 : vector<32x64xf32>
    %869 = vector.broadcast %25 : vector<1x64xf32> to vector<32x64xf32>
    %870 = arith.addf %868, %869 : vector<32x64xf32>
    %cst_328 = arith.constant 0.000000e+00 : f32
    %871 = vector.broadcast %cst_328 : f32 to vector<32x64xf32>
    %872 = arith.maximumf %870, %871 : vector<32x64xf32>
    %873 = arith.maximumf %865, %872 : vector<32x64xf32>
    %c512_329 = arith.constant 512 : index
    %c0_330 = arith.constant 0 : index
    %874 = vector.load %arg11[%c512_329, %c0_330] : memref<800x64xf32, #tpu.memory_space<vmem>>, vector<32x64xf32>
    %875 = vector.broadcast %24 : vector<1x64xf32> to vector<32x64xf32>
    %876 = arith.mulf %874, %875 : vector<32x64xf32>
    %877 = vector.broadcast %25 : vector<1x64xf32> to vector<32x64xf32>
    %878 = arith.addf %876, %877 : vector<32x64xf32>
    %cst_331 = arith.constant 0.000000e+00 : f32
    %879 = vector.broadcast %cst_331 : f32 to vector<32x64xf32>
    %880 = arith.maximumf %878, %879 : vector<32x64xf32>
    %881 = arith.maximumf %873, %880 : vector<32x64xf32>
    %882 = vector.extract_strided_slice %881 {offsets = [0, 0], sizes = [1, 64], strides = [1, 1]} : vector<32x64xf32> to vector<1x64xf32>
    %883 = vector.extract_strided_slice %881 {offsets = [1, 0], sizes = [1, 64], strides = [1, 1]} : vector<32x64xf32> to vector<1x64xf32>
    %884 = arith.maximumf %882, %883 : vector<1x64xf32>
    %885 = vector.extract_strided_slice %881 {offsets = [2, 0], sizes = [1, 64], strides = [1, 1]} : vector<32x64xf32> to vector<1x64xf32>
    %886 = arith.maximumf %884, %885 : vector<1x64xf32>
    %c7_332 = arith.constant 7 : index
    %c0_333 = arith.constant 0 : index
    %c0_334 = arith.constant 0 : index
    %887 = vector.load %arg12[%c7_332, %c0_333, %c0_334] : memref<12x12x64xf32, #tpu.memory_space<vmem>>, vector<1x1x64xf32>
    %888 = vector.shape_cast %887 : vector<1x1x64xf32> to vector<1x64xf32>
    %889 = vector.shape_cast %886 : vector<1x64xf32> to vector<1x1x64xf32>
    tpu.vector_store %arg12[%c7_332, %c0_333, %c0_334], %889 {strides = array<i32>} : memref<12x12x64xf32, #tpu.memory_space<vmem>>, vector<1x1x64xf32>,
    %890 = vector.extract_strided_slice %881 {offsets = [2, 0], sizes = [1, 64], strides = [1, 1]} : vector<32x64xf32> to vector<1x64xf32>
    %891 = vector.extract_strided_slice %881 {offsets = [3, 0], sizes = [1, 64], strides = [1, 1]} : vector<32x64xf32> to vector<1x64xf32>
    %892 = arith.maximumf %890, %891 : vector<1x64xf32>
    %893 = vector.extract_strided_slice %881 {offsets = [4, 0], sizes = [1, 64], strides = [1, 1]} : vector<32x64xf32> to vector<1x64xf32>
    %894 = arith.maximumf %892, %893 : vector<1x64xf32>
    %c7_335 = arith.constant 7 : index
    %c1_336 = arith.constant 1 : index
    %c0_337 = arith.constant 0 : index
    %895 = vector.load %arg12[%c7_335, %c1_336, %c0_337] : memref<12x12x64xf32, #tpu.memory_space<vmem>>, vector<1x1x64xf32>
    %896 = vector.shape_cast %895 : vector<1x1x64xf32> to vector<1x64xf32>
    %897 = vector.shape_cast %894 : vector<1x64xf32> to vector<1x1x64xf32>
    tpu.vector_store %arg12[%c7_335, %c1_336, %c0_337], %897 {strides = array<i32>} : memref<12x12x64xf32, #tpu.memory_space<vmem>>, vector<1x1x64xf32>,
    %898 = vector.extract_strided_slice %881 {offsets = [4, 0], sizes = [1, 64], strides = [1, 1]} : vector<32x64xf32> to vector<1x64xf32>
    %899 = vector.extract_strided_slice %881 {offsets = [5, 0], sizes = [1, 64], strides = [1, 1]} : vector<32x64xf32> to vector<1x64xf32>
    %900 = arith.maximumf %898, %899 : vector<1x64xf32>
    %901 = vector.extract_strided_slice %881 {offsets = [6, 0], sizes = [1, 64], strides = [1, 1]} : vector<32x64xf32> to vector<1x64xf32>
    %902 = arith.maximumf %900, %901 : vector<1x64xf32>
    %c7_338 = arith.constant 7 : index
    %c2_339 = arith.constant 2 : index
    %c0_340 = arith.constant 0 : index
    %903 = vector.load %arg12[%c7_338, %c2_339, %c0_340] : memref<12x12x64xf32, #tpu.memory_space<vmem>>, vector<1x1x64xf32>
    %904 = vector.shape_cast %903 : vector<1x1x64xf32> to vector<1x64xf32>
    %905 = vector.shape_cast %902 : vector<1x64xf32> to vector<1x1x64xf32>
    tpu.vector_store %arg12[%c7_338, %c2_339, %c0_340], %905 {strides = array<i32>} : memref<12x12x64xf32, #tpu.memory_space<vmem>>, vector<1x1x64xf32>,
    %906 = vector.extract_strided_slice %881 {offsets = [6, 0], sizes = [1, 64], strides = [1, 1]} : vector<32x64xf32> to vector<1x64xf32>
    %907 = vector.extract_strided_slice %881 {offsets = [7, 0], sizes = [1, 64], strides = [1, 1]} : vector<32x64xf32> to vector<1x64xf32>
    %908 = arith.maximumf %906, %907 : vector<1x64xf32>
    %909 = vector.extract_strided_slice %881 {offsets = [8, 0], sizes = [1, 64], strides = [1, 1]} : vector<32x64xf32> to vector<1x64xf32>
    %910 = arith.maximumf %908, %909 : vector<1x64xf32>
    %c7_341 = arith.constant 7 : index
    %c3_342 = arith.constant 3 : index
    %c0_343 = arith.constant 0 : index
    %911 = vector.load %arg12[%c7_341, %c3_342, %c0_343] : memref<12x12x64xf32, #tpu.memory_space<vmem>>, vector<1x1x64xf32>
    %912 = vector.shape_cast %911 : vector<1x1x64xf32> to vector<1x64xf32>
    %913 = vector.shape_cast %910 : vector<1x64xf32> to vector<1x1x64xf32>
    tpu.vector_store %arg12[%c7_341, %c3_342, %c0_343], %913 {strides = array<i32>} : memref<12x12x64xf32, #tpu.memory_space<vmem>>, vector<1x1x64xf32>,
    %914 = vector.extract_strided_slice %881 {offsets = [8, 0], sizes = [1, 64], strides = [1, 1]} : vector<32x64xf32> to vector<1x64xf32>
    %915 = vector.extract_strided_slice %881 {offsets = [9, 0], sizes = [1, 64], strides = [1, 1]} : vector<32x64xf32> to vector<1x64xf32>
    %916 = arith.maximumf %914, %915 : vector<1x64xf32>
    %917 = vector.extract_strided_slice %881 {offsets = [10, 0], sizes = [1, 64], strides = [1, 1]} : vector<32x64xf32> to vector<1x64xf32>
    %918 = arith.maximumf %916, %917 : vector<1x64xf32>
    %c7_344 = arith.constant 7 : index
    %c4_345 = arith.constant 4 : index
    %c0_346 = arith.constant 0 : index
    %919 = vector.load %arg12[%c7_344, %c4_345, %c0_346] : memref<12x12x64xf32, #tpu.memory_space<vmem>>, vector<1x1x64xf32>
    %920 = vector.shape_cast %919 : vector<1x1x64xf32> to vector<1x64xf32>
    %921 = vector.shape_cast %918 : vector<1x64xf32> to vector<1x1x64xf32>
    tpu.vector_store %arg12[%c7_344, %c4_345, %c0_346], %921 {strides = array<i32>} : memref<12x12x64xf32, #tpu.memory_space<vmem>>, vector<1x1x64xf32>,
    %922 = vector.extract_strided_slice %881 {offsets = [10, 0], sizes = [1, 64], strides = [1, 1]} : vector<32x64xf32> to vector<1x64xf32>
    %923 = vector.extract_strided_slice %881 {offsets = [11, 0], sizes = [1, 64], strides = [1, 1]} : vector<32x64xf32> to vector<1x64xf32>
    %924 = arith.maximumf %922, %923 : vector<1x64xf32>
    %925 = vector.extract_strided_slice %881 {offsets = [12, 0], sizes = [1, 64], strides = [1, 1]} : vector<32x64xf32> to vector<1x64xf32>
    %926 = arith.maximumf %924, %925 : vector<1x64xf32>
    %c7_347 = arith.constant 7 : index
    %c5_348 = arith.constant 5 : index
    %c0_349 = arith.constant 0 : index
    %927 = vector.load %arg12[%c7_347, %c5_348, %c0_349] : memref<12x12x64xf32, #tpu.memory_space<vmem>>, vector<1x1x64xf32>
    %928 = vector.shape_cast %927 : vector<1x1x64xf32> to vector<1x64xf32>
    %929 = vector.shape_cast %926 : vector<1x64xf32> to vector<1x1x64xf32>
    tpu.vector_store %arg12[%c7_347, %c5_348, %c0_349], %929 {strides = array<i32>} : memref<12x12x64xf32, #tpu.memory_space<vmem>>, vector<1x1x64xf32>,
    %930 = vector.extract_strided_slice %881 {offsets = [12, 0], sizes = [1, 64], strides = [1, 1]} : vector<32x64xf32> to vector<1x64xf32>
    %931 = vector.extract_strided_slice %881 {offsets = [13, 0], sizes = [1, 64], strides = [1, 1]} : vector<32x64xf32> to vector<1x64xf32>
    %932 = arith.maximumf %930, %931 : vector<1x64xf32>
    %933 = vector.extract_strided_slice %881 {offsets = [14, 0], sizes = [1, 64], strides = [1, 1]} : vector<32x64xf32> to vector<1x64xf32>
    %934 = arith.maximumf %932, %933 : vector<1x64xf32>
    %c7_350 = arith.constant 7 : index
    %c6_351 = arith.constant 6 : index
    %c0_352 = arith.constant 0 : index
    %935 = vector.load %arg12[%c7_350, %c6_351, %c0_352] : memref<12x12x64xf32, #tpu.memory_space<vmem>>, vector<1x1x64xf32>
    %936 = vector.shape_cast %935 : vector<1x1x64xf32> to vector<1x64xf32>
    %937 = vector.shape_cast %934 : vector<1x64xf32> to vector<1x1x64xf32>
    tpu.vector_store %arg12[%c7_350, %c6_351, %c0_352], %937 {strides = array<i32>} : memref<12x12x64xf32, #tpu.memory_space<vmem>>, vector<1x1x64xf32>,
    %938 = vector.extract_strided_slice %881 {offsets = [14, 0], sizes = [1, 64], strides = [1, 1]} : vector<32x64xf32> to vector<1x64xf32>
    %939 = vector.extract_strided_slice %881 {offsets = [15, 0], sizes = [1, 64], strides = [1, 1]} : vector<32x64xf32> to vector<1x64xf32>
    %940 = arith.maximumf %938, %939 : vector<1x64xf32>
    %941 = vector.extract_strided_slice %881 {offsets = [16, 0], sizes = [1, 64], strides = [1, 1]} : vector<32x64xf32> to vector<1x64xf32>
    %942 = arith.maximumf %940, %941 : vector<1x64xf32>
    %c7_353 = arith.constant 7 : index
    %c7_354 = arith.constant 7 : index
    %c0_355 = arith.constant 0 : index
    %943 = vector.load %arg12[%c7_353, %c7_354, %c0_355] : memref<12x12x64xf32, #tpu.memory_space<vmem>>, vector<1x1x64xf32>
    %944 = vector.shape_cast %943 : vector<1x1x64xf32> to vector<1x64xf32>
    %945 = vector.shape_cast %942 : vector<1x64xf32> to vector<1x1x64xf32>
    tpu.vector_store %arg12[%c7_353, %c7_354, %c0_355], %945 {strides = array<i32>} : memref<12x12x64xf32, #tpu.memory_space<vmem>>, vector<1x1x64xf32>,
    %946 = vector.extract_strided_slice %881 {offsets = [16, 0], sizes = [1, 64], strides = [1, 1]} : vector<32x64xf32> to vector<1x64xf32>
    %947 = vector.extract_strided_slice %881 {offsets = [17, 0], sizes = [1, 64], strides = [1, 1]} : vector<32x64xf32> to vector<1x64xf32>
    %948 = arith.maximumf %946, %947 : vector<1x64xf32>
    %949 = vector.extract_strided_slice %881 {offsets = [18, 0], sizes = [1, 64], strides = [1, 1]} : vector<32x64xf32> to vector<1x64xf32>
    %950 = arith.maximumf %948, %949 : vector<1x64xf32>
    %c7_356 = arith.constant 7 : index
    %c8_357 = arith.constant 8 : index
    %c0_358 = arith.constant 0 : index
    %951 = vector.load %arg12[%c7_356, %c8_357, %c0_358] : memref<12x12x64xf32, #tpu.memory_space<vmem>>, vector<1x1x64xf32>
    %952 = vector.shape_cast %951 : vector<1x1x64xf32> to vector<1x64xf32>
    %953 = vector.shape_cast %950 : vector<1x64xf32> to vector<1x1x64xf32>
    tpu.vector_store %arg12[%c7_356, %c8_357, %c0_358], %953 {strides = array<i32>} : memref<12x12x64xf32, #tpu.memory_space<vmem>>, vector<1x1x64xf32>,
    %954 = vector.extract_strided_slice %881 {offsets = [18, 0], sizes = [1, 64], strides = [1, 1]} : vector<32x64xf32> to vector<1x64xf32>
    %955 = vector.extract_strided_slice %881 {offsets = [19, 0], sizes = [1, 64], strides = [1, 1]} : vector<32x64xf32> to vector<1x64xf32>
    %956 = arith.maximumf %954, %955 : vector<1x64xf32>
    %957 = vector.extract_strided_slice %881 {offsets = [20, 0], sizes = [1, 64], strides = [1, 1]} : vector<32x64xf32> to vector<1x64xf32>
    %958 = arith.maximumf %956, %957 : vector<1x64xf32>
    %c7_359 = arith.constant 7 : index
    %c9_360 = arith.constant 9 : index
    %c0_361 = arith.constant 0 : index
    %959 = vector.load %arg12[%c7_359, %c9_360, %c0_361] : memref<12x12x64xf32, #tpu.memory_space<vmem>>, vector<1x1x64xf32>
    %960 = vector.shape_cast %959 : vector<1x1x64xf32> to vector<1x64xf32>
    %961 = vector.shape_cast %958 : vector<1x64xf32> to vector<1x1x64xf32>
    tpu.vector_store %arg12[%c7_359, %c9_360, %c0_361], %961 {strides = array<i32>} : memref<12x12x64xf32, #tpu.memory_space<vmem>>, vector<1x1x64xf32>,
    %962 = vector.extract_strided_slice %881 {offsets = [20, 0], sizes = [1, 64], strides = [1, 1]} : vector<32x64xf32> to vector<1x64xf32>
    %963 = vector.extract_strided_slice %881 {offsets = [21, 0], sizes = [1, 64], strides = [1, 1]} : vector<32x64xf32> to vector<1x64xf32>
    %964 = arith.maximumf %962, %963 : vector<1x64xf32>
    %965 = vector.extract_strided_slice %881 {offsets = [22, 0], sizes = [1, 64], strides = [1, 1]} : vector<32x64xf32> to vector<1x64xf32>
    %966 = arith.maximumf %964, %965 : vector<1x64xf32>
    %c7_362 = arith.constant 7 : index
    %c10_363 = arith.constant 10 : index
    %c0_364 = arith.constant 0 : index
    %967 = vector.load %arg12[%c7_362, %c10_363, %c0_364] : memref<12x12x64xf32, #tpu.memory_space<vmem>>, vector<1x1x64xf32>
    %968 = vector.shape_cast %967 : vector<1x1x64xf32> to vector<1x64xf32>
    %969 = vector.shape_cast %966 : vector<1x64xf32> to vector<1x1x64xf32>
    tpu.vector_store %arg12[%c7_362, %c10_363, %c0_364], %969 {strides = array<i32>} : memref<12x12x64xf32, #tpu.memory_space<vmem>>, vector<1x1x64xf32>,
    %970 = vector.extract_strided_slice %881 {offsets = [22, 0], sizes = [1, 64], strides = [1, 1]} : vector<32x64xf32> to vector<1x64xf32>
    %971 = vector.extract_strided_slice %881 {offsets = [23, 0], sizes = [1, 64], strides = [1, 1]} : vector<32x64xf32> to vector<1x64xf32>
    %972 = arith.maximumf %970, %971 : vector<1x64xf32>
    %973 = vector.extract_strided_slice %881 {offsets = [24, 0], sizes = [1, 64], strides = [1, 1]} : vector<32x64xf32> to vector<1x64xf32>
    %974 = arith.maximumf %972, %973 : vector<1x64xf32>
    %c7_365 = arith.constant 7 : index
    %c11_366 = arith.constant 11 : index
    %c0_367 = arith.constant 0 : index
    %975 = vector.load %arg12[%c7_365, %c11_366, %c0_367] : memref<12x12x64xf32, #tpu.memory_space<vmem>>, vector<1x1x64xf32>
    %976 = vector.shape_cast %975 : vector<1x1x64xf32> to vector<1x64xf32>
    %977 = vector.shape_cast %974 : vector<1x64xf32> to vector<1x1x64xf32>
    tpu.vector_store %arg12[%c7_365, %c11_366, %c0_367], %977 {strides = array<i32>} : memref<12x12x64xf32, #tpu.memory_space<vmem>>, vector<1x1x64xf32>,
    %c512_368 = arith.constant 512 : index
    %c0_369 = arith.constant 0 : index
    %978 = vector.load %arg11[%c512_368, %c0_369] : memref<800x64xf32, #tpu.memory_space<vmem>>, vector<32x64xf32>
    %979 = vector.broadcast %24 : vector<1x64xf32> to vector<32x64xf32>
    %980 = arith.mulf %978, %979 : vector<32x64xf32>
    %981 = vector.broadcast %25 : vector<1x64xf32> to vector<32x64xf32>
    %982 = arith.addf %980, %981 : vector<32x64xf32>
    %cst_370 = arith.constant 0.000000e+00 : f32
    %983 = vector.broadcast %cst_370 : f32 to vector<32x64xf32>
    %984 = arith.maximumf %982, %983 : vector<32x64xf32>
    %c544 = arith.constant 544 : index
    %c0_371 = arith.constant 0 : index
    %985 = vector.load %arg11[%c544, %c0_371] : memref<800x64xf32, #tpu.memory_space<vmem>>, vector<32x64xf32>
    %986 = vector.broadcast %24 : vector<1x64xf32> to vector<32x64xf32>
    %987 = arith.mulf %985, %986 : vector<32x64xf32>
    %988 = vector.broadcast %25 : vector<1x64xf32> to vector<32x64xf32>
    %989 = arith.addf %987, %988 : vector<32x64xf32>
    %cst_372 = arith.constant 0.000000e+00 : f32
    %990 = vector.broadcast %cst_372 : f32 to vector<32x64xf32>
    %991 = arith.maximumf %989, %990 : vector<32x64xf32>
    %992 = arith.maximumf %984, %991 : vector<32x64xf32>
    %c576 = arith.constant 576 : index
    %c0_373 = arith.constant 0 : index
    %993 = vector.load %arg11[%c576, %c0_373] : memref<800x64xf32, #tpu.memory_space<vmem>>, vector<32x64xf32>
    %994 = vector.broadcast %24 : vector<1x64xf32> to vector<32x64xf32>
    %995 = arith.mulf %993, %994 : vector<32x64xf32>
    %996 = vector.broadcast %25 : vector<1x64xf32> to vector<32x64xf32>
    %997 = arith.addf %995, %996 : vector<32x64xf32>
    %cst_374 = arith.constant 0.000000e+00 : f32
    %998 = vector.broadcast %cst_374 : f32 to vector<32x64xf32>
    %999 = arith.maximumf %997, %998 : vector<32x64xf32>
    %1000 = arith.maximumf %992, %999 : vector<32x64xf32>
    %1001 = vector.extract_strided_slice %1000 {offsets = [0, 0], sizes = [1, 64], strides = [1, 1]} : vector<32x64xf32> to vector<1x64xf32>
    %1002 = vector.extract_strided_slice %1000 {offsets = [1, 0], sizes = [1, 64], strides = [1, 1]} : vector<32x64xf32> to vector<1x64xf32>
    %1003 = arith.maximumf %1001, %1002 : vector<1x64xf32>
    %1004 = vector.extract_strided_slice %1000 {offsets = [2, 0], sizes = [1, 64], strides = [1, 1]} : vector<32x64xf32> to vector<1x64xf32>
    %1005 = arith.maximumf %1003, %1004 : vector<1x64xf32>
    %c8_375 = arith.constant 8 : index
    %c0_376 = arith.constant 0 : index
    %c0_377 = arith.constant 0 : index
    %1006 = vector.load %arg12[%c8_375, %c0_376, %c0_377] : memref<12x12x64xf32, #tpu.memory_space<vmem>>, vector<1x1x64xf32>
    %1007 = vector.shape_cast %1006 : vector<1x1x64xf32> to vector<1x64xf32>
    %1008 = vector.shape_cast %1005 : vector<1x64xf32> to vector<1x1x64xf32>
    tpu.vector_store %arg12[%c8_375, %c0_376, %c0_377], %1008 {strides = array<i32>} : memref<12x12x64xf32, #tpu.memory_space<vmem>>, vector<1x1x64xf32>,
    %1009 = vector.extract_strided_slice %1000 {offsets = [2, 0], sizes = [1, 64], strides = [1, 1]} : vector<32x64xf32> to vector<1x64xf32>
    %1010 = vector.extract_strided_slice %1000 {offsets = [3, 0], sizes = [1, 64], strides = [1, 1]} : vector<32x64xf32> to vector<1x64xf32>
    %1011 = arith.maximumf %1009, %1010 : vector<1x64xf32>
    %1012 = vector.extract_strided_slice %1000 {offsets = [4, 0], sizes = [1, 64], strides = [1, 1]} : vector<32x64xf32> to vector<1x64xf32>
    %1013 = arith.maximumf %1011, %1012 : vector<1x64xf32>
    %c8_378 = arith.constant 8 : index
    %c1_379 = arith.constant 1 : index
    %c0_380 = arith.constant 0 : index
    %1014 = vector.load %arg12[%c8_378, %c1_379, %c0_380] : memref<12x12x64xf32, #tpu.memory_space<vmem>>, vector<1x1x64xf32>
    %1015 = vector.shape_cast %1014 : vector<1x1x64xf32> to vector<1x64xf32>
    %1016 = vector.shape_cast %1013 : vector<1x64xf32> to vector<1x1x64xf32>
    tpu.vector_store %arg12[%c8_378, %c1_379, %c0_380], %1016 {strides = array<i32>} : memref<12x12x64xf32, #tpu.memory_space<vmem>>, vector<1x1x64xf32>,
    %1017 = vector.extract_strided_slice %1000 {offsets = [4, 0], sizes = [1, 64], strides = [1, 1]} : vector<32x64xf32> to vector<1x64xf32>
    %1018 = vector.extract_strided_slice %1000 {offsets = [5, 0], sizes = [1, 64], strides = [1, 1]} : vector<32x64xf32> to vector<1x64xf32>
    %1019 = arith.maximumf %1017, %1018 : vector<1x64xf32>
    %1020 = vector.extract_strided_slice %1000 {offsets = [6, 0], sizes = [1, 64], strides = [1, 1]} : vector<32x64xf32> to vector<1x64xf32>
    %1021 = arith.maximumf %1019, %1020 : vector<1x64xf32>
    %c8_381 = arith.constant 8 : index
    %c2_382 = arith.constant 2 : index
    %c0_383 = arith.constant 0 : index
    %1022 = vector.load %arg12[%c8_381, %c2_382, %c0_383] : memref<12x12x64xf32, #tpu.memory_space<vmem>>, vector<1x1x64xf32>
    %1023 = vector.shape_cast %1022 : vector<1x1x64xf32> to vector<1x64xf32>
    %1024 = vector.shape_cast %1021 : vector<1x64xf32> to vector<1x1x64xf32>
    tpu.vector_store %arg12[%c8_381, %c2_382, %c0_383], %1024 {strides = array<i32>} : memref<12x12x64xf32, #tpu.memory_space<vmem>>, vector<1x1x64xf32>,
    %1025 = vector.extract_strided_slice %1000 {offsets = [6, 0], sizes = [1, 64], strides = [1, 1]} : vector<32x64xf32> to vector<1x64xf32>
    %1026 = vector.extract_strided_slice %1000 {offsets = [7, 0], sizes = [1, 64], strides = [1, 1]} : vector<32x64xf32> to vector<1x64xf32>
    %1027 = arith.maximumf %1025, %1026 : vector<1x64xf32>
    %1028 = vector.extract_strided_slice %1000 {offsets = [8, 0], sizes = [1, 64], strides = [1, 1]} : vector<32x64xf32> to vector<1x64xf32>
    %1029 = arith.maximumf %1027, %1028 : vector<1x64xf32>
    %c8_384 = arith.constant 8 : index
    %c3_385 = arith.constant 3 : index
    %c0_386 = arith.constant 0 : index
    %1030 = vector.load %arg12[%c8_384, %c3_385, %c0_386] : memref<12x12x64xf32, #tpu.memory_space<vmem>>, vector<1x1x64xf32>
    %1031 = vector.shape_cast %1030 : vector<1x1x64xf32> to vector<1x64xf32>
    %1032 = vector.shape_cast %1029 : vector<1x64xf32> to vector<1x1x64xf32>
    tpu.vector_store %arg12[%c8_384, %c3_385, %c0_386], %1032 {strides = array<i32>} : memref<12x12x64xf32, #tpu.memory_space<vmem>>, vector<1x1x64xf32>,
    %1033 = vector.extract_strided_slice %1000 {offsets = [8, 0], sizes = [1, 64], strides = [1, 1]} : vector<32x64xf32> to vector<1x64xf32>
    %1034 = vector.extract_strided_slice %1000 {offsets = [9, 0], sizes = [1, 64], strides = [1, 1]} : vector<32x64xf32> to vector<1x64xf32>
    %1035 = arith.maximumf %1033, %1034 : vector<1x64xf32>
    %1036 = vector.extract_strided_slice %1000 {offsets = [10, 0], sizes = [1, 64], strides = [1, 1]} : vector<32x64xf32> to vector<1x64xf32>
    %1037 = arith.maximumf %1035, %1036 : vector<1x64xf32>
    %c8_387 = arith.constant 8 : index
    %c4_388 = arith.constant 4 : index
    %c0_389 = arith.constant 0 : index
    %1038 = vector.load %arg12[%c8_387, %c4_388, %c0_389] : memref<12x12x64xf32, #tpu.memory_space<vmem>>, vector<1x1x64xf32>
    %1039 = vector.shape_cast %1038 : vector<1x1x64xf32> to vector<1x64xf32>
    %1040 = vector.shape_cast %1037 : vector<1x64xf32> to vector<1x1x64xf32>
    tpu.vector_store %arg12[%c8_387, %c4_388, %c0_389], %1040 {strides = array<i32>} : memref<12x12x64xf32, #tpu.memory_space<vmem>>, vector<1x1x64xf32>,
    %1041 = vector.extract_strided_slice %1000 {offsets = [10, 0], sizes = [1, 64], strides = [1, 1]} : vector<32x64xf32> to vector<1x64xf32>
    %1042 = vector.extract_strided_slice %1000 {offsets = [11, 0], sizes = [1, 64], strides = [1, 1]} : vector<32x64xf32> to vector<1x64xf32>
    %1043 = arith.maximumf %1041, %1042 : vector<1x64xf32>
    %1044 = vector.extract_strided_slice %1000 {offsets = [12, 0], sizes = [1, 64], strides = [1, 1]} : vector<32x64xf32> to vector<1x64xf32>
    %1045 = arith.maximumf %1043, %1044 : vector<1x64xf32>
    %c8_390 = arith.constant 8 : index
    %c5_391 = arith.constant 5 : index
    %c0_392 = arith.constant 0 : index
    %1046 = vector.load %arg12[%c8_390, %c5_391, %c0_392] : memref<12x12x64xf32, #tpu.memory_space<vmem>>, vector<1x1x64xf32>
    %1047 = vector.shape_cast %1046 : vector<1x1x64xf32> to vector<1x64xf32>
    %1048 = vector.shape_cast %1045 : vector<1x64xf32> to vector<1x1x64xf32>
    tpu.vector_store %arg12[%c8_390, %c5_391, %c0_392], %1048 {strides = array<i32>} : memref<12x12x64xf32, #tpu.memory_space<vmem>>, vector<1x1x64xf32>,
    %1049 = vector.extract_strided_slice %1000 {offsets = [12, 0], sizes = [1, 64], strides = [1, 1]} : vector<32x64xf32> to vector<1x64xf32>
    %1050 = vector.extract_strided_slice %1000 {offsets = [13, 0], sizes = [1, 64], strides = [1, 1]} : vector<32x64xf32> to vector<1x64xf32>
    %1051 = arith.maximumf %1049, %1050 : vector<1x64xf32>
    %1052 = vector.extract_strided_slice %1000 {offsets = [14, 0], sizes = [1, 64], strides = [1, 1]} : vector<32x64xf32> to vector<1x64xf32>
    %1053 = arith.maximumf %1051, %1052 : vector<1x64xf32>
    %c8_393 = arith.constant 8 : index
    %c6_394 = arith.constant 6 : index
    %c0_395 = arith.constant 0 : index
    %1054 = vector.load %arg12[%c8_393, %c6_394, %c0_395] : memref<12x12x64xf32, #tpu.memory_space<vmem>>, vector<1x1x64xf32>
    %1055 = vector.shape_cast %1054 : vector<1x1x64xf32> to vector<1x64xf32>
    %1056 = vector.shape_cast %1053 : vector<1x64xf32> to vector<1x1x64xf32>
    tpu.vector_store %arg12[%c8_393, %c6_394, %c0_395], %1056 {strides = array<i32>} : memref<12x12x64xf32, #tpu.memory_space<vmem>>, vector<1x1x64xf32>,
    %1057 = vector.extract_strided_slice %1000 {offsets = [14, 0], sizes = [1, 64], strides = [1, 1]} : vector<32x64xf32> to vector<1x64xf32>
    %1058 = vector.extract_strided_slice %1000 {offsets = [15, 0], sizes = [1, 64], strides = [1, 1]} : vector<32x64xf32> to vector<1x64xf32>
    %1059 = arith.maximumf %1057, %1058 : vector<1x64xf32>
    %1060 = vector.extract_strided_slice %1000 {offsets = [16, 0], sizes = [1, 64], strides = [1, 1]} : vector<32x64xf32> to vector<1x64xf32>
    %1061 = arith.maximumf %1059, %1060 : vector<1x64xf32>
    %c8_396 = arith.constant 8 : index
    %c7_397 = arith.constant 7 : index
    %c0_398 = arith.constant 0 : index
    %1062 = vector.load %arg12[%c8_396, %c7_397, %c0_398] : memref<12x12x64xf32, #tpu.memory_space<vmem>>, vector<1x1x64xf32>
    %1063 = vector.shape_cast %1062 : vector<1x1x64xf32> to vector<1x64xf32>
    %1064 = vector.shape_cast %1061 : vector<1x64xf32> to vector<1x1x64xf32>
    tpu.vector_store %arg12[%c8_396, %c7_397, %c0_398], %1064 {strides = array<i32>} : memref<12x12x64xf32, #tpu.memory_space<vmem>>, vector<1x1x64xf32>,
    %1065 = vector.extract_strided_slice %1000 {offsets = [16, 0], sizes = [1, 64], strides = [1, 1]} : vector<32x64xf32> to vector<1x64xf32>
    %1066 = vector.extract_strided_slice %1000 {offsets = [17, 0], sizes = [1, 64], strides = [1, 1]} : vector<32x64xf32> to vector<1x64xf32>
    %1067 = arith.maximumf %1065, %1066 : vector<1x64xf32>
    %1068 = vector.extract_strided_slice %1000 {offsets = [18, 0], sizes = [1, 64], strides = [1, 1]} : vector<32x64xf32> to vector<1x64xf32>
    %1069 = arith.maximumf %1067, %1068 : vector<1x64xf32>
    %c8_399 = arith.constant 8 : index
    %c8_400 = arith.constant 8 : index
    %c0_401 = arith.constant 0 : index
    %1070 = vector.load %arg12[%c8_399, %c8_400, %c0_401] : memref<12x12x64xf32, #tpu.memory_space<vmem>>, vector<1x1x64xf32>
    %1071 = vector.shape_cast %1070 : vector<1x1x64xf32> to vector<1x64xf32>
    %1072 = vector.shape_cast %1069 : vector<1x64xf32> to vector<1x1x64xf32>
    tpu.vector_store %arg12[%c8_399, %c8_400, %c0_401], %1072 {strides = array<i32>} : memref<12x12x64xf32, #tpu.memory_space<vmem>>, vector<1x1x64xf32>,
    %1073 = vector.extract_strided_slice %1000 {offsets = [18, 0], sizes = [1, 64], strides = [1, 1]} : vector<32x64xf32> to vector<1x64xf32>
    %1074 = vector.extract_strided_slice %1000 {offsets = [19, 0], sizes = [1, 64], strides = [1, 1]} : vector<32x64xf32> to vector<1x64xf32>
    %1075 = arith.maximumf %1073, %1074 : vector<1x64xf32>
    %1076 = vector.extract_strided_slice %1000 {offsets = [20, 0], sizes = [1, 64], strides = [1, 1]} : vector<32x64xf32> to vector<1x64xf32>
    %1077 = arith.maximumf %1075, %1076 : vector<1x64xf32>
    %c8_402 = arith.constant 8 : index
    %c9_403 = arith.constant 9 : index
    %c0_404 = arith.constant 0 : index
    %1078 = vector.load %arg12[%c8_402, %c9_403, %c0_404] : memref<12x12x64xf32, #tpu.memory_space<vmem>>, vector<1x1x64xf32>
    %1079 = vector.shape_cast %1078 : vector<1x1x64xf32> to vector<1x64xf32>
    %1080 = vector.shape_cast %1077 : vector<1x64xf32> to vector<1x1x64xf32>
    tpu.vector_store %arg12[%c8_402, %c9_403, %c0_404], %1080 {strides = array<i32>} : memref<12x12x64xf32, #tpu.memory_space<vmem>>, vector<1x1x64xf32>,
    %1081 = vector.extract_strided_slice %1000 {offsets = [20, 0], sizes = [1, 64], strides = [1, 1]} : vector<32x64xf32> to vector<1x64xf32>
    %1082 = vector.extract_strided_slice %1000 {offsets = [21, 0], sizes = [1, 64], strides = [1, 1]} : vector<32x64xf32> to vector<1x64xf32>
    %1083 = arith.maximumf %1081, %1082 : vector<1x64xf32>
    %1084 = vector.extract_strided_slice %1000 {offsets = [22, 0], sizes = [1, 64], strides = [1, 1]} : vector<32x64xf32> to vector<1x64xf32>
    %1085 = arith.maximumf %1083, %1084 : vector<1x64xf32>
    %c8_405 = arith.constant 8 : index
    %c10_406 = arith.constant 10 : index
    %c0_407 = arith.constant 0 : index
    %1086 = vector.load %arg12[%c8_405, %c10_406, %c0_407] : memref<12x12x64xf32, #tpu.memory_space<vmem>>, vector<1x1x64xf32>
    %1087 = vector.shape_cast %1086 : vector<1x1x64xf32> to vector<1x64xf32>
    %1088 = vector.shape_cast %1085 : vector<1x64xf32> to vector<1x1x64xf32>
    tpu.vector_store %arg12[%c8_405, %c10_406, %c0_407], %1088 {strides = array<i32>} : memref<12x12x64xf32, #tpu.memory_space<vmem>>, vector<1x1x64xf32>,
    %1089 = vector.extract_strided_slice %1000 {offsets = [22, 0], sizes = [1, 64], strides = [1, 1]} : vector<32x64xf32> to vector<1x64xf32>
    %1090 = vector.extract_strided_slice %1000 {offsets = [23, 0], sizes = [1, 64], strides = [1, 1]} : vector<32x64xf32> to vector<1x64xf32>
    %1091 = arith.maximumf %1089, %1090 : vector<1x64xf32>
    %1092 = vector.extract_strided_slice %1000 {offsets = [24, 0], sizes = [1, 64], strides = [1, 1]} : vector<32x64xf32> to vector<1x64xf32>
    %1093 = arith.maximumf %1091, %1092 : vector<1x64xf32>
    %c8_408 = arith.constant 8 : index
    %c11_409 = arith.constant 11 : index
    %c0_410 = arith.constant 0 : index
    %1094 = vector.load %arg12[%c8_408, %c11_409, %c0_410] : memref<12x12x64xf32, #tpu.memory_space<vmem>>, vector<1x1x64xf32>
    %1095 = vector.shape_cast %1094 : vector<1x1x64xf32> to vector<1x64xf32>
    %1096 = vector.shape_cast %1093 : vector<1x64xf32> to vector<1x1x64xf32>
    tpu.vector_store %arg12[%c8_408, %c11_409, %c0_410], %1096 {strides = array<i32>} : memref<12x12x64xf32, #tpu.memory_space<vmem>>, vector<1x1x64xf32>,
    %c576_411 = arith.constant 576 : index
    %c0_412 = arith.constant 0 : index
    %1097 = vector.load %arg11[%c576_411, %c0_412] : memref<800x64xf32, #tpu.memory_space<vmem>>, vector<32x64xf32>
    %1098 = vector.broadcast %24 : vector<1x64xf32> to vector<32x64xf32>
    %1099 = arith.mulf %1097, %1098 : vector<32x64xf32>
    %1100 = vector.broadcast %25 : vector<1x64xf32> to vector<32x64xf32>
    %1101 = arith.addf %1099, %1100 : vector<32x64xf32>
    %cst_413 = arith.constant 0.000000e+00 : f32
    %1102 = vector.broadcast %cst_413 : f32 to vector<32x64xf32>
    %1103 = arith.maximumf %1101, %1102 : vector<32x64xf32>
    %c608 = arith.constant 608 : index
    %c0_414 = arith.constant 0 : index
    %1104 = vector.load %arg11[%c608, %c0_414] : memref<800x64xf32, #tpu.memory_space<vmem>>, vector<32x64xf32>
    %1105 = vector.broadcast %24 : vector<1x64xf32> to vector<32x64xf32>
    %1106 = arith.mulf %1104, %1105 : vector<32x64xf32>
    %1107 = vector.broadcast %25 : vector<1x64xf32> to vector<32x64xf32>
    %1108 = arith.addf %1106, %1107 : vector<32x64xf32>
    %cst_415 = arith.constant 0.000000e+00 : f32
    %1109 = vector.broadcast %cst_415 : f32 to vector<32x64xf32>
    %1110 = arith.maximumf %1108, %1109 : vector<32x64xf32>
    %1111 = arith.maximumf %1103, %1110 : vector<32x64xf32>
    %c640 = arith.constant 640 : index
    %c0_416 = arith.constant 0 : index
    %1112 = vector.load %arg11[%c640, %c0_416] : memref<800x64xf32, #tpu.memory_space<vmem>>, vector<32x64xf32>
    %1113 = vector.broadcast %24 : vector<1x64xf32> to vector<32x64xf32>
    %1114 = arith.mulf %1112, %1113 : vector<32x64xf32>
    %1115 = vector.broadcast %25 : vector<1x64xf32> to vector<32x64xf32>
    %1116 = arith.addf %1114, %1115 : vector<32x64xf32>
    %cst_417 = arith.constant 0.000000e+00 : f32
    %1117 = vector.broadcast %cst_417 : f32 to vector<32x64xf32>
    %1118 = arith.maximumf %1116, %1117 : vector<32x64xf32>
    %1119 = arith.maximumf %1111, %1118 : vector<32x64xf32>
    %1120 = vector.extract_strided_slice %1119 {offsets = [0, 0], sizes = [1, 64], strides = [1, 1]} : vector<32x64xf32> to vector<1x64xf32>
    %1121 = vector.extract_strided_slice %1119 {offsets = [1, 0], sizes = [1, 64], strides = [1, 1]} : vector<32x64xf32> to vector<1x64xf32>
    %1122 = arith.maximumf %1120, %1121 : vector<1x64xf32>
    %1123 = vector.extract_strided_slice %1119 {offsets = [2, 0], sizes = [1, 64], strides = [1, 1]} : vector<32x64xf32> to vector<1x64xf32>
    %1124 = arith.maximumf %1122, %1123 : vector<1x64xf32>
    %c9_418 = arith.constant 9 : index
    %c0_419 = arith.constant 0 : index
    %c0_420 = arith.constant 0 : index
    %1125 = vector.load %arg12[%c9_418, %c0_419, %c0_420] : memref<12x12x64xf32, #tpu.memory_space<vmem>>, vector<1x1x64xf32>
    %1126 = vector.shape_cast %1125 : vector<1x1x64xf32> to vector<1x64xf32>
    %1127 = vector.shape_cast %1124 : vector<1x64xf32> to vector<1x1x64xf32>
    tpu.vector_store %arg12[%c9_418, %c0_419, %c0_420], %1127 {strides = array<i32>} : memref<12x12x64xf32, #tpu.memory_space<vmem>>, vector<1x1x64xf32>,
    %1128 = vector.extract_strided_slice %1119 {offsets = [2, 0], sizes = [1, 64], strides = [1, 1]} : vector<32x64xf32> to vector<1x64xf32>
    %1129 = vector.extract_strided_slice %1119 {offsets = [3, 0], sizes = [1, 64], strides = [1, 1]} : vector<32x64xf32> to vector<1x64xf32>
    %1130 = arith.maximumf %1128, %1129 : vector<1x64xf32>
    %1131 = vector.extract_strided_slice %1119 {offsets = [4, 0], sizes = [1, 64], strides = [1, 1]} : vector<32x64xf32> to vector<1x64xf32>
    %1132 = arith.maximumf %1130, %1131 : vector<1x64xf32>
    %c9_421 = arith.constant 9 : index
    %c1_422 = arith.constant 1 : index
    %c0_423 = arith.constant 0 : index
    %1133 = vector.load %arg12[%c9_421, %c1_422, %c0_423] : memref<12x12x64xf32, #tpu.memory_space<vmem>>, vector<1x1x64xf32>
    %1134 = vector.shape_cast %1133 : vector<1x1x64xf32> to vector<1x64xf32>
    %1135 = vector.shape_cast %1132 : vector<1x64xf32> to vector<1x1x64xf32>
    tpu.vector_store %arg12[%c9_421, %c1_422, %c0_423], %1135 {strides = array<i32>} : memref<12x12x64xf32, #tpu.memory_space<vmem>>, vector<1x1x64xf32>,
    %1136 = vector.extract_strided_slice %1119 {offsets = [4, 0], sizes = [1, 64], strides = [1, 1]} : vector<32x64xf32> to vector<1x64xf32>
    %1137 = vector.extract_strided_slice %1119 {offsets = [5, 0], sizes = [1, 64], strides = [1, 1]} : vector<32x64xf32> to vector<1x64xf32>
    %1138 = arith.maximumf %1136, %1137 : vector<1x64xf32>
    %1139 = vector.extract_strided_slice %1119 {offsets = [6, 0], sizes = [1, 64], strides = [1, 1]} : vector<32x64xf32> to vector<1x64xf32>
    %1140 = arith.maximumf %1138, %1139 : vector<1x64xf32>
    %c9_424 = arith.constant 9 : index
    %c2_425 = arith.constant 2 : index
    %c0_426 = arith.constant 0 : index
    %1141 = vector.load %arg12[%c9_424, %c2_425, %c0_426] : memref<12x12x64xf32, #tpu.memory_space<vmem>>, vector<1x1x64xf32>
    %1142 = vector.shape_cast %1141 : vector<1x1x64xf32> to vector<1x64xf32>
    %1143 = vector.shape_cast %1140 : vector<1x64xf32> to vector<1x1x64xf32>
    tpu.vector_store %arg12[%c9_424, %c2_425, %c0_426], %1143 {strides = array<i32>} : memref<12x12x64xf32, #tpu.memory_space<vmem>>, vector<1x1x64xf32>,
    %1144 = vector.extract_strided_slice %1119 {offsets = [6, 0], sizes = [1, 64], strides = [1, 1]} : vector<32x64xf32> to vector<1x64xf32>
    %1145 = vector.extract_strided_slice %1119 {offsets = [7, 0], sizes = [1, 64], strides = [1, 1]} : vector<32x64xf32> to vector<1x64xf32>
    %1146 = arith.maximumf %1144, %1145 : vector<1x64xf32>
    %1147 = vector.extract_strided_slice %1119 {offsets = [8, 0], sizes = [1, 64], strides = [1, 1]} : vector<32x64xf32> to vector<1x64xf32>
    %1148 = arith.maximumf %1146, %1147 : vector<1x64xf32>
    %c9_427 = arith.constant 9 : index
    %c3_428 = arith.constant 3 : index
    %c0_429 = arith.constant 0 : index
    %1149 = vector.load %arg12[%c9_427, %c3_428, %c0_429] : memref<12x12x64xf32, #tpu.memory_space<vmem>>, vector<1x1x64xf32>
    %1150 = vector.shape_cast %1149 : vector<1x1x64xf32> to vector<1x64xf32>
    %1151 = vector.shape_cast %1148 : vector<1x64xf32> to vector<1x1x64xf32>
    tpu.vector_store %arg12[%c9_427, %c3_428, %c0_429], %1151 {strides = array<i32>} : memref<12x12x64xf32, #tpu.memory_space<vmem>>, vector<1x1x64xf32>,
    %1152 = vector.extract_strided_slice %1119 {offsets = [8, 0], sizes = [1, 64], strides = [1, 1]} : vector<32x64xf32> to vector<1x64xf32>
    %1153 = vector.extract_strided_slice %1119 {offsets = [9, 0], sizes = [1, 64], strides = [1, 1]} : vector<32x64xf32> to vector<1x64xf32>
    %1154 = arith.maximumf %1152, %1153 : vector<1x64xf32>
    %1155 = vector.extract_strided_slice %1119 {offsets = [10, 0], sizes = [1, 64], strides = [1, 1]} : vector<32x64xf32> to vector<1x64xf32>
    %1156 = arith.maximumf %1154, %1155 : vector<1x64xf32>
    %c9_430 = arith.constant 9 : index
    %c4_431 = arith.constant 4 : index
    %c0_432 = arith.constant 0 : index
    %1157 = vector.load %arg12[%c9_430, %c4_431, %c0_432] : memref<12x12x64xf32, #tpu.memory_space<vmem>>, vector<1x1x64xf32>
    %1158 = vector.shape_cast %1157 : vector<1x1x64xf32> to vector<1x64xf32>
    %1159 = vector.shape_cast %1156 : vector<1x64xf32> to vector<1x1x64xf32>
    tpu.vector_store %arg12[%c9_430, %c4_431, %c0_432], %1159 {strides = array<i32>} : memref<12x12x64xf32, #tpu.memory_space<vmem>>, vector<1x1x64xf32>,
    %1160 = vector.extract_strided_slice %1119 {offsets = [10, 0], sizes = [1, 64], strides = [1, 1]} : vector<32x64xf32> to vector<1x64xf32>
    %1161 = vector.extract_strided_slice %1119 {offsets = [11, 0], sizes = [1, 64], strides = [1, 1]} : vector<32x64xf32> to vector<1x64xf32>
    %1162 = arith.maximumf %1160, %1161 : vector<1x64xf32>
    %1163 = vector.extract_strided_slice %1119 {offsets = [12, 0], sizes = [1, 64], strides = [1, 1]} : vector<32x64xf32> to vector<1x64xf32>
    %1164 = arith.maximumf %1162, %1163 : vector<1x64xf32>
    %c9_433 = arith.constant 9 : index
    %c5_434 = arith.constant 5 : index
    %c0_435 = arith.constant 0 : index
    %1165 = vector.load %arg12[%c9_433, %c5_434, %c0_435] : memref<12x12x64xf32, #tpu.memory_space<vmem>>, vector<1x1x64xf32>
    %1166 = vector.shape_cast %1165 : vector<1x1x64xf32> to vector<1x64xf32>
    %1167 = vector.shape_cast %1164 : vector<1x64xf32> to vector<1x1x64xf32>
    tpu.vector_store %arg12[%c9_433, %c5_434, %c0_435], %1167 {strides = array<i32>} : memref<12x12x64xf32, #tpu.memory_space<vmem>>, vector<1x1x64xf32>,
    %1168 = vector.extract_strided_slice %1119 {offsets = [12, 0], sizes = [1, 64], strides = [1, 1]} : vector<32x64xf32> to vector<1x64xf32>
    %1169 = vector.extract_strided_slice %1119 {offsets = [13, 0], sizes = [1, 64], strides = [1, 1]} : vector<32x64xf32> to vector<1x64xf32>
    %1170 = arith.maximumf %1168, %1169 : vector<1x64xf32>
    %1171 = vector.extract_strided_slice %1119 {offsets = [14, 0], sizes = [1, 64], strides = [1, 1]} : vector<32x64xf32> to vector<1x64xf32>
    %1172 = arith.maximumf %1170, %1171 : vector<1x64xf32>
    %c9_436 = arith.constant 9 : index
    %c6_437 = arith.constant 6 : index
    %c0_438 = arith.constant 0 : index
    %1173 = vector.load %arg12[%c9_436, %c6_437, %c0_438] : memref<12x12x64xf32, #tpu.memory_space<vmem>>, vector<1x1x64xf32>
    %1174 = vector.shape_cast %1173 : vector<1x1x64xf32> to vector<1x64xf32>
    %1175 = vector.shape_cast %1172 : vector<1x64xf32> to vector<1x1x64xf32>
    tpu.vector_store %arg12[%c9_436, %c6_437, %c0_438], %1175 {strides = array<i32>} : memref<12x12x64xf32, #tpu.memory_space<vmem>>, vector<1x1x64xf32>,
    %1176 = vector.extract_strided_slice %1119 {offsets = [14, 0], sizes = [1, 64], strides = [1, 1]} : vector<32x64xf32> to vector<1x64xf32>
    %1177 = vector.extract_strided_slice %1119 {offsets = [15, 0], sizes = [1, 64], strides = [1, 1]} : vector<32x64xf32> to vector<1x64xf32>
    %1178 = arith.maximumf %1176, %1177 : vector<1x64xf32>
    %1179 = vector.extract_strided_slice %1119 {offsets = [16, 0], sizes = [1, 64], strides = [1, 1]} : vector<32x64xf32> to vector<1x64xf32>
    %1180 = arith.maximumf %1178, %1179 : vector<1x64xf32>
    %c9_439 = arith.constant 9 : index
    %c7_440 = arith.constant 7 : index
    %c0_441 = arith.constant 0 : index
    %1181 = vector.load %arg12[%c9_439, %c7_440, %c0_441] : memref<12x12x64xf32, #tpu.memory_space<vmem>>, vector<1x1x64xf32>
    %1182 = vector.shape_cast %1181 : vector<1x1x64xf32> to vector<1x64xf32>
    %1183 = vector.shape_cast %1180 : vector<1x64xf32> to vector<1x1x64xf32>
    tpu.vector_store %arg12[%c9_439, %c7_440, %c0_441], %1183 {strides = array<i32>} : memref<12x12x64xf32, #tpu.memory_space<vmem>>, vector<1x1x64xf32>,
    %1184 = vector.extract_strided_slice %1119 {offsets = [16, 0], sizes = [1, 64], strides = [1, 1]} : vector<32x64xf32> to vector<1x64xf32>
    %1185 = vector.extract_strided_slice %1119 {offsets = [17, 0], sizes = [1, 64], strides = [1, 1]} : vector<32x64xf32> to vector<1x64xf32>
    %1186 = arith.maximumf %1184, %1185 : vector<1x64xf32>
    %1187 = vector.extract_strided_slice %1119 {offsets = [18, 0], sizes = [1, 64], strides = [1, 1]} : vector<32x64xf32> to vector<1x64xf32>
    %1188 = arith.maximumf %1186, %1187 : vector<1x64xf32>
    %c9_442 = arith.constant 9 : index
    %c8_443 = arith.constant 8 : index
    %c0_444 = arith.constant 0 : index
    %1189 = vector.load %arg12[%c9_442, %c8_443, %c0_444] : memref<12x12x64xf32, #tpu.memory_space<vmem>>, vector<1x1x64xf32>
    %1190 = vector.shape_cast %1189 : vector<1x1x64xf32> to vector<1x64xf32>
    %1191 = vector.shape_cast %1188 : vector<1x64xf32> to vector<1x1x64xf32>
    tpu.vector_store %arg12[%c9_442, %c8_443, %c0_444], %1191 {strides = array<i32>} : memref<12x12x64xf32, #tpu.memory_space<vmem>>, vector<1x1x64xf32>,
    %1192 = vector.extract_strided_slice %1119 {offsets = [18, 0], sizes = [1, 64], strides = [1, 1]} : vector<32x64xf32> to vector<1x64xf32>
    %1193 = vector.extract_strided_slice %1119 {offsets = [19, 0], sizes = [1, 64], strides = [1, 1]} : vector<32x64xf32> to vector<1x64xf32>
    %1194 = arith.maximumf %1192, %1193 : vector<1x64xf32>
    %1195 = vector.extract_strided_slice %1119 {offsets = [20, 0], sizes = [1, 64], strides = [1, 1]} : vector<32x64xf32> to vector<1x64xf32>
    %1196 = arith.maximumf %1194, %1195 : vector<1x64xf32>
    %c9_445 = arith.constant 9 : index
    %c9_446 = arith.constant 9 : index
    %c0_447 = arith.constant 0 : index
    %1197 = vector.load %arg12[%c9_445, %c9_446, %c0_447] : memref<12x12x64xf32, #tpu.memory_space<vmem>>, vector<1x1x64xf32>
    %1198 = vector.shape_cast %1197 : vector<1x1x64xf32> to vector<1x64xf32>
    %1199 = vector.shape_cast %1196 : vector<1x64xf32> to vector<1x1x64xf32>
    tpu.vector_store %arg12[%c9_445, %c9_446, %c0_447], %1199 {strides = array<i32>} : memref<12x12x64xf32, #tpu.memory_space<vmem>>, vector<1x1x64xf32>,
    %1200 = vector.extract_strided_slice %1119 {offsets = [20, 0], sizes = [1, 64], strides = [1, 1]} : vector<32x64xf32> to vector<1x64xf32>
    %1201 = vector.extract_strided_slice %1119 {offsets = [21, 0], sizes = [1, 64], strides = [1, 1]} : vector<32x64xf32> to vector<1x64xf32>
    %1202 = arith.maximumf %1200, %1201 : vector<1x64xf32>
    %1203 = vector.extract_strided_slice %1119 {offsets = [22, 0], sizes = [1, 64], strides = [1, 1]} : vector<32x64xf32> to vector<1x64xf32>
    %1204 = arith.maximumf %1202, %1203 : vector<1x64xf32>
    %c9_448 = arith.constant 9 : index
    %c10_449 = arith.constant 10 : index
    %c0_450 = arith.constant 0 : index
    %1205 = vector.load %arg12[%c9_448, %c10_449, %c0_450] : memref<12x12x64xf32, #tpu.memory_space<vmem>>, vector<1x1x64xf32>
    %1206 = vector.shape_cast %1205 : vector<1x1x64xf32> to vector<1x64xf32>
    %1207 = vector.shape_cast %1204 : vector<1x64xf32> to vector<1x1x64xf32>
    tpu.vector_store %arg12[%c9_448, %c10_449, %c0_450], %1207 {strides = array<i32>} : memref<12x12x64xf32, #tpu.memory_space<vmem>>, vector<1x1x64xf32>,
    %1208 = vector.extract_strided_slice %1119 {offsets = [22, 0], sizes = [1, 64], strides = [1, 1]} : vector<32x64xf32> to vector<1x64xf32>
    %1209 = vector.extract_strided_slice %1119 {offsets = [23, 0], sizes = [1, 64], strides = [1, 1]} : vector<32x64xf32> to vector<1x64xf32>
    %1210 = arith.maximumf %1208, %1209 : vector<1x64xf32>
    %1211 = vector.extract_strided_slice %1119 {offsets = [24, 0], sizes = [1, 64], strides = [1, 1]} : vector<32x64xf32> to vector<1x64xf32>
    %1212 = arith.maximumf %1210, %1211 : vector<1x64xf32>
    %c9_451 = arith.constant 9 : index
    %c11_452 = arith.constant 11 : index
    %c0_453 = arith.constant 0 : index
    %1213 = vector.load %arg12[%c9_451, %c11_452, %c0_453] : memref<12x12x64xf32, #tpu.memory_space<vmem>>, vector<1x1x64xf32>
    %1214 = vector.shape_cast %1213 : vector<1x1x64xf32> to vector<1x64xf32>
    %1215 = vector.shape_cast %1212 : vector<1x64xf32> to vector<1x1x64xf32>
    tpu.vector_store %arg12[%c9_451, %c11_452, %c0_453], %1215 {strides = array<i32>} : memref<12x12x64xf32, #tpu.memory_space<vmem>>, vector<1x1x64xf32>,
    %c640_454 = arith.constant 640 : index
    %c0_455 = arith.constant 0 : index
    %1216 = vector.load %arg11[%c640_454, %c0_455] : memref<800x64xf32, #tpu.memory_space<vmem>>, vector<32x64xf32>
    %1217 = vector.broadcast %24 : vector<1x64xf32> to vector<32x64xf32>
    %1218 = arith.mulf %1216, %1217 : vector<32x64xf32>
    %1219 = vector.broadcast %25 : vector<1x64xf32> to vector<32x64xf32>
    %1220 = arith.addf %1218, %1219 : vector<32x64xf32>
    %cst_456 = arith.constant 0.000000e+00 : f32
    %1221 = vector.broadcast %cst_456 : f32 to vector<32x64xf32>
    %1222 = arith.maximumf %1220, %1221 : vector<32x64xf32>
    %c672 = arith.constant 672 : index
    %c0_457 = arith.constant 0 : index
    %1223 = vector.load %arg11[%c672, %c0_457] : memref<800x64xf32, #tpu.memory_space<vmem>>, vector<32x64xf32>
    %1224 = vector.broadcast %24 : vector<1x64xf32> to vector<32x64xf32>
    %1225 = arith.mulf %1223, %1224 : vector<32x64xf32>
    %1226 = vector.broadcast %25 : vector<1x64xf32> to vector<32x64xf32>
    %1227 = arith.addf %1225, %1226 : vector<32x64xf32>
    %cst_458 = arith.constant 0.000000e+00 : f32
    %1228 = vector.broadcast %cst_458 : f32 to vector<32x64xf32>
    %1229 = arith.maximumf %1227, %1228 : vector<32x64xf32>
    %1230 = arith.maximumf %1222, %1229 : vector<32x64xf32>
    %c704 = arith.constant 704 : index
    %c0_459 = arith.constant 0 : index
    %1231 = vector.load %arg11[%c704, %c0_459] : memref<800x64xf32, #tpu.memory_space<vmem>>, vector<32x64xf32>
    %1232 = vector.broadcast %24 : vector<1x64xf32> to vector<32x64xf32>
    %1233 = arith.mulf %1231, %1232 : vector<32x64xf32>
    %1234 = vector.broadcast %25 : vector<1x64xf32> to vector<32x64xf32>
    %1235 = arith.addf %1233, %1234 : vector<32x64xf32>
    %cst_460 = arith.constant 0.000000e+00 : f32
    %1236 = vector.broadcast %cst_460 : f32 to vector<32x64xf32>
    %1237 = arith.maximumf %1235, %1236 : vector<32x64xf32>
    %1238 = arith.maximumf %1230, %1237 : vector<32x64xf32>
    %1239 = vector.extract_strided_slice %1238 {offsets = [0, 0], sizes = [1, 64], strides = [1, 1]} : vector<32x64xf32> to vector<1x64xf32>
    %1240 = vector.extract_strided_slice %1238 {offsets = [1, 0], sizes = [1, 64], strides = [1, 1]} : vector<32x64xf32> to vector<1x64xf32>
    %1241 = arith.maximumf %1239, %1240 : vector<1x64xf32>
    %1242 = vector.extract_strided_slice %1238 {offsets = [2, 0], sizes = [1, 64], strides = [1, 1]} : vector<32x64xf32> to vector<1x64xf32>
    %1243 = arith.maximumf %1241, %1242 : vector<1x64xf32>
    %c10_461 = arith.constant 10 : index
    %c0_462 = arith.constant 0 : index
    %c0_463 = arith.constant 0 : index
    %1244 = vector.load %arg12[%c10_461, %c0_462, %c0_463] : memref<12x12x64xf32, #tpu.memory_space<vmem>>, vector<1x1x64xf32>
    %1245 = vector.shape_cast %1244 : vector<1x1x64xf32> to vector<1x64xf32>
    %1246 = vector.shape_cast %1243 : vector<1x64xf32> to vector<1x1x64xf32>
    tpu.vector_store %arg12[%c10_461, %c0_462, %c0_463], %1246 {strides = array<i32>} : memref<12x12x64xf32, #tpu.memory_space<vmem>>, vector<1x1x64xf32>,
    %1247 = vector.extract_strided_slice %1238 {offsets = [2, 0], sizes = [1, 64], strides = [1, 1]} : vector<32x64xf32> to vector<1x64xf32>
    %1248 = vector.extract_strided_slice %1238 {offsets = [3, 0], sizes = [1, 64], strides = [1, 1]} : vector<32x64xf32> to vector<1x64xf32>
    %1249 = arith.maximumf %1247, %1248 : vector<1x64xf32>
    %1250 = vector.extract_strided_slice %1238 {offsets = [4, 0], sizes = [1, 64], strides = [1, 1]} : vector<32x64xf32> to vector<1x64xf32>
    %1251 = arith.maximumf %1249, %1250 : vector<1x64xf32>
    %c10_464 = arith.constant 10 : index
    %c1_465 = arith.constant 1 : index
    %c0_466 = arith.constant 0 : index
    %1252 = vector.load %arg12[%c10_464, %c1_465, %c0_466] : memref<12x12x64xf32, #tpu.memory_space<vmem>>, vector<1x1x64xf32>
    %1253 = vector.shape_cast %1252 : vector<1x1x64xf32> to vector<1x64xf32>
    %1254 = vector.shape_cast %1251 : vector<1x64xf32> to vector<1x1x64xf32>
    tpu.vector_store %arg12[%c10_464, %c1_465, %c0_466], %1254 {strides = array<i32>} : memref<12x12x64xf32, #tpu.memory_space<vmem>>, vector<1x1x64xf32>,
    %1255 = vector.extract_strided_slice %1238 {offsets = [4, 0], sizes = [1, 64], strides = [1, 1]} : vector<32x64xf32> to vector<1x64xf32>
    %1256 = vector.extract_strided_slice %1238 {offsets = [5, 0], sizes = [1, 64], strides = [1, 1]} : vector<32x64xf32> to vector<1x64xf32>
    %1257 = arith.maximumf %1255, %1256 : vector<1x64xf32>
    %1258 = vector.extract_strided_slice %1238 {offsets = [6, 0], sizes = [1, 64], strides = [1, 1]} : vector<32x64xf32> to vector<1x64xf32>
    %1259 = arith.maximumf %1257, %1258 : vector<1x64xf32>
    %c10_467 = arith.constant 10 : index
    %c2_468 = arith.constant 2 : index
    %c0_469 = arith.constant 0 : index
    %1260 = vector.load %arg12[%c10_467, %c2_468, %c0_469] : memref<12x12x64xf32, #tpu.memory_space<vmem>>, vector<1x1x64xf32>
    %1261 = vector.shape_cast %1260 : vector<1x1x64xf32> to vector<1x64xf32>
    %1262 = vector.shape_cast %1259 : vector<1x64xf32> to vector<1x1x64xf32>
    tpu.vector_store %arg12[%c10_467, %c2_468, %c0_469], %1262 {strides = array<i32>} : memref<12x12x64xf32, #tpu.memory_space<vmem>>, vector<1x1x64xf32>,
    %1263 = vector.extract_strided_slice %1238 {offsets = [6, 0], sizes = [1, 64], strides = [1, 1]} : vector<32x64xf32> to vector<1x64xf32>
    %1264 = vector.extract_strided_slice %1238 {offsets = [7, 0], sizes = [1, 64], strides = [1, 1]} : vector<32x64xf32> to vector<1x64xf32>
    %1265 = arith.maximumf %1263, %1264 : vector<1x64xf32>
    %1266 = vector.extract_strided_slice %1238 {offsets = [8, 0], sizes = [1, 64], strides = [1, 1]} : vector<32x64xf32> to vector<1x64xf32>
    %1267 = arith.maximumf %1265, %1266 : vector<1x64xf32>
    %c10_470 = arith.constant 10 : index
    %c3_471 = arith.constant 3 : index
    %c0_472 = arith.constant 0 : index
    %1268 = vector.load %arg12[%c10_470, %c3_471, %c0_472] : memref<12x12x64xf32, #tpu.memory_space<vmem>>, vector<1x1x64xf32>
    %1269 = vector.shape_cast %1268 : vector<1x1x64xf32> to vector<1x64xf32>
    %1270 = vector.shape_cast %1267 : vector<1x64xf32> to vector<1x1x64xf32>
    tpu.vector_store %arg12[%c10_470, %c3_471, %c0_472], %1270 {strides = array<i32>} : memref<12x12x64xf32, #tpu.memory_space<vmem>>, vector<1x1x64xf32>,
    %1271 = vector.extract_strided_slice %1238 {offsets = [8, 0], sizes = [1, 64], strides = [1, 1]} : vector<32x64xf32> to vector<1x64xf32>
    %1272 = vector.extract_strided_slice %1238 {offsets = [9, 0], sizes = [1, 64], strides = [1, 1]} : vector<32x64xf32> to vector<1x64xf32>
    %1273 = arith.maximumf %1271, %1272 : vector<1x64xf32>
    %1274 = vector.extract_strided_slice %1238 {offsets = [10, 0], sizes = [1, 64], strides = [1, 1]} : vector<32x64xf32> to vector<1x64xf32>
    %1275 = arith.maximumf %1273, %1274 : vector<1x64xf32>
    %c10_473 = arith.constant 10 : index
    %c4_474 = arith.constant 4 : index
    %c0_475 = arith.constant 0 : index
    %1276 = vector.load %arg12[%c10_473, %c4_474, %c0_475] : memref<12x12x64xf32, #tpu.memory_space<vmem>>, vector<1x1x64xf32>
    %1277 = vector.shape_cast %1276 : vector<1x1x64xf32> to vector<1x64xf32>
    %1278 = vector.shape_cast %1275 : vector<1x64xf32> to vector<1x1x64xf32>
    tpu.vector_store %arg12[%c10_473, %c4_474, %c0_475], %1278 {strides = array<i32>} : memref<12x12x64xf32, #tpu.memory_space<vmem>>, vector<1x1x64xf32>,
    %1279 = vector.extract_strided_slice %1238 {offsets = [10, 0], sizes = [1, 64], strides = [1, 1]} : vector<32x64xf32> to vector<1x64xf32>
    %1280 = vector.extract_strided_slice %1238 {offsets = [11, 0], sizes = [1, 64], strides = [1, 1]} : vector<32x64xf32> to vector<1x64xf32>
    %1281 = arith.maximumf %1279, %1280 : vector<1x64xf32>
    %1282 = vector.extract_strided_slice %1238 {offsets = [12, 0], sizes = [1, 64], strides = [1, 1]} : vector<32x64xf32> to vector<1x64xf32>
    %1283 = arith.maximumf %1281, %1282 : vector<1x64xf32>
    %c10_476 = arith.constant 10 : index
    %c5_477 = arith.constant 5 : index
    %c0_478 = arith.constant 0 : index
    %1284 = vector.load %arg12[%c10_476, %c5_477, %c0_478] : memref<12x12x64xf32, #tpu.memory_space<vmem>>, vector<1x1x64xf32>
    %1285 = vector.shape_cast %1284 : vector<1x1x64xf32> to vector<1x64xf32>
    %1286 = vector.shape_cast %1283 : vector<1x64xf32> to vector<1x1x64xf32>
    tpu.vector_store %arg12[%c10_476, %c5_477, %c0_478], %1286 {strides = array<i32>} : memref<12x12x64xf32, #tpu.memory_space<vmem>>, vector<1x1x64xf32>,
    %1287 = vector.extract_strided_slice %1238 {offsets = [12, 0], sizes = [1, 64], strides = [1, 1]} : vector<32x64xf32> to vector<1x64xf32>
    %1288 = vector.extract_strided_slice %1238 {offsets = [13, 0], sizes = [1, 64], strides = [1, 1]} : vector<32x64xf32> to vector<1x64xf32>
    %1289 = arith.maximumf %1287, %1288 : vector<1x64xf32>
    %1290 = vector.extract_strided_slice %1238 {offsets = [14, 0], sizes = [1, 64], strides = [1, 1]} : vector<32x64xf32> to vector<1x64xf32>
    %1291 = arith.maximumf %1289, %1290 : vector<1x64xf32>
    %c10_479 = arith.constant 10 : index
    %c6_480 = arith.constant 6 : index
    %c0_481 = arith.constant 0 : index
    %1292 = vector.load %arg12[%c10_479, %c6_480, %c0_481] : memref<12x12x64xf32, #tpu.memory_space<vmem>>, vector<1x1x64xf32>
    %1293 = vector.shape_cast %1292 : vector<1x1x64xf32> to vector<1x64xf32>
    %1294 = vector.shape_cast %1291 : vector<1x64xf32> to vector<1x1x64xf32>
    tpu.vector_store %arg12[%c10_479, %c6_480, %c0_481], %1294 {strides = array<i32>} : memref<12x12x64xf32, #tpu.memory_space<vmem>>, vector<1x1x64xf32>,
    %1295 = vector.extract_strided_slice %1238 {offsets = [14, 0], sizes = [1, 64], strides = [1, 1]} : vector<32x64xf32> to vector<1x64xf32>
    %1296 = vector.extract_strided_slice %1238 {offsets = [15, 0], sizes = [1, 64], strides = [1, 1]} : vector<32x64xf32> to vector<1x64xf32>
    %1297 = arith.maximumf %1295, %1296 : vector<1x64xf32>
    %1298 = vector.extract_strided_slice %1238 {offsets = [16, 0], sizes = [1, 64], strides = [1, 1]} : vector<32x64xf32> to vector<1x64xf32>
    %1299 = arith.maximumf %1297, %1298 : vector<1x64xf32>
    %c10_482 = arith.constant 10 : index
    %c7_483 = arith.constant 7 : index
    %c0_484 = arith.constant 0 : index
    %1300 = vector.load %arg12[%c10_482, %c7_483, %c0_484] : memref<12x12x64xf32, #tpu.memory_space<vmem>>, vector<1x1x64xf32>
    %1301 = vector.shape_cast %1300 : vector<1x1x64xf32> to vector<1x64xf32>
    %1302 = vector.shape_cast %1299 : vector<1x64xf32> to vector<1x1x64xf32>
    tpu.vector_store %arg12[%c10_482, %c7_483, %c0_484], %1302 {strides = array<i32>} : memref<12x12x64xf32, #tpu.memory_space<vmem>>, vector<1x1x64xf32>,
    %1303 = vector.extract_strided_slice %1238 {offsets = [16, 0], sizes = [1, 64], strides = [1, 1]} : vector<32x64xf32> to vector<1x64xf32>
    %1304 = vector.extract_strided_slice %1238 {offsets = [17, 0], sizes = [1, 64], strides = [1, 1]} : vector<32x64xf32> to vector<1x64xf32>
    %1305 = arith.maximumf %1303, %1304 : vector<1x64xf32>
    %1306 = vector.extract_strided_slice %1238 {offsets = [18, 0], sizes = [1, 64], strides = [1, 1]} : vector<32x64xf32> to vector<1x64xf32>
    %1307 = arith.maximumf %1305, %1306 : vector<1x64xf32>
    %c10_485 = arith.constant 10 : index
    %c8_486 = arith.constant 8 : index
    %c0_487 = arith.constant 0 : index
    %1308 = vector.load %arg12[%c10_485, %c8_486, %c0_487] : memref<12x12x64xf32, #tpu.memory_space<vmem>>, vector<1x1x64xf32>
    %1309 = vector.shape_cast %1308 : vector<1x1x64xf32> to vector<1x64xf32>
    %1310 = vector.shape_cast %1307 : vector<1x64xf32> to vector<1x1x64xf32>
    tpu.vector_store %arg12[%c10_485, %c8_486, %c0_487], %1310 {strides = array<i32>} : memref<12x12x64xf32, #tpu.memory_space<vmem>>, vector<1x1x64xf32>,
    %1311 = vector.extract_strided_slice %1238 {offsets = [18, 0], sizes = [1, 64], strides = [1, 1]} : vector<32x64xf32> to vector<1x64xf32>
    %1312 = vector.extract_strided_slice %1238 {offsets = [19, 0], sizes = [1, 64], strides = [1, 1]} : vector<32x64xf32> to vector<1x64xf32>
    %1313 = arith.maximumf %1311, %1312 : vector<1x64xf32>
    %1314 = vector.extract_strided_slice %1238 {offsets = [20, 0], sizes = [1, 64], strides = [1, 1]} : vector<32x64xf32> to vector<1x64xf32>
    %1315 = arith.maximumf %1313, %1314 : vector<1x64xf32>
    %c10_488 = arith.constant 10 : index
    %c9_489 = arith.constant 9 : index
    %c0_490 = arith.constant 0 : index
    %1316 = vector.load %arg12[%c10_488, %c9_489, %c0_490] : memref<12x12x64xf32, #tpu.memory_space<vmem>>, vector<1x1x64xf32>
    %1317 = vector.shape_cast %1316 : vector<1x1x64xf32> to vector<1x64xf32>
    %1318 = vector.shape_cast %1315 : vector<1x64xf32> to vector<1x1x64xf32>
    tpu.vector_store %arg12[%c10_488, %c9_489, %c0_490], %1318 {strides = array<i32>} : memref<12x12x64xf32, #tpu.memory_space<vmem>>, vector<1x1x64xf32>,
    %1319 = vector.extract_strided_slice %1238 {offsets = [20, 0], sizes = [1, 64], strides = [1, 1]} : vector<32x64xf32> to vector<1x64xf32>
    %1320 = vector.extract_strided_slice %1238 {offsets = [21, 0], sizes = [1, 64], strides = [1, 1]} : vector<32x64xf32> to vector<1x64xf32>
    %1321 = arith.maximumf %1319, %1320 : vector<1x64xf32>
    %1322 = vector.extract_strided_slice %1238 {offsets = [22, 0], sizes = [1, 64], strides = [1, 1]} : vector<32x64xf32> to vector<1x64xf32>
    %1323 = arith.maximumf %1321, %1322 : vector<1x64xf32>
    %c10_491 = arith.constant 10 : index
    %c10_492 = arith.constant 10 : index
    %c0_493 = arith.constant 0 : index
    %1324 = vector.load %arg12[%c10_491, %c10_492, %c0_493] : memref<12x12x64xf32, #tpu.memory_space<vmem>>, vector<1x1x64xf32>
    %1325 = vector.shape_cast %1324 : vector<1x1x64xf32> to vector<1x64xf32>
    %1326 = vector.shape_cast %1323 : vector<1x64xf32> to vector<1x1x64xf32>
    tpu.vector_store %arg12[%c10_491, %c10_492, %c0_493], %1326 {strides = array<i32>} : memref<12x12x64xf32, #tpu.memory_space<vmem>>, vector<1x1x64xf32>,
    %1327 = vector.extract_strided_slice %1238 {offsets = [22, 0], sizes = [1, 64], strides = [1, 1]} : vector<32x64xf32> to vector<1x64xf32>
    %1328 = vector.extract_strided_slice %1238 {offsets = [23, 0], sizes = [1, 64], strides = [1, 1]} : vector<32x64xf32> to vector<1x64xf32>
    %1329 = arith.maximumf %1327, %1328 : vector<1x64xf32>
    %1330 = vector.extract_strided_slice %1238 {offsets = [24, 0], sizes = [1, 64], strides = [1, 1]} : vector<32x64xf32> to vector<1x64xf32>
    %1331 = arith.maximumf %1329, %1330 : vector<1x64xf32>
    %c10_494 = arith.constant 10 : index
    %c11_495 = arith.constant 11 : index
    %c0_496 = arith.constant 0 : index
    %1332 = vector.load %arg12[%c10_494, %c11_495, %c0_496] : memref<12x12x64xf32, #tpu.memory_space<vmem>>, vector<1x1x64xf32>
    %1333 = vector.shape_cast %1332 : vector<1x1x64xf32> to vector<1x64xf32>
    %1334 = vector.shape_cast %1331 : vector<1x64xf32> to vector<1x1x64xf32>
    tpu.vector_store %arg12[%c10_494, %c11_495, %c0_496], %1334 {strides = array<i32>} : memref<12x12x64xf32, #tpu.memory_space<vmem>>, vector<1x1x64xf32>,
    %c704_497 = arith.constant 704 : index
    %c0_498 = arith.constant 0 : index
    %1335 = vector.load %arg11[%c704_497, %c0_498] : memref<800x64xf32, #tpu.memory_space<vmem>>, vector<32x64xf32>
    %1336 = vector.broadcast %24 : vector<1x64xf32> to vector<32x64xf32>
    %1337 = arith.mulf %1335, %1336 : vector<32x64xf32>
    %1338 = vector.broadcast %25 : vector<1x64xf32> to vector<32x64xf32>
    %1339 = arith.addf %1337, %1338 : vector<32x64xf32>
    %cst_499 = arith.constant 0.000000e+00 : f32
    %1340 = vector.broadcast %cst_499 : f32 to vector<32x64xf32>
    %1341 = arith.maximumf %1339, %1340 : vector<32x64xf32>
    %c736 = arith.constant 736 : index
    %c0_500 = arith.constant 0 : index
    %1342 = vector.load %arg11[%c736, %c0_500] : memref<800x64xf32, #tpu.memory_space<vmem>>, vector<32x64xf32>
    %1343 = vector.broadcast %24 : vector<1x64xf32> to vector<32x64xf32>
    %1344 = arith.mulf %1342, %1343 : vector<32x64xf32>
    %1345 = vector.broadcast %25 : vector<1x64xf32> to vector<32x64xf32>
    %1346 = arith.addf %1344, %1345 : vector<32x64xf32>
    %cst_501 = arith.constant 0.000000e+00 : f32
    %1347 = vector.broadcast %cst_501 : f32 to vector<32x64xf32>
    %1348 = arith.maximumf %1346, %1347 : vector<32x64xf32>
    %1349 = arith.maximumf %1341, %1348 : vector<32x64xf32>
    %c768_502 = arith.constant 768 : index
    %c0_503 = arith.constant 0 : index
    %1350 = vector.load %arg11[%c768_502, %c0_503] : memref<800x64xf32, #tpu.memory_space<vmem>>, vector<32x64xf32>
    %1351 = vector.broadcast %24 : vector<1x64xf32> to vector<32x64xf32>
    %1352 = arith.mulf %1350, %1351 : vector<32x64xf32>
    %1353 = vector.broadcast %25 : vector<1x64xf32> to vector<32x64xf32>
    %1354 = arith.addf %1352, %1353 : vector<32x64xf32>
    %cst_504 = arith.constant 0.000000e+00 : f32
    %1355 = vector.broadcast %cst_504 : f32 to vector<32x64xf32>
    %1356 = arith.maximumf %1354, %1355 : vector<32x64xf32>
    %1357 = arith.maximumf %1349, %1356 : vector<32x64xf32>
    %1358 = vector.extract_strided_slice %1357 {offsets = [0, 0], sizes = [1, 64], strides = [1, 1]} : vector<32x64xf32> to vector<1x64xf32>
    %1359 = vector.extract_strided_slice %1357 {offsets = [1, 0], sizes = [1, 64], strides = [1, 1]} : vector<32x64xf32> to vector<1x64xf32>
    %1360 = arith.maximumf %1358, %1359 : vector<1x64xf32>
    %1361 = vector.extract_strided_slice %1357 {offsets = [2, 0], sizes = [1, 64], strides = [1, 1]} : vector<32x64xf32> to vector<1x64xf32>
    %1362 = arith.maximumf %1360, %1361 : vector<1x64xf32>
    %c11_505 = arith.constant 11 : index
    %c0_506 = arith.constant 0 : index
    %c0_507 = arith.constant 0 : index
    %1363 = vector.load %arg12[%c11_505, %c0_506, %c0_507] : memref<12x12x64xf32, #tpu.memory_space<vmem>>, vector<1x1x64xf32>
    %1364 = vector.shape_cast %1363 : vector<1x1x64xf32> to vector<1x64xf32>
    %1365 = vector.shape_cast %1362 : vector<1x64xf32> to vector<1x1x64xf32>
    tpu.vector_store %arg12[%c11_505, %c0_506, %c0_507], %1365 {strides = array<i32>} : memref<12x12x64xf32, #tpu.memory_space<vmem>>, vector<1x1x64xf32>,
    %1366 = vector.extract_strided_slice %1357 {offsets = [2, 0], sizes = [1, 64], strides = [1, 1]} : vector<32x64xf32> to vector<1x64xf32>
    %1367 = vector.extract_strided_slice %1357 {offsets = [3, 0], sizes = [1, 64], strides = [1, 1]} : vector<32x64xf32> to vector<1x64xf32>
    %1368 = arith.maximumf %1366, %1367 : vector<1x64xf32>
    %1369 = vector.extract_strided_slice %1357 {offsets = [4, 0], sizes = [1, 64], strides = [1, 1]} : vector<32x64xf32> to vector<1x64xf32>
    %1370 = arith.maximumf %1368, %1369 : vector<1x64xf32>
    %c11_508 = arith.constant 11 : index
    %c1_509 = arith.constant 1 : index
    %c0_510 = arith.constant 0 : index
    %1371 = vector.load %arg12[%c11_508, %c1_509, %c0_510] : memref<12x12x64xf32, #tpu.memory_space<vmem>>, vector<1x1x64xf32>
    %1372 = vector.shape_cast %1371 : vector<1x1x64xf32> to vector<1x64xf32>
    %1373 = vector.shape_cast %1370 : vector<1x64xf32> to vector<1x1x64xf32>
    tpu.vector_store %arg12[%c11_508, %c1_509, %c0_510], %1373 {strides = array<i32>} : memref<12x12x64xf32, #tpu.memory_space<vmem>>, vector<1x1x64xf32>,
    %1374 = vector.extract_strided_slice %1357 {offsets = [4, 0], sizes = [1, 64], strides = [1, 1]} : vector<32x64xf32> to vector<1x64xf32>
    %1375 = vector.extract_strided_slice %1357 {offsets = [5, 0], sizes = [1, 64], strides = [1, 1]} : vector<32x64xf32> to vector<1x64xf32>
    %1376 = arith.maximumf %1374, %1375 : vector<1x64xf32>
    %1377 = vector.extract_strided_slice %1357 {offsets = [6, 0], sizes = [1, 64], strides = [1, 1]} : vector<32x64xf32> to vector<1x64xf32>
    %1378 = arith.maximumf %1376, %1377 : vector<1x64xf32>
    %c11_511 = arith.constant 11 : index
    %c2_512 = arith.constant 2 : index
    %c0_513 = arith.constant 0 : index
    %1379 = vector.load %arg12[%c11_511, %c2_512, %c0_513] : memref<12x12x64xf32, #tpu.memory_space<vmem>>, vector<1x1x64xf32>
    %1380 = vector.shape_cast %1379 : vector<1x1x64xf32> to vector<1x64xf32>
    %1381 = vector.shape_cast %1378 : vector<1x64xf32> to vector<1x1x64xf32>
    tpu.vector_store %arg12[%c11_511, %c2_512, %c0_513], %1381 {strides = array<i32>} : memref<12x12x64xf32, #tpu.memory_space<vmem>>, vector<1x1x64xf32>,
    %1382 = vector.extract_strided_slice %1357 {offsets = [6, 0], sizes = [1, 64], strides = [1, 1]} : vector<32x64xf32> to vector<1x64xf32>
    %1383 = vector.extract_strided_slice %1357 {offsets = [7, 0], sizes = [1, 64], strides = [1, 1]} : vector<32x64xf32> to vector<1x64xf32>
    %1384 = arith.maximumf %1382, %1383 : vector<1x64xf32>
    %1385 = vector.extract_strided_slice %1357 {offsets = [8, 0], sizes = [1, 64], strides = [1, 1]} : vector<32x64xf32> to vector<1x64xf32>
    %1386 = arith.maximumf %1384, %1385 : vector<1x64xf32>
    %c11_514 = arith.constant 11 : index
    %c3_515 = arith.constant 3 : index
    %c0_516 = arith.constant 0 : index
    %1387 = vector.load %arg12[%c11_514, %c3_515, %c0_516] : memref<12x12x64xf32, #tpu.memory_space<vmem>>, vector<1x1x64xf32>
    %1388 = vector.shape_cast %1387 : vector<1x1x64xf32> to vector<1x64xf32>
    %1389 = vector.shape_cast %1386 : vector<1x64xf32> to vector<1x1x64xf32>
    tpu.vector_store %arg12[%c11_514, %c3_515, %c0_516], %1389 {strides = array<i32>} : memref<12x12x64xf32, #tpu.memory_space<vmem>>, vector<1x1x64xf32>,
    %1390 = vector.extract_strided_slice %1357 {offsets = [8, 0], sizes = [1, 64], strides = [1, 1]} : vector<32x64xf32> to vector<1x64xf32>
    %1391 = vector.extract_strided_slice %1357 {offsets = [9, 0], sizes = [1, 64], strides = [1, 1]} : vector<32x64xf32> to vector<1x64xf32>
    %1392 = arith.maximumf %1390, %1391 : vector<1x64xf32>
    %1393 = vector.extract_strided_slice %1357 {offsets = [10, 0], sizes = [1, 64], strides = [1, 1]} : vector<32x64xf32> to vector<1x64xf32>
    %1394 = arith.maximumf %1392, %1393 : vector<1x64xf32>
    %c11_517 = arith.constant 11 : index
    %c4_518 = arith.constant 4 : index
    %c0_519 = arith.constant 0 : index
    %1395 = vector.load %arg12[%c11_517, %c4_518, %c0_519] : memref<12x12x64xf32, #tpu.memory_space<vmem>>, vector<1x1x64xf32>
    %1396 = vector.shape_cast %1395 : vector<1x1x64xf32> to vector<1x64xf32>
    %1397 = vector.shape_cast %1394 : vector<1x64xf32> to vector<1x1x64xf32>
    tpu.vector_store %arg12[%c11_517, %c4_518, %c0_519], %1397 {strides = array<i32>} : memref<12x12x64xf32, #tpu.memory_space<vmem>>, vector<1x1x64xf32>,
    %1398 = vector.extract_strided_slice %1357 {offsets = [10, 0], sizes = [1, 64], strides = [1, 1]} : vector<32x64xf32> to vector<1x64xf32>
    %1399 = vector.extract_strided_slice %1357 {offsets = [11, 0], sizes = [1, 64], strides = [1, 1]} : vector<32x64xf32> to vector<1x64xf32>
    %1400 = arith.maximumf %1398, %1399 : vector<1x64xf32>
    %1401 = vector.extract_strided_slice %1357 {offsets = [12, 0], sizes = [1, 64], strides = [1, 1]} : vector<32x64xf32> to vector<1x64xf32>
    %1402 = arith.maximumf %1400, %1401 : vector<1x64xf32>
    %c11_520 = arith.constant 11 : index
    %c5_521 = arith.constant 5 : index
    %c0_522 = arith.constant 0 : index
    %1403 = vector.load %arg12[%c11_520, %c5_521, %c0_522] : memref<12x12x64xf32, #tpu.memory_space<vmem>>, vector<1x1x64xf32>
    %1404 = vector.shape_cast %1403 : vector<1x1x64xf32> to vector<1x64xf32>
    %1405 = vector.shape_cast %1402 : vector<1x64xf32> to vector<1x1x64xf32>
    tpu.vector_store %arg12[%c11_520, %c5_521, %c0_522], %1405 {strides = array<i32>} : memref<12x12x64xf32, #tpu.memory_space<vmem>>, vector<1x1x64xf32>,
    %1406 = vector.extract_strided_slice %1357 {offsets = [12, 0], sizes = [1, 64], strides = [1, 1]} : vector<32x64xf32> to vector<1x64xf32>
    %1407 = vector.extract_strided_slice %1357 {offsets = [13, 0], sizes = [1, 64], strides = [1, 1]} : vector<32x64xf32> to vector<1x64xf32>
    %1408 = arith.maximumf %1406, %1407 : vector<1x64xf32>
    %1409 = vector.extract_strided_slice %1357 {offsets = [14, 0], sizes = [1, 64], strides = [1, 1]} : vector<32x64xf32> to vector<1x64xf32>
    %1410 = arith.maximumf %1408, %1409 : vector<1x64xf32>
    %c11_523 = arith.constant 11 : index
    %c6_524 = arith.constant 6 : index
    %c0_525 = arith.constant 0 : index
    %1411 = vector.load %arg12[%c11_523, %c6_524, %c0_525] : memref<12x12x64xf32, #tpu.memory_space<vmem>>, vector<1x1x64xf32>
    %1412 = vector.shape_cast %1411 : vector<1x1x64xf32> to vector<1x64xf32>
    %1413 = vector.shape_cast %1410 : vector<1x64xf32> to vector<1x1x64xf32>
    tpu.vector_store %arg12[%c11_523, %c6_524, %c0_525], %1413 {strides = array<i32>} : memref<12x12x64xf32, #tpu.memory_space<vmem>>, vector<1x1x64xf32>,
    %1414 = vector.extract_strided_slice %1357 {offsets = [14, 0], sizes = [1, 64], strides = [1, 1]} : vector<32x64xf32> to vector<1x64xf32>
    %1415 = vector.extract_strided_slice %1357 {offsets = [15, 0], sizes = [1, 64], strides = [1, 1]} : vector<32x64xf32> to vector<1x64xf32>
    %1416 = arith.maximumf %1414, %1415 : vector<1x64xf32>
    %1417 = vector.extract_strided_slice %1357 {offsets = [16, 0], sizes = [1, 64], strides = [1, 1]} : vector<32x64xf32> to vector<1x64xf32>
    %1418 = arith.maximumf %1416, %1417 : vector<1x64xf32>
    %c11_526 = arith.constant 11 : index
    %c7_527 = arith.constant 7 : index
    %c0_528 = arith.constant 0 : index
    %1419 = vector.load %arg12[%c11_526, %c7_527, %c0_528] : memref<12x12x64xf32, #tpu.memory_space<vmem>>, vector<1x1x64xf32>
    %1420 = vector.shape_cast %1419 : vector<1x1x64xf32> to vector<1x64xf32>
    %1421 = vector.shape_cast %1418 : vector<1x64xf32> to vector<1x1x64xf32>
    tpu.vector_store %arg12[%c11_526, %c7_527, %c0_528], %1421 {strides = array<i32>} : memref<12x12x64xf32, #tpu.memory_space<vmem>>, vector<1x1x64xf32>,
    %1422 = vector.extract_strided_slice %1357 {offsets = [16, 0], sizes = [1, 64], strides = [1, 1]} : vector<32x64xf32> to vector<1x64xf32>
    %1423 = vector.extract_strided_slice %1357 {offsets = [17, 0], sizes = [1, 64], strides = [1, 1]} : vector<32x64xf32> to vector<1x64xf32>
    %1424 = arith.maximumf %1422, %1423 : vector<1x64xf32>
    %1425 = vector.extract_strided_slice %1357 {offsets = [18, 0], sizes = [1, 64], strides = [1, 1]} : vector<32x64xf32> to vector<1x64xf32>
    %1426 = arith.maximumf %1424, %1425 : vector<1x64xf32>
    %c11_529 = arith.constant 11 : index
    %c8_530 = arith.constant 8 : index
    %c0_531 = arith.constant 0 : index
    %1427 = vector.load %arg12[%c11_529, %c8_530, %c0_531] : memref<12x12x64xf32, #tpu.memory_space<vmem>>, vector<1x1x64xf32>
    %1428 = vector.shape_cast %1427 : vector<1x1x64xf32> to vector<1x64xf32>
    %1429 = vector.shape_cast %1426 : vector<1x64xf32> to vector<1x1x64xf32>
    tpu.vector_store %arg12[%c11_529, %c8_530, %c0_531], %1429 {strides = array<i32>} : memref<12x12x64xf32, #tpu.memory_space<vmem>>, vector<1x1x64xf32>,
    %1430 = vector.extract_strided_slice %1357 {offsets = [18, 0], sizes = [1, 64], strides = [1, 1]} : vector<32x64xf32> to vector<1x64xf32>
    %1431 = vector.extract_strided_slice %1357 {offsets = [19, 0], sizes = [1, 64], strides = [1, 1]} : vector<32x64xf32> to vector<1x64xf32>
    %1432 = arith.maximumf %1430, %1431 : vector<1x64xf32>
    %1433 = vector.extract_strided_slice %1357 {offsets = [20, 0], sizes = [1, 64], strides = [1, 1]} : vector<32x64xf32> to vector<1x64xf32>
    %1434 = arith.maximumf %1432, %1433 : vector<1x64xf32>
    %c11_532 = arith.constant 11 : index
    %c9_533 = arith.constant 9 : index
    %c0_534 = arith.constant 0 : index
    %1435 = vector.load %arg12[%c11_532, %c9_533, %c0_534] : memref<12x12x64xf32, #tpu.memory_space<vmem>>, vector<1x1x64xf32>
    %1436 = vector.shape_cast %1435 : vector<1x1x64xf32> to vector<1x64xf32>
    %1437 = vector.shape_cast %1434 : vector<1x64xf32> to vector<1x1x64xf32>
    tpu.vector_store %arg12[%c11_532, %c9_533, %c0_534], %1437 {strides = array<i32>} : memref<12x12x64xf32, #tpu.memory_space<vmem>>, vector<1x1x64xf32>,
    %1438 = vector.extract_strided_slice %1357 {offsets = [20, 0], sizes = [1, 64], strides = [1, 1]} : vector<32x64xf32> to vector<1x64xf32>
    %1439 = vector.extract_strided_slice %1357 {offsets = [21, 0], sizes = [1, 64], strides = [1, 1]} : vector<32x64xf32> to vector<1x64xf32>
    %1440 = arith.maximumf %1438, %1439 : vector<1x64xf32>
    %1441 = vector.extract_strided_slice %1357 {offsets = [22, 0], sizes = [1, 64], strides = [1, 1]} : vector<32x64xf32> to vector<1x64xf32>
    %1442 = arith.maximumf %1440, %1441 : vector<1x64xf32>
    %c11_535 = arith.constant 11 : index
    %c10_536 = arith.constant 10 : index
    %c0_537 = arith.constant 0 : index
    %1443 = vector.load %arg12[%c11_535, %c10_536, %c0_537] : memref<12x12x64xf32, #tpu.memory_space<vmem>>, vector<1x1x64xf32>
    %1444 = vector.shape_cast %1443 : vector<1x1x64xf32> to vector<1x64xf32>
    %1445 = vector.shape_cast %1442 : vector<1x64xf32> to vector<1x1x64xf32>
    tpu.vector_store %arg12[%c11_535, %c10_536, %c0_537], %1445 {strides = array<i32>} : memref<12x12x64xf32, #tpu.memory_space<vmem>>, vector<1x1x64xf32>,
    %1446 = vector.extract_strided_slice %1357 {offsets = [22, 0], sizes = [1, 64], strides = [1, 1]} : vector<32x64xf32> to vector<1x64xf32>
    %1447 = vector.extract_strided_slice %1357 {offsets = [23, 0], sizes = [1, 64], strides = [1, 1]} : vector<32x64xf32> to vector<1x64xf32>
    %1448 = arith.maximumf %1446, %1447 : vector<1x64xf32>
    %1449 = vector.extract_strided_slice %1357 {offsets = [24, 0], sizes = [1, 64], strides = [1, 1]} : vector<32x64xf32> to vector<1x64xf32>
    %1450 = arith.maximumf %1448, %1449 : vector<1x64xf32>
    %c11_538 = arith.constant 11 : index
    %c11_539 = arith.constant 11 : index
    %c0_540 = arith.constant 0 : index
    %1451 = vector.load %arg12[%c11_538, %c11_539, %c0_540] : memref<12x12x64xf32, #tpu.memory_space<vmem>>, vector<1x1x64xf32>
    %1452 = vector.shape_cast %1451 : vector<1x1x64xf32> to vector<1x64xf32>
    %1453 = vector.shape_cast %1450 : vector<1x64xf32> to vector<1x1x64xf32>
    tpu.vector_store %arg12[%c11_538, %c11_539, %c0_540], %1453 {strides = array<i32>} : memref<12x12x64xf32, #tpu.memory_space<vmem>>, vector<1x1x64xf32>,
    %c0_541 = arith.constant 0 : index
    %c0_542 = arith.constant 0 : index
    %c0_543 = arith.constant 0 : index
    %1454 = vector.load %arg12[%c0_541, %c0_542, %c0_543] : memref<12x12x64xf32, #tpu.memory_space<vmem>>, vector<8x8x64xf32>
    %1455 = vector.shape_cast %1454 : vector<8x8x64xf32> to vector<64x64xf32>
    %1456 = arith.truncf %1455 : vector<64x64xf32> to vector<64x64xbf16>
    %c0_544 = arith.constant 0 : index
    %c0_545 = arith.constant 0 : index
    %c0_546 = arith.constant 0 : index
    %1457 = vector.load %arg5[%c0_544, %c0_545, %c0_546] : memref<25x64x64xbf16, #tpu.memory_space<vmem>>, vector<1x64x64xbf16>
    %1458 = vector.shape_cast %1457 : vector<1x64x64xbf16> to vector<64x64xbf16>
    %cst_547 = arith.constant dense<0.000000e+00> : vector<64x64xf32>
    %1459 = tpu.matmul %1456, %1458, %cst_547 {dimension_numbers = #tpu.dot_dimension_numbers<[1], [0], [0], [1], [0, 0, 1, 1], [], []>} : vector<64x64xbf16>, vector<64x64xbf16>, vector<64x64xf32> -> vector<64x64xf32>
    %c0_548 = arith.constant 0 : index
    %c1_549 = arith.constant 1 : index
    %c0_550 = arith.constant 0 : index
    %1460 = vector.load %arg12[%c0_548, %c1_549, %c0_550] : memref<12x12x64xf32, #tpu.memory_space<vmem>>, vector<8x8x64xf32>
    %1461 = vector.shape_cast %1460 : vector<8x8x64xf32> to vector<64x64xf32>
    %1462 = arith.truncf %1461 : vector<64x64xf32> to vector<64x64xbf16>
    %c1_551 = arith.constant 1 : index
    %c0_552 = arith.constant 0 : index
    %c0_553 = arith.constant 0 : index
    %1463 = vector.load %arg5[%c1_551, %c0_552, %c0_553] : memref<25x64x64xbf16, #tpu.memory_space<vmem>>, vector<1x64x64xbf16>
    %1464 = vector.shape_cast %1463 : vector<1x64x64xbf16> to vector<64x64xbf16>
    %cst_554 = arith.constant dense<0.000000e+00> : vector<64x64xf32>
    %1465 = tpu.matmul %1462, %1464, %cst_554 {dimension_numbers = #tpu.dot_dimension_numbers<[1], [0], [0], [1], [0, 0, 1, 1], [], []>} : vector<64x64xbf16>, vector<64x64xbf16>, vector<64x64xf32> -> vector<64x64xf32>
    %1466 = arith.addf %1459, %1465 : vector<64x64xf32>
    %c0_555 = arith.constant 0 : index
    %c2_556 = arith.constant 2 : index
    %c0_557 = arith.constant 0 : index
    %1467 = vector.load %arg12[%c0_555, %c2_556, %c0_557] : memref<12x12x64xf32, #tpu.memory_space<vmem>>, vector<8x8x64xf32>
    %1468 = vector.shape_cast %1467 : vector<8x8x64xf32> to vector<64x64xf32>
    %1469 = arith.truncf %1468 : vector<64x64xf32> to vector<64x64xbf16>
    %c2_558 = arith.constant 2 : index
    %c0_559 = arith.constant 0 : index
    %c0_560 = arith.constant 0 : index
    %1470 = vector.load %arg5[%c2_558, %c0_559, %c0_560] : memref<25x64x64xbf16, #tpu.memory_space<vmem>>, vector<1x64x64xbf16>
    %1471 = vector.shape_cast %1470 : vector<1x64x64xbf16> to vector<64x64xbf16>
    %cst_561 = arith.constant dense<0.000000e+00> : vector<64x64xf32>
    %1472 = tpu.matmul %1469, %1471, %cst_561 {dimension_numbers = #tpu.dot_dimension_numbers<[1], [0], [0], [1], [0, 0, 1, 1], [], []>} : vector<64x64xbf16>, vector<64x64xbf16>, vector<64x64xf32> -> vector<64x64xf32>
    %1473 = arith.addf %1466, %1472 : vector<64x64xf32>
    %c0_562 = arith.constant 0 : index
    %c3_563 = arith.constant 3 : index
    %c0_564 = arith.constant 0 : index
    %1474 = vector.load %arg12[%c0_562, %c3_563, %c0_564] : memref<12x12x64xf32, #tpu.memory_space<vmem>>, vector<8x8x64xf32>
    %1475 = vector.shape_cast %1474 : vector<8x8x64xf32> to vector<64x64xf32>
    %1476 = arith.truncf %1475 : vector<64x64xf32> to vector<64x64xbf16>
    %c3_565 = arith.constant 3 : index
    %c0_566 = arith.constant 0 : index
    %c0_567 = arith.constant 0 : index
    %1477 = vector.load %arg5[%c3_565, %c0_566, %c0_567] : memref<25x64x64xbf16, #tpu.memory_space<vmem>>, vector<1x64x64xbf16>
    %1478 = vector.shape_cast %1477 : vector<1x64x64xbf16> to vector<64x64xbf16>
    %cst_568 = arith.constant dense<0.000000e+00> : vector<64x64xf32>
    %1479 = tpu.matmul %1476, %1478, %cst_568 {dimension_numbers = #tpu.dot_dimension_numbers<[1], [0], [0], [1], [0, 0, 1, 1], [], []>} : vector<64x64xbf16>, vector<64x64xbf16>, vector<64x64xf32> -> vector<64x64xf32>
    %1480 = arith.addf %1473, %1479 : vector<64x64xf32>
    %c0_569 = arith.constant 0 : index
    %c4_570 = arith.constant 4 : index
    %c0_571 = arith.constant 0 : index
    %1481 = vector.load %arg12[%c0_569, %c4_570, %c0_571] : memref<12x12x64xf32, #tpu.memory_space<vmem>>, vector<8x8x64xf32>
    %1482 = vector.shape_cast %1481 : vector<8x8x64xf32> to vector<64x64xf32>
    %1483 = arith.truncf %1482 : vector<64x64xf32> to vector<64x64xbf16>
    %c4_572 = arith.constant 4 : index
    %c0_573 = arith.constant 0 : index
    %c0_574 = arith.constant 0 : index
    %1484 = vector.load %arg5[%c4_572, %c0_573, %c0_574] : memref<25x64x64xbf16, #tpu.memory_space<vmem>>, vector<1x64x64xbf16>
    %1485 = vector.shape_cast %1484 : vector<1x64x64xbf16> to vector<64x64xbf16>
    %cst_575 = arith.constant dense<0.000000e+00> : vector<64x64xf32>
    %1486 = tpu.matmul %1483, %1485, %cst_575 {dimension_numbers = #tpu.dot_dimension_numbers<[1], [0], [0], [1], [0, 0, 1, 1], [], []>} : vector<64x64xbf16>, vector<64x64xbf16>, vector<64x64xf32> -> vector<64x64xf32>
    %1487 = arith.addf %1480, %1486 : vector<64x64xf32>
    %c1_576 = arith.constant 1 : index
    %c0_577 = arith.constant 0 : index
    %c0_578 = arith.constant 0 : index
    %1488 = vector.load %arg12[%c1_576, %c0_577, %c0_578] : memref<12x12x64xf32, #tpu.memory_space<vmem>>, vector<8x8x64xf32>
    %1489 = vector.shape_cast %1488 : vector<8x8x64xf32> to vector<64x64xf32>
    %1490 = arith.truncf %1489 : vector<64x64xf32> to vector<64x64xbf16>
    %c5_579 = arith.constant 5 : index
    %c0_580 = arith.constant 0 : index
    %c0_581 = arith.constant 0 : index
    %1491 = vector.load %arg5[%c5_579, %c0_580, %c0_581] : memref<25x64x64xbf16, #tpu.memory_space<vmem>>, vector<1x64x64xbf16>
    %1492 = vector.shape_cast %1491 : vector<1x64x64xbf16> to vector<64x64xbf16>
    %cst_582 = arith.constant dense<0.000000e+00> : vector<64x64xf32>
    %1493 = tpu.matmul %1490, %1492, %cst_582 {dimension_numbers = #tpu.dot_dimension_numbers<[1], [0], [0], [1], [0, 0, 1, 1], [], []>} : vector<64x64xbf16>, vector<64x64xbf16>, vector<64x64xf32> -> vector<64x64xf32>
    %1494 = arith.addf %1487, %1493 : vector<64x64xf32>
    %c1_583 = arith.constant 1 : index
    %c1_584 = arith.constant 1 : index
    %c0_585 = arith.constant 0 : index
    %1495 = vector.load %arg12[%c1_583, %c1_584, %c0_585] : memref<12x12x64xf32, #tpu.memory_space<vmem>>, vector<8x8x64xf32>
    %1496 = vector.shape_cast %1495 : vector<8x8x64xf32> to vector<64x64xf32>
    %1497 = arith.truncf %1496 : vector<64x64xf32> to vector<64x64xbf16>
    %c6_586 = arith.constant 6 : index
    %c0_587 = arith.constant 0 : index
    %c0_588 = arith.constant 0 : index
    %1498 = vector.load %arg5[%c6_586, %c0_587, %c0_588] : memref<25x64x64xbf16, #tpu.memory_space<vmem>>, vector<1x64x64xbf16>
    %1499 = vector.shape_cast %1498 : vector<1x64x64xbf16> to vector<64x64xbf16>
    %cst_589 = arith.constant dense<0.000000e+00> : vector<64x64xf32>
    %1500 = tpu.matmul %1497, %1499, %cst_589 {dimension_numbers = #tpu.dot_dimension_numbers<[1], [0], [0], [1], [0, 0, 1, 1], [], []>} : vector<64x64xbf16>, vector<64x64xbf16>, vector<64x64xf32> -> vector<64x64xf32>
    %1501 = arith.addf %1494, %1500 : vector<64x64xf32>
    %c1_590 = arith.constant 1 : index
    %c2_591 = arith.constant 2 : index
    %c0_592 = arith.constant 0 : index
    %1502 = vector.load %arg12[%c1_590, %c2_591, %c0_592] : memref<12x12x64xf32, #tpu.memory_space<vmem>>, vector<8x8x64xf32>
    %1503 = vector.shape_cast %1502 : vector<8x8x64xf32> to vector<64x64xf32>
    %1504 = arith.truncf %1503 : vector<64x64xf32> to vector<64x64xbf16>
    %c7_593 = arith.constant 7 : index
    %c0_594 = arith.constant 0 : index
    %c0_595 = arith.constant 0 : index
    %1505 = vector.load %arg5[%c7_593, %c0_594, %c0_595] : memref<25x64x64xbf16, #tpu.memory_space<vmem>>, vector<1x64x64xbf16>
    %1506 = vector.shape_cast %1505 : vector<1x64x64xbf16> to vector<64x64xbf16>
    %cst_596 = arith.constant dense<0.000000e+00> : vector<64x64xf32>
    %1507 = tpu.matmul %1504, %1506, %cst_596 {dimension_numbers = #tpu.dot_dimension_numbers<[1], [0], [0], [1], [0, 0, 1, 1], [], []>} : vector<64x64xbf16>, vector<64x64xbf16>, vector<64x64xf32> -> vector<64x64xf32>
    %1508 = arith.addf %1501, %1507 : vector<64x64xf32>
    %c1_597 = arith.constant 1 : index
    %c3_598 = arith.constant 3 : index
    %c0_599 = arith.constant 0 : index
    %1509 = vector.load %arg12[%c1_597, %c3_598, %c0_599] : memref<12x12x64xf32, #tpu.memory_space<vmem>>, vector<8x8x64xf32>
    %1510 = vector.shape_cast %1509 : vector<8x8x64xf32> to vector<64x64xf32>
    %1511 = arith.truncf %1510 : vector<64x64xf32> to vector<64x64xbf16>
    %c8_600 = arith.constant 8 : index
    %c0_601 = arith.constant 0 : index
    %c0_602 = arith.constant 0 : index
    %1512 = vector.load %arg5[%c8_600, %c0_601, %c0_602] : memref<25x64x64xbf16, #tpu.memory_space<vmem>>, vector<1x64x64xbf16>
    %1513 = vector.shape_cast %1512 : vector<1x64x64xbf16> to vector<64x64xbf16>
    %cst_603 = arith.constant dense<0.000000e+00> : vector<64x64xf32>
    %1514 = tpu.matmul %1511, %1513, %cst_603 {dimension_numbers = #tpu.dot_dimension_numbers<[1], [0], [0], [1], [0, 0, 1, 1], [], []>} : vector<64x64xbf16>, vector<64x64xbf16>, vector<64x64xf32> -> vector<64x64xf32>
    %1515 = arith.addf %1508, %1514 : vector<64x64xf32>
    %c1_604 = arith.constant 1 : index
    %c4_605 = arith.constant 4 : index
    %c0_606 = arith.constant 0 : index
    %1516 = vector.load %arg12[%c1_604, %c4_605, %c0_606] : memref<12x12x64xf32, #tpu.memory_space<vmem>>, vector<8x8x64xf32>
    %1517 = vector.shape_cast %1516 : vector<8x8x64xf32> to vector<64x64xf32>
    %1518 = arith.truncf %1517 : vector<64x64xf32> to vector<64x64xbf16>
    %c9_607 = arith.constant 9 : index
    %c0_608 = arith.constant 0 : index
    %c0_609 = arith.constant 0 : index
    %1519 = vector.load %arg5[%c9_607, %c0_608, %c0_609] : memref<25x64x64xbf16, #tpu.memory_space<vmem>>, vector<1x64x64xbf16>
    %1520 = vector.shape_cast %1519 : vector<1x64x64xbf16> to vector<64x64xbf16>
    %cst_610 = arith.constant dense<0.000000e+00> : vector<64x64xf32>
    %1521 = tpu.matmul %1518, %1520, %cst_610 {dimension_numbers = #tpu.dot_dimension_numbers<[1], [0], [0], [1], [0, 0, 1, 1], [], []>} : vector<64x64xbf16>, vector<64x64xbf16>, vector<64x64xf32> -> vector<64x64xf32>
    %1522 = arith.addf %1515, %1521 : vector<64x64xf32>
    %c2_611 = arith.constant 2 : index
    %c0_612 = arith.constant 0 : index
    %c0_613 = arith.constant 0 : index
    %1523 = vector.load %arg12[%c2_611, %c0_612, %c0_613] : memref<12x12x64xf32, #tpu.memory_space<vmem>>, vector<8x8x64xf32>
    %1524 = vector.shape_cast %1523 : vector<8x8x64xf32> to vector<64x64xf32>
    %1525 = arith.truncf %1524 : vector<64x64xf32> to vector<64x64xbf16>
    %c10_614 = arith.constant 10 : index
    %c0_615 = arith.constant 0 : index
    %c0_616 = arith.constant 0 : index
    %1526 = vector.load %arg5[%c10_614, %c0_615, %c0_616] : memref<25x64x64xbf16, #tpu.memory_space<vmem>>, vector<1x64x64xbf16>
    %1527 = vector.shape_cast %1526 : vector<1x64x64xbf16> to vector<64x64xbf16>
    %cst_617 = arith.constant dense<0.000000e+00> : vector<64x64xf32>
    %1528 = tpu.matmul %1525, %1527, %cst_617 {dimension_numbers = #tpu.dot_dimension_numbers<[1], [0], [0], [1], [0, 0, 1, 1], [], []>} : vector<64x64xbf16>, vector<64x64xbf16>, vector<64x64xf32> -> vector<64x64xf32>
    %1529 = arith.addf %1522, %1528 : vector<64x64xf32>
    %c2_618 = arith.constant 2 : index
    %c1_619 = arith.constant 1 : index
    %c0_620 = arith.constant 0 : index
    %1530 = vector.load %arg12[%c2_618, %c1_619, %c0_620] : memref<12x12x64xf32, #tpu.memory_space<vmem>>, vector<8x8x64xf32>
    %1531 = vector.shape_cast %1530 : vector<8x8x64xf32> to vector<64x64xf32>
    %1532 = arith.truncf %1531 : vector<64x64xf32> to vector<64x64xbf16>
    %c11_621 = arith.constant 11 : index
    %c0_622 = arith.constant 0 : index
    %c0_623 = arith.constant 0 : index
    %1533 = vector.load %arg5[%c11_621, %c0_622, %c0_623] : memref<25x64x64xbf16, #tpu.memory_space<vmem>>, vector<1x64x64xbf16>
    %1534 = vector.shape_cast %1533 : vector<1x64x64xbf16> to vector<64x64xbf16>
    %cst_624 = arith.constant dense<0.000000e+00> : vector<64x64xf32>
    %1535 = tpu.matmul %1532, %1534, %cst_624 {dimension_numbers = #tpu.dot_dimension_numbers<[1], [0], [0], [1], [0, 0, 1, 1], [], []>} : vector<64x64xbf16>, vector<64x64xbf16>, vector<64x64xf32> -> vector<64x64xf32>
    %1536 = arith.addf %1529, %1535 : vector<64x64xf32>
    %c2_625 = arith.constant 2 : index
    %c2_626 = arith.constant 2 : index
    %c0_627 = arith.constant 0 : index
    %1537 = vector.load %arg12[%c2_625, %c2_626, %c0_627] : memref<12x12x64xf32, #tpu.memory_space<vmem>>, vector<8x8x64xf32>
    %1538 = vector.shape_cast %1537 : vector<8x8x64xf32> to vector<64x64xf32>
    %1539 = arith.truncf %1538 : vector<64x64xf32> to vector<64x64xbf16>
    %c12 = arith.constant 12 : index
    %c0_628 = arith.constant 0 : index
    %c0_629 = arith.constant 0 : index
    %1540 = vector.load %arg5[%c12, %c0_628, %c0_629] : memref<25x64x64xbf16, #tpu.memory_space<vmem>>, vector<1x64x64xbf16>
    %1541 = vector.shape_cast %1540 : vector<1x64x64xbf16> to vector<64x64xbf16>
    %cst_630 = arith.constant dense<0.000000e+00> : vector<64x64xf32>
    %1542 = tpu.matmul %1539, %1541, %cst_630 {dimension_numbers = #tpu.dot_dimension_numbers<[1], [0], [0], [1], [0, 0, 1, 1], [], []>} : vector<64x64xbf16>, vector<64x64xbf16>, vector<64x64xf32> -> vector<64x64xf32>
    %1543 = arith.addf %1536, %1542 : vector<64x64xf32>
    %c2_631 = arith.constant 2 : index
    %c3_632 = arith.constant 3 : index
    %c0_633 = arith.constant 0 : index
    %1544 = vector.load %arg12[%c2_631, %c3_632, %c0_633] : memref<12x12x64xf32, #tpu.memory_space<vmem>>, vector<8x8x64xf32>
    %1545 = vector.shape_cast %1544 : vector<8x8x64xf32> to vector<64x64xf32>
    %1546 = arith.truncf %1545 : vector<64x64xf32> to vector<64x64xbf16>
    %c13 = arith.constant 13 : index
    %c0_634 = arith.constant 0 : index
    %c0_635 = arith.constant 0 : index
    %1547 = vector.load %arg5[%c13, %c0_634, %c0_635] : memref<25x64x64xbf16, #tpu.memory_space<vmem>>, vector<1x64x64xbf16>
    %1548 = vector.shape_cast %1547 : vector<1x64x64xbf16> to vector<64x64xbf16>
    %cst_636 = arith.constant dense<0.000000e+00> : vector<64x64xf32>
    %1549 = tpu.matmul %1546, %1548, %cst_636 {dimension_numbers = #tpu.dot_dimension_numbers<[1], [0], [0], [1], [0, 0, 1, 1], [], []>} : vector<64x64xbf16>, vector<64x64xbf16>, vector<64x64xf32> -> vector<64x64xf32>
    %1550 = arith.addf %1543, %1549 : vector<64x64xf32>
    %c2_637 = arith.constant 2 : index
    %c4_638 = arith.constant 4 : index
    %c0_639 = arith.constant 0 : index
    %1551 = vector.load %arg12[%c2_637, %c4_638, %c0_639] : memref<12x12x64xf32, #tpu.memory_space<vmem>>, vector<8x8x64xf32>
    %1552 = vector.shape_cast %1551 : vector<8x8x64xf32> to vector<64x64xf32>
    %1553 = arith.truncf %1552 : vector<64x64xf32> to vector<64x64xbf16>
    %c14 = arith.constant 14 : index
    %c0_640 = arith.constant 0 : index
    %c0_641 = arith.constant 0 : index
    %1554 = vector.load %arg5[%c14, %c0_640, %c0_641] : memref<25x64x64xbf16, #tpu.memory_space<vmem>>, vector<1x64x64xbf16>
    %1555 = vector.shape_cast %1554 : vector<1x64x64xbf16> to vector<64x64xbf16>
    %cst_642 = arith.constant dense<0.000000e+00> : vector<64x64xf32>
    %1556 = tpu.matmul %1553, %1555, %cst_642 {dimension_numbers = #tpu.dot_dimension_numbers<[1], [0], [0], [1], [0, 0, 1, 1], [], []>} : vector<64x64xbf16>, vector<64x64xbf16>, vector<64x64xf32> -> vector<64x64xf32>
    %1557 = arith.addf %1550, %1556 : vector<64x64xf32>
    %c3_643 = arith.constant 3 : index
    %c0_644 = arith.constant 0 : index
    %c0_645 = arith.constant 0 : index
    %1558 = vector.load %arg12[%c3_643, %c0_644, %c0_645] : memref<12x12x64xf32, #tpu.memory_space<vmem>>, vector<8x8x64xf32>
    %1559 = vector.shape_cast %1558 : vector<8x8x64xf32> to vector<64x64xf32>
    %1560 = arith.truncf %1559 : vector<64x64xf32> to vector<64x64xbf16>
    %c15 = arith.constant 15 : index
    %c0_646 = arith.constant 0 : index
    %c0_647 = arith.constant 0 : index
    %1561 = vector.load %arg5[%c15, %c0_646, %c0_647] : memref<25x64x64xbf16, #tpu.memory_space<vmem>>, vector<1x64x64xbf16>
    %1562 = vector.shape_cast %1561 : vector<1x64x64xbf16> to vector<64x64xbf16>
    %cst_648 = arith.constant dense<0.000000e+00> : vector<64x64xf32>
    %1563 = tpu.matmul %1560, %1562, %cst_648 {dimension_numbers = #tpu.dot_dimension_numbers<[1], [0], [0], [1], [0, 0, 1, 1], [], []>} : vector<64x64xbf16>, vector<64x64xbf16>, vector<64x64xf32> -> vector<64x64xf32>
    %1564 = arith.addf %1557, %1563 : vector<64x64xf32>
    %c3_649 = arith.constant 3 : index
    %c1_650 = arith.constant 1 : index
    %c0_651 = arith.constant 0 : index
    %1565 = vector.load %arg12[%c3_649, %c1_650, %c0_651] : memref<12x12x64xf32, #tpu.memory_space<vmem>>, vector<8x8x64xf32>
    %1566 = vector.shape_cast %1565 : vector<8x8x64xf32> to vector<64x64xf32>
    %1567 = arith.truncf %1566 : vector<64x64xf32> to vector<64x64xbf16>
    %c16_652 = arith.constant 16 : index
    %c0_653 = arith.constant 0 : index
    %c0_654 = arith.constant 0 : index
    %1568 = vector.load %arg5[%c16_652, %c0_653, %c0_654] : memref<25x64x64xbf16, #tpu.memory_space<vmem>>, vector<1x64x64xbf16>
    %1569 = vector.shape_cast %1568 : vector<1x64x64xbf16> to vector<64x64xbf16>
    %cst_655 = arith.constant dense<0.000000e+00> : vector<64x64xf32>
    %1570 = tpu.matmul %1567, %1569, %cst_655 {dimension_numbers = #tpu.dot_dimension_numbers<[1], [0], [0], [1], [0, 0, 1, 1], [], []>} : vector<64x64xbf16>, vector<64x64xbf16>, vector<64x64xf32> -> vector<64x64xf32>
    %1571 = arith.addf %1564, %1570 : vector<64x64xf32>
    %c3_656 = arith.constant 3 : index
    %c2_657 = arith.constant 2 : index
    %c0_658 = arith.constant 0 : index
    %1572 = vector.load %arg12[%c3_656, %c2_657, %c0_658] : memref<12x12x64xf32, #tpu.memory_space<vmem>>, vector<8x8x64xf32>
    %1573 = vector.shape_cast %1572 : vector<8x8x64xf32> to vector<64x64xf32>
    %1574 = arith.truncf %1573 : vector<64x64xf32> to vector<64x64xbf16>
    %c17 = arith.constant 17 : index
    %c0_659 = arith.constant 0 : index
    %c0_660 = arith.constant 0 : index
    %1575 = vector.load %arg5[%c17, %c0_659, %c0_660] : memref<25x64x64xbf16, #tpu.memory_space<vmem>>, vector<1x64x64xbf16>
    %1576 = vector.shape_cast %1575 : vector<1x64x64xbf16> to vector<64x64xbf16>
    %cst_661 = arith.constant dense<0.000000e+00> : vector<64x64xf32>
    %1577 = tpu.matmul %1574, %1576, %cst_661 {dimension_numbers = #tpu.dot_dimension_numbers<[1], [0], [0], [1], [0, 0, 1, 1], [], []>} : vector<64x64xbf16>, vector<64x64xbf16>, vector<64x64xf32> -> vector<64x64xf32>
    %1578 = arith.addf %1571, %1577 : vector<64x64xf32>
    %c3_662 = arith.constant 3 : index
    %c3_663 = arith.constant 3 : index
    %c0_664 = arith.constant 0 : index
    %1579 = vector.load %arg12[%c3_662, %c3_663, %c0_664] : memref<12x12x64xf32, #tpu.memory_space<vmem>>, vector<8x8x64xf32>
    %1580 = vector.shape_cast %1579 : vector<8x8x64xf32> to vector<64x64xf32>
    %1581 = arith.truncf %1580 : vector<64x64xf32> to vector<64x64xbf16>
    %c18 = arith.constant 18 : index
    %c0_665 = arith.constant 0 : index
    %c0_666 = arith.constant 0 : index
    %1582 = vector.load %arg5[%c18, %c0_665, %c0_666] : memref<25x64x64xbf16, #tpu.memory_space<vmem>>, vector<1x64x64xbf16>
    %1583 = vector.shape_cast %1582 : vector<1x64x64xbf16> to vector<64x64xbf16>
    %cst_667 = arith.constant dense<0.000000e+00> : vector<64x64xf32>
    %1584 = tpu.matmul %1581, %1583, %cst_667 {dimension_numbers = #tpu.dot_dimension_numbers<[1], [0], [0], [1], [0, 0, 1, 1], [], []>} : vector<64x64xbf16>, vector<64x64xbf16>, vector<64x64xf32> -> vector<64x64xf32>
    %1585 = arith.addf %1578, %1584 : vector<64x64xf32>
    %c3_668 = arith.constant 3 : index
    %c4_669 = arith.constant 4 : index
    %c0_670 = arith.constant 0 : index
    %1586 = vector.load %arg12[%c3_668, %c4_669, %c0_670] : memref<12x12x64xf32, #tpu.memory_space<vmem>>, vector<8x8x64xf32>
    %1587 = vector.shape_cast %1586 : vector<8x8x64xf32> to vector<64x64xf32>
    %1588 = arith.truncf %1587 : vector<64x64xf32> to vector<64x64xbf16>
    %c19 = arith.constant 19 : index
    %c0_671 = arith.constant 0 : index
    %c0_672 = arith.constant 0 : index
    %1589 = vector.load %arg5[%c19, %c0_671, %c0_672] : memref<25x64x64xbf16, #tpu.memory_space<vmem>>, vector<1x64x64xbf16>
    %1590 = vector.shape_cast %1589 : vector<1x64x64xbf16> to vector<64x64xbf16>
    %cst_673 = arith.constant dense<0.000000e+00> : vector<64x64xf32>
    %1591 = tpu.matmul %1588, %1590, %cst_673 {dimension_numbers = #tpu.dot_dimension_numbers<[1], [0], [0], [1], [0, 0, 1, 1], [], []>} : vector<64x64xbf16>, vector<64x64xbf16>, vector<64x64xf32> -> vector<64x64xf32>
    %1592 = arith.addf %1585, %1591 : vector<64x64xf32>
    %c4_674 = arith.constant 4 : index
    %c0_675 = arith.constant 0 : index
    %c0_676 = arith.constant 0 : index
    %1593 = vector.load %arg12[%c4_674, %c0_675, %c0_676] : memref<12x12x64xf32, #tpu.memory_space<vmem>>, vector<8x8x64xf32>
    %1594 = vector.shape_cast %1593 : vector<8x8x64xf32> to vector<64x64xf32>
    %1595 = arith.truncf %1594 : vector<64x64xf32> to vector<64x64xbf16>
    %c20 = arith.constant 20 : index
    %c0_677 = arith.constant 0 : index
    %c0_678 = arith.constant 0 : index
    %1596 = vector.load %arg5[%c20, %c0_677, %c0_678] : memref<25x64x64xbf16, #tpu.memory_space<vmem>>, vector<1x64x64xbf16>
    %1597 = vector.shape_cast %1596 : vector<1x64x64xbf16> to vector<64x64xbf16>
    %cst_679 = arith.constant dense<0.000000e+00> : vector<64x64xf32>
    %1598 = tpu.matmul %1595, %1597, %cst_679 {dimension_numbers = #tpu.dot_dimension_numbers<[1], [0], [0], [1], [0, 0, 1, 1], [], []>} : vector<64x64xbf16>, vector<64x64xbf16>, vector<64x64xf32> -> vector<64x64xf32>
    %1599 = arith.addf %1592, %1598 : vector<64x64xf32>
    %c4_680 = arith.constant 4 : index
    %c1_681 = arith.constant 1 : index
    %c0_682 = arith.constant 0 : index
    %1600 = vector.load %arg12[%c4_680, %c1_681, %c0_682] : memref<12x12x64xf32, #tpu.memory_space<vmem>>, vector<8x8x64xf32>
    %1601 = vector.shape_cast %1600 : vector<8x8x64xf32> to vector<64x64xf32>
    %1602 = arith.truncf %1601 : vector<64x64xf32> to vector<64x64xbf16>
    %c21 = arith.constant 21 : index
    %c0_683 = arith.constant 0 : index
    %c0_684 = arith.constant 0 : index
    %1603 = vector.load %arg5[%c21, %c0_683, %c0_684] : memref<25x64x64xbf16, #tpu.memory_space<vmem>>, vector<1x64x64xbf16>
    %1604 = vector.shape_cast %1603 : vector<1x64x64xbf16> to vector<64x64xbf16>
    %cst_685 = arith.constant dense<0.000000e+00> : vector<64x64xf32>
    %1605 = tpu.matmul %1602, %1604, %cst_685 {dimension_numbers = #tpu.dot_dimension_numbers<[1], [0], [0], [1], [0, 0, 1, 1], [], []>} : vector<64x64xbf16>, vector<64x64xbf16>, vector<64x64xf32> -> vector<64x64xf32>
    %1606 = arith.addf %1599, %1605 : vector<64x64xf32>
    %c4_686 = arith.constant 4 : index
    %c2_687 = arith.constant 2 : index
    %c0_688 = arith.constant 0 : index
    %1607 = vector.load %arg12[%c4_686, %c2_687, %c0_688] : memref<12x12x64xf32, #tpu.memory_space<vmem>>, vector<8x8x64xf32>
    %1608 = vector.shape_cast %1607 : vector<8x8x64xf32> to vector<64x64xf32>
    %1609 = arith.truncf %1608 : vector<64x64xf32> to vector<64x64xbf16>
    %c22 = arith.constant 22 : index
    %c0_689 = arith.constant 0 : index
    %c0_690 = arith.constant 0 : index
    %1610 = vector.load %arg5[%c22, %c0_689, %c0_690] : memref<25x64x64xbf16, #tpu.memory_space<vmem>>, vector<1x64x64xbf16>
    %1611 = vector.shape_cast %1610 : vector<1x64x64xbf16> to vector<64x64xbf16>
    %cst_691 = arith.constant dense<0.000000e+00> : vector<64x64xf32>
    %1612 = tpu.matmul %1609, %1611, %cst_691 {dimension_numbers = #tpu.dot_dimension_numbers<[1], [0], [0], [1], [0, 0, 1, 1], [], []>} : vector<64x64xbf16>, vector<64x64xbf16>, vector<64x64xf32> -> vector<64x64xf32>
    %1613 = arith.addf %1606, %1612 : vector<64x64xf32>
    %c4_692 = arith.constant 4 : index
    %c3_693 = arith.constant 3 : index
    %c0_694 = arith.constant 0 : index
    %1614 = vector.load %arg12[%c4_692, %c3_693, %c0_694] : memref<12x12x64xf32, #tpu.memory_space<vmem>>, vector<8x8x64xf32>
    %1615 = vector.shape_cast %1614 : vector<8x8x64xf32> to vector<64x64xf32>
    %1616 = arith.truncf %1615 : vector<64x64xf32> to vector<64x64xbf16>
    %c23 = arith.constant 23 : index
    %c0_695 = arith.constant 0 : index
    %c0_696 = arith.constant 0 : index
    %1617 = vector.load %arg5[%c23, %c0_695, %c0_696] : memref<25x64x64xbf16, #tpu.memory_space<vmem>>, vector<1x64x64xbf16>
    %1618 = vector.shape_cast %1617 : vector<1x64x64xbf16> to vector<64x64xbf16>
    %cst_697 = arith.constant dense<0.000000e+00> : vector<64x64xf32>
    %1619 = tpu.matmul %1616, %1618, %cst_697 {dimension_numbers = #tpu.dot_dimension_numbers<[1], [0], [0], [1], [0, 0, 1, 1], [], []>} : vector<64x64xbf16>, vector<64x64xbf16>, vector<64x64xf32> -> vector<64x64xf32>
    %1620 = arith.addf %1613, %1619 : vector<64x64xf32>
    %c4_698 = arith.constant 4 : index
    %c4_699 = arith.constant 4 : index
    %c0_700 = arith.constant 0 : index
    %1621 = vector.load %arg12[%c4_698, %c4_699, %c0_700] : memref<12x12x64xf32, #tpu.memory_space<vmem>>, vector<8x8x64xf32>
    %1622 = vector.shape_cast %1621 : vector<8x8x64xf32> to vector<64x64xf32>
    %1623 = arith.truncf %1622 : vector<64x64xf32> to vector<64x64xbf16>
    %c24_701 = arith.constant 24 : index
    %c0_702 = arith.constant 0 : index
    %c0_703 = arith.constant 0 : index
    %1624 = vector.load %arg5[%c24_701, %c0_702, %c0_703] : memref<25x64x64xbf16, #tpu.memory_space<vmem>>, vector<1x64x64xbf16>
    %1625 = vector.shape_cast %1624 : vector<1x64x64xbf16> to vector<64x64xbf16>
    %cst_704 = arith.constant dense<0.000000e+00> : vector<64x64xf32>
    %1626 = tpu.matmul %1623, %1625, %cst_704 {dimension_numbers = #tpu.dot_dimension_numbers<[1], [0], [0], [1], [0, 0, 1, 1], [], []>} : vector<64x64xbf16>, vector<64x64xbf16>, vector<64x64xf32> -> vector<64x64xf32>
    %1627 = arith.addf %1620, %1626 : vector<64x64xf32>
    %c0_705 = arith.constant 0 : index
    %c0_706 = arith.constant 0 : index
    %1628 = vector.load %arg6[%c0_705, %c0_706] : memref<1x64xf32, #tpu.memory_space<vmem>>, vector<1x64xf32>
    %c0_707 = arith.constant 0 : index
    %c0_708 = arith.constant 0 : index
    %1629 = vector.load %arg7[%c0_707, %c0_708] : memref<1x64xf32, #tpu.memory_space<vmem>>, vector<1x64xf32>
    %1630 = vector.extract_strided_slice %1627 {offsets = [0, 0], sizes = [8, 64], strides = [1, 1]} : vector<64x64xf32> to vector<8x64xf32>
    %1631 = vector.broadcast %1628 : vector<1x64xf32> to vector<8x64xf32>
    %1632 = arith.mulf %1630, %1631 : vector<8x64xf32>
    %1633 = vector.broadcast %1629 : vector<1x64xf32> to vector<8x64xf32>
    %1634 = arith.addf %1632, %1633 : vector<8x64xf32>
    %cst_709 = arith.constant 0.000000e+00 : f32
    %1635 = vector.broadcast %cst_709 : f32 to vector<8x64xf32>
    %1636 = arith.maximumf %1634, %1635 : vector<8x64xf32>
    %1637 = vector.extract_strided_slice %1627 {offsets = [8, 0], sizes = [8, 64], strides = [1, 1]} : vector<64x64xf32> to vector<8x64xf32>
    %1638 = vector.broadcast %1628 : vector<1x64xf32> to vector<8x64xf32>
    %1639 = arith.mulf %1637, %1638 : vector<8x64xf32>
    %1640 = vector.broadcast %1629 : vector<1x64xf32> to vector<8x64xf32>
    %1641 = arith.addf %1639, %1640 : vector<8x64xf32>
    %cst_710 = arith.constant 0.000000e+00 : f32
    %1642 = vector.broadcast %cst_710 : f32 to vector<8x64xf32>
    %1643 = arith.maximumf %1641, %1642 : vector<8x64xf32>
    %1644 = arith.maximumf %1636, %1643 : vector<8x64xf32>
    %1645 = vector.extract_strided_slice %1627 {offsets = [16, 0], sizes = [8, 64], strides = [1, 1]} : vector<64x64xf32> to vector<8x64xf32>
    %1646 = vector.broadcast %1628 : vector<1x64xf32> to vector<8x64xf32>
    %1647 = arith.mulf %1645, %1646 : vector<8x64xf32>
    %1648 = vector.broadcast %1629 : vector<1x64xf32> to vector<8x64xf32>
    %1649 = arith.addf %1647, %1648 : vector<8x64xf32>
    %cst_711 = arith.constant 0.000000e+00 : f32
    %1650 = vector.broadcast %cst_711 : f32 to vector<8x64xf32>
    %1651 = arith.maximumf %1649, %1650 : vector<8x64xf32>
    %1652 = arith.maximumf %1644, %1651 : vector<8x64xf32>
    %1653 = vector.extract_strided_slice %1652 {offsets = [0, 0], sizes = [1, 64], strides = [1, 1]} : vector<8x64xf32> to vector<1x64xf32>
    %1654 = vector.extract_strided_slice %1652 {offsets = [1, 0], sizes = [1, 64], strides = [1, 1]} : vector<8x64xf32> to vector<1x64xf32>
    %1655 = arith.maximumf %1653, %1654 : vector<1x64xf32>
    %1656 = vector.extract_strided_slice %1652 {offsets = [2, 0], sizes = [1, 64], strides = [1, 1]} : vector<8x64xf32> to vector<1x64xf32>
    %1657 = arith.maximumf %1655, %1656 : vector<1x64xf32>
    %c0_712 = arith.constant 0 : index
    %c0_713 = arith.constant 0 : index
    %c0_714 = arith.constant 0 : index
    %1658 = vector.load %arg13[%c0_712, %c0_713, %c0_714] : memref<3x3x64xf32, #tpu.memory_space<vmem>>, vector<1x1x64xf32>
    %1659 = vector.shape_cast %1658 : vector<1x1x64xf32> to vector<1x64xf32>
    %1660 = vector.shape_cast %1657 : vector<1x64xf32> to vector<1x1x64xf32>
    tpu.vector_store %arg13[%c0_712, %c0_713, %c0_714], %1660 {strides = array<i32>} : memref<3x3x64xf32, #tpu.memory_space<vmem>>, vector<1x1x64xf32>,
    %1661 = vector.extract_strided_slice %1652 {offsets = [2, 0], sizes = [1, 64], strides = [1, 1]} : vector<8x64xf32> to vector<1x64xf32>
    %1662 = vector.extract_strided_slice %1652 {offsets = [3, 0], sizes = [1, 64], strides = [1, 1]} : vector<8x64xf32> to vector<1x64xf32>
    %1663 = arith.maximumf %1661, %1662 : vector<1x64xf32>
    %1664 = vector.extract_strided_slice %1652 {offsets = [4, 0], sizes = [1, 64], strides = [1, 1]} : vector<8x64xf32> to vector<1x64xf32>
    %1665 = arith.maximumf %1663, %1664 : vector<1x64xf32>
    %c0_715 = arith.constant 0 : index
    %c1_716 = arith.constant 1 : index
    %c0_717 = arith.constant 0 : index
    %1666 = vector.load %arg13[%c0_715, %c1_716, %c0_717] : memref<3x3x64xf32, #tpu.memory_space<vmem>>, vector<1x1x64xf32>
    %1667 = vector.shape_cast %1666 : vector<1x1x64xf32> to vector<1x64xf32>
    %1668 = vector.shape_cast %1665 : vector<1x64xf32> to vector<1x1x64xf32>
    tpu.vector_store %arg13[%c0_715, %c1_716, %c0_717], %1668 {strides = array<i32>} : memref<3x3x64xf32, #tpu.memory_space<vmem>>, vector<1x1x64xf32>,
    %1669 = vector.extract_strided_slice %1652 {offsets = [4, 0], sizes = [1, 64], strides = [1, 1]} : vector<8x64xf32> to vector<1x64xf32>
    %1670 = vector.extract_strided_slice %1652 {offsets = [5, 0], sizes = [1, 64], strides = [1, 1]} : vector<8x64xf32> to vector<1x64xf32>
    %1671 = arith.maximumf %1669, %1670 : vector<1x64xf32>
    %1672 = vector.extract_strided_slice %1652 {offsets = [6, 0], sizes = [1, 64], strides = [1, 1]} : vector<8x64xf32> to vector<1x64xf32>
    %1673 = arith.maximumf %1671, %1672 : vector<1x64xf32>
    %c0_718 = arith.constant 0 : index
    %c2_719 = arith.constant 2 : index
    %c0_720 = arith.constant 0 : index
    %1674 = vector.load %arg13[%c0_718, %c2_719, %c0_720] : memref<3x3x64xf32, #tpu.memory_space<vmem>>, vector<1x1x64xf32>
    %1675 = vector.shape_cast %1674 : vector<1x1x64xf32> to vector<1x64xf32>
    %1676 = vector.shape_cast %1673 : vector<1x64xf32> to vector<1x1x64xf32>
    tpu.vector_store %arg13[%c0_718, %c2_719, %c0_720], %1676 {strides = array<i32>} : memref<3x3x64xf32, #tpu.memory_space<vmem>>, vector<1x1x64xf32>,
    %1677 = vector.extract_strided_slice %1627 {offsets = [16, 0], sizes = [8, 64], strides = [1, 1]} : vector<64x64xf32> to vector<8x64xf32>
    %1678 = vector.broadcast %1628 : vector<1x64xf32> to vector<8x64xf32>
    %1679 = arith.mulf %1677, %1678 : vector<8x64xf32>
    %1680 = vector.broadcast %1629 : vector<1x64xf32> to vector<8x64xf32>
    %1681 = arith.addf %1679, %1680 : vector<8x64xf32>
    %cst_721 = arith.constant 0.000000e+00 : f32
    %1682 = vector.broadcast %cst_721 : f32 to vector<8x64xf32>
    %1683 = arith.maximumf %1681, %1682 : vector<8x64xf32>
    %1684 = vector.extract_strided_slice %1627 {offsets = [24, 0], sizes = [8, 64], strides = [1, 1]} : vector<64x64xf32> to vector<8x64xf32>
    %1685 = vector.broadcast %1628 : vector<1x64xf32> to vector<8x64xf32>
    %1686 = arith.mulf %1684, %1685 : vector<8x64xf32>
    %1687 = vector.broadcast %1629 : vector<1x64xf32> to vector<8x64xf32>
    %1688 = arith.addf %1686, %1687 : vector<8x64xf32>
    %cst_722 = arith.constant 0.000000e+00 : f32
    %1689 = vector.broadcast %cst_722 : f32 to vector<8x64xf32>
    %1690 = arith.maximumf %1688, %1689 : vector<8x64xf32>
    %1691 = arith.maximumf %1683, %1690 : vector<8x64xf32>
    %1692 = vector.extract_strided_slice %1627 {offsets = [32, 0], sizes = [8, 64], strides = [1, 1]} : vector<64x64xf32> to vector<8x64xf32>
    %1693 = vector.broadcast %1628 : vector<1x64xf32> to vector<8x64xf32>
    %1694 = arith.mulf %1692, %1693 : vector<8x64xf32>
    %1695 = vector.broadcast %1629 : vector<1x64xf32> to vector<8x64xf32>
    %1696 = arith.addf %1694, %1695 : vector<8x64xf32>
    %cst_723 = arith.constant 0.000000e+00 : f32
    %1697 = vector.broadcast %cst_723 : f32 to vector<8x64xf32>
    %1698 = arith.maximumf %1696, %1697 : vector<8x64xf32>
    %1699 = arith.maximumf %1691, %1698 : vector<8x64xf32>
    %1700 = vector.extract_strided_slice %1699 {offsets = [0, 0], sizes = [1, 64], strides = [1, 1]} : vector<8x64xf32> to vector<1x64xf32>
    %1701 = vector.extract_strided_slice %1699 {offsets = [1, 0], sizes = [1, 64], strides = [1, 1]} : vector<8x64xf32> to vector<1x64xf32>
    %1702 = arith.maximumf %1700, %1701 : vector<1x64xf32>
    %1703 = vector.extract_strided_slice %1699 {offsets = [2, 0], sizes = [1, 64], strides = [1, 1]} : vector<8x64xf32> to vector<1x64xf32>
    %1704 = arith.maximumf %1702, %1703 : vector<1x64xf32>
    %c1_724 = arith.constant 1 : index
    %c0_725 = arith.constant 0 : index
    %c0_726 = arith.constant 0 : index
    %1705 = vector.load %arg13[%c1_724, %c0_725, %c0_726] : memref<3x3x64xf32, #tpu.memory_space<vmem>>, vector<1x1x64xf32>
    %1706 = vector.shape_cast %1705 : vector<1x1x64xf32> to vector<1x64xf32>
    %1707 = vector.shape_cast %1704 : vector<1x64xf32> to vector<1x1x64xf32>
    tpu.vector_store %arg13[%c1_724, %c0_725, %c0_726], %1707 {strides = array<i32>} : memref<3x3x64xf32, #tpu.memory_space<vmem>>, vector<1x1x64xf32>,
    %1708 = vector.extract_strided_slice %1699 {offsets = [2, 0], sizes = [1, 64], strides = [1, 1]} : vector<8x64xf32> to vector<1x64xf32>
    %1709 = vector.extract_strided_slice %1699 {offsets = [3, 0], sizes = [1, 64], strides = [1, 1]} : vector<8x64xf32> to vector<1x64xf32>
    %1710 = arith.maximumf %1708, %1709 : vector<1x64xf32>
    %1711 = vector.extract_strided_slice %1699 {offsets = [4, 0], sizes = [1, 64], strides = [1, 1]} : vector<8x64xf32> to vector<1x64xf32>
    %1712 = arith.maximumf %1710, %1711 : vector<1x64xf32>
    %c1_727 = arith.constant 1 : index
    %c1_728 = arith.constant 1 : index
    %c0_729 = arith.constant 0 : index
    %1713 = vector.load %arg13[%c1_727, %c1_728, %c0_729] : memref<3x3x64xf32, #tpu.memory_space<vmem>>, vector<1x1x64xf32>
    %1714 = vector.shape_cast %1713 : vector<1x1x64xf32> to vector<1x64xf32>
    %1715 = vector.shape_cast %1712 : vector<1x64xf32> to vector<1x1x64xf32>
    tpu.vector_store %arg13[%c1_727, %c1_728, %c0_729], %1715 {strides = array<i32>} : memref<3x3x64xf32, #tpu.memory_space<vmem>>, vector<1x1x64xf32>,
    %1716 = vector.extract_strided_slice %1699 {offsets = [4, 0], sizes = [1, 64], strides = [1, 1]} : vector<8x64xf32> to vector<1x64xf32>
    %1717 = vector.extract_strided_slice %1699 {offsets = [5, 0], sizes = [1, 64], strides = [1, 1]} : vector<8x64xf32> to vector<1x64xf32>
    %1718 = arith.maximumf %1716, %1717 : vector<1x64xf32>
    %1719 = vector.extract_strided_slice %1699 {offsets = [6, 0], sizes = [1, 64], strides = [1, 1]} : vector<8x64xf32> to vector<1x64xf32>
    %1720 = arith.maximumf %1718, %1719 : vector<1x64xf32>
    %c1_730 = arith.constant 1 : index
    %c2_731 = arith.constant 2 : index
    %c0_732 = arith.constant 0 : index
    %1721 = vector.load %arg13[%c1_730, %c2_731, %c0_732] : memref<3x3x64xf32, #tpu.memory_space<vmem>>, vector<1x1x64xf32>
    %1722 = vector.shape_cast %1721 : vector<1x1x64xf32> to vector<1x64xf32>
    %1723 = vector.shape_cast %1720 : vector<1x64xf32> to vector<1x1x64xf32>
    tpu.vector_store %arg13[%c1_730, %c2_731, %c0_732], %1723 {strides = array<i32>} : memref<3x3x64xf32, #tpu.memory_space<vmem>>, vector<1x1x64xf32>,
    %1724 = vector.extract_strided_slice %1627 {offsets = [32, 0], sizes = [8, 64], strides = [1, 1]} : vector<64x64xf32> to vector<8x64xf32>
    %1725 = vector.broadcast %1628 : vector<1x64xf32> to vector<8x64xf32>
    %1726 = arith.mulf %1724, %1725 : vector<8x64xf32>
    %1727 = vector.broadcast %1629 : vector<1x64xf32> to vector<8x64xf32>
    %1728 = arith.addf %1726, %1727 : vector<8x64xf32>
    %cst_733 = arith.constant 0.000000e+00 : f32
    %1729 = vector.broadcast %cst_733 : f32 to vector<8x64xf32>
    %1730 = arith.maximumf %1728, %1729 : vector<8x64xf32>
    %1731 = vector.extract_strided_slice %1627 {offsets = [40, 0], sizes = [8, 64], strides = [1, 1]} : vector<64x64xf32> to vector<8x64xf32>
    %1732 = vector.broadcast %1628 : vector<1x64xf32> to vector<8x64xf32>
    %1733 = arith.mulf %1731, %1732 : vector<8x64xf32>
    %1734 = vector.broadcast %1629 : vector<1x64xf32> to vector<8x64xf32>
    %1735 = arith.addf %1733, %1734 : vector<8x64xf32>
    %cst_734 = arith.constant 0.000000e+00 : f32
    %1736 = vector.broadcast %cst_734 : f32 to vector<8x64xf32>
    %1737 = arith.maximumf %1735, %1736 : vector<8x64xf32>
    %1738 = arith.maximumf %1730, %1737 : vector<8x64xf32>
    %1739 = vector.extract_strided_slice %1627 {offsets = [48, 0], sizes = [8, 64], strides = [1, 1]} : vector<64x64xf32> to vector<8x64xf32>
    %1740 = vector.broadcast %1628 : vector<1x64xf32> to vector<8x64xf32>
    %1741 = arith.mulf %1739, %1740 : vector<8x64xf32>
    %1742 = vector.broadcast %1629 : vector<1x64xf32> to vector<8x64xf32>
    %1743 = arith.addf %1741, %1742 : vector<8x64xf32>
    %cst_735 = arith.constant 0.000000e+00 : f32
    %1744 = vector.broadcast %cst_735 : f32 to vector<8x64xf32>
    %1745 = arith.maximumf %1743, %1744 : vector<8x64xf32>
    %1746 = arith.maximumf %1738, %1745 : vector<8x64xf32>
    %1747 = vector.extract_strided_slice %1746 {offsets = [0, 0], sizes = [1, 64], strides = [1, 1]} : vector<8x64xf32> to vector<1x64xf32>
    %1748 = vector.extract_strided_slice %1746 {offsets = [1, 0], sizes = [1, 64], strides = [1, 1]} : vector<8x64xf32> to vector<1x64xf32>
    %1749 = arith.maximumf %1747, %1748 : vector<1x64xf32>
    %1750 = vector.extract_strided_slice %1746 {offsets = [2, 0], sizes = [1, 64], strides = [1, 1]} : vector<8x64xf32> to vector<1x64xf32>
    %1751 = arith.maximumf %1749, %1750 : vector<1x64xf32>
    %c2_736 = arith.constant 2 : index
    %c0_737 = arith.constant 0 : index
    %c0_738 = arith.constant 0 : index
    %1752 = vector.load %arg13[%c2_736, %c0_737, %c0_738] : memref<3x3x64xf32, #tpu.memory_space<vmem>>, vector<1x1x64xf32>
    %1753 = vector.shape_cast %1752 : vector<1x1x64xf32> to vector<1x64xf32>
    %1754 = vector.shape_cast %1751 : vector<1x64xf32> to vector<1x1x64xf32>
    tpu.vector_store %arg13[%c2_736, %c0_737, %c0_738], %1754 {strides = array<i32>} : memref<3x3x64xf32, #tpu.memory_space<vmem>>, vector<1x1x64xf32>,
    %1755 = vector.extract_strided_slice %1746 {offsets = [2, 0], sizes = [1, 64], strides = [1, 1]} : vector<8x64xf32> to vector<1x64xf32>
    %1756 = vector.extract_strided_slice %1746 {offsets = [3, 0], sizes = [1, 64], strides = [1, 1]} : vector<8x64xf32> to vector<1x64xf32>
    %1757 = arith.maximumf %1755, %1756 : vector<1x64xf32>
    %1758 = vector.extract_strided_slice %1746 {offsets = [4, 0], sizes = [1, 64], strides = [1, 1]} : vector<8x64xf32> to vector<1x64xf32>
    %1759 = arith.maximumf %1757, %1758 : vector<1x64xf32>
    %c2_739 = arith.constant 2 : index
    %c1_740 = arith.constant 1 : index
    %c0_741 = arith.constant 0 : index
    %1760 = vector.load %arg13[%c2_739, %c1_740, %c0_741] : memref<3x3x64xf32, #tpu.memory_space<vmem>>, vector<1x1x64xf32>
    %1761 = vector.shape_cast %1760 : vector<1x1x64xf32> to vector<1x64xf32>
    %1762 = vector.shape_cast %1759 : vector<1x64xf32> to vector<1x1x64xf32>
    tpu.vector_store %arg13[%c2_739, %c1_740, %c0_741], %1762 {strides = array<i32>} : memref<3x3x64xf32, #tpu.memory_space<vmem>>, vector<1x1x64xf32>,
    %1763 = vector.extract_strided_slice %1746 {offsets = [4, 0], sizes = [1, 64], strides = [1, 1]} : vector<8x64xf32> to vector<1x64xf32>
    %1764 = vector.extract_strided_slice %1746 {offsets = [5, 0], sizes = [1, 64], strides = [1, 1]} : vector<8x64xf32> to vector<1x64xf32>
    %1765 = arith.maximumf %1763, %1764 : vector<1x64xf32>
    %1766 = vector.extract_strided_slice %1746 {offsets = [6, 0], sizes = [1, 64], strides = [1, 1]} : vector<8x64xf32> to vector<1x64xf32>
    %1767 = arith.maximumf %1765, %1766 : vector<1x64xf32>
    %c2_742 = arith.constant 2 : index
    %c2_743 = arith.constant 2 : index
    %c0_744 = arith.constant 0 : index
    %1768 = vector.load %arg13[%c2_742, %c2_743, %c0_744] : memref<3x3x64xf32, #tpu.memory_space<vmem>>, vector<1x1x64xf32>
    %1769 = vector.shape_cast %1768 : vector<1x1x64xf32> to vector<1x64xf32>
    %1770 = vector.shape_cast %1767 : vector<1x64xf32> to vector<1x1x64xf32>
    tpu.vector_store %arg13[%c2_742, %c2_743, %c0_744], %1770 {strides = array<i32>} : memref<3x3x64xf32, #tpu.memory_space<vmem>>, vector<1x1x64xf32>,
    %c0_745 = arith.constant 0 : index
    %c0_746 = arith.constant 0 : index
    %c0_747 = arith.constant 0 : index
    %1771 = vector.load %arg13[%c0_745, %c0_746, %c0_747] : memref<3x3x64xf32, #tpu.memory_space<vmem>>, vector<1x1x64xf32>
    %1772 = vector.shape_cast %1771 : vector<1x1x64xf32> to vector<1x64xf32>
    %1773 = arith.truncf %1772 : vector<1x64xf32> to vector<1x64xbf16>
    %c0_748 = arith.constant 0 : index
    %c0_749 = arith.constant 0 : index
    %c0_750 = arith.constant 0 : index
    %1774 = vector.load %arg8[%c0_748, %c0_749, %c0_750] : memref<9x64x128xbf16, #tpu.memory_space<vmem>>, vector<1x64x128xbf16>
    %1775 = vector.shape_cast %1774 : vector<1x64x128xbf16> to vector<64x128xbf16>
    %cst_751 = arith.constant dense<0.000000e+00> : vector<1x128xf32>
    %1776 = tpu.matmul %1773, %1775, %cst_751 {dimension_numbers = #tpu.dot_dimension_numbers<[1], [0], [0], [1], [0, 0, 1, 1], [], []>} : vector<1x64xbf16>, vector<64x128xbf16>, vector<1x128xf32> -> vector<1x128xf32>
    %c0_752 = arith.constant 0 : index
    %c1_753 = arith.constant 1 : index
    %c0_754 = arith.constant 0 : index
    %1777 = vector.load %arg13[%c0_752, %c1_753, %c0_754] : memref<3x3x64xf32, #tpu.memory_space<vmem>>, vector<1x1x64xf32>
    %1778 = vector.shape_cast %1777 : vector<1x1x64xf32> to vector<1x64xf32>
    %1779 = arith.truncf %1778 : vector<1x64xf32> to vector<1x64xbf16>
    %c1_755 = arith.constant 1 : index
    %c0_756 = arith.constant 0 : index
    %c0_757 = arith.constant 0 : index
    %1780 = vector.load %arg8[%c1_755, %c0_756, %c0_757] : memref<9x64x128xbf16, #tpu.memory_space<vmem>>, vector<1x64x128xbf16>
    %1781 = vector.shape_cast %1780 : vector<1x64x128xbf16> to vector<64x128xbf16>
    %cst_758 = arith.constant dense<0.000000e+00> : vector<1x128xf32>
    %1782 = tpu.matmul %1779, %1781, %cst_758 {dimension_numbers = #tpu.dot_dimension_numbers<[1], [0], [0], [1], [0, 0, 1, 1], [], []>} : vector<1x64xbf16>, vector<64x128xbf16>, vector<1x128xf32> -> vector<1x128xf32>
    %1783 = arith.addf %1776, %1782 : vector<1x128xf32>
    %c0_759 = arith.constant 0 : index
    %c2_760 = arith.constant 2 : index
    %c0_761 = arith.constant 0 : index
    %1784 = vector.load %arg13[%c0_759, %c2_760, %c0_761] : memref<3x3x64xf32, #tpu.memory_space<vmem>>, vector<1x1x64xf32>
    %1785 = vector.shape_cast %1784 : vector<1x1x64xf32> to vector<1x64xf32>
    %1786 = arith.truncf %1785 : vector<1x64xf32> to vector<1x64xbf16>
    %c2_762 = arith.constant 2 : index
    %c0_763 = arith.constant 0 : index
    %c0_764 = arith.constant 0 : index
    %1787 = vector.load %arg8[%c2_762, %c0_763, %c0_764] : memref<9x64x128xbf16, #tpu.memory_space<vmem>>, vector<1x64x128xbf16>
    %1788 = vector.shape_cast %1787 : vector<1x64x128xbf16> to vector<64x128xbf16>
    %cst_765 = arith.constant dense<0.000000e+00> : vector<1x128xf32>
    %1789 = tpu.matmul %1786, %1788, %cst_765 {dimension_numbers = #tpu.dot_dimension_numbers<[1], [0], [0], [1], [0, 0, 1, 1], [], []>} : vector<1x64xbf16>, vector<64x128xbf16>, vector<1x128xf32> -> vector<1x128xf32>
    %1790 = arith.addf %1783, %1789 : vector<1x128xf32>
    %c1_766 = arith.constant 1 : index
    %c0_767 = arith.constant 0 : index
    %c0_768 = arith.constant 0 : index
    %1791 = vector.load %arg13[%c1_766, %c0_767, %c0_768] : memref<3x3x64xf32, #tpu.memory_space<vmem>>, vector<1x1x64xf32>
    %1792 = vector.shape_cast %1791 : vector<1x1x64xf32> to vector<1x64xf32>
    %1793 = arith.truncf %1792 : vector<1x64xf32> to vector<1x64xbf16>
    %c3_769 = arith.constant 3 : index
    %c0_770 = arith.constant 0 : index
    %c0_771 = arith.constant 0 : index
    %1794 = vector.load %arg8[%c3_769, %c0_770, %c0_771] : memref<9x64x128xbf16, #tpu.memory_space<vmem>>, vector<1x64x128xbf16>
    %1795 = vector.shape_cast %1794 : vector<1x64x128xbf16> to vector<64x128xbf16>
    %cst_772 = arith.constant dense<0.000000e+00> : vector<1x128xf32>
    %1796 = tpu.matmul %1793, %1795, %cst_772 {dimension_numbers = #tpu.dot_dimension_numbers<[1], [0], [0], [1], [0, 0, 1, 1], [], []>} : vector<1x64xbf16>, vector<64x128xbf16>, vector<1x128xf32> -> vector<1x128xf32>
    %1797 = arith.addf %1790, %1796 : vector<1x128xf32>
    %c1_773 = arith.constant 1 : index
    %c1_774 = arith.constant 1 : index
    %c0_775 = arith.constant 0 : index
    %1798 = vector.load %arg13[%c1_773, %c1_774, %c0_775] : memref<3x3x64xf32, #tpu.memory_space<vmem>>, vector<1x1x64xf32>
    %1799 = vector.shape_cast %1798 : vector<1x1x64xf32> to vector<1x64xf32>
    %1800 = arith.truncf %1799 : vector<1x64xf32> to vector<1x64xbf16>
    %c4_776 = arith.constant 4 : index
    %c0_777 = arith.constant 0 : index
    %c0_778 = arith.constant 0 : index
    %1801 = vector.load %arg8[%c4_776, %c0_777, %c0_778] : memref<9x64x128xbf16, #tpu.memory_space<vmem>>, vector<1x64x128xbf16>
    %1802 = vector.shape_cast %1801 : vector<1x64x128xbf16> to vector<64x128xbf16>
    %cst_779 = arith.constant dense<0.000000e+00> : vector<1x128xf32>
    %1803 = tpu.matmul %1800, %1802, %cst_779 {dimension_numbers = #tpu.dot_dimension_numbers<[1], [0], [0], [1], [0, 0, 1, 1], [], []>} : vector<1x64xbf16>, vector<64x128xbf16>, vector<1x128xf32> -> vector<1x128xf32>
    %1804 = arith.addf %1797, %1803 : vector<1x128xf32>
    %c1_780 = arith.constant 1 : index
    %c2_781 = arith.constant 2 : index
    %c0_782 = arith.constant 0 : index
    %1805 = vector.load %arg13[%c1_780, %c2_781, %c0_782] : memref<3x3x64xf32, #tpu.memory_space<vmem>>, vector<1x1x64xf32>
    %1806 = vector.shape_cast %1805 : vector<1x1x64xf32> to vector<1x64xf32>
    %1807 = arith.truncf %1806 : vector<1x64xf32> to vector<1x64xbf16>
    %c5_783 = arith.constant 5 : index
    %c0_784 = arith.constant 0 : index
    %c0_785 = arith.constant 0 : index
    %1808 = vector.load %arg8[%c5_783, %c0_784, %c0_785] : memref<9x64x128xbf16, #tpu.memory_space<vmem>>, vector<1x64x128xbf16>
    %1809 = vector.shape_cast %1808 : vector<1x64x128xbf16> to vector<64x128xbf16>
    %cst_786 = arith.constant dense<0.000000e+00> : vector<1x128xf32>
    %1810 = tpu.matmul %1807, %1809, %cst_786 {dimension_numbers = #tpu.dot_dimension_numbers<[1], [0], [0], [1], [0, 0, 1, 1], [], []>} : vector<1x64xbf16>, vector<64x128xbf16>, vector<1x128xf32> -> vector<1x128xf32>
    %1811 = arith.addf %1804, %1810 : vector<1x128xf32>
    %c2_787 = arith.constant 2 : index
    %c0_788 = arith.constant 0 : index
    %c0_789 = arith.constant 0 : index
    %1812 = vector.load %arg13[%c2_787, %c0_788, %c0_789] : memref<3x3x64xf32, #tpu.memory_space<vmem>>, vector<1x1x64xf32>
    %1813 = vector.shape_cast %1812 : vector<1x1x64xf32> to vector<1x64xf32>
    %1814 = arith.truncf %1813 : vector<1x64xf32> to vector<1x64xbf16>
    %c6_790 = arith.constant 6 : index
    %c0_791 = arith.constant 0 : index
    %c0_792 = arith.constant 0 : index
    %1815 = vector.load %arg8[%c6_790, %c0_791, %c0_792] : memref<9x64x128xbf16, #tpu.memory_space<vmem>>, vector<1x64x128xbf16>
    %1816 = vector.shape_cast %1815 : vector<1x64x128xbf16> to vector<64x128xbf16>
    %cst_793 = arith.constant dense<0.000000e+00> : vector<1x128xf32>
    %1817 = tpu.matmul %1814, %1816, %cst_793 {dimension_numbers = #tpu.dot_dimension_numbers<[1], [0], [0], [1], [0, 0, 1, 1], [], []>} : vector<1x64xbf16>, vector<64x128xbf16>, vector<1x128xf32> -> vector<1x128xf32>
    %1818 = arith.addf %1811, %1817 : vector<1x128xf32>
    %c2_794 = arith.constant 2 : index
    %c1_795 = arith.constant 1 : index
    %c0_796 = arith.constant 0 : index
    %1819 = vector.load %arg13[%c2_794, %c1_795, %c0_796] : memref<3x3x64xf32, #tpu.memory_space<vmem>>, vector<1x1x64xf32>
    %1820 = vector.shape_cast %1819 : vector<1x1x64xf32> to vector<1x64xf32>
    %1821 = arith.truncf %1820 : vector<1x64xf32> to vector<1x64xbf16>
    %c7_797 = arith.constant 7 : index
    %c0_798 = arith.constant 0 : index
    %c0_799 = arith.constant 0 : index
    %1822 = vector.load %arg8[%c7_797, %c0_798, %c0_799] : memref<9x64x128xbf16, #tpu.memory_space<vmem>>, vector<1x64x128xbf16>
    %1823 = vector.shape_cast %1822 : vector<1x64x128xbf16> to vector<64x128xbf16>
    %cst_800 = arith.constant dense<0.000000e+00> : vector<1x128xf32>
    %1824 = tpu.matmul %1821, %1823, %cst_800 {dimension_numbers = #tpu.dot_dimension_numbers<[1], [0], [0], [1], [0, 0, 1, 1], [], []>} : vector<1x64xbf16>, vector<64x128xbf16>, vector<1x128xf32> -> vector<1x128xf32>
    %1825 = arith.addf %1818, %1824 : vector<1x128xf32>
    %c2_801 = arith.constant 2 : index
    %c2_802 = arith.constant 2 : index
    %c0_803 = arith.constant 0 : index
    %1826 = vector.load %arg13[%c2_801, %c2_802, %c0_803] : memref<3x3x64xf32, #tpu.memory_space<vmem>>, vector<1x1x64xf32>
    %1827 = vector.shape_cast %1826 : vector<1x1x64xf32> to vector<1x64xf32>
    %1828 = arith.truncf %1827 : vector<1x64xf32> to vector<1x64xbf16>
    %c8_804 = arith.constant 8 : index
    %c0_805 = arith.constant 0 : index
    %c0_806 = arith.constant 0 : index
    %1829 = vector.load %arg8[%c8_804, %c0_805, %c0_806] : memref<9x64x128xbf16, #tpu.memory_space<vmem>>, vector<1x64x128xbf16>
    %1830 = vector.shape_cast %1829 : vector<1x64x128xbf16> to vector<64x128xbf16>
    %cst_807 = arith.constant dense<0.000000e+00> : vector<1x128xf32>
    %1831 = tpu.matmul %1828, %1830, %cst_807 {dimension_numbers = #tpu.dot_dimension_numbers<[1], [0], [0], [1], [0, 0, 1, 1], [], []>} : vector<1x64xbf16>, vector<64x128xbf16>, vector<1x128xf32> -> vector<1x128xf32>
    %1832 = arith.addf %1825, %1831 : vector<1x128xf32>
    %c0_808 = arith.constant 0 : index
    %c0_809 = arith.constant 0 : index
    %1833 = vector.load %arg9[%c0_808, %c0_809] : memref<1x128xf32, #tpu.memory_space<vmem>>, vector<1x128xf32>
    %1834 = arith.addf %1832, %1833 : vector<1x128xf32>
    %c0_810 = arith.constant 0 : index
    %c0_811 = arith.constant 0 : index
    %c0_812 = arith.constant 0 : index
    %1835 = vector.load %arg10[%c0_810, %c0_811, %c0_812] : memref<1x1x128xf32, #tpu.memory_space<vmem>>, vector<1x1x128xf32>
    %1836 = vector.shape_cast %1835 : vector<1x1x128xf32> to vector<1x128xf32>
    %1837 = vector.shape_cast %1834 : vector<1x128xf32> to vector<1x1x128xf32>
    tpu.vector_store %arg10[%c0_810, %c0_811, %c0_812], %1837 {strides = array<i32>} : memref<1x1x128xf32, #tpu.memory_space<vmem>>, vector<1x1x128xf32>,
    return
  }
  func.func @transform_0(%arg0: i32) -> (i32, i32, i32, i32) {
    %c0_i32 = arith.constant 0 : i32
    %c0_i32_0 = arith.constant 0 : i32
    %c0_i32_1 = arith.constant 0 : i32
    %c0_i32_2 = arith.constant 0 : i32
    return %arg0, %c0_i32, %c0_i32_0, %c0_i32_1 : i32, i32, i32, i32
  }
  func.func @transform_1(%arg0: i32) -> (i32, i32) {
    %c0_i32 = arith.constant 0 : i32
    %c0_i32_0 = arith.constant 0 : i32
    %c0_i32_1 = arith.constant 0 : i32
    return %c0_i32, %c0_i32_0 : i32, i32
  }
  func.func @transform_2(%arg0: i32) -> (i32, i32) {
    %c0_i32 = arith.constant 0 : i32
    %c0_i32_0 = arith.constant 0 : i32
    %c0_i32_1 = arith.constant 0 : i32
    return %c0_i32, %c0_i32_0 : i32, i32
  }
  func.func @transform_3(%arg0: i32) -> (i32, i32) {
    %c0_i32 = arith.constant 0 : i32
    %c0_i32_0 = arith.constant 0 : i32
    %c0_i32_1 = arith.constant 0 : i32
    return %c0_i32, %c0_i32_0 : i32, i32
  }
  func.func @transform_4(%arg0: i32) -> (i32, i32, i32) {
    %c0_i32 = arith.constant 0 : i32
    %c0_i32_0 = arith.constant 0 : i32
    %c0_i32_1 = arith.constant 0 : i32
    %c0_i32_2 = arith.constant 0 : i32
    return %c0_i32, %c0_i32_0, %c0_i32_1 : i32, i32, i32
  }
  func.func @transform_5(%arg0: i32) -> (i32, i32) {
    %c0_i32 = arith.constant 0 : i32
    %c0_i32_0 = arith.constant 0 : i32
    %c0_i32_1 = arith.constant 0 : i32
    return %c0_i32, %c0_i32_0 : i32, i32
  }
  func.func @transform_6(%arg0: i32) -> (i32, i32) {
    %c0_i32 = arith.constant 0 : i32
    %c0_i32_0 = arith.constant 0 : i32
    %c0_i32_1 = arith.constant 0 : i32
    return %c0_i32, %c0_i32_0 : i32, i32
  }
  func.func @transform_7(%arg0: i32) -> (i32, i32, i32) {
    %c0_i32 = arith.constant 0 : i32
    %c0_i32_0 = arith.constant 0 : i32
    %c0_i32_1 = arith.constant 0 : i32
    %c0_i32_2 = arith.constant 0 : i32
    return %c0_i32, %c0_i32_0, %c0_i32_1 : i32, i32, i32
  }
  func.func @transform_8(%arg0: i32) -> (i32, i32) {
    %c0_i32 = arith.constant 0 : i32
    %c0_i32_0 = arith.constant 0 : i32
    %c0_i32_1 = arith.constant 0 : i32
    return %c0_i32, %c0_i32_0 : i32, i32
  }
  func.func @transform_9(%arg0: i32) -> (i32, i32, i32) {
    %c0_i32 = arith.constant 0 : i32
    %c0_i32_0 = arith.constant 0 : i32
    %c0_i32_1 = arith.constant 0 : i32
    return %arg0, %c0_i32, %c0_i32_0 : i32, i32, i32
  }
}

</mosaic_0001>

<bundles_post_ra>
// kernel: feature_extractor_forward.1
= control target key start
LH: loop header
LB: loop body
LE: loop exit
PB: predicated region body
PF: predicated region fallthrough
CT: control target
= control target key end

     0   :  { %14 = vsyncpa [#allocation6], 0  ;;  %s11042_s0 = inlined_call_operand.vmem [shape: bf16[2,25,32,48], index: 0, kind: input, shape index: {}]   ;;  %s11043_s1 = inlined_call_operand.vmem [shape: bf16[48,64], index: 1, kind: input, shape index: {}]   ;;  %s11044_s2 = inlined_call_operand.vmem [shape: f32[1,64], index: 2, kind: input, shape index: {}]   ;;  %s11045_s3 = inlined_call_operand.vmem [shape: f32[1,64], index: 3, kind: input, shape index: {}]   ;;  %s11046_s4 = inlined_call_operand.vmem [shape: bf16[25,64,64], index: 4, kind: input, shape index: {}]   ;;  %s11047_s5 = inlined_call_operand.vmem [shape: f32[1,64], index: 5, kind: input, shape index: {}]   ;;  %s11048_s6 = inlined_call_operand.vmem [shape: f32[1,64], index: 6, kind: input, shape index: {}]   ;;  %s11049_s7 = inlined_call_operand.vmem [shape: bf16[9,64,128], index: 7, kind: input, shape index: {}]   ;;  %s11050_s8 = inlined_call_operand.vmem [shape: f32[1,128], index: 8, kind: input, shape index: {}]   ;;  %s11051_s9 = inlined_call_operand.hbm [shape: f32[2,1,128], index: 9, kind: output, shape index: {}]  }
   0x1   :  { %16 = vsyncpa [#allocation6 + $0x1], 0  ;;  %s8978_s30 = smov 0   ;;  %s8980_s10 = smov 0  }
   0x2   :  { %s8982_s11 = smov 0   ;;  %s8984_s12 = smov 0  }
   0x3 LB: > { %s8999_s13 = sadd.s32 4294967295, %s8923_s12   ;;  %s6770_s14 = sadd.s32 4294967294, %s8923_s12   ;;  %s8923_s12 = sphi %s8984_s12, %s11166_s12   ;;  %s8919_s11 = sphi %s8982_s11, %s11165_s11   ;;  %s8915_s10 = sphi %s8980_s10, %s11164_s10   ;;  %s8911_s30 = sphi %s8978_s30, %s11163_s30  }
   0x4   : > { %s9003_s15 = sadd.s32 1, %s8923_s12   ;;  %s223_s16 = sadd.s32 1, %s8919_s11 }
   0x5   : > { %s220_s17 = ssub.s32 %s8923_s12, %s9003_s15  ;;  %p233_p0 = scmp.ne.s32.totalorder %s8919_s11, %s8915_s10 }
   0x6   : > { %p221_p1 = scmp.eq.s32.totalorder %s220_s17, 0  ;;  %p234_p2 = scmp.eq.s32.totalorder %s8999_s13, 1 }
   0x7   : > { %p239_p3 = scmp.ne.s32.totalorder %s8915_s10, %s8911_s30  ;;  %p240_p4 = scmp.eq.s32.totalorder %s6770_s14, 1 }
   0x8   : > { %s9014_s18 = scalar_select %p221_p1, %s8919_s11, %s223_s16  }
   0x9   : > { %p9016_p5 = por %p234_p2, %p233_p0  ;;  %p9020_p6 = por %p240_p4, %p239_p3 }
   0xa   : > { %p6773_p7 = scmp.ge.s32.totalorder %s8923_s12, 1  ;;  %p290_p8 = scmp.lt.s32.totalorder %s8923_s12, 3 }
   0xc   : > { %p291_p9 = pnand %p6773_p7, %p290_p8 }
   0xe   : > { %294 = sbr.rel (%p291_p9) target bundleno = 1373 (0x55d), region = 56 }
  0x15   : > { %v8635_v0 = vld [vmem:[%s11043_s1] sm:$0xff]   ;;  %p325_p10 = scmp.lt.s32.totalorder %s8999_s13, 1  ;;  %v8636_v1 = vld [vmem:[%s11043_s1 + $0x8] sm:$0xff]   ;;  %v8637_v2 = vld [vmem:[%s11043_s1 + $0x10] sm:$0xff]   ;;  %vm467_vm0 = vcmask 392192   ;;  %vm677_vm1 = vcmask 523264  }
  0x16   : > { %7770 = vmatprep.subr.bf16.mxu0 %v8635_v0  ;;  %v8640_v4 = vld [vmem:[%s11043_s1] sm:$0xff]   ;;  %v8645_v7 = vld [vmem:[%s11043_s1 + $0x8] sm:$0xff]   ;;  %v8652_v8 = vld [vmem:[%s11043_s1 + $0x10] sm:$0xff]   ;;  %vm1641_vm2 = vcmask 516096   ;;  %vm1645_vm3 = vcmask 520196   ;;  %vm1651_vm4 = vcmask 522246  }
  0x17   : > { %s326_s25 = scalar_select %p325_p10, %s8999_s13, 1  ;;  %7771 = vmatpush3.bf16.msra.mxu0 %v8635_v0  ;;  %v8659_v11 = vld [vmem:[%s11043_s1] sm:$0xff]   ;;  %v8664_v26 = vld [vmem:[%s11043_s1 + $0x8] sm:$0xff]   ;;  %v8671_v27 = vld [vmem:[%s11043_s1 + $0x10] sm:$0xff]   ;;  %vm1643_vm5 = vcmask 518146   ;;  %vm8926_vm6 = vmmov 0  }
  0x18   : > { %7772 = vmatprep.subr.bf16.mxu0 %v8636_v1  ;;  %v8690_v40 = vld [vmem:[%s11043_s1] sm:$0xff]   ;;  %v8693_v45 = vld [vmem:[%s11043_s1 + $0x8] sm:$0xff]   ;;  %v8694_v46 = vld [vmem:[%s11043_s1 + $0x10] sm:$0xff]   ;;  %s7460_s17 = sshll.u32 %s8999_s13, 4  ;;  %s8927_s26 = smov [#allocation5]  }
  0x19   : > { %s8593_s28 = smul.u32 400, %s326_s25  ;;  %v8697_v57 = vld [vmem:[%s11046_s4 + $0x20] sm:$0xff]   ;;  %v8700_v61 = vld [vmem:[%s11046_s4 + $0x48] sm:$0xff]   ;;  %v8702_v62 = vld [vmem:[%s11046_s4 + $0x50] sm:$0xff]   ;;  %s11000_s24 = scalar_lea.hbm %s11051_s9, %s7460_s17 }
  0x1a   : > { %v8698_v58 = vld [vmem:[%s11046_s4 + $0x40] sm:$0xff]   ;;  %s8865_s27 = sshll.u32 %s8927_s26, 4  ;;  %s8866_s27 = int_to_ptr.vmem [resolvable:$false] %s8865_s27 }
  0x1b   : > { %s9040_s16 = scalar_lea.vmem %s11042_s0, %s8593_s28  ;;  %7773 = vmatpush3.bf16.msra.mxu0 %v8636_v1  ;;  %7926 = vmatprep.subr.bf16.mxu1 %v8698_v58  ;;  %v8704_v1 = vld [vmem:[%s11046_s4 + $0x58] sm:$0xff]   ;;  %s323_s28 = sand.u32 1, %s8915_s10  }
  0x1c   : > { %v8638_v3 = vld [vmem:[%s9040_s16] sm:$0xff]   ;;  %7774 = vmatprep.subr.bf16.mxu0 %v8637_v2  ;;  %v8639_v5 = vld [vmem:[%s9040_s16 + $0x8] sm:$0xff]   ;;  %v8641_v6 = vld [vmem:[%s9040_s16 + $0x10] sm:$0xff]   ;;  %7927 = vmatpush3.bf16.msra.mxu1 %v8698_v58  ;;  %s6703_s25 = scalar_lea.sflag [#allocation6], %s323_s28  ;;  %s8867_s29 = scalar_lea.vmem %s8866_s27, 32 }
  0x1d   : > { %7776 = vmatprep.mubr.msk.bf16.mxu0 %vm467_vm0, %v8638_v3  ;;  %v8642_v9 = vld [vmem:[%s9040_s16 + $0x18] sm:$0xff]   ;;  %v8643_v10 = vld [vmem:[%s9040_s16 + $0x20] sm:$0xff]   ;;  %v8644_v12 = vld [vmem:[%s9040_s16 + $0x28] sm:$0xff]   ;;  %7928 = vmatprep.subr.bf16.mxu1 %v8700_v61 }
  0x1e   : > { %v8646_v13 = vld [vmem:[%s9040_s16 + $0x30] sm:$0xff]   ;;  %v8647_v14 = vld [vmem:[%s9040_s16 + $0x38] sm:$0xff]   ;;  %v8648_v15 = vld [vmem:[%s9040_s16 + $0x40] sm:$0xff]  }
  0x1f   : > { %7775 = vmatpush3.bf16.msra.mxu0 %v8637_v2  ;;  %v8649_v16 = vld [vmem:[%s9040_s16 + $0x48] sm:$0xff]   ;;  %v8650_v17 = vld [vmem:[%s9040_s16 + $0x50] sm:$0xff]   ;;  %v8651_v18 = vld [vmem:[%s9040_s16 + $0x58] sm:$0xff]  }
  0x20   : > { %7808 = vmatprep.subr.bf16.mxu0 %v8640_v4  ;;  %v8653_v19 = vld [vmem:[%s9040_s16 + $0x60] sm:$0xff]   ;;  %v8654_v20 = vld [vmem:[%s9040_s16 + $0x68] sm:$0xff]   ;;  %v8655_v21 = vld [vmem:[%s9040_s16 + $0x70] sm:$0xff]   ;;  %7929 = vmatpush3.bf16.msra.mxu1 %v8700_v61 }
  0x21   : > { %v8656_v22 = vld [vmem:[%s9040_s16 + $0x78] sm:$0xff]   ;;  %v8657_v23 = vld [vmem:[%s9040_s16 + $0x80] sm:$0xff]   ;;  %v8658_v24 = vld [vmem:[%s9040_s16 + $0x88] sm:$0xff]   ;;  %7930 = vmatprep.subr.bf16.mxu1 %v8702_v62 }
  0x22   : > { %7777 = vmatmul.mubr.msk.bf16.vlgmr.msra.gmra.mrb[0].mxu0 %vm467_vm0, %v8639_v5  ;;  %v8660_v25 = vld [vmem:[%s9040_s16 + $0x90] sm:$0xff]   ;;  %v8661_v28 = vld [vmem:[%s9040_s16 + $0x98] sm:$0xff]   ;;  %v8662_v29 = vld [vmem:[%s9040_s16 + $0xa0] sm:$0xff]  }
  0x23   : > { %7809 = vmatpush3.bf16.msra.mxu0 %v8640_v4  ;;  %7780 = vmatprep.mubr.msk.bf16.mxu0 %vm467_vm0, %v8641_v6  ;;  %v8663_v30 = vld [vmem:[%s9040_s16 + $0xa8] sm:$0xff]   ;;  %v8665_v31 = vld [vmem:[%s9040_s16 + $0xb0] sm:$0xff]   ;;  %v8666_v32 = vld [vmem:[%s9040_s16 + $0xb8] sm:$0xff]  }
  0x24   : > { %7810 = vmatprep.subr.bf16.mxu0 %v8645_v7  ;;  %v8667_v33 = vld [vmem:[%s9040_s16 + $0xc0] sm:$0xff]   ;;  %v8668_v34 = vld [vmem:[%s9040_s16 + $0xc8] sm:$0xff]   ;;  %v8669_v35 = vld [vmem:[%s9040_s16 + $0xd0] sm:$0xff]   ;;  %7931 = vmatpush3.bf16.msra.mxu1 %v8702_v62 }
  0x25   : > { %v8670_v36 = vld [vmem:[%s9040_s16 + $0xd8] sm:$0xff]   ;;  %v8672_v37 = vld [vmem:[%s9040_s16 + $0xe0] sm:$0xff]   ;;  %v8673_v38 = vld [vmem:[%s9040_s16 + $0xe8] sm:$0xff]   ;;  %7932 = vmatprep.subr.bf16.mxu1 %v8704_v1 }
  0x26   : > { %v8674_v39 = vld [vmem:[%s9040_s16 + $0xf0] sm:$0xff]   ;;  %v8675_v41 = vld [vmem:[%s9040_s16 + $0xf8] sm:$0xff]   ;;  %v8676_v42 = vld [vmem:[%s9040_s16 + $0x100] sm:$0xff]  }
  0x27   : > { %7811 = vmatpush3.bf16.msra.mxu0 %v8645_v7  ;;  %v8677_v43 = vld [vmem:[%s9040_s16 + $0x108] sm:$0xff]   ;;  %v8678_v44 = vld [vmem:[%s9040_s16 + $0x110] sm:$0xff]   ;;  %v8679_v47 = vld [vmem:[%s9040_s16 + $0x118] sm:$0xff]  }
  0x28   : > { %7812 = vmatprep.subr.bf16.mxu0 %v8652_v8  ;;  %v8680_v48 = vld [vmem:[%s9040_s16 + $0x120] sm:$0xff]   ;;  %v8681_v49 = vld [vmem:[%s9040_s16 + $0x128] sm:$0xff]   ;;  %v8682_v50 = vld [vmem:[%s9040_s16 + $0x130] sm:$0xff]   ;;  %7933 = vmatpush3.bf16.msra.mxu1 %v8704_v1 }
  0x29   : > { %v8683_v51 = vld [vmem:[%s9040_s16 + $0x138] sm:$0xff]   ;;  %v8684_v52 = vld [vmem:[%s9040_s16 + $0x140] sm:$0xff]   ;;  %v8685_v53 = vld [vmem:[%s9040_s16 + $0x148] sm:$0xff]  }
  0x2a   : > { %7781 = vmatmul.mubr.msk.bf16.gmra.mrb[4].mxu0 %vm467_vm0, %v8642_v9  ;;  %v8686_v54 = vld [vmem:[%s9040_s16 + $0x150] sm:$0xff]   ;;  %v8687_v55 = vld [vmem:[%s9040_s16 + $0x158] sm:$0xff]   ;;  %v8688_v56 = vld [vmem:[%s9040_s16 + $0x160] sm:$0xff]  }
  0x2b   : > { %7784 = vmatprep.mubr.msk.bf16.mxu0 %vm467_vm0, %v8643_v10  ;;  %7813 = vmatpush3.bf16.msra.mxu0 %v8652_v8  ;;  %v8689_v59 = vld [vmem:[%s9040_s16 + $0x168] sm:$0xff]   ;;  %v8691_v60 = vld [vmem:[%s9040_s16 + $0x170] sm:$0xff]   ;;  %v8692_v63 = vld [vmem:[%s9040_s16 + $0x178] sm:$0xff]  }
  0x2c   : > { %7846 = vmatprep.subr.bf16.mxu0 %v8659_v11  ;;  %v8695_v0 = vld [vmem:[%s9040_s16 + $0x180] sm:$0xff]   ;;  %v8696_v2 = vld [vmem:[%s9040_s16 + $0x188] sm:$0xff]   ;;  %v8701_v4 = vld [vmem:[%s11046_s4 + $0x30] sm:$0xff]   ;;  %s324_s16 = scalar_lea.vmem [#allocation5], %s323_s28 }
  0x2d   : > { %v8699_v3 = vld [vmem:[%s11046_s4 + $0x28] sm:$0xff]   ;;  %v8703_v5 = vld [vmem:[%s11046_s4 + $0x38] sm:$0xff]   ;;  %s6715_s21 = sshll.u32 %s324_s16, 4  ;;  %s11002_s21 = int_to_ptr.vmem [resolvable:$true] %s6715_s21 }
  0x2e   : > { %s8861_s13 = scalar_lea.vmem %s11002_s21, 16  ;;  %p8868_p0 = scmp.lt.s32.totalorder %s11002_s21, %s8866_s27 }
  0x2f   : > { %p8862_p11 = scmp.ne.s32.totalorder %s11002_s21, %s8861_s13  ;;  %p8869_p1 = scmp.lt.s32.totalorder %s8867_s29, %s8861_s13 }
  0x31   : > { %p8863_p12 = pnand %p8862_p11, %p9016_p5  ;;  %p8870_p2 = por %p8869_p1, %p8868_p0 }
  0x32   : > { %7785 = vmatmul.mubr.msk.bf16.gmra.mrb[8].mxu0 %vm467_vm0, %v8644_v12 }
  0x33   : > { %7788 = vmatprep.mubr.msk.bf16.mxu0 %vm467_vm0, %v8646_v13  ;;  %p8864_p13 = pneg %p8863_p12 }
  0x35   : > { %p8871_p3 = pnand %p8870_p2, %p8864_p13 }
  0x3a   : > { %7789 = vmatmul.mubr.msk.bf16.gmra.mrb[12].mxu0 %vm467_vm0, %v8647_v14  ;;  %v9204_v14 = vld [vmem:[%s11044_s2] ss:$0 sm:$0xff] }
  0x3b   : > { %7792 = vmatprep.mubr.msk.bf16.mxu0 %vm467_vm0, %v8648_v15 }
  0x42   : > { %7793 = vmatmul.mubr.msk.bf16.gmra.mrb[16].mxu0 %vm467_vm0, %v8649_v16 }
  0x43   : > { %7796 = vmatprep.mubr.msk.bf16.mxu0 %vm467_vm0, %v8650_v17 }
  0x4a   : > { %7797 = vmatmul.mubr.msk.bf16.gmra.mrb[20].mxu0 %vm467_vm0, %v8651_v18 }
  0x4b   : > { %7800 = vmatprep.mubr.msk.bf16.mxu0 %vm467_vm0, %v8653_v19 }
  0x52   : > { %7801 = vmatmul.mubr.msk.bf16.gmra.mrb[24].mxu0 %vm467_vm0, %v8654_v20 }
  0x53   : > { %7804 = vmatprep.mubr.msk.bf16.mxu0 %vm467_vm0, %v8655_v21 }
  0x5a   : > { %7805 = vmatmul.mubr.msk.bf16.gmra.mrb[28].mxu0 %vm467_vm0, %v8656_v22 }
  0x5b   : > { %7814 = vmatprep.mubr.msk.bf16.mxu0 %vm467_vm0, %v8657_v23 }
  0x62   : > { %7815 = vmatmul.mubr.msk.bf16.vlgmr.msra.gmra.mrb[32].mxu0 %vm467_vm0, %v8658_v24 }
  0x63   : > { %7847 = vmatpush3.bf16.msra.mxu0 %v8659_v11  ;;  %7818 = vmatprep.mubr.msk.bf16.mxu0 %vm467_vm0, %v8660_v25 }
  0x64   : > { %7848 = vmatprep.subr.bf16.mxu0 %v8664_v26 }
  0x67   : > { %7849 = vmatpush3.bf16.msra.mxu0 %v8664_v26 }
  0x68   : > { %7850 = vmatprep.subr.bf16.mxu0 %v8671_v27 }
  0x6a   : > { %7819 = vmatmul.mubr.msk.bf16.gmra.mrb[36].mxu0 %vm467_vm0, %v8661_v28 }
  0x6b   : > { %7822 = vmatprep.mubr.msk.bf16.mxu0 %vm467_vm0, %v8662_v29  ;;  %7851 = vmatpush3.bf16.msra.mxu0 %v8671_v27 }
  0x6c   : > { %7884 = vmatprep.subr.bf16.mxu0 %v8690_v40 }
  0x72   : > { %7823 = vmatmul.mubr.msk.bf16.gmra.mrb[40].mxu0 %vm467_vm0, %v8663_v30 }
  0x73   : > { %7826 = vmatprep.mubr.msk.bf16.mxu0 %vm467_vm0, %v8665_v31  ;;  %v9216_v31 = vld [vmem:[%s11045_s3] ss:$0 sm:$0xff] }
  0x7a   : > { %7827 = vmatmul.mubr.msk.bf16.gmra.mrb[44].mxu0 %vm467_vm0, %v8666_v32 }
  0x7b   : > { %7830 = vmatprep.mubr.msk.bf16.mxu0 %vm467_vm0, %v8667_v33 }
  0x82   : > { %7831 = vmatmul.mubr.msk.bf16.gmra.mrb[48].mxu0 %vm467_vm0, %v8668_v34 }
  0x83   : > { %7834 = vmatprep.mubr.msk.bf16.mxu0 %vm467_vm0, %v8669_v35 }
  0x8a   : > { %7835 = vmatmul.mubr.msk.bf16.gmra.mrb[52].mxu0 %vm467_vm0, %v8670_v36 }
  0x8b   : > { %7838 = vmatprep.mubr.msk.bf16.mxu0 %vm467_vm0, %v8672_v37 }
  0x92   : > { %7839 = vmatmul.mubr.msk.bf16.gmra.mrb[56].mxu0 %vm467_vm0, %v8673_v38 }
  0x93   : > { %7842 = vmatprep.mubr.msk.bf16.mxu0 %vm467_vm0, %v8674_v39 }
  0x9a   : > { %7843 = vmatmul.mubr.msk.bf16.gmra.mrb[60].mxu0 %vm467_vm0, %v8675_v41 }
  0x9b   : > { %7852 = vmatprep.mubr.msk.bf16.mxu0 %vm467_vm0, %v8676_v42 }
  0xa2   : > { %7853 = vmatmul.mubr.msk.bf16.vlgmr.msra.gmra.mrb[64].mxu0 %vm467_vm0, %v8677_v43 }
  0xa3   : > { %7856 = vmatprep.mubr.msk.bf16.mxu0 %vm467_vm0, %v8678_v44  ;;  %7885 = vmatpush3.bf16.msra.mxu0 %v8690_v40 }
  0xa4   : > { %7886 = vmatprep.subr.bf16.mxu0 %v8693_v45 }
  0xa7   : > { %7887 = vmatpush3.bf16.msra.mxu0 %v8693_v45 }
  0xa8   : > { %7888 = vmatprep.subr.bf16.mxu0 %v8694_v46 }
  0xaa   : > { %7857 = vmatmul.mubr.msk.bf16.gmra.mrb[68].mxu0 %vm467_vm0, %v8679_v47 }
  0xab   : > { %7860 = vmatprep.mubr.msk.bf16.mxu0 %vm467_vm0, %v8680_v48  ;;  %7889 = vmatpush3.bf16.msra.mxu0 %v8694_v46 }
  0xac   : > { %7894 = vmatprep.subr.bf16.mxu0 %v8697_v57 }
  0xb2   : > { %7861 = vmatmul.mubr.msk.bf16.gmra.mrb[72].mxu0 %vm467_vm0, %v8681_v49 }
  0xb3   : > { %7864 = vmatprep.mubr.msk.bf16.mxu0 %vm467_vm0, %v8682_v50 }
  0xba   : > { %7865 = vmatmul.mubr.msk.bf16.gmra.mrb[76].mxu0 %vm467_vm0, %v8683_v51 }
  0xbb   : > { %7868 = vmatprep.mubr.msk.bf16.mxu0 %vm467_vm0, %v8684_v52 }
  0xc2   : > { %7869 = vmatmul.mubr.msk.bf16.gmra.mrb[80].mxu0 %vm467_vm0, %v8685_v53 }
  0xc3   : > { %7872 = vmatprep.mubr.msk.bf16.mxu0 %vm467_vm0, %v8686_v54 }
  0xca   : > { %7873 = vmatmul.mubr.msk.bf16.gmra.mrb[84].mxu0 %vm467_vm0, %v8687_v55 }
  0xcb   : > { %7876 = vmatprep.mubr.msk.bf16.mxu0 %vm467_vm0, %v8688_v56 }
  0xd2   : > { %7877 = vmatmul.mubr.msk.bf16.gmra.mrb[88].mxu0 %vm467_vm0, %v8689_v59 }
  0xd3   : > { %7880 = vmatprep.mubr.msk.bf16.mxu0 %vm467_vm0, %v8691_v60 }
  0xda   : > { %7881 = vmatmul.mubr.msk.bf16.gmra.mrb[92].mxu0 %vm467_vm0, %v8692_v63 }
  0xdb   : > { %7890 = vmatprep.mubr.msk.bf16.mxu0 %vm467_vm0, %v8695_v0 }
  0xe2   : > { %7891 = vmatmul.mubr.msk.bf16.vlgmr.msra.gmra.mrb[96].mxu0 %vm467_vm0, %v8696_v2 }
  0xe3   : > { %7895 = vmatpush3.bf16.msra.mxu0 %v8697_v57 }
  0xe4   : > { %7896 = vmatprep.subr.bf16.mxu0 %v8699_v3 }
  0xe7   : > { %7897 = vmatpush3.bf16.msra.mxu0 %v8699_v3 }
  0xe8   : > { %7898 = vmatprep.subr.bf16.mxu0 %v8701_v4 }
  0xeb   : > { %7899 = vmatpush3.bf16.msra.mxu0 %v8701_v4 }
  0xec   : > { %7900 = vmatprep.subr.bf16.mxu0 %v8703_v5 }
  0xef   : > { %7901 = vmatpush3.bf16.msra.mxu0 %v8703_v5 }
  0xf5   : > { %v7778_v6 = vpop.f32.mrb[0].mxu0 }
  0xf6   : > { %680 = vst.msk [vmem:[#allocation2 + $0x10] sm:$0xff] %vm677_vm1, %v7778_v6  ;;  %v550_v7 = vpop.f32.mrb[1].mxu0 }
  0xf7   : > { %678 = vst.msk [vmem:[#allocation2] sm:$0xff] %vm677_vm1, %v550_v7  ;;  %v7779_v8 = vpop.f32.mrb[2].mxu0 }
  0xf8   : > { %681 = vst.msk [vmem:[#allocation2 + $0x18] sm:$0xff] %vm677_vm1, %v7779_v8  ;;  %v553_v9 = vpop.f32.mrb[3].mxu0 }
  0xf9   : > { %679 = vst.msk [vmem:[#allocation2 + $0x8] sm:$0xff] %vm677_vm1, %v553_v9 }
  0xfd   : > { %v7782_v10 = vpop.f32.mrb[4].mxu0  ;;  %v1568_v15 = vld [vmem:[#allocation2 + $0x10] sm:$0xff] }
  0xfe   : > { %684 = vst.msk [vmem:[#allocation2 + $0x30] sm:$0xff] %vm677_vm1, %v7782_v10  ;;  %v566_v11 = vpop.f32.mrb[5].mxu0  ;;  %v1566_v18 = vld [vmem:[#allocation2] sm:$0xff]  ;;  %v1578_v26 = vmul.f32 %v9204_v14, %v1568_v15 }
  0xff   : > { %682 = vst.msk [vmem:[#allocation2 + $0x20] sm:$0xff] %vm677_vm1, %v566_v11  ;;  %v7783_v12 = vpop.f32.mrb[6].mxu0  ;;  %v1569_v22 = vld [vmem:[#allocation2 + $0x18] sm:$0xff]  ;;  %v1576_v32 = vmul.f32 %v9204_v14, %v1566_v18  ;;  %v9267_v18 = vld [vmem:[%s11046_s4 + $0x60] sm:$0xff]  }
 0x100   : > { %685 = vst.msk [vmem:[#allocation2 + $0x38] sm:$0xff] %vm677_vm1, %v7783_v12  ;;  %v569_v13 = vpop.f32.mrb[7].mxu0  ;;  %v1567_v27 = vld [vmem:[#allocation2 + $0x8] sm:$0xff]  ;;  %v1579_v34 = vmul.f32 %v9204_v14, %v1569_v22  ;;  %v1588_v38 = vadd.f32 %v9216_v31, %v1578_v26  ;;  %7942 = vmatprep.subr.bf16.mxu1 %v9267_v18 }
 0x101   : > { %683 = vst.msk [vmem:[#allocation2 + $0x28] sm:$0xff] %vm677_vm1, %v569_v13  ;;  %v1577_v36 = vmul.f32 %v9204_v14, %v1567_v27  ;;  %v1586_v40 = vadd.f32 %v9216_v31, %v1576_v32 }
 0x102   : > { %v1589_v44 = vadd.f32 %v9216_v31, %v1579_v34  ;;  %v1592_v54 = vmax.f32 %v1588_v38, 0.0 }
 0x103   : > { %v1587_v49 = vadd.f32 %v9216_v31, %v1577_v36  ;;  %v1590_v60 = vmax.f32 %v1586_v40, 0.0 }
 0x104   : > { %v1593_v0 = vmax.f32 %v1589_v44, 0.0 }
 0x105   : > { %v1596_v16 = vld [vmem:[#allocation2 + $0x30] sm:$0xff]  ;;  %v7786_v17 = vpop.f32.mrb[8].mxu0  ;;  %v1591_v4 = vmax.f32 %v1587_v49, 0.0 }
 0x106   : > { %v1600_v19 = vmul.f32 %v9204_v14, %v1596_v16  ;;  %v1594_v20 = vld [vmem:[#allocation2 + $0x20] sm:$0xff]  ;;  %688 = vst.msk [vmem:[#allocation2 + $0x50] sm:$0xff] %vm677_vm1, %v7786_v17  ;;  %v582_v21 = vpop.f32.mrb[9].mxu0 }
 0x107   : > { %v1598_v23 = vmul.f32 %v9204_v14, %v1594_v20  ;;  %v1597_v24 = vld [vmem:[#allocation2 + $0x38] sm:$0xff]  ;;  %686 = vst.msk [vmem:[#allocation2 + $0x40] sm:$0xff] %vm677_vm1, %v582_v21  ;;  %v7787_v25 = vpop.f32.mrb[10].mxu0  ;;  %v9262_v17 = vld [vmem:[%s11046_s4] sm:$0xff]  }
 0x108   : > { %v1601_v28 = vmul.f32 %v9204_v14, %v1597_v24  ;;  %v1595_v29 = vld [vmem:[#allocation2 + $0x28] sm:$0xff]  ;;  %689 = vst.msk [vmem:[#allocation2 + $0x58] sm:$0xff] %vm677_vm1, %v7787_v25  ;;  %v585_v30 = vpop.f32.mrb[11].mxu0  ;;  %v1604_v35 = vadd.f32 %v9216_v31, %v1600_v19  ;;  %7910 = vmatprep.subr.bf16.mxu0 %v9262_v17 }
 0x109   : > { %v1599_v33 = vmul.f32 %v9204_v14, %v1595_v29  ;;  %687 = vst.msk [vmem:[#allocation2 + $0x48] sm:$0xff] %vm677_vm1, %v585_v30  ;;  %v1602_v37 = vadd.f32 %v9216_v31, %v1598_v23 }
 0x10a   : > { %v1605_v39 = vadd.f32 %v9216_v31, %v1601_v28  ;;  %v1608_v45 = vmax.f32 %v1604_v35, 0.0 }
 0x10b   : > { %v1603_v41 = vadd.f32 %v9216_v31, %v1599_v33  ;;  %v1606_v50 = vmax.f32 %v1602_v37, 0.0 }
 0x10c   : > { %v1609_v55 = vmax.f32 %v1605_v39, 0.0  ;;  %v1612_v1 = vmax.f32 %v1592_v54, %v1608_v45 }
 0x10d   : > { %v1616_v42 = vld [vmem:[#allocation2 + $0x50] sm:$0xff]  ;;  %v7790_v43 = vpop.f32.mrb[12].mxu0  ;;  %v1607_v61 = vmax.f32 %v1603_v41, 0.0  ;;  %v1610_v5 = vmax.f32 %v1590_v60, %v1606_v50 }
 0x10e   : > { %v1620_v46 = vmul.f32 %v9204_v14, %v1616_v42  ;;  %v1614_v47 = vld [vmem:[#allocation2 + $0x40] sm:$0xff]  ;;  %692 = vst.msk [vmem:[#allocation2 + $0x70] sm:$0xff] %vm677_vm1, %v7790_v43  ;;  %v598_v48 = vpop.f32.mrb[13].mxu0  ;;  %v1613_v8 = vmax.f32 %v1593_v0, %v1609_v55 }
 0x10f   : > { %v1618_v51 = vmul.f32 %v9204_v14, %v1614_v47  ;;  %v1617_v52 = vld [vmem:[#allocation2 + $0x58] sm:$0xff]  ;;  %690 = vst.msk [vmem:[#allocation2 + $0x60] sm:$0xff] %vm677_vm1, %v598_v48  ;;  %v7791_v53 = vpop.f32.mrb[14].mxu0  ;;  %v1611_v11 = vmax.f32 %v1591_v4, %v1607_v61 }
 0x110   : > { %v9236_v56 = vadd.f32 %v9216_v31, %v1620_v46  ;;  %v1621_v57 = vmul.f32 %v9204_v14, %v1617_v52  ;;  %v1615_v58 = vld [vmem:[#allocation2 + $0x48] sm:$0xff]  ;;  %693 = vst.msk [vmem:[#allocation2 + $0x78] sm:$0xff] %vm677_vm1, %v7791_v53  ;;  %v601_v59 = vpop.f32.mrb[15].mxu0 }
 0x111   : > { %v9241_v62 = vadd.f32 %v9216_v31, %v1618_v51  ;;  %v1619_v63 = vmul.f32 %v9204_v14, %v1615_v58  ;;  %691 = vst.msk [vmem:[#allocation2 + $0x68] sm:$0xff] %vm677_vm1, %v601_v59 }
 0x112   : > { %v1628_v2 = vmax.f32 %v9236_v56, 0.0  ;;  %v9247_v3 = vadd.f32 %v9216_v31, %v1621_v57 }
 0x113   : > { %v1626_v6 = vmax.f32 %v9241_v62, 0.0  ;;  %v9251_v7 = vadd.f32 %v9216_v31, %v1619_v63 }
 0x114   : > { %v1632_v9 = vmax.f32 %v1612_v1, %v1628_v2  ;;  %v1629_v10 = vmax.f32 %v9247_v3, 0.0 }
 0x115   : > { %v1630_v12 = vmax.f32 %v1610_v5, %v1626_v6  ;;  %v1627_v13 = vmax.f32 %v9251_v7, 0.0  ;;  %v1695_v15 = vld [vmem:[#allocation2 + $0x70] sm:$0xff]  ;;  %v7794_v16 = vpop.f32.mrb[16].mxu0 }
 0x116   : > { %v1665_v19 = vrot.slane %v1632_v9, 1  ;;  %v1633_v20 = vmax.f32 %v1613_v8, %v1629_v10  ;;  %v1699_v21 = vmul.f32 %v9204_v14, %v1695_v15  ;;  %v1693_v22 = vld [vmem:[#allocation2 + $0x60] sm:$0xff]  ;;  %696 = vst.msk [vmem:[#allocation2 + $0x90] sm:$0xff] %vm677_vm1, %v7794_v16  ;;  %v614_v23 = vpop.f32.mrb[17].mxu0  ;;  %v1661_v29 = vrot.slane %v1632_v9, 2 }
 0x117   : > { %v1635_v24 = vrot.slane %v1630_v12, 1  ;;  %v1631_v25 = vmax.f32 %v1611_v11, %v1627_v13  ;;  %v1697_v26 = vmul.f32 %v9204_v14, %v1693_v22  ;;  %v1696_v27 = vld [vmem:[#allocation2 + $0x78] sm:$0xff]  ;;  %694 = vst.msk [vmem:[#allocation2 + $0x80] sm:$0xff] %vm677_vm1, %v614_v23  ;;  %v7795_v28 = vpop.f32.mrb[18].mxu0  ;;  %v1638_v37 = vrot.slane %v1630_v12, 2 }
 0x118   : > { %v1667_v30 = vmax.f32 %v1632_v9, %v1665_v19  ;;  %v1673_v32 = vrot.slane %v1633_v20, 2  ;;  %v1700_v33 = vmul.f32 %v9204_v14, %v1696_v27  ;;  %v1694_v34 = vld [vmem:[#allocation2 + $0x68] sm:$0xff]  ;;  %697 = vst.msk [vmem:[#allocation2 + $0x98] sm:$0xff] %vm677_vm1, %v7795_v28  ;;  %v617_v35 = vpop.f32.mrb[19].mxu0  ;;  %v1703_v42 = vadd.f32 %v9216_v31, %v1699_v21 }
 0x119   : > { %v1637_v36 = vmax.f32 %v1630_v12, %v1635_v24  ;;  %v1648_v38 = vrot.slane %v1631_v25, 2  ;;  %v1653_v39 = vrot.slane %v1631_v25, 1  ;;  %695 = vst.msk [vmem:[#allocation2 + $0x88] sm:$0xff] %vm677_vm1, %v617_v35  ;;  %v1701_v45 = vadd.f32 %v9216_v31, %v1697_v26 }
 0x11a   : > { %v1668_v40 = vmax.f32 %v1667_v30, %v1661_v29  ;;  %v1675_v41 = vmax.f32 %v1667_v30, %v1673_v32  ;;  %v1698_v46 = vmul.f32 %v9204_v14, %v1694_v34  ;;  %v1704_v47 = vadd.f32 %v9216_v31, %v1700_v33 }
 0x11b   : > { %v1640_v43 = vmax.f32 %v1637_v36, %v1638_v37  ;;  %v1655_v44 = vmax.f32 %v1631_v25, %v1653_v39  ;;  %v1650_v48 = vmax.f32 %v1637_v36, %v1648_v38  ;;  %v1707_v54 = vmax.f32 %v1703_v42, 0.0 }
 0x11c   : > { %1669 = vst.msk [vmem:[#allocation3 + $0x8] sm:$0x1] %vm1641_vm2, %v1668_v40  ;;  %v1702_v50 = vadd.f32 %v9216_v31, %v1698_v46  ;;  %v1705_v59 = vmax.f32 %v1701_v45, 0.0  ;;  %v1708_v0 = vmax.f32 %v1704_v47, 0.0 }
 0x11d   : > { %1671 = vst.msk [vmem:[#allocation3 + $0x6] sm:$0x10] %vm1645_vm3, %v1668_v40  ;;  %v1656_v49 = vmax.f32 %v1655_v44, %v1648_v38  ;;  %v1715_v51 = vld [vmem:[#allocation2 + $0x90] sm:$0xff]  ;;  %v7798_v52 = vpop.f32.mrb[20].mxu0  ;;  %1646 = vst.msk [vmem:[#allocation3 - $0x2] sm:$0x10] %vm1645_vm3, %v1640_v43  ;;  %v1663_v53 = vmax.f32 %v1655_v44, %v1661_v29  ;;  %v1711_v15 = vmax.f32 %v1628_v2, %v1707_v54 }
 0x11e   : > { %1676 = vst.msk [vmem:[#allocation3 + $0x5] sm:$0x40] %vm1651_vm4, %v1675_v41  ;;  %v1719_v55 = vmul.f32 %v9204_v14, %v1715_v51  ;;  %v1713_v57 = vld [vmem:[#allocation2 + $0x80] sm:$0xff]  ;;  %v630_v58 = vpop.f32.mrb[21].mxu0  ;;  %1652 = vst.msk [vmem:[#allocation3 - $0x3] sm:$0x40] %vm1651_vm4, %v1650_v48  ;;  %v1709_v20 = vmax.f32 %v1626_v6, %v1705_v59  ;;  %v1712_v23 = vmax.f32 %v1629_v10, %v1708_v0 }
 0x11f   : > { %1670 = vst.msk [vmem:[#allocation3 + $0x7] sm:$0x4] %vm1643_vm5, %v1668_v40  ;;  %1644 = vst.msk [vmem:[#allocation3 - $0x1] sm:$0x4] %vm1643_vm5, %v1640_v43  ;;  %v1717_v60 = vmul.f32 %v9204_v14, %v1713_v57  ;;  %v1716_v61 = vld [vmem:[#allocation2 + $0x98] sm:$0xff]  ;;  %v7799_v63 = vpop.f32.mrb[22].mxu0 }
 0x120   : > { %1642 = vst.msk [vmem:[#allocation3] sm:$0x1] %vm1641_vm2, %v1640_v43  ;;  %1657 = vst.msk [vmem:[#allocation3 + $0x4] sm:$0x1] %vm1641_vm2, %v1656_v49  ;;  %v9304_v1 = vadd.f32 %v9216_v31, %v1719_v55  ;;  %v1720_v4 = vmul.f32 %v9204_v14, %v1716_v61  ;;  %v1714_v5 = vld [vmem:[#allocation2 + $0x88] sm:$0xff]  ;;  %v633_v8 = vpop.f32.mrb[23].mxu0 }
 0x121   : > { %700 = vst.msk [vmem:[#allocation2 + $0xb0] sm:$0xff] %vm677_vm1, %v7798_v52  ;;  %698 = vst.msk [vmem:[#allocation2 + $0xa0] sm:$0xff] %vm677_vm1, %v630_v58  ;;  %v1706_v9 = vmax.f32 %v1702_v50, 0.0  ;;  %v9309_v11 = vadd.f32 %v9216_v31, %v1717_v60  ;;  %v1718_v12 = vmul.f32 %v9204_v14, %v1714_v5 }
 0x122   : > { %1659 = vst.msk [vmem:[#allocation3 + $0x2] sm:$0x10] %vm1645_vm3, %v1656_v49  ;;  %v1727_v16 = vmax.f32 %v9304_v1, 0.0  ;;  %v9317_v19 = vadd.f32 %v9216_v31, %v1720_v4 }
 0x123   : > { %1658 = vst.msk [vmem:[#allocation3 + $0x3] sm:$0x4] %vm1643_vm5, %v1656_v49  ;;  %v1725_v21 = vmax.f32 %v9309_v11, 0.0  ;;  %v9323_v22 = vadd.f32 %v9216_v31, %v1718_v12  ;;  %v1710_v24 = vmax.f32 %v1627_v13, %v1706_v9 }
 0x124   : > { %1664 = vst.msk [vmem:[#allocation3 + $0x1] sm:$0x40] %vm1651_vm4, %v1663_v53  ;;  %v1731_v56 = vmax.f32 %v1711_v15, %v1727_v16  ;;  %v1728_v2 = vmax.f32 %v9317_v19, 0.0 }
 0x125   : > { %701 = vst.msk [vmem:[#allocation2 + $0xb8] sm:$0xff] %vm677_vm1, %v7799_v63  ;;  %699 = vst.msk [vmem:[#allocation2 + $0xa8] sm:$0xff] %vm677_vm1, %v633_v8  ;;  %v1729_v62 = vmax.f32 %v1709_v20, %v1725_v21  ;;  %v1726_v6 = vmax.f32 %v9323_v22, 0.0  ;;  %v7802_v26 = vpop.f32.mrb[24].mxu0 }
 0x126   : > { %v1761_v27 = vrot.slane %v1731_v56, 1  ;;  %v1732_v3 = vmax.f32 %v1712_v23, %v1728_v2  ;;  %704 = vst.msk [vmem:[#allocation2 + $0xd0] sm:$0xff] %vm677_vm1, %v7802_v26  ;;  %v646_v29 = vpop.f32.mrb[25].mxu0  ;;  %v1757_v34 = vrot.slane %v1731_v56, 2 }
 0x127   : > { %v1734_v30 = vrot.slane %v1729_v62, 1  ;;  %v1730_v7 = vmax.f32 %v1710_v24, %v1726_v6  ;;  %702 = vst.msk [vmem:[#allocation2 + $0xc0] sm:$0xff] %vm677_vm1, %v646_v29  ;;  %v7803_v33 = vpop.f32.mrb[26].mxu0  ;;  %v1737_v41 = vrot.slane %v1729_v62, 2 }
 0x128   : > { %v1791_v25 = vld [vmem:[#allocation2 + $0xb0] sm:$0xff]  ;;  %v1789_v28 = vld [vmem:[#allocation2 + $0xa0] sm:$0xff]  ;;  %v1763_v35 = vmax.f32 %v1731_v56, %v1761_v27  ;;  %v1769_v36 = vrot.slane %v1732_v3, 2  ;;  %705 = vst.msk [vmem:[#allocation2 + $0xd8] sm:$0xff] %vm677_vm1, %v7803_v33  ;;  %v649_v39 = vpop.f32.mrb[27].mxu0 }
 0x129   : > { %v1795_v10 = vmul.f32 %v9204_v14, %v1791_v25  ;;  %v1793_v13 = vmul.f32 %v9204_v14, %v1789_v28  ;;  %v1736_v40 = vmax.f32 %v1729_v62, %v1734_v30  ;;  %v1745_v42 = vrot.slane %v1730_v7, 2  ;;  %703 = vst.msk [vmem:[#allocation2 + $0xc8] sm:$0xff] %vm677_vm1, %v649_v39 }
 0x12a   : > { %v1749_v43 = vrot.slane %v1730_v7, 1  ;;  %v1764_v44 = vmax.f32 %v1763_v35, %v1757_v34  ;;  %v1771_v45 = vmax.f32 %v1763_v35, %v1769_v36 }
 0x12b   : > { %v1799_v46 = vadd.f32 %v9216_v31, %v1795_v10  ;;  %v1739_v47 = vmax.f32 %v1736_v40, %v1737_v41  ;;  %v1797_v49 = vadd.f32 %v9216_v31, %v1793_v13  ;;  %v1747_v52 = vmax.f32 %v1736_v40, %v1745_v42 }
 0x12c   : > { %v1792_v32 = vld [vmem:[#allocation2 + $0xb8] sm:$0xff]  ;;  %v1790_v38 = vld [vmem:[#allocation2 + $0xa8] sm:$0xff]  ;;  %v1751_v48 = vmax.f32 %v1730_v7, %v1749_v43  ;;  %1765 = vst.msk [vmem:[#allocation3 + $0x18] sm:$0x1] %vm1641_vm2, %v1764_v44 }
 0x12d   : > { %v1796_v37 = vmul.f32 %v9204_v14, %v1792_v32  ;;  %v1794_v50 = vmul.f32 %v9204_v14, %v1790_v38  ;;  %1767 = vst.msk [vmem:[#allocation3 + $0x16] sm:$0x10] %vm1645_vm3, %v1764_v44  ;;  %v1811_v55 = vld [vmem:[#allocation2 + $0xd0] sm:$0xff]  ;;  %1743 = vst.msk [vmem:[#allocation3 + $0xe] sm:$0x10] %vm1645_vm3, %v1739_v47  ;;  %v7806_v57 = vpop.f32.mrb[28].mxu0 }
 0x12e   : > { %1772 = vst.msk [vmem:[#allocation3 + $0x15] sm:$0x40] %vm1651_vm4, %v1771_v45  ;;  %v1752_v53 = vmax.f32 %v1751_v48, %v1745_v42  ;;  %v1759_v58 = vmax.f32 %v1751_v48, %v1757_v34  ;;  %v1803_v59 = vmax.f32 %v1799_v46, 0.0  ;;  %v1815_v60 = vmul.f32 %v9204_v14, %v1811_v55  ;;  %v1809_v61 = vld [vmem:[#allocation2 + $0xc0] sm:$0xff]  ;;  %v662_v63 = vpop.f32.mrb[29].mxu0 }
 0x12f   : > { %v1800_v51 = vadd.f32 %v9216_v31, %v1796_v37  ;;  %1766 = vst.msk [vmem:[#allocation3 + $0x17] sm:$0x4] %vm1643_vm5, %v1764_v44  ;;  %v1798_v54 = vadd.f32 %v9216_v31, %v1794_v50  ;;  %1742 = vst.msk [vmem:[#allocation3 + $0xf] sm:$0x4] %vm1643_vm5, %v1739_v47  ;;  %v1801_v0 = vmax.f32 %v1797_v49, 0.0  ;;  %v1813_v4 = vmul.f32 %v9204_v14, %v1809_v61  ;;  %v1812_v5 = vld [vmem:[#allocation2 + $0xd8] sm:$0xff] }
 0x130   : > { %1741 = vst.msk [vmem:[#allocation3 + $0x10] sm:$0x1] %vm1641_vm2, %v1739_v47  ;;  %1753 = vst.msk [vmem:[#allocation3 + $0x14] sm:$0x1] %vm1641_vm2, %v1752_v53  ;;  %v7807_v8 = vpop.f32.mrb[30].mxu0  ;;  %v9368_v12 = vadd.f32 %v9216_v31, %v1815_v60  ;;  %v1816_v15 = vmul.f32 %v9204_v14, %v1812_v5  ;;  %v1810_v20 = vld [vmem:[#allocation2 + $0xc8] sm:$0xff]  ;;  %v1807_v25 = vmax.f32 %v1727_v16, %v1803_v59 }
 0x131   : > { %708 = vst.msk [vmem:[#allocation2 + $0xf0] sm:$0xff] %vm677_vm1, %v7806_v57  ;;  %706 = vst.msk [vmem:[#allocation2 + $0xe0] sm:$0xff] %vm677_vm1, %v662_v63  ;;  %v1804_v9 = vmax.f32 %v1800_v51, 0.0  ;;  %v665_v23 = vpop.f32.mrb[31].mxu0  ;;  %v1802_v56 = vmax.f32 %v1798_v54, 0.0  ;;  %v9373_v24 = vadd.f32 %v9216_v31, %v1813_v4  ;;  %v1814_v62 = vmul.f32 %v9204_v14, %v1810_v20  ;;  %v2974_v63 = vld [vmem:[#allocation3 + $0x2] sm:$0xff] }
 0x132   : > { %1748 = vst.msk [vmem:[#allocation3 + $0xd] sm:$0x40] %vm1651_vm4, %v1747_v52  ;;  %1760 = vst.msk [vmem:[#allocation3 + $0x11] sm:$0x40] %vm1651_vm4, %v1759_v58  ;;  %v1823_v26 = vmax.f32 %v9368_v12, 0.0  ;;  %v9381_v27 = vadd.f32 %v9216_v31, %v1816_v15  ;;  %v1805_v3 = vmax.f32 %v1725_v21, %v1801_v0  ;;  %v2753_v58 = vld [vmem:[#allocation3 + $0x1] sm:$0xff] }
 0x133   : > { %1755 = vst.msk [vmem:[#allocation3 + $0x12] sm:$0x10] %vm1645_vm3, %v1752_v53  ;;  %v1821_v10 = vmax.f32 %v9373_v24, 0.0  ;;  %v9387_v28 = vadd.f32 %v9216_v31, %v1814_v62  ;;  %v1808_v29 = vmax.f32 %v1728_v2, %v1804_v9  ;;  %v1806_v30 = vmax.f32 %v1726_v6, %v1802_v56 }
 0x134   : > { %1754 = vst.msk [vmem:[#allocation3 + $0x13] sm:$0x4] %vm1643_vm5, %v1752_v53  ;;  %v1827_v1 = vmax.f32 %v1807_v25, %v1823_v26  ;;  %v1824_v16 = vmax.f32 %v9381_v27, 0.0 }
 0x135   : > { %709 = vst.msk [vmem:[#allocation2 + $0xf8] sm:$0xff] %vm677_vm1, %v7807_v8  ;;  %707 = vst.msk [vmem:[#allocation2 + $0xe8] sm:$0xff] %vm677_vm1, %v665_v23  ;;  %v1825_v11 = vmax.f32 %v1805_v3, %v1821_v10  ;;  %v1822_v21 = vmax.f32 %v9387_v28, 0.0  ;;  %v7816_v13 = vpop.f32.mrb[32].mxu0 }
 0x136   : > { %v1857_v32 = vrot.slane %v1827_v1, 1  ;;  %v1828_v19 = vmax.f32 %v1808_v29, %v1824_v16  ;;  %1058 = vst.msk [vmem:[#allocation2 + $0x110] sm:$0xff] %vm677_vm1, %v7816_v13  ;;  %v929_v34 = vpop.f32.mrb[33].mxu0  ;;  %v1853_v38 = vrot.slane %v1827_v1, 2 }
 0x137   : > { %v1830_v35 = vrot.slane %v1825_v11, 1  ;;  %v1826_v22 = vmax.f32 %v1806_v30, %v1822_v21  ;;  %1056 = vst.msk [vmem:[#allocation2 + $0x100] sm:$0xff] %vm677_vm1, %v929_v34  ;;  %v7817_v37 = vpop.f32.mrb[34].mxu0  ;;  %v1833_v44 = vrot.slane %v1825_v11, 2 }
 0x138   : > { %v1887_v7 = vld [vmem:[#allocation2 + $0xf0] sm:$0xff]  ;;  %v1885_v33 = vld [vmem:[#allocation2 + $0xe0] sm:$0xff]  ;;  %v1859_v39 = vmax.f32 %v1827_v1, %v1857_v32  ;;  %v1865_v40 = vrot.slane %v1828_v19, 2  ;;  %1059 = vst.msk [vmem:[#allocation2 + $0x118] sm:$0xff] %vm677_vm1, %v7817_v37  ;;  %v932_v42 = vpop.f32.mrb[35].mxu0 }
 0x139   : > { %v1891_v2 = vmul.f32 %v9204_v14, %v1887_v7  ;;  %v1889_v6 = vmul.f32 %v9204_v14, %v1885_v33  ;;  %v1832_v43 = vmax.f32 %v1825_v11, %v1830_v35  ;;  %v1841_v45 = vrot.slane %v1826_v22, 2  ;;  %1057 = vst.msk [vmem:[#allocation2 + $0x108] sm:$0xff] %vm677_vm1, %v932_v42 }
 0x13a   : > { %v1845_v46 = vrot.slane %v1826_v22, 1  ;;  %v1860_v49 = vmax.f32 %v1859_v39, %v1853_v38  ;;  %v1867_v50 = vmax.f32 %v1859_v39, %v1865_v40 }
 0x13b   : > { %v2754_v48 = vld [vmem:[#allocation3 + $0x11] sm:$0xff]  ;;  %v1895_v51 = vadd.f32 %v9216_v31, %v1891_v2  ;;  %v1835_v53 = vmax.f32 %v1832_v43, %v1833_v44  ;;  %v1843_v54 = vmax.f32 %v1832_v43, %v1841_v45  ;;  %v1893_v57 = vadd.f32 %v9216_v31, %v1889_v6 }
 0x13c   : > { %v1888_v36 = vld [vmem:[#allocation2 + $0xf8] sm:$0xff]  ;;  %v1886_v47 = vld [vmem:[#allocation2 + $0xe8] sm:$0xff]  ;;  %v1847_v55 = vmax.f32 %v1826_v22, %v1845_v46  ;;  %1863 = vst.msk [vmem:[#allocation3 + $0x26] sm:$0x10] %vm1645_vm3, %v1860_v49  ;;  %v2761_v61 = vpack.c.bf16 %v2754_v48, %v2753_v58 }
 0x13d   : > { %v1892_v41 = vmul.f32 %v9204_v14, %v1888_v36  ;;  %v2975_v52 = vld [vmem:[#allocation3 + $0x12] sm:$0xff]  ;;  %1868 = vst.msk [vmem:[#allocation3 + $0x25] sm:$0x40] %vm1651_vm4, %v1867_v50  ;;  %v1890_v60 = vmul.f32 %v9204_v14, %v1886_v47  ;;  %1844 = vst.msk [vmem:[#allocation3 + $0x1d] sm:$0x40] %vm1651_vm4, %v1843_v54  ;;  %v7820_v9 = vpop.f32.mrb[36].mxu0 }
 0x13e   : > { %1861 = vst.msk [vmem:[#allocation3 + $0x28] sm:$0x1] %vm1641_vm2, %v1860_v49  ;;  %1837 = vst.msk [vmem:[#allocation3 + $0x20] sm:$0x1] %vm1641_vm2, %v1835_v53  ;;  %v1848_v0 = vmax.f32 %v1847_v55, %v1841_v45  ;;  %v1855_v4 = vmax.f32 %v1847_v55, %v1853_v38  ;;  %v1907_v5 = vld [vmem:[#allocation2 + $0x110] sm:$0xff]  ;;  %v2982_v8 = vpack.c.bf16 %v2975_v52, %v2974_v63  ;;  %v1899_v15 = vmax.f32 %v1895_v51, 0.0 }
 0x13f   : > { %v1896_v59 = vadd.f32 %v9216_v31, %v1892_v41  ;;  %1862 = vst.msk [vmem:[#allocation3 + $0x27] sm:$0x4] %vm1643_vm5, %v1860_v49  ;;  %1838 = vst.msk [vmem:[#allocation3 + $0x1f] sm:$0x4] %vm1643_vm5, %v1835_v53  ;;  %v1894_v20 = vadd.f32 %v9216_v31, %v1890_v60  ;;  %v1911_v23 = vmul.f32 %v9204_v14, %v1907_v5  ;;  %v1905_v56 = vld [vmem:[#allocation2 + $0x100] sm:$0xff]  ;;  %7902 = vmatprep.mubr.msk.bf16.mxu0 %vm677_vm1, %v2761_v61  ;;  %v945_v62 = vpop.f32.mrb[37].mxu0 }
 0x140   : > { %1839 = vst.msk [vmem:[#allocation3 + $0x1e] sm:$0x10] %vm1645_vm3, %v1835_v53  ;;  %1851 = vst.msk [vmem:[#allocation3 + $0x22] sm:$0x10] %vm1645_vm3, %v1848_v0  ;;  %v1897_v25 = vmax.f32 %v1893_v57, 0.0  ;;  %v1909_v3 = vmul.f32 %v9204_v14, %v1905_v56  ;;  %v1908_v29 = vld [vmem:[#allocation2 + $0x118] sm:$0xff]  ;;  %7934 = vmatprep.mubr.msk.bf16.mxu1 %vm677_vm1, %v2982_v8  ;;  %v1903_v34 = vmax.f32 %v1823_v26, %v1899_v15 }
 0x141   : > { %1062 = vst.msk [vmem:[#allocation2 + $0x130] sm:$0xff] %vm677_vm1, %v7820_v9  ;;  %1060 = vst.msk [vmem:[#allocation2 + $0x120] sm:$0xff] %vm677_vm1, %v945_v62  ;;  %v7821_v1 = vpop.f32.mrb[38].mxu0  ;;  %v1900_v30 = vmax.f32 %v1896_v59, 0.0  ;;  %v9434_v11 = vadd.f32 %v9216_v31, %v1911_v23  ;;  %v1912_v7 = vmul.f32 %v9204_v14, %v1908_v29  ;;  %v1906_v13 = vld [vmem:[#allocation2 + $0x108] sm:$0xff]  ;;  %v1898_v19 = vmax.f32 %v1894_v20, 0.0 }
 0x142   : > { %1849 = vst.msk [vmem:[#allocation3 + $0x24] sm:$0x1] %vm1641_vm2, %v1848_v0  ;;  %v948_v32 = vpop.f32.mrb[39].mxu0  ;;  %v9439_v2 = vadd.f32 %v9216_v31, %v1909_v3  ;;  %v1910_v33 = vmul.f32 %v9204_v14, %v1906_v13  ;;  %v1901_v6 = vmax.f32 %v1821_v10, %v1897_v25  ;;  %v9495_v13 = vld [vmem:[#allocation3 + $0x13] sm:$0xff] }
 0x143   : > { %1856 = vst.msk [vmem:[#allocation3 + $0x21] sm:$0x40] %vm1651_vm4, %v1855_v4  ;;  %v1919_v35 = vmax.f32 %v9434_v11, 0.0  ;;  %v9447_v22 = vadd.f32 %v9216_v31, %v1912_v7  ;;  %v1904_v38 = vmax.f32 %v1824_v16, %v1900_v30  ;;  %v1902_v39 = vmax.f32 %v1822_v21, %v1898_v19 }
 0x144   : > { %1850 = vst.msk [vmem:[#allocation3 + $0x23] sm:$0x4] %vm1643_vm5, %v1848_v0  ;;  %v1917_v36 = vmax.f32 %v9439_v2, 0.0  ;;  %v9453_v37 = vadd.f32 %v9216_v31, %v1910_v33 }
 0x145   : > { %1063 = vst.msk [vmem:[#allocation2 + $0x138] sm:$0xff] %vm677_vm1, %v7821_v1  ;;  %1061 = vst.msk [vmem:[#allocation2 + $0x128] sm:$0xff] %vm677_vm1, %v948_v32  ;;  %v1923_v12 = vmax.f32 %v1903_v34, %v1919_v35  ;;  %v1920_v26 = vmax.f32 %v9447_v22, 0.0  ;;  %v7824_v41 = vpop.f32.mrb[40].mxu0  ;;  %v9497_v32 = vld [vmem:[#allocation3 + $0x14] sm:$0xff] }
 0x146   : > { %v1921_v24 = vmax.f32 %v1901_v6, %v1917_v36  ;;  %v1918_v10 = vmax.f32 %v9453_v37, 0.0  ;;  %1066 = vst.msk [vmem:[#allocation2 + $0x150] sm:$0xff] %vm677_vm1, %v7824_v41  ;;  %v961_v44 = vpop.f32.mrb[41].mxu0 }
 0x147   : > { %v1953_v42 = vrot.slane %v1923_v12, 1  ;;  %v1924_v27 = vmax.f32 %v1904_v38, %v1920_v26  ;;  %1064 = vst.msk [vmem:[#allocation2 + $0x140] sm:$0xff] %vm677_vm1, %v961_v44  ;;  %v7825_v47 = vpop.f32.mrb[42].mxu0  ;;  %v1949_v48 = vrot.slane %v1923_v12, 2  ;;  %v2733_v38 = vld [vmem:[#allocation3] sm:$0xff] }
 0x148   : > { %v1983_v40 = vld [vmem:[#allocation2 + $0x130] sm:$0xff]  ;;  %v1981_v43 = vld [vmem:[#allocation2 + $0x120] sm:$0xff]  ;;  %v1926_v45 = vrot.slane %v1921_v24, 1  ;;  %v1922_v28 = vmax.f32 %v1902_v39, %v1918_v10  ;;  %1067 = vst.msk [vmem:[#allocation2 + $0x158] sm:$0xff] %vm677_vm1, %v7825_v47  ;;  %v964_v52 = vpop.f32.mrb[43].mxu0  ;;  %v1929_v54 = vrot.slane %v1921_v24, 2 }
 0x149   : > { %v1987_v16 = vmul.f32 %v9204_v14, %v1983_v40  ;;  %v1985_v21 = vmul.f32 %v9204_v14, %v1981_v43  ;;  %v1955_v49 = vmax.f32 %v1923_v12, %v1953_v42  ;;  %v1961_v50 = vrot.slane %v1924_v27, 2  ;;  %1065 = vst.msk [vmem:[#allocation2 + $0x148] sm:$0xff] %vm677_vm1, %v964_v52 }
 0x14a   : > { %v1928_v53 = vmax.f32 %v1921_v24, %v1926_v45  ;;  %v1937_v55 = vrot.slane %v1922_v28, 2  ;;  %v1941_v57 = vrot.slane %v1922_v28, 1 }
 0x14b   : > { %v1956_v59 = vmax.f32 %v1955_v49, %v1949_v48  ;;  %v1963_v60 = vmax.f32 %v1955_v49, %v1961_v50  ;;  %v1991_v61 = vadd.f32 %v9216_v31, %v1987_v16  ;;  %v1989_v5 = vadd.f32 %v9216_v31, %v1985_v21  ;;  %v9484_v15 = vld [vmem:[#allocation3 + $0x23] sm:$0xff] }
 0x14c   : > { %v1984_v46 = vld [vmem:[#allocation2 + $0x138] sm:$0xff]  ;;  %v1982_v58 = vld [vmem:[#allocation2 + $0x128] sm:$0xff]  ;;  %v1931_v63 = vmax.f32 %v1928_v53, %v1929_v54  ;;  %v1939_v0 = vmax.f32 %v1928_v53, %v1937_v55  ;;  %v1943_v4 = vmax.f32 %v1922_v28, %v1941_v57 }
 0x14d   : > { %v1988_v51 = vmul.f32 %v9204_v14, %v1984_v46  ;;  %1959 = vst.msk [vmem:[#allocation3 + $0x36] sm:$0x10] %vm1645_vm3, %v1956_v59  ;;  %v1986_v9 = vmul.f32 %v9204_v14, %v1982_v58  ;;  %v9486_v20 = vld [vmem:[#allocation3 + $0x24] sm:$0xff]  ;;  %v2003_v62 = vld [vmem:[#allocation2 + $0x150] sm:$0xff]  ;;  %v7828_v25 = vpop.f32.mrb[44].mxu0  ;;  %v1995_v3 = vmax.f32 %v1991_v61, 0.0 }
 0x14e   : > { %1964 = vst.msk [vmem:[#allocation3 + $0x35] sm:$0x40] %vm1651_vm4, %v1963_v60  ;;  %v1944_v23 = vmax.f32 %v1943_v4, %v1937_v55  ;;  %v1951_v56 = vmax.f32 %v1943_v4, %v1949_v48  ;;  %1940 = vst.msk [vmem:[#allocation3 + $0x2d] sm:$0x40] %vm1651_vm4, %v1939_v0  ;;  %v2007_v1 = vmul.f32 %v9204_v14, %v2003_v62  ;;  %v2001_v30 = vld [vmem:[#allocation2 + $0x140] sm:$0xff]  ;;  %v977_v7 = vpop.f32.mrb[45].mxu0 }
 0x14f   : > { %1957 = vst.msk [vmem:[#allocation3 + $0x38] sm:$0x1] %vm1641_vm2, %v1956_v59  ;;  %v1992_v8 = vadd.f32 %v9216_v31, %v1988_v51  ;;  %1933 = vst.msk [vmem:[#allocation3 + $0x30] sm:$0x1] %vm1641_vm2, %v1931_v63  ;;  %v1990_v29 = vadd.f32 %v9216_v31, %v1986_v9  ;;  %v1993_v19 = vmax.f32 %v1989_v5, 0.0  ;;  %v2005_v33 = vmul.f32 %v9204_v14, %v2001_v30  ;;  %v2004_v34 = vld [vmem:[#allocation2 + $0x158] sm:$0xff] }
 0x150   : > { %1958 = vst.msk [vmem:[#allocation3 + $0x37] sm:$0x4] %vm1643_vm5, %v1956_v59  ;;  %1934 = vst.msk [vmem:[#allocation3 + $0x2f] sm:$0x4] %vm1643_vm5, %v1931_v63  ;;  %v7829_v6 = vpop.f32.mrb[46].mxu0  ;;  %v9510_v24 = vadd.f32 %v9216_v31, %v2007_v1  ;;  %v2008_v40 = vmul.f32 %v9204_v14, %v2004_v34  ;;  %v2002_v41 = vld [vmem:[#allocation2 + $0x148] sm:$0xff]  ;;  %v1999_v44 = vmax.f32 %v1919_v35, %v1995_v3 }
 0x151   : > { %1935 = vst.msk [vmem:[#allocation3 + $0x2e] sm:$0x10] %vm1645_vm3, %v1931_v63  ;;  %1947 = vst.msk [vmem:[#allocation3 + $0x32] sm:$0x10] %vm1645_vm3, %v1944_v23  ;;  %v1996_v39 = vmax.f32 %v1992_v8, 0.0  ;;  %v980_v42 = vpop.f32.mrb[47].mxu0  ;;  %v9515_v16 = vadd.f32 %v9216_v31, %v2005_v33  ;;  %v2006_v43 = vmul.f32 %v9204_v14, %v2002_v41  ;;  %v1997_v21 = vmax.f32 %v1917_v36, %v1993_v19 }
 0x152   : > { %1070 = vst.msk [vmem:[#allocation2 + $0x170] sm:$0xff] %vm677_vm1, %v7828_v25  ;;  %1068 = vst.msk [vmem:[#allocation2 + $0x160] sm:$0xff] %vm677_vm1, %v977_v7  ;;  %v1994_v27 = vmax.f32 %v1990_v29, 0.0  ;;  %v2015_v45 = vmax.f32 %v9510_v24, 0.0  ;;  %v9523_v28 = vadd.f32 %v9216_v31, %v2008_v40  ;;  %v2755_v33 = vld [vmem:[#allocation3 + $0x21] sm:$0xff] }
 0x153   : > { %1945 = vst.msk [vmem:[#allocation3 + $0x34] sm:$0x1] %vm1641_vm2, %v1944_v23  ;;  %v2013_v46 = vmax.f32 %v9515_v16, 0.0  ;;  %v9529_v47 = vadd.f32 %v9216_v31, %v2006_v43  ;;  %v2000_v48 = vmax.f32 %v1920_v26, %v1996_v39  ;;  %v2976_v34 = vld [vmem:[#allocation3 + $0x22] sm:$0xff]  ;;  %v8711_v16 = vld [vmem:[%s11046_s4 + $0x18] sm:$0xff]  }
 0x154   : > { %1952 = vst.msk [vmem:[#allocation3 + $0x31] sm:$0x40] %vm1651_vm4, %v1951_v56  ;;  %v9535_v11 = vmax.f32 %v1999_v44, %v2015_v45  ;;  %v2016_v35 = vmax.f32 %v9523_v28, 0.0  ;;  %v1998_v49 = vmax.f32 %v1918_v10, %v1994_v27  ;;  %v8707_v41 = vld [vmem:[%s11046_s4 + $0x8] sm:$0xff]  }
 0x155   : > { %1946 = vst.msk [vmem:[#allocation3 + $0x33] sm:$0x4] %vm1643_vm5, %v1944_v23  ;;  %v2017_v2 = vmax.f32 %v1997_v21, %v2013_v46  ;;  %v2014_v36 = vmax.f32 %v9529_v47, 0.0  ;;  %v7832_v51 = vpop.f32.mrb[48].mxu0 }
 0x156   : > { %1071 = vst.msk [vmem:[#allocation2 + $0x178] sm:$0xff] %vm677_vm1, %v7829_v6  ;;  %1069 = vst.msk [vmem:[#allocation2 + $0x168] sm:$0xff] %vm677_vm1, %v980_v42  ;;  %v2049_v52 = vrot.slane %v9535_v11, 1  ;;  %v2020_v22 = vmax.f32 %v2000_v48, %v2016_v35  ;;  %v993_v54 = vpop.f32.mrb[49].mxu0  ;;  %v2045_v59 = vrot.slane %v9535_v11, 2  ;;  %v8708_v42 = vld [vmem:[%s11046_s4 + $0x68] sm:$0xff]  }
 0x157   : > { %1074 = vst.msk [vmem:[#allocation2 + $0x190] sm:$0xff] %vm677_vm1, %v7832_v51  ;;  %v2022_v37 = vrot.slane %v2017_v2, 1  ;;  %v2018_v10 = vmax.f32 %v1998_v49, %v2014_v36  ;;  %1072 = vst.msk [vmem:[#allocation2 + $0x180] sm:$0xff] %vm677_vm1, %v993_v54  ;;  %v7833_v58 = vpop.f32.mrb[50].mxu0  ;;  %v2025_v8 = vrot.slane %v2017_v2, 2 }
 0x158   : > { %v2051_v60 = vmax.f32 %v9535_v11, %v2049_v52  ;;  %v2057_v61 = vrot.slane %v2020_v22, 2  ;;  %1075 = vst.msk [vmem:[#allocation2 + $0x198] sm:$0xff] %vm677_vm1, %v7833_v58  ;;  %v996_v4 = vpop.f32.mrb[51].mxu0 }
 0x159   : > { %v2079_v50 = vld [vmem:[#allocation2 + $0x170] sm:$0xff]  ;;  %v2077_v53 = vld [vmem:[#allocation2 + $0x160] sm:$0xff]  ;;  %v2024_v5 = vmax.f32 %v2017_v2, %v2022_v37  ;;  %v2033_v9 = vrot.slane %v2018_v10, 2  ;;  %v2037_v23 = vrot.slane %v2018_v10, 1  ;;  %1073 = vst.msk [vmem:[#allocation2 + $0x188] sm:$0xff] %vm677_vm1, %v996_v4 }
 0x15a   : > { %v2083_v26 = vmul.f32 %v9204_v14, %v2079_v50  ;;  %v2081_v55 = vmul.f32 %v9204_v14, %v2077_v53  ;;  %v2052_v25 = vmax.f32 %v2051_v60, %v2045_v59  ;;  %v2059_v3 = vmax.f32 %v2051_v60, %v2057_v61  ;;  %v8709_v37 = vld [vmem:[%s11046_s4 + $0x10] sm:$0xff]   ;;  %v9624_v4 = vld [vmem:[#allocation3 + $0x22] sm:$0xff] }
 0x15b   : > { %v2027_v1 = vmax.f32 %v2024_v5, %v2025_v8  ;;  %v2039_v30 = vmax.f32 %v2018_v10, %v2037_v23  ;;  %v2035_v48 = vmax.f32 %v2024_v5, %v2033_v9  ;;  %11086 = vst [vmem:[#allocation8_spill] sm:$0xff] %v9624_v4 }
 0x15c   : > { %v2756_v56 = vld [vmem:[#allocation3 + $0x31] sm:$0xff]  ;;  %v9558_v29 = vadd.f32 %v9216_v31, %v2083_v26  ;;  %v9561_v7 = vadd.f32 %v9216_v31, %v2081_v55  ;;  %2053 = vst.msk [vmem:[#allocation3 + $0x48] sm:$0x1] %vm1641_vm2, %v2052_v25 }
 0x15d   : > { %v2080_v57 = vld [vmem:[#allocation2 + $0x178] sm:$0xff]  ;;  %v2078_v0 = vld [vmem:[#allocation2 + $0x168] sm:$0xff]  ;;  %2054 = vst.msk [vmem:[#allocation3 + $0x47] sm:$0x4] %vm1643_vm5, %v2052_v25  ;;  %v2762_v39 = vpack.c.bf16 %v2756_v56, %v2755_v33  ;;  %2030 = vst.msk [vmem:[#allocation3 + $0x3f] sm:$0x4] %vm1643_vm5, %v2027_v1  ;;  %v2040_v27 = vmax.f32 %v2039_v30, %v2033_v9  ;;  %v2047_v51 = vmax.f32 %v2039_v30, %v2045_v59 }
 0x15e   : > { %v2084_v63 = vmul.f32 %v9204_v14, %v2080_v57  ;;  %v2977_v62 = vld [vmem:[#allocation3 + $0x32] sm:$0xff]  ;;  %v2082_v19 = vmul.f32 %v9204_v14, %v2078_v0  ;;  %2055 = vst.msk [vmem:[#allocation3 + $0x46] sm:$0x10] %vm1645_vm3, %v2052_v25  ;;  %2031 = vst.msk [vmem:[#allocation3 + $0x3e] sm:$0x10] %vm1645_vm3, %v2027_v1  ;;  %v7836_v21 = vpop.f32.mrb[52].mxu0 }
 0x15f   : > { %2060 = vst.msk [vmem:[#allocation3 + $0x45] sm:$0x40] %vm1651_vm4, %v2059_v3  ;;  %v2983_v40 = vpack.c.bf16 %v2977_v62, %v2976_v34  ;;  %v2099_v44 = vld [vmem:[#allocation2 + $0x190] sm:$0xff]  ;;  %v2091_v11 = vmax.f32 %v9558_v29, 0.0  ;;  %v2097_v2 = vld [vmem:[#allocation2 + $0x180] sm:$0xff]  ;;  %7903 = vmatmul.mubr.msk.bf16.vlgmr.msra.gmra.mrb[100].mxu0 %vm677_vm1, %v2762_v39  ;;  %v1009_v50 = vpop.f32.mrb[53].mxu0 }
 0x160   : > { %v9569_v6 = vadd.f32 %v9216_v31, %v2084_v63  ;;  %2029 = vst.msk [vmem:[#allocation3 + $0x40] sm:$0x1] %vm1641_vm2, %v2027_v1  ;;  %v2086_v43 = vadd.f32 %v9216_v31, %v2082_v19  ;;  %v2103_v49 = vmul.f32 %v9204_v14, %v2099_v44  ;;  %v9586_v52 = vld [vmem:[#allocation3 + $0x31] sm:$0xff]  ;;  %2041 = vst.msk [vmem:[#allocation3 + $0x44] sm:$0x1] %vm1641_vm2, %v2040_v27  ;;  %v2089_v22 = vmax.f32 %v9561_v7, 0.0 }
 0x161   : > { %7935 = vmatmul.mubr.msk.bf16.vlgmr.msra.gmra.mrb[0].mxu1 %vm677_vm1, %v2983_v40  ;;  %1078 = vst.msk [vmem:[#allocation2 + $0x1b0] sm:$0xff] %vm677_vm1, %v7836_v21  ;;  %v2101_v26 = vmul.f32 %v9204_v14, %v2097_v2  ;;  %v2100_v53 = vld [vmem:[#allocation2 + $0x198] sm:$0xff]  ;;  %1076 = vst.msk [vmem:[#allocation2 + $0x1a0] sm:$0xff] %vm677_vm1, %v1009_v50  ;;  %v7837_v54 = vpop.f32.mrb[54].mxu0  ;;  %7911 = vmatpush3.bf16.msra.mxu0 %v9262_v17  ;;  %v2098_v59 = vld [vmem:[#allocation2 + $0x188] sm:$0xff]  ;;  %v2095_v8 = vmax.f32 %v2015_v45, %v2091_v11 }
 0x162   : > { %2042 = vst.msk [vmem:[#allocation3 + $0x43] sm:$0x4] %vm1643_vm5, %v2040_v27  ;;  %7943 = vmatpush3.bf16.msra.mxu1 %v9267_v18  ;;  %v9600_v10 = vld [vmem:[#allocation3 + $0x32] sm:$0xff]  ;;  %v2092_v55 = vmax.f32 %v9569_v6, 0.0  ;;  %v9604_v57 = vadd.f32 %v9216_v31, %v2103_v49  ;;  %v2104_v58 = vmul.f32 %v9204_v14, %v2100_v53  ;;  %v1012_v60 = vpop.f32.mrb[55].mxu0  ;;  %7912 = vmatprep.subr.bf16.mxu0 %v8707_v41  ;;  %v9612_v18 = vld [vmem:[#allocation3 + $0x21] sm:$0xff] }
 0x163   : > { %2043 = vst.msk [vmem:[#allocation3 + $0x42] sm:$0x10] %vm1645_vm3, %v2040_v27  ;;  %7944 = vmatprep.subr.bf16.mxu1 %v8708_v42  ;;  %v8710_v17 = vld [vmem:[%s11046_s4 + $0x70] sm:$0xff]   ;;  %v2090_v61 = vmax.f32 %v2086_v43, 0.0  ;;  %v9615_v63 = vadd.f32 %v9216_v31, %v2101_v26  ;;  %v9620_v14 = vld [vmem:[%s11044_s2] ss:$0 sm:$0xff]  ;;  %v2093_v62 = vmax.f32 %v2013_v46, %v2089_v22 }
 0x164   : > { %2036 = vst.msk [vmem:[#allocation3 + $0x3d] sm:$0x40] %vm1651_vm4, %v2035_v48  ;;  %2048 = vst.msk [vmem:[#allocation3 + $0x41] sm:$0x40] %vm1651_vm4, %v2047_v51  ;;  %v2102_v0 = vmul.f32 %v9620_v14, %v2098_v59  ;;  %v2111_v9 = vmax.f32 %v9604_v57, 0.0  ;;  %v9632_v23 = vadd.f32 %v9216_v31, %v2104_v58  ;;  %v2096_v24 = vmax.f32 %v2016_v35, %v2092_v55  ;;  %v9676_v11 = vld [vmem:[%s11046_s4 + $0x80] sm:$0xff]  }
 0x165   : > { %1079 = vst.msk [vmem:[#allocation2 + $0x1b8] sm:$0xff] %vm677_vm1, %v7837_v54  ;;  %1077 = vst.msk [vmem:[#allocation2 + $0x1a8] sm:$0xff] %vm677_vm1, %v1012_v60  ;;  %v2109_v25 = vmax.f32 %v9615_v63, 0.0  ;;  %7913 = vmatpush3.bf16.msra.mxu0 %v8707_v41  ;;  %v2094_v28 = vmax.f32 %v2014_v36, %v2090_v61  ;;  %v7840_v30 = vpop.f32.mrb[56].mxu0  ;;  %v9682_v53 = vld [vmem:[%s11045_s3] ss:$0 sm:$0xff] }
 0x166   : > { %v9640_v3 = vadd.f32 %v9216_v31, %v2102_v0  ;;  %7945 = vmatpush3.bf16.msra.mxu1 %v8708_v42  ;;  %v9646_v45 = vmax.f32 %v2095_v8, %v2111_v9  ;;  %v2112_v29 = vmax.f32 %v9632_v23, 0.0  ;;  %7914 = vmatprep.subr.bf16.mxu0 %v8709_v37  ;;  %v8712_v31 = vld [vmem:[%s11046_s4 + $0x78] sm:$0xff]   ;;  %1082 = vst.msk [vmem:[#allocation2 + $0x1d0] sm:$0xff] %vm677_vm1, %v7840_v30  ;;  %v1025_v6 = vpop.f32.mrb[57].mxu0 }
 0x167   : > { %7946 = vmatprep.subr.bf16.mxu1 %v8710_v17  ;;  %v2113_v46 = vmax.f32 %v2093_v62, %v2109_v25  ;;  %1080 = vst.msk [vmem:[#allocation2 + $0x1c0] sm:$0xff] %vm677_vm1, %v1025_v6  ;;  %v7841_v41 = vpop.f32.mrb[58].mxu0 }
 0x168   : > { %v2110_v35 = vmax.f32 %v9640_v3, 0.0  ;;  %v2175_v1 = vld [vmem:[#allocation2 + $0x1b0] sm:$0xff]  ;;  %v2145_v7 = vrot.slane %v9646_v45, 1  ;;  %v2116_v19 = vmax.f32 %v2096_v24, %v2112_v29  ;;  %v2173_v34 = vld [vmem:[#allocation2 + $0x1a0] sm:$0xff]  ;;  %v2141_v42 = vrot.slane %v9646_v45, 2  ;;  %1083 = vst.msk [vmem:[#allocation2 + $0x1d8] sm:$0xff] %vm677_vm1, %v7841_v41 }
 0x169   : > { %v2179_v33 = vmul.f32 %v9620_v14, %v2175_v1  ;;  %v2118_v47 = vrot.slane %v2113_v46, 1  ;;  %v2177_v39 = vmul.f32 %v9620_v14, %v2173_v34  ;;  %7915 = vmatpush3.bf16.msra.mxu0 %v8709_v37  ;;  %v1028_v48 = vpop.f32.mrb[59].mxu0  ;;  %v2121_v2 = vrot.slane %v2113_v46, 2 }
 0x16a   : > { %v2114_v36 = vmax.f32 %v2094_v28, %v2110_v35  ;;  %7947 = vmatpush3.bf16.msra.mxu1 %v8710_v17  ;;  %v2147_v27 = vmax.f32 %v9646_v45, %v2145_v7  ;;  %v2153_v43 = vrot.slane %v2116_v19, 2  ;;  %7916 = vmatprep.subr.bf16.mxu0 %v8711_v16  ;;  %1081 = vst.msk [vmem:[#allocation2 + $0x1c8] sm:$0xff] %vm677_vm1, %v1028_v48  ;;  %v9708_v19 = vld [vmem:[#allocation3 + $0x34] sm:$0xff] }
 0x16b   : > { %7948 = vmatprep.subr.bf16.mxu1 %v8712_v31  ;;  %v2120_v49 = vmax.f32 %v2113_v46, %v2118_v47  ;;  %v2183_v54 = vadd.f32 %v9682_v53, %v2179_v33  ;;  %v2181_v37 = vadd.f32 %v9682_v53, %v2177_v39  ;;  %v9693_v61 = vld [vmem:[#allocation3 + $0x43] sm:$0xff] }
 0x16c   : > { %v2176_v40 = vld [vmem:[#allocation2 + $0x1b8] sm:$0xff]  ;;  %v2174_v21 = vld [vmem:[#allocation2 + $0x1a8] sm:$0xff]  ;;  %v2129_v50 = vrot.slane %v2114_v36, 2  ;;  %v2133_v51 = vrot.slane %v2114_v36, 1  ;;  %v2148_v22 = vmax.f32 %v2147_v27, %v2141_v42  ;;  %v2155_v26 = vmax.f32 %v2147_v27, %v2153_v43 }
 0x16d   : > { %v2180_v44 = vmul.f32 %v9620_v14, %v2176_v40  ;;  %v2123_v55 = vmax.f32 %v2120_v49, %v2121_v2  ;;  %v2178_v59 = vmul.f32 %v9620_v14, %v2174_v21  ;;  %7917 = vmatpush3.bf16.msra.mxu0 %v8711_v16  ;;  %v9695_v0 = vld [vmem:[#allocation3 + $0x44] sm:$0xff]  ;;  %v2195_v24 = vld [vmem:[#allocation2 + $0x1d0] sm:$0xff]  ;;  %v7844_v45 = vpop.f32.mrb[60].mxu0  ;;  %v2187_v46 = vmax.f32 %v2183_v54, 0.0 }
 0x16e   : > { %v2135_v58 = vmax.f32 %v2114_v36, %v2133_v51  ;;  %7949 = vmatpush3.bf16.msra.mxu1 %v8712_v31  ;;  %2149 = vst.msk [vmem:[#allocation3 + $0x58] sm:$0x1] %vm1641_vm2, %v2148_v22  ;;  %v2131_v17 = vmax.f32 %v2120_v49, %v2129_v50  ;;  %v9701_v31 = vld [vmem:[#allocation3 + $0x33] sm:$0xff]  ;;  %v9703_v28 = vld [vmem:[#allocation3 + $0x41] sm:$0xff]  ;;  %v2199_v1 = vmul.f32 %v9620_v14, %v2195_v24  ;;  %v1041_v7 = vpop.f32.mrb[61].mxu0  ;;  %v2185_v34 = vmax.f32 %v2181_v37, 0.0 }
 0x16f   : > { %2150 = vst.msk [vmem:[#allocation3 + $0x57] sm:$0x4] %vm1643_vm5, %v2148_v22  ;;  %v2184_v60 = vadd.f32 %v9682_v53, %v2180_v44  ;;  %7958 = vmatprep.subr.bf16.mxu1 %v9676_v11  ;;  %2126 = vst.msk [vmem:[#allocation3 + $0x4f] sm:$0x4] %vm1643_vm5, %v2123_v55  ;;  %v2182_v62 = vadd.f32 %v9682_v53, %v2178_v59  ;;  %v2193_v30 = vld [vmem:[#allocation2 + $0x1c0] sm:$0xff]  ;;  %v2196_v47 = vld [vmem:[#allocation2 + $0x1d8] sm:$0xff] }
 0x170   : > { %2151 = vst.msk [vmem:[#allocation3 + $0x56] sm:$0x10] %vm1645_vm3, %v2148_v22  ;;  %2127 = vst.msk [vmem:[#allocation3 + $0x4e] sm:$0x10] %vm1645_vm3, %v2123_v55  ;;  %v2136_v8 = vmax.f32 %v2135_v58, %v2129_v50  ;;  %v2143_v16 = vmax.f32 %v2135_v58, %v2141_v42  ;;  %v9710_v33 = vld [vmem:[#allocation3 + $0x43] sm:$0xff]  ;;  %v2197_v6 = vmul.f32 %v9620_v14, %v2193_v30  ;;  %v7845_v36 = vpop.f32.mrb[62].mxu0 }
 0x171   : > { %2156 = vst.msk [vmem:[#allocation3 + $0x55] sm:$0x40] %vm1651_vm4, %v2155_v26  ;;  %11087 = vst [vmem:[#allocation9_spill] sm:$0xff] %v9703_v28  ;;  %v2188_v41 = vmax.f32 %v2184_v60, 0.0  ;;  %v9723_v42 = vadd.f32 %v9682_v53, %v2199_v1  ;;  %v2200_v27 = vmul.f32 %v9620_v14, %v2196_v47  ;;  %v2194_v43 = vld [vmem:[#allocation2 + $0x1c8] sm:$0xff]  ;;  %v1044_v44 = vpop.f32.mrb[63].mxu0  ;;  %v2191_v22 = vmax.f32 %v2111_v9, %v2187_v46 }
 0x172   : > { %2125 = vst.msk [vmem:[#allocation3 + $0x50] sm:$0x1] %vm1641_vm2, %v2123_v55  ;;  %11088 = vst [vmem:[#allocation10_spill] sm:$0xff] %v9710_v33  ;;  %v9727_v21 = vld [vmem:[#allocation3 + $0x33] sm:$0xff]  ;;  %v2186_v49 = vmax.f32 %v2182_v62, 0.0  ;;  %v9732_v2 = vadd.f32 %v9682_v53, %v2197_v6  ;;  %v2198_v50 = vmul.f32 %v9620_v14, %v2194_v43  ;;  %v2189_v37 = vmax.f32 %v2109_v25, %v2185_v34 }
 0x173   : > { %1086 = vst.msk [vmem:[#allocation2 + $0x1f0] sm:$0xff] %vm677_vm1, %v7844_v45  ;;  %1084 = vst.msk [vmem:[#allocation2 + $0x1e0] sm:$0xff] %vm677_vm1, %v1041_v7  ;;  %v2207_v26 = vmax.f32 %v9723_v42, 0.0  ;;  %v9742_v54 = vadd.f32 %v9682_v53, %v2200_v27  ;;  %v2192_v59 = vmax.f32 %v2112_v29, %v2188_v41 }
 0x174   : > { %2132 = vst.msk [vmem:[#allocation3 + $0x4d] sm:$0x40] %vm1651_vm4, %v2131_v17  ;;  %2144 = vst.msk [vmem:[#allocation3 + $0x51] sm:$0x40] %vm1651_vm4, %v2143_v16  ;;  %v2205_v55 = vmax.f32 %v9732_v2, 0.0  ;;  %v9748_v58 = vadd.f32 %v9682_v53, %v2198_v50  ;;  %v2190_v60 = vmax.f32 %v2110_v35, %v2186_v49 }
 0x175   : > { %2137 = vst.msk [vmem:[#allocation3 + $0x54] sm:$0x1] %vm1641_vm2, %v2136_v8  ;;  %11089 = vst [vmem:[#allocation11_spill] sm:$0xff] %v9727_v21  ;;  %v9754_v57 = vmax.f32 %v2191_v22, %v2207_v26  ;;  %v2208_v9 = vmax.f32 %v9742_v54, 0.0 }
 0x176   : > { %2138 = vst.msk [vmem:[#allocation3 + $0x53] sm:$0x4] %vm1643_vm5, %v2136_v8  ;;  %v2209_v63 = vmax.f32 %v2189_v37, %v2205_v55  ;;  %v2206_v25 = vmax.f32 %v9748_v58, 0.0 }
 0x177   : > { %2139 = vst.msk [vmem:[#allocation3 + $0x52] sm:$0x10] %vm1645_vm3, %v2136_v8  ;;  %v7854_v8 = vpop.f32.mrb[64].mxu0  ;;  %v2241_v62 = vrot.slane %v9754_v57, 1  ;;  %v2212_v23 = vmax.f32 %v2192_v59, %v2208_v9  ;;  %v2237_v30 = vrot.slane %v9754_v57, 2 }
 0x178   : > { %1087 = vst.msk [vmem:[#allocation2 + $0x1f8] sm:$0xff] %vm677_vm1, %v7845_v36  ;;  %1085 = vst.msk [vmem:[#allocation2 + $0x1e8] sm:$0xff] %vm677_vm1, %v1044_v44  ;;  %v1307_v45 = vpop.f32.mrb[65].mxu0  ;;  %v2214_v3 = vrot.slane %v2209_v63, 1  ;;  %v2210_v35 = vmax.f32 %v2190_v60, %v2206_v25  ;;  %v2217_v27 = vrot.slane %v2209_v63, 2 }
 0x179   : > { %1436 = vst.msk [vmem:[#allocation2 + $0x210] sm:$0xff] %vm677_vm1, %v7854_v8  ;;  %1434 = vst.msk [vmem:[#allocation2 + $0x200] sm:$0xff] %vm677_vm1, %v1307_v45  ;;  %v7855_v1 = vpop.f32.mrb[66].mxu0  ;;  %v2243_v7 = vmax.f32 %v9754_v57, %v2241_v62  ;;  %v2249_v34 = vrot.slane %v2212_v23, 2  ;;  %v2757_v62 = vld [vmem:[#allocation3 + $0x41] sm:$0xff] }
 0x17a   : > { %v2271_v17 = vld [vmem:[#allocation2 + $0x1f0] sm:$0xff]  ;;  %v2269_v24 = vld [vmem:[#allocation2 + $0x1e0] sm:$0xff]  ;;  %1437 = vst.msk [vmem:[#allocation2 + $0x218] sm:$0xff] %vm677_vm1, %v7855_v1  ;;  %v1310_v36 = vpop.f32.mrb[67].mxu0  ;;  %v2216_v41 = vmax.f32 %v2209_v63, %v2214_v3  ;;  %v2225_v43 = vrot.slane %v2210_v35, 2  ;;  %v2229_v44 = vrot.slane %v2210_v35, 1 }
 0x17b   : > { %v2275_v29 = vmul.f32 %v9620_v14, %v2271_v17  ;;  %v2273_v16 = vmul.f32 %v9620_v14, %v2269_v24  ;;  %1435 = vst.msk [vmem:[#allocation2 + $0x208] sm:$0xff] %vm677_vm1, %v1310_v36  ;;  %v2244_v22 = vmax.f32 %v2243_v7, %v2237_v30  ;;  %v2251_v37 = vmax.f32 %v2243_v7, %v2249_v34  ;;  %v2978_v23 = vld [vmem:[#allocation3 + $0x42] sm:$0xff] }
 0x17c   : > { %v2219_v57 = vmax.f32 %v2216_v41, %v2217_v27  ;;  %v2231_v60 = vmax.f32 %v2210_v35, %v2229_v44 }
 0x17d   : > { %v2279_v59 = vadd.f32 %v9682_v53, %v2275_v29  ;;  %v2277_v17 = vadd.f32 %v9682_v53, %v2273_v16  ;;  %2245 = vst.msk [vmem:[#allocation3 + $0x68] sm:$0x1] %vm1641_vm2, %v2244_v22  ;;  %v7858_v16 = vpop.f32.mrb[68].mxu0 }
 0x17e   : > { %v2758_v49 = vld [vmem:[#allocation3 + $0x51] sm:$0xff]  ;;  %2246 = vst.msk [vmem:[#allocation3 + $0x67] sm:$0x4] %vm1643_vm5, %v2244_v22  ;;  %2222 = vst.msk [vmem:[#allocation3 + $0x5f] sm:$0x4] %vm1643_vm5, %v2219_v57  ;;  %v2232_v45 = vmax.f32 %v2231_v60, %v2225_v43 }
 0x17f   : > { %v2272_v46 = vld [vmem:[#allocation2 + $0x1f8] sm:$0xff]  ;;  %v2270_v47 = vld [vmem:[#allocation2 + $0x1e8] sm:$0xff]  ;;  %2247 = vst.msk [vmem:[#allocation3 + $0x66] sm:$0x10] %vm1645_vm3, %v2244_v22  ;;  %v2763_v24 = vpack.c.bf16 %v2758_v49, %v2757_v62  ;;  %2223 = vst.msk [vmem:[#allocation3 + $0x5e] sm:$0x10] %vm1645_vm3, %v2219_v57 }
 0x180   : > { %v2276_v6 = vmul.f32 %v9620_v14, %v2272_v46  ;;  %v2979_v50 = vld [vmem:[#allocation3 + $0x52] sm:$0xff]  ;;  %v2274_v8 = vmul.f32 %v9620_v14, %v2270_v47  ;;  %2252 = vst.msk [vmem:[#allocation3 + $0x65] sm:$0x40] %vm1651_vm4, %v2251_v37  ;;  %v2227_v46 = vmax.f32 %v2216_v41, %v2225_v43  ;;  %v2283_v1 = vmax.f32 %v2279_v59, 0.0  ;;  %v2289_v34 = vld [vmem:[#allocation2 + $0x200] sm:$0xff] }
 0x181   : > { %v2984_v29 = vpack.c.bf16 %v2979_v50, %v2978_v23  ;;  %2221 = vst.msk [vmem:[#allocation3 + $0x60] sm:$0x1] %vm1641_vm2, %v2219_v57  ;;  %v2291_v35 = vld [vmem:[#allocation2 + $0x210] sm:$0xff]  ;;  %7906 = vmatprep.mubr.msk.bf16.mxu0 %vm677_vm1, %v2763_v24  ;;  %v2239_v47 = vmax.f32 %v2231_v60, %v2237_v30  ;;  %2233 = vst.msk [vmem:[#allocation3 + $0x64] sm:$0x1] %vm1641_vm2, %v2232_v45  ;;  %v2281_v41 = vmax.f32 %v2277_v17, 0.0 }
 0x182   : > { %v2280_v63 = vadd.f32 %v9682_v53, %v2276_v6  ;;  %v2278_v3 = vadd.f32 %v9682_v53, %v2274_v8  ;;  %v2295_v7 = vmul.f32 %v9620_v14, %v2291_v35  ;;  %1440 = vst.msk [vmem:[#allocation2 + $0x230] sm:$0xff] %vm677_vm1, %v7858_v16  ;;  %v1323_v6 = vpop.f32.mrb[69].mxu0  ;;  %v9792_v36 = vld [vmem:[#allocation3 + $0x52] sm:$0xff]  ;;  %v2293_v27 = vmul.f32 %v9620_v14, %v2289_v34  ;;  %v2290_v37 = vld [vmem:[#allocation2 + $0x208] sm:$0xff] }
 0x183   : > { %7938 = vmatprep.mubr.msk.bf16.mxu1 %vm677_vm1, %v2984_v29  ;;  %11090 = vst [vmem:[#allocation12_spill] sm:$0xff] %v9792_v36  ;;  %2234 = vst.msk [vmem:[#allocation3 + $0x63] sm:$0x4] %vm1643_vm5, %v2232_v45  ;;  %v2292_v43 = vld [vmem:[#allocation2 + $0x218] sm:$0xff]  ;;  %v7859_v44 = vpop.f32.mrb[70].mxu0  ;;  %v9800_v49 = vld [vmem:[#allocation3 + $0x50] sm:$0xff]  ;;  %v2294_v62 = vmul.f32 %v9620_v14, %v2290_v37  ;;  %v2287_v24 = vmax.f32 %v2207_v26, %v2283_v1  ;;  %v2285_v16 = vmax.f32 %v2205_v55, %v2281_v41 }
 0x184   : > { %2235 = vst.msk [vmem:[#allocation3 + $0x62] sm:$0x10] %vm1645_vm3, %v2232_v45  ;;  %11091 = vst [vmem:[#allocation13_spill] sm:$0xff] %v9800_v49  ;;  %v2284_v30 = vmax.f32 %v2280_v63, 0.0  ;;  %v9803_v50 = vadd.f32 %v9682_v53, %v2295_v7  ;;  %v2296_v22 = vmul.f32 %v9620_v14, %v2292_v43  ;;  %v1326_v59 = vpop.f32.mrb[71].mxu0  ;;  %v9808_v57 = vld [vmem:[#allocation3 + $0x42] sm:$0xff]  ;;  %v9813_v8 = vadd.f32 %v9682_v53, %v2293_v27 }
 0x185   : > { %1438 = vst.msk [vmem:[#allocation2 + $0x220] sm:$0xff] %vm677_vm1, %v1323_v6  ;;  %1441 = vst.msk [vmem:[#allocation2 + $0x238] sm:$0xff] %vm677_vm1, %v7859_v44  ;;  %v9810_v60 = vld [vmem:[#allocation3 + $0x54] sm:$0xff]  ;;  %v2282_v17 = vmax.f32 %v2278_v3, 0.0  ;;  %v9819_v63 = vld [vmem:[#allocation3 + $0x40] sm:$0xff]  ;;  %v9835_v7 = vadd.f32 %v9682_v53, %v2294_v62  ;;  %v7862_v41 = vpop.f32.mrb[72].mxu0 }
 0x186   : > { %2228 = vst.msk [vmem:[#allocation3 + $0x5d] sm:$0x40] %vm1651_vm4, %v2227_v46  ;;  %2240 = vst.msk [vmem:[#allocation3 + $0x61] sm:$0x40] %vm1651_vm4, %v2239_v47  ;;  %v2303_v29 = vmax.f32 %v9803_v50, 0.0  ;;  %v9825_v45 = vadd.f32 %v9682_v53, %v2296_v22  ;;  %v9827_v3 = vld [vmem:[#allocation3 + $0x44] sm:$0xff]  ;;  %v2288_v26 = vmax.f32 %v2208_v9, %v2284_v30 }
 0x187   : > { %11092 = vst [vmem:[#allocation14_spill] sm:$0xff] %v9808_v57  ;;  %11093 = vst [vmem:[#allocation15_spill] sm:$0xff] %v9810_v60  ;;  %v2301_v46 = vmax.f32 %v9813_v8, 0.0  ;;  %v2286_v2 = vmax.f32 %v2206_v25, %v2282_v17  ;;  %v2302_v6 = vmax.f32 %v9835_v7, 0.0  ;;  %v1339_v44 = vpop.f32.mrb[73].mxu0 }
 0x188   : > { %1439 = vst.msk [vmem:[#allocation2 + $0x228] sm:$0xff] %vm677_vm1, %v1326_v59  ;;  %11094 = vst [vmem:[#allocation16_spill] sm:$0xff] %v9819_v63  ;;  %v2307_v1 = vmax.f32 %v2287_v24, %v2303_v29  ;;  %v2304_v34 = vmax.f32 %v9825_v45, 0.0  ;;  %v7863_v37 = vpop.f32.mrb[74].mxu0 }
 0x189   : > { %11095 = vst [vmem:[#allocation17_spill] sm:$0xff] %v9827_v3  ;;  %v2305_v55 = vmax.f32 %v2285_v16, %v2301_v46  ;;  %v2367_v47 = vld [vmem:[#allocation2 + $0x230] sm:$0xff]  ;;  %1444 = vst.msk [vmem:[#allocation2 + $0x250] sm:$0xff] %vm677_vm1, %v7862_v41  ;;  %v2306_v58 = vmax.f32 %v2286_v2, %v2302_v6 }
 0x18a   : > { %v2337_v27 = vrot.slane %v2307_v1, 1  ;;  %v2308_v54 = vmax.f32 %v2288_v26, %v2304_v34  ;;  %v2371_v9 = vmul.f32 %v9620_v14, %v2367_v47  ;;  %1442 = vst.msk [vmem:[#allocation2 + $0x240] sm:$0xff] %vm677_vm1, %v1339_v44  ;;  %v2333_v59 = vrot.slane %v2307_v1, 2  ;;  %1445 = vst.msk [vmem:[#allocation2 + $0x258] sm:$0xff] %vm677_vm1, %v7863_v37  ;;  %v1342_v26 = vpop.f32.mrb[75].mxu0 }
 0x18b   : > { %v2310_v30 = vrot.slane %v2305_v55, 1  ;;  %v2313_v41 = vrot.slane %v2305_v55, 2  ;;  %v2321_v42 = vrot.slane %v2306_v58, 2  ;;  %v2325_v35 = vrot.slane %v2306_v58, 1  ;;  %1443 = vst.msk [vmem:[#allocation2 + $0x248] sm:$0xff] %vm677_vm1, %v1342_v26 }
 0x18c   : > { %v2365_v43 = vld [vmem:[#allocation2 + $0x220] sm:$0xff]  ;;  %v2368_v22 = vld [vmem:[#allocation2 + $0x238] sm:$0xff]  ;;  %v2339_v17 = vmax.f32 %v2307_v1, %v2337_v27  ;;  %v2345_v62 = vrot.slane %v2308_v54, 2  ;;  %v2375_v44 = vadd.f32 %v9682_v53, %v2371_v9 }
 0x18d   : > { %v2369_v25 = vmul.f32 %v9620_v14, %v2365_v43  ;;  %v2372_v24 = vmul.f32 %v9620_v14, %v2368_v22  ;;  %v2312_v47 = vmax.f32 %v2305_v55, %v2310_v30  ;;  %v2327_v48 = vmax.f32 %v2306_v58, %v2325_v35  ;;  %v9868_v30 = vld [vmem:[#allocation3 + $0x63] sm:$0xff]  ;;  %v7866_v22 = vpop.f32.mrb[76].mxu0 }
 0x18e   : > { %v2340_v2 = vmax.f32 %v2339_v17, %v2333_v59  ;;  %v2347_v43 = vmax.f32 %v2339_v17, %v2345_v62  ;;  %v9870_v9 = vld [vmem:[#allocation3 + $0x64] sm:$0xff]  ;;  %v9876_v17 = vld [vmem:[#allocation3 + $0x53] sm:$0xff]  ;;  %1448 = vst.msk [vmem:[#allocation2 + $0x270] sm:$0xff] %vm677_vm1, %v7866_v22 }
 0x18f   : > { %v2366_v16 = vld [vmem:[#allocation2 + $0x228] sm:$0xff]  ;;  %v2315_v51 = vmax.f32 %v2312_v47, %v2313_v41  ;;  %v2373_v1 = vadd.f32 %v9682_v53, %v2369_v25  ;;  %v2376_v55 = vadd.f32 %v9682_v53, %v2372_v24  ;;  %v2323_v54 = vmax.f32 %v2312_v47, %v2321_v42  ;;  %v1355_v47 = vpop.f32.mrb[77].mxu0  ;;  %v10114_v21 = vld [vmem:[#allocation3 + $0x60] sm:$0xff] }
 0x190   : > { %v2370_v27 = vmul.f32 %v9620_v14, %v2366_v16  ;;  %2341 = vst.msk [vmem:[#allocation3 + $0x78] sm:$0x1] %vm1641_vm2, %v2340_v2  ;;  %v2328_v35 = vmax.f32 %v2327_v48, %v2321_v42  ;;  %v2387_v25 = vld [vmem:[#allocation2 + $0x250] sm:$0xff]  ;;  %v2335_v37 = vmax.f32 %v2327_v48, %v2333_v59  ;;  %v9878_v62 = vld [vmem:[#allocation3 + $0x61] sm:$0xff]  ;;  %v2379_v24 = vmax.f32 %v2375_v44, 0.0 }
 0x191   : > { %2342 = vst.msk [vmem:[#allocation3 + $0x77] sm:$0x4] %vm1643_vm5, %v2340_v2  ;;  %2318 = vst.msk [vmem:[#allocation3 + $0x6f] sm:$0x4] %vm1643_vm5, %v2315_v51  ;;  %v2391_v16 = vmul.f32 %v9620_v14, %v2387_v25  ;;  %v2385_v26 = vld [vmem:[#allocation2 + $0x240] sm:$0xff]  ;;  %v2377_v48 = vmax.f32 %v2373_v1, 0.0 }
 0x192   : > { %2343 = vst.msk [vmem:[#allocation3 + $0x76] sm:$0x10] %vm1645_vm3, %v2340_v2  ;;  %2319 = vst.msk [vmem:[#allocation3 + $0x6e] sm:$0x10] %vm1645_vm3, %v2315_v51  ;;  %v2374_v58 = vadd.f32 %v9682_v53, %v2370_v27  ;;  %v9885_v42 = vld [vmem:[#allocation3 + $0x62] sm:$0xff]  ;;  %v2389_v59 = vmul.f32 %v9620_v14, %v2385_v26  ;;  %v2388_v41 = vld [vmem:[#allocation2 + $0x258] sm:$0xff] }
 0x193   : > { %2348 = vst.msk [vmem:[#allocation3 + $0x75] sm:$0x40] %vm1651_vm4, %v2347_v43  ;;  %11096 = vst [vmem:[#allocation18_spill] sm:$0xff] %v9878_v62  ;;  %v7867_v2 = vpop.f32.mrb[78].mxu0  ;;  %v9897_v27 = vld [vmem:[#allocation3 + $0x51] sm:$0xff]  ;;  %v2392_v1 = vmul.f32 %v9620_v14, %v2388_v41  ;;  %v2386_v25 = vld [vmem:[#allocation2 + $0x248] sm:$0xff] }
 0x194   : > { %2317 = vst.msk [vmem:[#allocation3 + $0x70] sm:$0x1] %vm1641_vm2, %v2315_v51  ;;  %v9883_v51 = vld [vmem:[#allocation3 + $0x54] sm:$0xff]  ;;  %11097 = vst [vmem:[#allocation19_spill] sm:$0xff] %v9885_v42  ;;  %v1358_v22 = vpop.f32.mrb[79].mxu0  ;;  %v2378_v26 = vmax.f32 %v2374_v58, 0.0  ;;  %v2390_v23 = vmul.f32 %v9620_v14, %v2386_v25  ;;  %v2381_v58 = vmax.f32 %v2301_v46, %v2377_v48 }
 0x195   : > { %2324 = vst.msk [vmem:[#allocation3 + $0x6d] sm:$0x40] %vm1651_vm4, %v2323_v54  ;;  %2336 = vst.msk [vmem:[#allocation3 + $0x71] sm:$0x40] %vm1651_vm4, %v2335_v37  ;;  %v2380_v54 = vmax.f32 %v2376_v55, 0.0  ;;  %v2463_v48 = vld [vmem:[#allocation2 + $0x270] sm:$0xff] }
 0x196   : > { %2329 = vst.msk [vmem:[#allocation3 + $0x74] sm:$0x1] %vm1641_vm2, %v2328_v35  ;;  %v9923_v25 = vadd.f32 %v9682_v53, %v2390_v23  ;;  %v7870_v23 = vpop.f32.mrb[80].mxu0  ;;  %v9970_v39 = vld [vmem:[#allocation3 + $0x62] sm:$0xff] }
 0x197   : > { %2330 = vst.msk [vmem:[#allocation3 + $0x73] sm:$0x4] %vm1643_vm5, %v2328_v35 }
 0x198   : > { %2331 = vst.msk [vmem:[#allocation3 + $0x72] sm:$0x10] %vm1645_vm3, %v2328_v35  ;;  %v9900_v35 = vadd.f32 %v9682_v53, %v2391_v16  ;;  %v2383_v16 = vmax.f32 %v2303_v29, %v2379_v24  ;;  %v2382_v24 = vmax.f32 %v2302_v6, %v2378_v26  ;;  %v11052_v46 = vmax.f32 %v9923_v25, 0.0 }
 0x199   : > { %1446 = vst.msk [vmem:[#allocation2 + $0x260] sm:$0xff] %vm677_vm1, %v1355_v47  ;;  %1449 = vst.msk [vmem:[#allocation2 + $0x278] sm:$0xff] %vm677_vm1, %v7867_v2  ;;  %v9907_v47 = vadd.f32 %v9682_v53, %v2389_v59  ;;  %v9917_v2 = vadd.f32 %v9682_v53, %v2392_v1 }
 0x19a   : > { %1447 = vst.msk [vmem:[#allocation2 + $0x268] sm:$0xff] %vm677_vm1, %v1358_v22  ;;  %v2399_v41 = vmax.f32 %v9900_v35, 0.0  ;;  %v2384_v22 = vmax.f32 %v2304_v34, %v2380_v54  ;;  %v2467_v34 = vmul.f32 %v9620_v14, %v2463_v48  ;;  %1452 = vst.msk [vmem:[#allocation2 + $0x290] sm:$0xff] %vm677_vm1, %v7870_v23  ;;  %v9945_v26 = vmax.f32 %v2382_v24, %v11052_v46 }
 0x19b   : > { %v11054_v59 = vmax.f32 %v9907_v47, 0.0  ;;  %v11053_v29 = vmax.f32 %v9917_v2, 0.0 }
 0x19c   : > { %v9929_v50 = vmax.f32 %v2383_v16, %v2399_v41  ;;  %v1371_v16 = vpop.f32.mrb[81].mxu0  ;;  %v2471_v56 = vadd.f32 %v9682_v53, %v2467_v34  ;;  %v2421_v12 = vrot.slane %v9945_v26, 1 }
 0x19d   : > { %v2401_v8 = vmax.f32 %v2381_v58, %v11054_v59  ;;  %v2404_v45 = vmax.f32 %v2384_v22, %v11053_v29  ;;  %1450 = vst.msk [vmem:[#allocation2 + $0x280] sm:$0xff] %vm677_vm1, %v1371_v16  ;;  %v7871_v37 = vpop.f32.mrb[82].mxu0 }
 0x19e   : > { %v2433_v1 = vrot.slane %v9929_v50, 1  ;;  %v11055_v7 = vrot.slane %v9929_v50, 2  ;;  %1453 = vst.msk [vmem:[#allocation2 + $0x298] sm:$0xff] %vm677_vm1, %v7871_v37  ;;  %v1374_v44 = vpop.f32.mrb[83].mxu0  ;;  %v2423_v43 = vmax.f32 %v9945_v26, %v2421_v12 }
 0x19f   : > { %v2406_v6 = vrot.slane %v2401_v8, 1  ;;  %v2441_v48 = vrot.slane %v2404_v45, 2  ;;  %v2409_v24 = vrot.slane %v2401_v8, 2  ;;  %1451 = vst.msk [vmem:[#allocation2 + $0x288] sm:$0xff] %vm677_vm1, %v1374_v44  ;;  %v9956_v16 = vld [vmem:[#allocation3 + $0x71] sm:$0xff]  ;;  %v9968_v44 = vld [vmem:[#allocation3 + $0x61] sm:$0xff] }
 0x1a0   : > { %v2461_v54 = vld [vmem:[#allocation2 + $0x260] sm:$0xff]  ;;  %v2464_v55 = vld [vmem:[#allocation2 + $0x278] sm:$0xff]  ;;  %v2435_v22 = vmax.f32 %v9929_v50, %v2433_v1  ;;  %v9960_v45 = vld [vmem:[#allocation3 + $0x10] sm:$0xff]  ;;  %v7874_v46 = vpop.f32.mrb[84].mxu0 }
 0x1a1   : > { %v2465_v58 = vmul.f32 %v9620_v14, %v2461_v54  ;;  %v2468_v23 = vmul.f32 %v9620_v14, %v2464_v55  ;;  %v2462_v5 = vld [vmem:[#allocation2 + $0x268] sm:$0xff]  ;;  %v2408_v40 = vmax.f32 %v2401_v8, %v2406_v6  ;;  %v9958_v1 = vld [vmem:[#allocation3 + $0x72] sm:$0xff]  ;;  %v2417_v8 = vrot.slane %v9945_v26, 2  ;;  %1456 = vst.msk [vmem:[#allocation2 + $0x2b0] sm:$0xff] %vm677_vm1, %v7874_v46 }
 0x1a2   : > { %v2436_v55 = vmax.f32 %v2435_v22, %v11055_v7  ;;  %v2443_v34 = vmax.f32 %v2435_v22, %v2441_v48  ;;  %v2475_v22 = vmax.f32 %v2471_v56, 0.0  ;;  %v2764_v48 = vpack.c.bf16 %v9956_v16, %v9968_v44  ;;  %v3102_v26 = vld [vmem:[#allocation3 + $0x3] sm:$0xff]  ;;  %v2483_v56 = vld [vmem:[#allocation2 + $0x290] sm:$0xff] }
 0x1a3   : > { %v2469_v54 = vadd.f32 %v9682_v53, %v2465_v58  ;;  %v2472_v37 = vadd.f32 %v9682_v53, %v2468_v23  ;;  %v2411_v6 = vmax.f32 %v2408_v40, %v2409_v24  ;;  %v2466_v58 = vmul.f32 %v9620_v14, %v2462_v5  ;;  %v9997_v46 = vld [vmem:[#allocation3 + $0x73] sm:$0xff] }
 0x1a4   : > { %2437 = vst.msk [vmem:[#allocation3 + $0x88] sm:$0x1] %vm1641_vm2, %v2436_v55  ;;  %v2985_v12 = vpack.c.bf16 %v9958_v1, %v9970_v39  ;;  %v2741_v5 = vpack.c.bf16 %v9960_v45, %v2733_v38  ;;  %v2424_v23 = vmax.f32 %v2423_v43, %v2417_v8  ;;  %v2487_v59 = vmul.f32 %v9620_v14, %v2483_v56  ;;  %v2481_v7 = vld [vmem:[#allocation2 + $0x280] sm:$0xff]  ;;  %v1387_v38 = vpop.f32.mrb[85].mxu0  ;;  %v10168_v4 = vld [vmem:[#allocation3 + $0x71] sm:$0xff] }
 0x1a5   : > { %2438 = vst.msk [vmem:[#allocation3 + $0x87] sm:$0x4] %vm1643_vm5, %v2436_v55  ;;  %2414 = vst.msk [vmem:[#allocation3 + $0x7f] sm:$0x4] %vm1643_vm5, %v2411_v6  ;;  %v2473_v24 = vmax.f32 %v2469_v54, 0.0  ;;  %v2476_v29 = vmax.f32 %v2472_v37, 0.0  ;;  %7907 = vmatmul.mubr.msk.bf16.gmra.mrb[104].mxu0 %vm677_vm1, %v2764_v48  ;;  %v2419_v48 = vmax.f32 %v2408_v40, %v2417_v8 }
 0x1a6   : > { %2439 = vst.msk [vmem:[#allocation3 + $0x86] sm:$0x10] %vm1645_vm3, %v2436_v55  ;;  %2415 = vst.msk [vmem:[#allocation3 + $0x7e] sm:$0x10] %vm1645_vm3, %v2411_v6  ;;  %v2470_v55 = vadd.f32 %v9682_v53, %v2466_v58  ;;  %7939 = vmatmul.mubr.msk.bf16.gmra.mrb[4].mxu1 %vm677_vm1, %v2985_v12  ;;  %v2484_v37 = vld [vmem:[#allocation2 + $0x298] sm:$0xff]  ;;  %7918 = vmatprep.mubr.msk.bf16.mxu0 %vm677_vm1, %v2741_v5  ;;  %v7875_v58 = vpop.f32.mrb[86].mxu0  ;;  %v2479_v12 = vmax.f32 %v2399_v41, %v2475_v22 }
 0x1a7   : > { %2444 = vst.msk [vmem:[#allocation3 + $0x85] sm:$0x40] %vm1651_vm4, %v2443_v34  ;;  %v3110_v34 = vpack.c.bf16 %v9495_v13, %v3102_v26  ;;  %11098 = vst [vmem:[#allocation20_spill] sm:$0xff] %v9997_v46  ;;  %v10002_v26 = vadd.f32 %v9682_v53, %v2487_v59  ;;  %v1390_v5 = vpop.f32.mrb[87].mxu0  ;;  %v11101_v40 = vmax.f32 %v9907_v47, 0.0  ;;  %v10016_v59 = vld [vmem:[#allocation3 + $0x30] sm:$0xff] }
 0x1a8   : > { %2413 = vst.msk [vmem:[#allocation3 + $0x80] sm:$0x1] %vm1641_vm2, %v2411_v6  ;;  %2425 = vst.msk [vmem:[#allocation3 + $0x84] sm:$0x1] %vm1641_vm2, %v2424_v23  ;;  %v2474_v54 = vmax.f32 %v2470_v55, 0.0  ;;  %v2485_v6 = vmul.f32 %v9620_v14, %v2481_v7  ;;  %v2482_v7 = vld [vmem:[#allocation2 + $0x288] sm:$0xff] }
 0x1a9   : > { %2426 = vst.msk [vmem:[#allocation3 + $0x83] sm:$0x4] %vm1643_vm5, %v2424_v23  ;;  %7950 = vmatprep.mubr.msk.bf16.mxu1 %vm677_vm1, %v3110_v34  ;;  %v11099_v55 = vrot.slane %v9929_v50, 2  ;;  %v10008_v34 = vld [vmem:[#allocation3 + $0x74] sm:$0xff]  ;;  %v2477_v8 = vmax.f32 %v11101_v40, %v2473_v24  ;;  %v2486_v41 = vmul.f32 %v9620_v14, %v2482_v7  ;;  %v10020_v22 = vld [vmem:[#allocation3 + $0x63] sm:$0xff]  ;;  %v11110_v28 = vmax.f32 %v10002_v26, 0.0 }
 0x1aa   : > { %2427 = vst.msk [vmem:[#allocation3 + $0x82] sm:$0x10] %vm1645_vm3, %v2424_v23  ;;  %v2488_v23 = vmul.f32 %v9620_v14, %v2484_v37  ;;  %11100 = vst [vmem:[#allocation21_spill] sm:$0xff] %v10008_v34  ;;  %v10013_v35 = vadd.f32 %v9682_v53, %v2485_v6  ;;  %v10028_v24 = vld [vmem:[#allocation3 + $0x50] sm:$0xff]  ;;  %v10031_v6 = vld [vmem:[#allocation3 + $0x64] sm:$0xff]  ;;  %v7878_v37 = vpop.f32.mrb[88].mxu0 }
 0x1ab   : > { %1454 = vst.msk [vmem:[#allocation2 + $0x2a0] sm:$0xff] %vm677_vm1, %v1387_v38  ;;  %1457 = vst.msk [vmem:[#allocation2 + $0x2b8] sm:$0xff] %vm677_vm1, %v7875_v58  ;;  %v2431_v56 = vmax.f32 %v2423_v43, %v11099_v55  ;;  %v11103_v43 = vmax.f32 %v9917_v2, 0.0  ;;  %v11056_v38 = vmax.f32 %v10002_v26, 0.0  ;;  %v11105_v58 = vmax.f32 %v9923_v25, 0.0  ;;  %v10041_v7 = vld [vmem:[#allocation3 + $0x20] sm:$0xff] }
 0x1ac   : > { %1455 = vst.msk [vmem:[#allocation2 + $0x2a8] sm:$0xff] %vm677_vm1, %v1390_v5  ;;  %11102 = vst [vmem:[#allocation22_spill] sm:$0xff] %v10020_v22  ;;  %v10026_v47 = vadd.f32 %v9682_v53, %v2488_v23  ;;  %v11057_v2 = vmax.f32 %v10013_v35, 0.0  ;;  %v10052_v25 = vpack.c.bf16 %v10016_v59, %v10041_v7  ;;  %v10055_v40 = vld [vmem:[#allocation3 + $0x40] sm:$0xff]  ;;  %v3112_v23 = vpack.c.bf16 %v9876_v17, %v9693_v61  ;;  %v1403_v34 = vpop.f32.mrb[89].mxu0 }
 0x1ad   : > { %2420 = vst.msk [vmem:[#allocation3 + $0x7d] sm:$0x40] %vm1651_vm4, %v2419_v48  ;;  %v2480_v50 = vmax.f32 %v11103_v43, %v2476_v29  ;;  %2432 = vst.msk [vmem:[#allocation3 + $0x81] sm:$0x40] %vm1651_vm4, %v2431_v56  ;;  %v2478_v48 = vmax.f32 %v11105_v58, %v2474_v54  ;;  %v10039_v29 = vadd.f32 %v9682_v53, %v2486_v41  ;;  %v8835_v54 = vld [vmem:[#allocation3 + $0x23] sm:$0xff]  ;;  %v2559_v58 = vld [vmem:[#allocation2 + $0x2b0] sm:$0xff] }
 0x1ae   : > { %11104 = vst [vmem:[#allocation23_spill] sm:$0xff] %v10031_v6  ;;  %v10047_v5 = vmax.f32 %v2479_v12, %v11056_v38  ;;  %v3111_v56 = vpack.c.bf16 %v9701_v31, %v8835_v54  ;;  %v2497_v41 = vmax.f32 %v2477_v8, %v11057_v2  ;;  %v10062_v12 = vpack.c.bf16 %v10028_v24, %v10055_v40  ;;  %v8714_v54 = vld [vmem:[%s11046_s4 + $0x88] sm:$0xff]   ;;  %v8717_v26 = vld [vmem:[%s11046_s4 + $0xa0] sm:$0xff]  }
 0x1af   : > { %v11106_v8 = vmax.f32 %v10026_v47, 0.0  ;;  %v2563_v43 = vmul.f32 %v9620_v14, %v2559_v58  ;;  %7919 = vmatmul.mubr.msk.bf16.vlgmr.msra.gmra.mrb[100].mxu0 %vm677_vm1, %v10052_v25  ;;  %1460 = vst.msk [vmem:[#allocation2 + $0x2d0] sm:$0xff] %vm677_vm1, %v7878_v37  ;;  %v11107_v38 = vmax.f32 %v10039_v29, 0.0  ;;  %1458 = vst.msk [vmem:[#allocation2 + $0x2c0] sm:$0xff] %vm677_vm1, %v1403_v34 }
 0x1b0   : > { %v2529_v55 = vrot.slane %v10047_v5, 1  ;;  %7951 = vmatmul.mubr.msk.bf16.vlgmr.msra.gmra.mrb[0].mxu1 %vm677_vm1, %v3111_v56  ;;  %v2502_v3 = vrot.slane %v2497_v41, 1  ;;  %v2505_v60 = vrot.slane %v2497_v41, 2  ;;  %7922 = vmatprep.mubr.msk.bf16.mxu0 %vm677_vm1, %v10062_v12  ;;  %v7879_v56 = vpop.f32.mrb[90].mxu0 }
 0x1b1   : > { %v2500_v2 = vmax.f32 %v2480_v50, %v11106_v8  ;;  %v10080_v22 = vmax.f32 %v2478_v48, %v11107_v38  ;;  %7954 = vmatprep.mubr.msk.bf16.mxu1 %vm677_vm1, %v3112_v23  ;;  %v10089_v8 = vadd.f32 %v9682_v53, %v2563_v43  ;;  %7959 = vmatpush3.bf16.msra.mxu1 %v9676_v11  ;;  %v1406_v48 = vpop.f32.mrb[91].mxu0  ;;  %v10102_v11 = vld [vmem:[#allocation3 + $0x73] sm:$0xff] }
 0x1b2   : > { %v2557_v6 = vld [vmem:[#allocation2 + $0x2a0] sm:$0xff]  ;;  %v2560_v50 = vld [vmem:[#allocation2 + $0x2b8] sm:$0xff]  ;;  %v2531_v37 = vmax.f32 %v10047_v5, %v2529_v55  ;;  %1461 = vst.msk [vmem:[#allocation2 + $0x2d8] sm:$0xff] %vm677_vm1, %v7879_v56  ;;  %v2504_v63 = vmax.f32 %v2497_v41, %v2502_v3  ;;  %7960 = vmatprep.subr.bf16.mxu1 %v8714_v54  ;;  %1459 = vst.msk [vmem:[#allocation2 + $0x2c8] sm:$0xff] %vm677_vm1, %v1406_v48  ;;  %v11108_v3 = vrot.slane %v10047_v5, 2 }
 0x1b3   : > { %v2561_v46 = vmul.f32 %v9620_v14, %v2557_v6  ;;  %v2537_v58 = vrot.slane %v2500_v2, 2  ;;  %v2564_v38 = vmul.f32 %v9620_v14, %v2560_v50  ;;  %v2558_v6 = vld [vmem:[#allocation2 + $0x2a8] sm:$0xff]  ;;  %v2513_v23 = vrot.slane %v10080_v22, 2  ;;  %v10100_v2 = vld [vmem:[#allocation3 + $0x70] sm:$0xff] }
 0x1b4   : > { %v2517_v34 = vrot.slane %v10080_v22, 1  ;;  %v8715_v55 = vld [vmem:[%s11046_s4 + $0x90] sm:$0xff]   ;;  %v2532_v41 = vmax.f32 %v2531_v37, %v11108_v3  ;;  %v2562_v48 = vmul.f32 %v9620_v14, %v2558_v6 }
 0x1b5   : > { %v10097_v49 = vadd.f32 %v9682_v53, %v2561_v46  ;;  %v2539_v43 = vmax.f32 %v2531_v37, %v2537_v58  ;;  %v10110_v50 = vadd.f32 %v9682_v53, %v2564_v38  ;;  %v2507_v46 = vmax.f32 %v2504_v63, %v2505_v60  ;;  %7961 = vmatpush3.bf16.msra.mxu1 %v8714_v54  ;;  %v3230_v58 = vld [vmem:[#allocation3 + $0x4] sm:$0xff] }
 0x1b6   : > { %v2519_v56 = vmax.f32 %v10080_v22, %v2517_v34  ;;  %2533 = vst.msk [vmem:[#allocation3 + $0x98] sm:$0x1] %vm1641_vm2, %v2532_v41  ;;  %v2571_v37 = vmax.f32 %v10089_v8, 0.0  ;;  %v10123_v60 = vpack.c.bf16 %v10100_v2, %v10114_v21  ;;  %v10127_v22 = vpack.c.bf16 %v10102_v11, %v9868_v30  ;;  %v2579_v8 = vld [vmem:[#allocation2 + $0x2d0] sm:$0xff]  ;;  %7962 = vmatprep.subr.bf16.mxu1 %v8715_v55  ;;  %v2577_v62 = vld [vmem:[#allocation2 + $0x2c0] sm:$0xff] }
 0x1b7   : > { %2534 = vst.msk [vmem:[#allocation3 + $0x97] sm:$0x4] %vm1643_vm5, %v2532_v41  ;;  %2510 = vst.msk [vmem:[#allocation3 + $0x8f] sm:$0x4] %vm1643_vm5, %v2507_v46  ;;  %v2569_v6 = vmax.f32 %v10097_v49, 0.0  ;;  %v2566_v54 = vadd.f32 %v9682_v53, %v2562_v48  ;;  %v8836_v34 = vld [vmem:[#allocation3 + $0x14] sm:$0xff]  ;;  %v2583_v42 = vmul.f32 %v9620_v14, %v2579_v8 }
 0x1b8   : > { %2535 = vst.msk [vmem:[#allocation3 + $0x96] sm:$0x10] %vm1645_vm3, %v2532_v41  ;;  %11109 = vst [vmem:[#allocation24_spill] sm:$0xff] %v10127_v22  ;;  %v2520_v38 = vmax.f32 %v2519_v56, %v2513_v23  ;;  %v3238_v3 = vpack.c.bf16 %v8836_v34, %v3230_v58  ;;  %v8716_v41 = vld [vmem:[%s11046_s4 + $0x98] sm:$0xff]   ;;  %v2572_v33 = vmax.f32 %v10110_v50, 0.0  ;;  %7923 = vmatmul.mubr.msk.bf16.gmra.mrb[104].mxu0 %vm677_vm1, %v10123_v60  ;;  %7955 = vmatmul.mubr.msk.bf16.gmra.mrb[4].mxu1 %vm677_vm1, %v10127_v22  ;;  %v10143_v49 = vld [vmem:[#allocation3 + $0x81] sm:$0xff] }
 0x1b9   : > { %2540 = vst.msk [vmem:[#allocation3 + $0x95] sm:$0x40] %vm1651_vm4, %v2539_v43  ;;  %v7882_v43 = vpop.f32.mrb[92].mxu0  ;;  %v2570_v50 = vmax.f32 %v2566_v54, 0.0  ;;  %v10152_v14 = vld [vmem:[%s11044_s2] ss:$0 sm:$0xff]  ;;  %v10162_v54 = vadd.f32 %v9682_v53, %v2583_v42  ;;  %7963 = vmatpush3.bf16.msra.mxu1 %v8715_v55 }
 0x1ba   : > { %2509 = vst.msk [vmem:[#allocation3 + $0x90] sm:$0x1] %vm1641_vm2, %v2507_v46  ;;  %2521 = vst.msk [vmem:[#allocation3 + $0x94] sm:$0x1] %vm1641_vm2, %v2520_v38  ;;  %v2581_v48 = vmul.f32 %v10152_v14, %v2577_v62  ;;  %v2580_v58 = vld [vmem:[#allocation2 + $0x2d8] sm:$0xff]  ;;  %7966 = vmatprep.mubr.msk.bf16.mxu1 %vm677_vm1, %v3238_v3  ;;  %v10156_v8 = vld [vmem:[#allocation3 + $0x82] sm:$0xff]  ;;  %7964 = vmatprep.subr.bf16.mxu1 %v8716_v41 }
 0x1bb   : > { %2511 = vst.msk [vmem:[#allocation3 + $0x8e] sm:$0x10] %vm1645_vm3, %v2507_v46  ;;  %v1419_v46 = vpop.f32.mrb[93].mxu0  ;;  %2523 = vst.msk [vmem:[#allocation3 + $0x92] sm:$0x10] %vm1645_vm3, %v2520_v38  ;;  %v2584_v22 = vmul.f32 %v10152_v14, %v2580_v58  ;;  %v2578_v57 = vld [vmem:[#allocation2 + $0x2c8] sm:$0xff] }
 0x1bc   : > { %1464 = vst.msk [vmem:[#allocation2 + $0x2f0] sm:$0xff] %vm677_vm1, %v7882_v43  ;;  %1462 = vst.msk [vmem:[#allocation2 + $0x2e0] sm:$0xff] %vm677_vm1, %v1419_v46  ;;  %v7883_v34 = vpop.f32.mrb[94].mxu0  ;;  %v2515_v43 = vmax.f32 %v2504_v63, %v2513_v23  ;;  %v11111_v3 = vrot.slane %v10047_v5, 2  ;;  %v11112_v63 = vmax.f32 %v10013_v35, 0.0  ;;  %v2582_v42 = vmul.f32 %v10152_v14, %v2578_v57  ;;  %v10181_v5 = vld [vmem:[#allocation3 + $0x72] sm:$0xff] }
 0x1bd   : > { %2522 = vst.msk [vmem:[#allocation3 + $0x93] sm:$0x4] %vm1643_vm5, %v2520_v38  ;;  %v2575_v38 = vmax.f32 %v11110_v28, %v2571_v37  ;;  %v1422_v62 = vpop.f32.mrb[95].mxu0  ;;  %v10173_v28 = vadd.f32 %v9682_v53, %v2581_v48  ;;  %11113 = vst [vmem:[#allocation25_spill] sm:$0xff] %v10181_v5  ;;  %v11114_v55 = vmax.f32 %v10026_v47, 0.0  ;;  %v11079_v37 = vmax.f32 %v10162_v54, 0.0  ;;  %7965 = vmatpush3.bf16.msra.mxu1 %v8716_v41 }
 0x1be   : > { %1465 = vst.msk [vmem:[#allocation2 + $0x2f8] sm:$0xff] %vm677_vm1, %v7883_v34  ;;  %v2527_v36 = vmax.f32 %v2519_v56, %v11111_v3  ;;  %v2573_v23 = vmax.f32 %v11112_v63, %v2569_v6  ;;  %1463 = vst.msk [vmem:[#allocation2 + $0x2e8] sm:$0xff] %vm677_vm1, %v1422_v62  ;;  %v10189_v57 = vadd.f32 %v9682_v53, %v2584_v22  ;;  %v11115_v46 = vmax.f32 %v10039_v29, 0.0  ;;  %v7892_v41 = vpop.f32.mrb[96].mxu0 }
 0x1bf   : > { %2516 = vst.msk [vmem:[#allocation3 + $0x8d] sm:$0x40] %vm1651_vm4, %v2515_v43  ;;  %v2576_v56 = vmax.f32 %v11114_v55, %v2572_v33  ;;  %v11076_v58 = vmax.f32 %v10173_v28, 0.0  ;;  %v10198_v34 = vadd.f32 %v9682_v53, %v2582_v42  ;;  %v10202_v33 = vmax.f32 %v2575_v38, %v11079_v37  ;;  %v8838_v43 = vld [vmem:[#allocation3 + $0x24] sm:$0xff]  ;;  %7974 = vmatprep.subr.bf16.mxu1 %v8717_v26  ;;  %v1545_v55 = vpop.f32.mrb[97].mxu0 }
 0x1c0   : > { %2528 = vst.msk [vmem:[#allocation3 + $0x91] sm:$0x40] %vm1651_vm4, %v2527_v36  ;;  %v2574_v48 = vmax.f32 %v11115_v46, %v2570_v50  ;;  %v11077_v47 = vmax.f32 %v10189_v57, 0.0  ;;  %v10209_v29 = vpack.c.bf16 %v9708_v19, %v8838_v43  ;;  %v10213_v53 = vpack.c.bf16 %v9883_v51, %v9695_v0  ;;  %v8718_v50 = vld [vmem:[%s11046_s4 + $0xa8] sm:$0xff]  }
 0x1c1   : > { %v2593_v36 = vmax.f32 %v2573_v23, %v11076_v58  ;;  %v11078_v22 = vmax.f32 %v10198_v34, 0.0  ;;  %v2625_v3 = vrot.slane %v10202_v33, 1  ;;  %1562 = vst.msk [vmem:[#allocation2 + $0x310] sm:$0xff] %vm677_vm1, %v7892_v41  ;;  %1560 = vst.msk [vmem:[#allocation2 + $0x300] sm:$0xff] %vm677_vm1, %v1545_v55 }
 0x1c2   : > { %11116 = vst [vmem:[#allocation26_spill] sm:$0xff] %v10209_v29  ;;  %11117 = vst [vmem:[#allocation27_spill] sm:$0xff] %v10213_v53  ;;  %v2596_v63 = vmax.f32 %v2576_v56, %v11077_v47  ;;  %7967 = vmatmul.mubr.msk.bf16.vlgmr.msra.gmra.mrb[0].mxu1 %vm677_vm1, %v10209_v29  ;;  %v7893_v56 = vpop.f32.mrb[98].mxu0  ;;  %v10248_v29 = vld [vmem:[#allocation3 + $0x74] sm:$0xff] }
 0x1c3   : > { %v2655_v38 = vld [vmem:[#allocation2 + $0x2f0] sm:$0xff]  ;;  %v2653_v42 = vld [vmem:[#allocation2 + $0x2e0] sm:$0xff]  ;;  %v2598_v46 = vrot.slane %v2593_v36, 1  ;;  %v2601_v43 = vrot.slane %v2593_v36, 2  ;;  %v2594_v6 = vmax.f32 %v2574_v48, %v11078_v22  ;;  %7970 = vmatprep.mubr.msk.bf16.mxu1 %vm677_vm1, %v10213_v53  ;;  %7975 = vmatpush3.bf16.msra.mxu1 %v8717_v26  ;;  %1563 = vst.msk [vmem:[#allocation2 + $0x318] sm:$0xff] %vm677_vm1, %v7893_v56  ;;  %v1548_v55 = vpop.f32.mrb[99].mxu0 }
 0x1c4   : > { %v2659_v23 = vmul.f32 %v10152_v14, %v2655_v38  ;;  %v2657_v35 = vmul.f32 %v10152_v14, %v2653_v42  ;;  %v2627_v38 = vmax.f32 %v10202_v33, %v2625_v3  ;;  %v2633_v47 = vrot.slane %v2596_v63, 2  ;;  %v10236_v48 = vld [vmem:[%s11045_s3] ss:$0 sm:$0xff]  ;;  %7976 = vmatprep.subr.bf16.mxu1 %v8718_v50  ;;  %v8719_v26 = vld [vmem:[%s11046_s4 + $0xb0] sm:$0xff]   ;;  %1561 = vst.msk [vmem:[#allocation2 + $0x308] sm:$0xff] %vm677_vm1, %v1548_v55 }
 0x1c5   : > { %v2656_v58 = vld [vmem:[#allocation2 + $0x2f8] sm:$0xff]  ;;  %v2654_v22 = vld [vmem:[#allocation2 + $0x2e8] sm:$0xff]  ;;  %v2600_v37 = vmax.f32 %v2593_v36, %v2598_v46  ;;  %v2609_v3 = vrot.slane %v2594_v6, 2  ;;  %v2613_v63 = vrot.slane %v2594_v6, 1 }
 0x1c6   : > { %v2663_v41 = vadd.f32 %v10236_v48, %v2659_v23  ;;  %v2660_v42 = vmul.f32 %v10152_v14, %v2656_v58  ;;  %v2661_v62 = vadd.f32 %v10236_v48, %v2657_v35  ;;  %v11118_v23 = vrot.slane %v10202_v33, 2 }
 0x1c7   : > { %v2635_v58 = vmax.f32 %v2627_v38, %v2633_v47  ;;  %v2603_v36 = vmax.f32 %v2600_v37, %v2601_v43  ;;  %v2615_v46 = vmax.f32 %v2594_v6, %v2613_v63  ;;  %v2658_v5 = vmul.f32 %v10152_v14, %v2654_v22  ;;  %7977 = vmatpush3.bf16.msra.mxu1 %v8718_v50  ;;  %v8720_v22 = vld [vmem:[%s11046_s4 + $0xb8] sm:$0xff]  }
 0x1c8   : > { %v2628_v53 = vmax.f32 %v2627_v38, %v11118_v23  ;;  %v2664_v56 = vadd.f32 %v10236_v48, %v2660_v42  ;;  %v2667_v35 = vmax.f32 %v2663_v41, 0.0  ;;  %v10261_v6 = vpack.c.bf16 %v10248_v29, %v9870_v9  ;;  %7978 = vmatprep.subr.bf16.mxu1 %v8719_v26  ;;  %v2675_v43 = vld [vmem:[#allocation2 + $0x310] sm:$0xff]  ;;  %v2673_v55 = vld [vmem:[#allocation2 + $0x300] sm:$0xff] }
 0x1c9   : > { %2636 = vst.msk [vmem:[#allocation3 + $0xa5] sm:$0x40] %vm1651_vm4, %v2635_v58  ;;  %v2616_v47 = vmax.f32 %v2615_v46, %v2609_v3  ;;  %v2662_v50 = vadd.f32 %v10236_v48, %v2658_v5  ;;  %v3366_v38 = vpack.c.bf16 %v10041_v7, %v9960_v45  ;;  %v2679_v42 = vmul.f32 %v10152_v14, %v2675_v43 }
 0x1ca   : > { %2629 = vst.msk [vmem:[#allocation3 + $0xa8] sm:$0x1] %vm1641_vm2, %v2628_v53  ;;  %2605 = vst.msk [vmem:[#allocation3 + $0xa0] sm:$0x1] %vm1641_vm2, %v2603_v36  ;;  %v2668_v41 = vmax.f32 %v2664_v56, 0.0  ;;  %7971 = vmatmul.mubr.msk.bf16.gmra.mrb[4].mxu1 %vm677_vm1, %v10261_v6  ;;  %v2677_v5 = vmul.f32 %v10152_v14, %v2673_v55  ;;  %v2676_v63 = vld [vmem:[#allocation2 + $0x318] sm:$0xff]  ;;  %v2611_v23 = vmax.f32 %v2600_v37, %v2609_v3 }
 0x1cb   : > { %2630 = vst.msk [vmem:[#allocation3 + $0xa7] sm:$0x4] %vm1643_vm5, %v2628_v53  ;;  %2606 = vst.msk [vmem:[#allocation3 + $0x9f] sm:$0x4] %vm1643_vm5, %v2603_v36  ;;  %v11119_v45 = vrot.slane %v10202_v33, 2  ;;  %7979 = vmatpush3.bf16.msra.mxu1 %v8719_v26  ;;  %7982 = vmatprep.mubr.msk.bf16.mxu1 %vm677_vm1, %v3366_v38  ;;  %v11120_v58 = vmax.f32 %v10162_v54, 0.0 }
 0x1cc   : > { %2631 = vst.msk [vmem:[#allocation3 + $0xa6] sm:$0x10] %vm1645_vm3, %v2628_v53  ;;  %2607 = vst.msk [vmem:[#allocation3 + $0x9e] sm:$0x10] %vm1645_vm3, %v2603_v36  ;;  %v2665_v53 = vmax.f32 %v2661_v62, 0.0  ;;  %v2666_v62 = vmax.f32 %v2662_v50, 0.0  ;;  %v2683_v36 = vadd.f32 %v10236_v48, %v2679_v42  ;;  %7980 = vmatprep.subr.bf16.mxu1 %v8720_v22  ;;  %v2681_v3 = vadd.f32 %v10236_v48, %v2677_v5 }
 0x1cd   : > { %2617 = vst.msk [vmem:[#allocation3 + $0xa4] sm:$0x1] %vm1641_vm2, %v2616_v47  ;;  %v2623_v7 = vmax.f32 %v2615_v46, %v11119_v45  ;;  %v2671_v56 = vmax.f32 %v11120_v58, %v2667_v35  ;;  %v2674_v43 = vld [vmem:[#allocation2 + $0x308] sm:$0xff]  ;;  %v8721_v50 = vld [vmem:[%s11046_s4 + $0xc0] sm:$0xff]   ;;  %v11121_v37 = vmax.f32 %v10173_v28, 0.0  ;;  %v11122_v54 = vmax.f32 %v10189_v57, 0.0 }
 0x1ce   : > { %2618 = vst.msk [vmem:[#allocation3 + $0xa3] sm:$0x4] %vm1643_vm5, %v2616_v47  ;;  %v2678_v26 = vmul.f32 %v10152_v14, %v2674_v43  ;;  %v2687_v35 = vmax.f32 %v2683_v36, 0.0  ;;  %v11123_v42 = vmax.f32 %v10198_v34, 0.0  ;;  %v8722_v57 = vld [vmem:[%s11046_s4 + $0xc8] sm:$0xff]   ;;  %v3368_v34 = vpack.c.bf16 %v10114_v21, %v10028_v24  ;;  %v10310_v43 = vld [vmem:[#allocation3 + $0x80] sm:$0xff] }
 0x1cf   : > { %2619 = vst.msk [vmem:[#allocation3 + $0xa2] sm:$0x10] %vm1645_vm3, %v2616_v47  ;;  %v2680_v47 = vmul.f32 %v10152_v14, %v2676_v63  ;;  %v2669_v33 = vmax.f32 %v11121_v37, %v2665_v53  ;;  %v2672_v46 = vmax.f32 %v11122_v54, %v2668_v41  ;;  %v2685_v63 = vmax.f32 %v2681_v3, 0.0  ;;  %7981 = vmatpush3.bf16.msra.mxu1 %v8720_v22 }
 0x1d0   : > { %2612 = vst.msk [vmem:[#allocation3 + $0x9d] sm:$0x40] %vm1651_vm4, %v2611_v23  ;;  %2624 = vst.msk [vmem:[#allocation3 + $0xa1] sm:$0x40] %vm1651_vm4, %v2623_v7  ;;  %v2670_v55 = vmax.f32 %v11123_v42, %v2666_v62  ;;  %v2682_v28 = vadd.f32 %v10236_v48, %v2678_v26  ;;  %v2691_v53 = vmax.f32 %v2671_v56, %v2687_v35  ;;  %7990 = vmatprep.subr.bf16.mxu1 %v8721_v50  ;;  %v8723_v56 = vld [vmem:[%s11046_s4 + $0xd0] sm:$0xff]   ;;  %v8724_v35 = vld [vmem:[%s11046_s4 + $0xd8] sm:$0xff]  }
 0x1d1   : > { %v2684_v38 = vadd.f32 %v10236_v48, %v2680_v47  ;;  %v3367_v14 = vpack.c.bf16 %v10055_v40, %v10016_v59  ;;  %v2689_v41 = vmax.f32 %v2669_v33, %v2685_v63  ;;  %v3369_v54 = vpack.c.bf16 %v10310_v43, %v10100_v2  ;;  %v8725_v2 = vld [vmem:[%s11046_s4 + $0xe0] sm:$0xff]  }
 0x1d2   : > { %v2686_v23 = vmax.f32 %v2682_v28, 0.0  ;;  %v2717_v62 = vrot.slane %v2691_v53, 2  ;;  %v2721_v45 = vrot.slane %v2691_v53, 1  ;;  %v8841_v28 = vld [vmem:[#allocation3 + $0x31] sm:$0xff] }
 0x1d3   : > { %v2688_v5 = vmax.f32 %v2684_v38, 0.0  ;;  %7983 = vmatmul.mubr.msk.bf16.vlgmr.msra.gmra.mrb[0].mxu1 %vm677_vm1, %v3367_v14  ;;  %v2694_v48 = vrot.slane %v2689_v41, 1  ;;  %v2697_v22 = vrot.slane %v2689_v41, 2  ;;  %v8726_v14 = vld [vmem:[%s11046_s4 + $0xe8] sm:$0xff]  }
 0x1d4   : > { %v2690_v58 = vmax.f32 %v2670_v55, %v2686_v23  ;;  %7986 = vmatprep.mubr.msk.bf16.mxu1 %vm677_vm1, %v3368_v34  ;;  %7991 = vmatpush3.bf16.msra.mxu1 %v8721_v50  ;;  %v2723_v59 = vmax.f32 %v2691_v53, %v2721_v45  ;;  %v8840_v55 = vld [vmem:[#allocation3 + $0x21] sm:$0xff]  ;;  %v8727_v23 = vld [vmem:[%s11046_s4 + $0xf0] sm:$0xff]   ;;  %v3497_v34 = vpack.c.bf16 %v10143_v49, %v9956_v16 }
 0x1d5   : > { %v2692_v7 = vmax.f32 %v2672_v46, %v2688_v5  ;;  %7992 = vmatprep.subr.bf16.mxu1 %v8722_v57  ;;  %v2696_v36 = vmax.f32 %v2689_v41, %v2694_v48  ;;  %v3486_v46 = vld [vmem:[#allocation3 + $0x11] sm:$0xff]  ;;  %v8842_v53 = vld [vmem:[#allocation3 + $0x41] sm:$0xff] }
 0x1d6   : > { %v2705_v24 = vrot.slane %v2690_v58, 2  ;;  %v2709_v47 = vrot.slane %v2690_v58, 1  ;;  %v2724_v37 = vmax.f32 %v2723_v59, %v2717_v62  ;;  %v3494_v63 = vpack.c.bf16 %v8840_v55, %v3486_v46  ;;  %v8844_v45 = vld [vmem:[#allocation3 + $0x22] sm:$0xff]  ;;  %v8845_v16 = vld [vmem:[#allocation3 + $0x32] sm:$0xff] }
 0x1d7   : > { %v2729_v40 = vrot.slane %v2692_v7, 2  ;;  %v2699_v3 = vmax.f32 %v2696_v36, %v2697_v22  ;;  %v3495_v5 = vpack.c.bf16 %v8842_v53, %v8841_v28  ;;  %v8729_v48 = vld [vmem:[%s11046_s4 + $0x100] sm:$0xff]   ;;  %v8748_v53 = vld [vmem:[%s11046_s4 + $0x198] sm:$0xff]  }
 0x1d8   : > { %v2711_v26 = vmax.f32 %v2690_v58, %v2709_v47  ;;  %7993 = vmatpush3.bf16.msra.mxu1 %v8722_v57  ;;  %2725 = vst.msk [vmem:[#allocation3 + $0xb8] sm:$0x1] %vm1641_vm2, %v2724_v37  ;;  %v2707_v50 = vmax.f32 %v2696_v36, %v2705_v24  ;;  %v8843_v57 = vld [vmem:[#allocation3 + $0x51] sm:$0xff]  ;;  %v8846_v22 = vld [vmem:[#allocation3 + $0x42] sm:$0xff]  ;;  %v11124_v47 = vpack.c.bf16 %v9484_v15, %v9495_v13 }
 0x1d9   : > { %v2731_v33 = vmax.f32 %v2723_v59, %v2729_v40  ;;  %2726 = vst.msk [vmem:[#allocation3 + $0xb7] sm:$0x4] %vm1643_vm5, %v2724_v37  ;;  %7994 = vmatprep.subr.bf16.mxu1 %v8723_v56  ;;  %2702 = vst.msk [vmem:[#allocation3 + $0xaf] sm:$0x4] %vm1643_vm5, %v2699_v3  ;;  %v3496_v41 = vpack.c.bf16 %v9968_v44, %v8843_v57  ;;  %v8728_v44 = vld [vmem:[%s11046_s4 + $0xf8] sm:$0xff]   ;;  %v10353_v58 = vpack.c.bf16 %v8846_v22, %v8845_v16  ;;  %v8730_v59 = vld [vmem:[%s11046_s4 + $0x108] sm:$0xff]  }
 0x1da   : > { %2727 = vst.msk [vmem:[#allocation3 + $0xb6] sm:$0x10] %vm1645_vm3, %v2724_v37  ;;  %2703 = vst.msk [vmem:[#allocation3 + $0xae] sm:$0x10] %vm1645_vm3, %v2699_v3  ;;  %v2712_v38 = vmax.f32 %v2711_v26, %v2705_v24  ;;  %v2719_v42 = vmax.f32 %v2711_v26, %v2717_v62  ;;  %v3614_v62 = vld [vmem:[#allocation3 + $0x12] sm:$0xff]  ;;  %v3625_v24 = vpack.c.bf16 %v10156_v8, %v9958_v1  ;;  %v8733_v37 = vld [vmem:[%s11046_s4 + $0x120] sm:$0xff]  }
 0x1db   : > { %2732 = vst.msk [vmem:[#allocation3 + $0xb5] sm:$0x40] %vm1651_vm4, %v2731_v33  ;;  %2708 = vst.msk [vmem:[#allocation3 + $0xad] sm:$0x40] %vm1651_vm4, %v2707_v50  ;;  %7987 = vmatmul.mubr.msk.bf16.gmra.mrb[4].mxu1 %vm677_vm1, %v3369_v54  ;;  %v3622_v7 = vpack.c.bf16 %v8844_v45, %v3614_v62  ;;  %v8847_v40 = vld [vmem:[#allocation3 + $0x52] sm:$0xff]  ;;  %v8734_v1 = vld [vmem:[%s11046_s4 + $0x128] sm:$0xff]   ;;  %v11125_v33 = vpack.c.bf16 %v9693_v61, %v9701_v31  ;;  %v11126_v15 = vpack.c.bf16 %v9868_v30, %v9876_v17 }
 0x1dc   : > { %2701 = vst.msk [vmem:[#allocation3 + $0xb0] sm:$0x1] %vm1641_vm2, %v2699_v3  ;;  %2713 = vst.msk [vmem:[#allocation3 + $0xb4] sm:$0x1] %vm1641_vm2, %v2712_v38  ;;  %7995 = vmatpush3.bf16.msra.mxu1 %v8723_v56  ;;  %7998 = vmatprep.mubr.msk.bf16.mxu1 %vm677_vm1, %v3494_v63  ;;  %v3624_v56 = vpack.c.bf16 %v9970_v39, %v8847_v40  ;;  %v8731_v36 = vld [vmem:[%s11046_s4 + $0x110] sm:$0xff]   ;;  %v8732_v39 = vld [vmem:[%s11046_s4 + $0x118] sm:$0xff]   ;;  %v11127_v31 = vpack.c.bf16 %v9486_v20, %v9497_v32 }
 0x1dd   : > { %2714 = vst.msk [vmem:[#allocation3 + $0xb3] sm:$0x4] %vm1643_vm5, %v2712_v38  ;;  %7996 = vmatprep.subr.bf16.mxu1 %v8724_v35  ;;  %v8735_v13 = vld [vmem:[%s11046_s4 + $0x130] sm:$0xff]   ;;  %v10392_v3 = vld [vmem:[#allocation3 + $0x83] sm:$0xff]  ;;  %v8736_v61 = vld [vmem:[%s11046_s4 + $0x138] sm:$0xff]   ;;  %v11129_v20 = vpack.c.bf16 %v9870_v9, %v9883_v51 }
 0x1de   : > { %2715 = vst.msk [vmem:[#allocation3 + $0xb2] sm:$0x10] %vm1645_vm3, %v2712_v38  ;;  %v3753_v26 = vpack.c.bf16 %v10392_v3, %v10102_v11  ;;  %v8737_v30 = vld [vmem:[%s11046_s4 + $0x140] sm:$0xff]   ;;  %v8738_v17 = vld [vmem:[%s11046_s4 + $0x148] sm:$0xff]   ;;  %v11128_v11 = vpack.c.bf16 %v9695_v0, %v9708_v19  ;;  %v8739_v32 = vld [vmem:[%s11046_s4 + $0x150] sm:$0xff]  }
 0x1df   : > { %2720 = vst.msk [vmem:[#allocation3 + $0xb1] sm:$0x40] %vm1651_vm4, %v2719_v42  ;;  %v10421_v50 = vld [vmem:[#allocation3 + $0x84] sm:$0xff]  ;;  %v8740_v0 = vld [vmem:[%s11046_s4 + $0x158] sm:$0xff]   ;;  %v8743_v51 = vld [vmem:[%s11046_s4 + $0x170] sm:$0xff]  }
 0x1e0   : > { %7997 = vmatpush3.bf16.msra.mxu1 %v8724_v35  ;;  %v3881_v54 = vpack.c.bf16 %v10421_v50, %v10248_v29  ;;  %v8741_v19 = vld [vmem:[%s11046_s4 + $0x160] sm:$0xff]   ;;  %v8742_v9 = vld [vmem:[%s11046_s4 + $0x168] sm:$0xff]   ;;  %v8747_v63 = vld [vmem:[%s11046_s4 + $0x190] sm:$0xff]  }
 0x1e1   : > { %8006 = vmatprep.subr.bf16.mxu1 %v8725_v2  ;;  %v8745_v46 = vld [vmem:[%s11046_s4 + $0x180] sm:$0xff]   ;;  %v8746_v42 = vld [vmem:[%s11046_s4 + $0x188] sm:$0xff]   ;;  %v8851_v40 = vld [vmem:[#allocation3 + $0x33] sm:$0xff] }
 0x1e2   : > { %v8848_v35 = vld [vmem:[#allocation3 + $0x41] sm:$0xff] }
 0x1e3   : > { %7999 = vmatmul.mubr.msk.bf16.vlgmr.msra.gmra.mrb[0].mxu1 %vm677_vm1, %v3495_v5  ;;  %v10460_v38 = vpack.c.bf16 %v9897_v27, %v8848_v35  ;;  %v8849_v55 = vld [vmem:[#allocation3 + $0x61] sm:$0xff]  ;;  %v11131_v5 = vld [vmem:[#allocation8_spill] sm:$0xff] }
 0x1e4   : > { %8002 = vmatprep.mubr.msk.bf16.mxu1 %vm677_vm1, %v3496_v41  ;;  %8007 = vmatpush3.bf16.msra.mxu1 %v8725_v2  ;;  %v10475_v2 = vld [vmem:[#allocation3 + $0x91] sm:$0xff]  ;;  %v8749_v57 = vld [vmem:[%s11046_s4 + $0x1a0] sm:$0xff]   ;;  %v8750_v41 = vld [vmem:[%s11046_s4 + $0x1a8] sm:$0xff]  }
 0x1e5   : > { %8008 = vmatprep.subr.bf16.mxu1 %v8726_v14  ;;  %v4137_v28 = vpack.c.bf16 %v10475_v2, %v10143_v49  ;;  %v11135_v45 = vld [vmem:[#allocation14_spill] sm:$0xff] }
 0x1e6   : > { %v4382_v22 = vld [vmem:[#allocation3 + $0x23] sm:$0xff] }
 0x1e7   : > { %v10580_v35 = vld [vmem:[#allocation3 + $0xa0] sm:$0xff] }
 0x1e8   : > { %8009 = vmatpush3.bf16.msra.mxu1 %v8726_v14  ;;  %v11132_v14 = vpack.c.bf16 %v9600_v10, %v11131_v5  ;;  %v11142_v5 = vld [vmem:[#allocation18_spill] sm:$0xff] }
 0x1e9   : > { %8010 = vmatprep.subr.bf16.mxu1 %v8727_v23 }
 0x1eb   : > { %8003 = vmatmul.mubr.msk.bf16.gmra.mrb[4].mxu1 %vm677_vm1, %v3497_v34  ;;  %v11133_v34 = vld [vmem:[#allocation25_spill] sm:$0xff] }
 0x1ec   : > { %8011 = vmatpush3.bf16.msra.mxu1 %v8727_v23  ;;  %8014 = vmatprep.mubr.msk.bf16.mxu1 %vm677_vm1, %v3622_v7  ;;  %v8850_v23 = vld [vmem:[#allocation3 + $0x62] sm:$0xff]  ;;  %v8751_v7 = vld [vmem:[%s11046_s4 + $0x1b0] sm:$0xff]  }
 0x1ed   : > { %8012 = vmatprep.subr.bf16.mxu1 %v8728_v44  ;;  %v10494_v62 = vpack.c.bf16 %v11133_v34, %v8850_v23 }
 0x1f0   : > { %8013 = vmatpush3.bf16.msra.mxu1 %v8728_v44  ;;  %v11134_v44 = vld [vmem:[#allocation12_spill] sm:$0xff] }
 0x1f1   : > { %8022 = vmatprep.subr.bf16.mxu1 %v8729_v48  ;;  %v11136_v10 = vpack.c.bf16 %v11134_v44, %v11135_v45  ;;  %v10613_v45 = vld [vmem:[#allocation3 + $0xa1] sm:$0xff] }
 0x1f3   : > { %8015 = vmatmul.mubr.msk.bf16.vlgmr.msra.gmra.mrb[0].mxu1 %vm677_vm1, %v10353_v58 }
 0x1f4   : > { %8018 = vmatprep.mubr.msk.bf16.mxu1 %vm677_vm1, %v3624_v56  ;;  %8023 = vmatpush3.bf16.msra.mxu1 %v8729_v48  ;;  %v10505_v48 = vld [vmem:[#allocation3 + $0x92] sm:$0xff]  ;;  %v4390_v56 = vpack.c.bf16 %v8851_v40, %v4382_v22 }
 0x1f5   : > { %8024 = vmatprep.subr.bf16.mxu1 %v8730_v59  ;;  %v4265_v16 = vpack.c.bf16 %v10505_v48, %v10156_v8 }
 0x1f8   : > { %8025 = vmatpush3.bf16.msra.mxu1 %v8730_v59  ;;  %v8752_v59 = vld [vmem:[%s11046_s4 + $0x1b8] sm:$0xff]  }
 0x1f9   : > { %8026 = vmatprep.subr.bf16.mxu1 %v8731_v36 }
 0x1fb   : > { %8019 = vmatmul.mubr.msk.bf16.gmra.mrb[4].mxu1 %vm677_vm1, %v3625_v24  ;;  %v10517_v24 = vld [vmem:[#allocation3 + $0x53] sm:$0xff] }
 0x1fc   : > { %8027 = vmatpush3.bf16.msra.mxu1 %v8731_v36  ;;  %8030 = vmatprep.mubr.msk.bf16.mxu1 %vm677_vm1, %v11124_v47  ;;  %v8753_v36 = vld [vmem:[%s11046_s4 + $0x1c0] sm:$0xff]  }
 0x1fd   : > { %8028 = vmatprep.subr.bf16.mxu1 %v8732_v39 }
 0x200   : > { %8029 = vmatpush3.bf16.msra.mxu1 %v8732_v39  ;;  %v8852_v39 = vld [vmem:[#allocation3 + $0x43] sm:$0xff] }
 0x201   : > { %8038 = vmatprep.subr.bf16.mxu1 %v8733_v37  ;;  %v10520_v47 = vpack.c.bf16 %v10517_v24, %v8852_v39  ;;  %v11147_v39 = vpack.c.bf16 %v10156_v8, %v11133_v34  ;;  %v11148_v8 = vld [vmem:[#allocation10_spill] sm:$0xff]  ;;  %v11149_v34 = vld [vmem:[#allocation11_spill] sm:$0xff] }
 0x203   : > { %8031 = vmatmul.mubr.msk.bf16.vlgmr.msra.gmra.mrb[0].mxu1 %vm677_vm1, %v11125_v33  ;;  %v8755_v33 = vld [vmem:[%s11046_s4 + $0x1d0] sm:$0xff]  }
 0x204   : > { %8034 = vmatprep.mubr.msk.bf16.mxu1 %vm677_vm1, %v11126_v15  ;;  %8039 = vmatpush3.bf16.msra.mxu1 %v8733_v37  ;;  %v8754_v37 = vld [vmem:[%s11046_s4 + $0x1c8] sm:$0xff]   ;;  %v10532_v15 = vld [vmem:[#allocation3 + $0x93] sm:$0xff] }
 0x205   : > { %8040 = vmatprep.subr.bf16.mxu1 %v8734_v1 }
 0x208   : > { %8041 = vmatpush3.bf16.msra.mxu1 %v8734_v1  ;;  %v11137_v1 = vld [vmem:[#allocation24_spill] sm:$0xff] }
 0x209   : > { %8042 = vmatprep.subr.bf16.mxu1 %v8735_v13 }
 0x20b   : > { %8035 = vmatmul.mubr.msk.bf16.gmra.mrb[4].mxu1 %vm677_vm1, %v3753_v26  ;;  %v8756_v26 = vld [vmem:[%s11046_s4 + $0x1d8] sm:$0xff]  }
 0x20c   : > { %8043 = vmatpush3.bf16.msra.mxu1 %v8735_v13  ;;  %8046 = vmatprep.mubr.msk.bf16.mxu1 %vm677_vm1, %v11127_v31  ;;  %v4393_v13 = vpack.c.bf16 %v10532_v15, %v10392_v3  ;;  %v8757_v31 = vld [vmem:[%s11046_s4 + $0x1e0] sm:$0xff]  }
 0x20d   : > { %8044 = vmatprep.subr.bf16.mxu1 %v8736_v61 }
 0x210   : > { %8045 = vmatpush3.bf16.msra.mxu1 %v8736_v61  ;;  %v11138_v61 = vld [vmem:[#allocation26_spill] sm:$0xff] }
 0x211   : > { %8054 = vmatprep.subr.bf16.mxu1 %v8737_v30 }
 0x213   : > { %8047 = vmatmul.mubr.msk.bf16.vlgmr.msra.gmra.mrb[0].mxu1 %vm677_vm1, %v11128_v11  ;;  %v8759_v11 = vld [vmem:[%s11046_s4 + $0x1f0] sm:$0xff]  }
 0x214   : > { %8050 = vmatprep.mubr.msk.bf16.mxu1 %vm677_vm1, %v11129_v20  ;;  %8055 = vmatpush3.bf16.msra.mxu1 %v8737_v30  ;;  %v8758_v30 = vld [vmem:[%s11046_s4 + $0x1e8] sm:$0xff]   ;;  %v10555_v20 = vld [vmem:[#allocation3 + $0x94] sm:$0xff] }
 0x215   : > { %8056 = vmatprep.subr.bf16.mxu1 %v8738_v17 }
 0x218   : > { %8057 = vmatpush3.bf16.msra.mxu1 %v8738_v17  ;;  %v11139_v17 = vld [vmem:[#allocation27_spill] sm:$0xff] }
 0x219   : > { %8058 = vmatprep.subr.bf16.mxu1 %v8739_v32 }
 0x21b   : > { %8051 = vmatmul.mubr.msk.bf16.gmra.mrb[4].mxu1 %vm677_vm1, %v3881_v54  ;;  %v4638_v54 = vld [vmem:[#allocation3 + $0x30] sm:$0xff] }
 0x21c   : > { %8059 = vmatpush3.bf16.msra.mxu1 %v8739_v32  ;;  %8062 = vmatprep.mubr.msk.bf16.mxu1 %vm677_vm1, %v10052_v25  ;;  %v10444_v25 = vld [vmem:[#allocation3 + $0x90] sm:$0xff]  ;;  %v4521_v32 = vpack.c.bf16 %v10555_v20, %v10421_v50 }
 0x21d   : > { %8060 = vmatprep.subr.bf16.mxu1 %v8740_v0  ;;  %v4009_v29 = vpack.c.bf16 %v10444_v25, %v10310_v43 }
 0x220   : > { %8061 = vmatpush3.bf16.msra.mxu1 %v8740_v0  ;;  %v8760_v0 = vld [vmem:[%s11046_s4 + $0x1f8] sm:$0xff]  }
 0x221   : > { %8070 = vmatprep.subr.bf16.mxu1 %v8741_v19 }
 0x223   : > { %8063 = vmatmul.mubr.msk.bf16.vlgmr.msra.gmra.mrb[0].mxu1 %vm677_vm1, %v10062_v12  ;;  %v8744_v12 = vld [vmem:[%s11046_s4 + $0x178] sm:$0xff]  }
 0x224   : > { %8066 = vmatprep.mubr.msk.bf16.mxu1 %vm677_vm1, %v10123_v60  ;;  %8071 = vmatpush3.bf16.msra.mxu1 %v8741_v19  ;;  %v11130_v60 = vpack.c.bf16 %v9586_v52, %v9612_v18  ;;  %v10466_v18 = vpack.c.bf16 %v10168_v4, %v8849_v55  ;;  %v8853_v19 = vld [vmem:[#allocation3 + $0x40] sm:$0xff]  ;;  %v11140_v55 = vld [vmem:[#allocation9_spill] sm:$0xff] }
 0x225   : > { %8072 = vmatprep.subr.bf16.mxu1 %v8742_v9 }
 0x228   : > { %8073 = vmatpush3.bf16.msra.mxu1 %v8742_v9  ;;  %v8761_v9 = vld [vmem:[%s11046_s4 + $0x200] sm:$0xff]  }
 0x229   : > { %8074 = vmatprep.subr.bf16.mxu1 %v8743_v51 }
 0x22b   : > { %8067 = vmatmul.mubr.msk.bf16.gmra.mrb[4].mxu1 %vm677_vm1, %v4009_v29 }
 0x22c   : > { %8075 = vmatpush3.bf16.msra.mxu1 %v8743_v51  ;;  %8078 = vmatprep.mubr.msk.bf16.mxu1 %vm677_vm1, %v11130_v60  ;;  %v8854_v51 = vld [vmem:[#allocation3 + $0x50] sm:$0xff]  ;;  %v8762_v60 = vld [vmem:[%s11046_s4 + $0x208] sm:$0xff]  }
 0x22d   : > { %8076 = vmatprep.subr.bf16.mxu1 %v8744_v12  ;;  %v4647_v29 = vpack.c.bf16 %v10114_v21, %v8854_v51  ;;  %v8763_v21 = vld [vmem:[%s11046_s4 + $0x210] sm:$0xff]  }
 0x22e   : > { %v8858_v51 = vld [vmem:[#allocation3 + $0x54] sm:$0xff] }
 0x230   : > { %8077 = vmatpush3.bf16.msra.mxu1 %v8744_v12  ;;  %v10568_v12 = vld [vmem:[#allocation3 + $0x70] sm:$0xff] }
 0x231   : > { %8086 = vmatprep.subr.bf16.mxu1 %v8745_v46 }
 0x233   : > { %8079 = vmatmul.mubr.msk.bf16.vlgmr.msra.gmra.mrb[0].mxu1 %vm677_vm1, %v10460_v38 }
 0x234   : > { %8082 = vmatprep.mubr.msk.bf16.mxu1 %vm677_vm1, %v10466_v18  ;;  %8087 = vmatpush3.bf16.msra.mxu1 %v8745_v46  ;;  %v4648_v46 = vpack.c.bf16 %v10310_v43, %v10568_v12  ;;  %v8764_v43 = vld [vmem:[%s11046_s4 + $0x218] sm:$0xff]  }
 0x235   : > { %8088 = vmatprep.subr.bf16.mxu1 %v8746_v42 }
 0x238   : > { %8089 = vmatpush3.bf16.msra.mxu1 %v8746_v42  ;;  %v4649_v42 = vpack.c.bf16 %v10580_v35, %v10444_v25 }
 0x239   : > { %8090 = vmatprep.subr.bf16.mxu1 %v8747_v63 }
 0x23b   : > { %8083 = vmatmul.mubr.msk.bf16.gmra.mrb[4].mxu1 %vm677_vm1, %v4137_v28  ;;  %v8765_v28 = vld [vmem:[%s11046_s4 + $0x220] sm:$0xff]  }
 0x23c   : > { %8091 = vmatpush3.bf16.msra.mxu1 %v8747_v63  ;;  %8094 = vmatprep.mubr.msk.bf16.mxu1 %vm677_vm1, %v11132_v14  ;;  %v11141_v63 = vpack.c.bf16 %v11140_v55, %v9586_v52  ;;  %v11143_v14 = vpack.c.bf16 %v11142_v5, %v9897_v27  ;;  %v11144_v52 = vpack.c.bf16 %v10143_v49, %v10168_v4  ;;  %v8768_v49 = vld [vmem:[%s11046_s4 + $0x238] sm:$0xff]   ;;  %v10696_v55 = vld [vmem:[#allocation3 + $0xa4] sm:$0xff] }
 0x23d   : > { %8092 = vmatprep.subr.bf16.mxu1 %v8748_v53  ;;  %v4777_v4 = vpack.c.bf16 %v10613_v45, %v10475_v2 }
 0x240   : > { %8093 = vmatpush3.bf16.msra.mxu1 %v8748_v53  ;;  %v8766_v53 = vld [vmem:[%s11046_s4 + $0x228] sm:$0xff]  }
 0x241   : > { %8102 = vmatprep.subr.bf16.mxu1 %v8749_v57 }
 0x243   : > { %8095 = vmatmul.mubr.msk.bf16.vlgmr.msra.gmra.mrb[0].mxu1 %vm677_vm1, %v11136_v10 }
 0x244   : > { %8098 = vmatprep.mubr.msk.bf16.mxu1 %vm677_vm1, %v10494_v62  ;;  %8103 = vmatpush3.bf16.msra.mxu1 %v8749_v57 }
 0x245   : > { %8104 = vmatprep.subr.bf16.mxu1 %v8750_v41 }
 0x248   : > { %8105 = vmatpush3.bf16.msra.mxu1 %v8750_v41  ;;  %v8767_v41 = vld [vmem:[%s11046_s4 + $0x230] sm:$0xff]  }
 0x249   : > { %8106 = vmatprep.subr.bf16.mxu1 %v8751_v7 }
 0x24b   : > { %8099 = vmatmul.mubr.msk.bf16.gmra.mrb[4].mxu1 %vm677_vm1, %v4265_v16  ;;  %v8769_v16 = vld [vmem:[%s11046_s4 + $0x240] sm:$0xff]  }
 0x24c   : > { %8107 = vmatpush3.bf16.msra.mxu1 %v8751_v7  ;;  %8110 = vmatprep.mubr.msk.bf16.mxu1 %vm677_vm1, %v4390_v56  ;;  %v8770_v56 = vld [vmem:[%s11046_s4 + $0x248] sm:$0xff]  }
 0x24d   : > { %8108 = vmatprep.subr.bf16.mxu1 %v8752_v59 }
 0x250   : > { %8109 = vmatpush3.bf16.msra.mxu1 %v8752_v59 }
 0x251   : > { %8118 = vmatprep.subr.bf16.mxu1 %v8753_v36 }
 0x253   : > { %8111 = vmatmul.mubr.msk.bf16.vlgmr.msra.gmra.mrb[0].mxu1 %vm677_vm1, %v10520_v47 }
 0x254   : > { %8114 = vmatprep.mubr.msk.bf16.mxu1 %vm677_vm1, %v11137_v1  ;;  %8119 = vmatpush3.bf16.msra.mxu1 %v8753_v36  ;;  %v11145_v36 = vld [vmem:[#allocation19_spill] sm:$0xff] }
 0x255   : > { %8120 = vmatprep.subr.bf16.mxu1 %v8754_v37  ;;  %v10650_v1 = vld [vmem:[#allocation3 + $0xa2] sm:$0xff] }
 0x258   : > { %8121 = vmatpush3.bf16.msra.mxu1 %v8754_v37  ;;  %v8771_v37 = vld [vmem:[%s11046_s4 + $0x250] sm:$0xff]  }
 0x259   : > { %8122 = vmatprep.subr.bf16.mxu1 %v8755_v33 }
 0x25b   : > { %8115 = vmatmul.mubr.msk.bf16.gmra.mrb[4].mxu1 %vm677_vm1, %v4393_v13  ;;  %v11150_v13 = vpack.c.bf16 %v11148_v8, %v11149_v34  ;;  %v5534_v8 = vld [vmem:[#allocation3 + $0x42] sm:$0xff] }
 0x25c   : > { %8123 = vmatpush3.bf16.msra.mxu1 %v8755_v33  ;;  %8126 = vmatprep.mubr.msk.bf16.mxu1 %vm677_vm1, %v11138_v61  ;;  %v4905_v33 = vpack.c.bf16 %v10650_v1, %v10505_v48  ;;  %v8855_v61 = vld [vmem:[#allocation3 + $0x63] sm:$0xff] }
 0x25d   : > { %8124 = vmatprep.subr.bf16.mxu1 %v8756_v26  ;;  %v8789_v34 = vld [vmem:[%s11046_s4 + $0x2e0] sm:$0xff]  }
 0x260   : > { %8125 = vmatpush3.bf16.msra.mxu1 %v8756_v26  ;;  %v8773_v26 = vld [vmem:[%s11046_s4 + $0x260] sm:$0xff]  }
 0x261   : > { %8134 = vmatprep.subr.bf16.mxu1 %v8757_v31 }
 0x263   : > { %8127 = vmatmul.mubr.msk.bf16.vlgmr.msra.gmra.mrb[0].mxu1 %vm677_vm1, %v11139_v17  ;;  %v8856_v17 = vld [vmem:[#allocation3 + $0x73] sm:$0xff] }
 0x264   : > { %8130 = vmatprep.mubr.msk.bf16.mxu1 %vm677_vm1, %v10261_v6  ;;  %8135 = vmatpush3.bf16.msra.mxu1 %v8757_v31  ;;  %v4646_v6 = vpack.c.bf16 %v8853_v19, %v4638_v54  ;;  %v5031_v31 = vpack.c.bf16 %v8855_v61, %v10517_v24  ;;  %v10675_v54 = vld [vmem:[#allocation3 + $0xa3] sm:$0xff]  ;;  %v8791_v61 = vld [vmem:[%s11046_s4 + $0x2f0] sm:$0xff]  }
 0x265   : > { %8136 = vmatprep.subr.bf16.mxu1 %v8758_v30  ;;  %v5033_v24 = vpack.c.bf16 %v10675_v54, %v10532_v15  ;;  %v8857_v19 = vld [vmem:[#allocation3 + $0x44] sm:$0xff] }
 0x268   : > { %8137 = vmatpush3.bf16.msra.mxu1 %v8758_v30  ;;  %v8774_v30 = vld [vmem:[%s11046_s4 + $0x268] sm:$0xff]  }
 0x269   : > { %8138 = vmatprep.subr.bf16.mxu1 %v8759_v11 }
 0x26b   : > { %8131 = vmatmul.mubr.msk.bf16.gmra.mrb[4].mxu1 %vm677_vm1, %v4521_v32  ;;  %v8775_v32 = vld [vmem:[%s11046_s4 + $0x270] sm:$0xff]  }
 0x26c   : > { %8139 = vmatpush3.bf16.msra.mxu1 %v8759_v11  ;;  %8142 = vmatprep.mubr.msk.bf16.mxu1 %vm677_vm1, %v4646_v6  ;;  %v5032_v11 = vpack.c.bf16 %v10392_v3, %v8856_v17  ;;  %v8776_v3 = vld [vmem:[%s11046_s4 + $0x278] sm:$0xff]   ;;  %v5666_v17 = vld [vmem:[#allocation3 + $0x83] sm:$0xff] }
 0x26d   : > { %8140 = vmatprep.subr.bf16.mxu1 %v8760_v0 }
 0x270   : > { %8141 = vmatpush3.bf16.msra.mxu1 %v8760_v0  ;;  %v5150_v0 = vld [vmem:[#allocation3 + $0x34] sm:$0xff] }
 0x271   : > { %8150 = vmatprep.subr.bf16.mxu1 %v8761_v9  ;;  %v5158_v6 = vpack.c.bf16 %v8857_v19, %v5150_v0 }
 0x273   : > { %8143 = vmatmul.mubr.msk.bf16.vlgmr.msra.gmra.mrb[0].mxu1 %vm677_vm1, %v4647_v29  ;;  %v8859_v29 = vld [vmem:[#allocation3 + $0x64] sm:$0xff] }
 0x274   : > { %8146 = vmatprep.mubr.msk.bf16.mxu1 %vm677_vm1, %v4648_v46  ;;  %8151 = vmatpush3.bf16.msra.mxu1 %v8761_v9  ;;  %v8777_v9 = vld [vmem:[%s11046_s4 + $0x280] sm:$0xff]   ;;  %v8778_v46 = vld [vmem:[%s11046_s4 + $0x288] sm:$0xff]  }
 0x275   : > { %8152 = vmatprep.subr.bf16.mxu1 %v8762_v60 }
 0x278   : > { %8153 = vmatpush3.bf16.msra.mxu1 %v8762_v60  ;;  %v5159_v60 = vpack.c.bf16 %v8859_v29, %v8858_v51  ;;  %v5794_v29 = vld [vmem:[#allocation3 + $0x84] sm:$0xff] }
 0x279   : > { %8154 = vmatprep.subr.bf16.mxu1 %v8763_v21 }
 0x27b   : > { %8147 = vmatmul.mubr.msk.bf16.gmra.mrb[4].mxu1 %vm677_vm1, %v4649_v42 }
 0x27c   : > { %8155 = vmatpush3.bf16.msra.mxu1 %v8763_v21  ;;  %8158 = vmatprep.mubr.msk.bf16.mxu1 %vm677_vm1, %v11141_v63  ;;  %v8860_v21 = vld [vmem:[#allocation3 + $0x74] sm:$0xff]  ;;  %v5161_v63 = vpack.c.bf16 %v10696_v55, %v10555_v20 }
 0x27d   : > { %8156 = vmatprep.subr.bf16.mxu1 %v8764_v43  ;;  %v5160_v42 = vpack.c.bf16 %v10421_v50, %v8860_v21  ;;  %v8780_v50 = vld [vmem:[%s11046_s4 + $0x298] sm:$0xff]  }
 0x280   : > { %8157 = vmatpush3.bf16.msra.mxu1 %v8764_v43  ;;  %v8779_v43 = vld [vmem:[%s11046_s4 + $0x290] sm:$0xff]  }
 0x281   : > { %8166 = vmatprep.subr.bf16.mxu1 %v8765_v28 }
 0x282   : > { %v10606_v57 = vpop.f32.mrb[100].mxu0 }
 0x283   : > { %8159 = vmatmul.mubr.msk.bf16.vlgmr.msra.gmra.mrb[0].mxu1 %vm677_vm1, %v11143_v14  ;;  %v10611_v23 = vpop.f32.mrb[101].mxu0  ;;  %v8781_v14 = vld [vmem:[%s11046_s4 + $0x2a0] sm:$0xff]  }
 0x284   : > { %8162 = vmatprep.mubr.msk.bf16.mxu1 %vm677_vm1, %v11144_v52  ;;  %8167 = vmatpush3.bf16.msra.mxu1 %v8765_v28  ;;  %v10615_v27 = vpop.f32.mrb[102].mxu0  ;;  %v11151_v28 = vld [vmem:[#allocation13_spill] sm:$0xff]  ;;  %v5280_v52 = vld [vmem:[#allocation3 + $0x60] sm:$0xff] }
 0x285   : > { %8168 = vmatprep.subr.bf16.mxu1 %v8766_v53  ;;  %v10617_v10 = vpop.f32.mrb[103].mxu0 }
 0x288   : > { %8169 = vmatpush3.bf16.msra.mxu1 %v8766_v53  ;;  %v11152_v53 = vld [vmem:[#allocation16_spill] sm:$0xff] }
 0x289   : > { %8170 = vmatprep.subr.bf16.mxu1 %v8767_v41  ;;  %v11153_v5 = vpack.c.bf16 %v11151_v28, %v11152_v53  ;;  %v8800_v28 = vld [vmem:[%s11049_s7 + $0x38] sm:$0xff]  }
 0x28b   : > { %8163 = vmatmul.mubr.msk.bf16.gmra.mrb[4].mxu1 %vm677_vm1, %v4777_v4  ;;  %v10627_v7 = vpop.f32.mrb[104].mxu0  ;;  %v5282_v4 = vld [vmem:[#allocation3 + $0x80] sm:$0xff] }
 0x28c   : > { %8171 = vmatpush3.bf16.msra.mxu1 %v8767_v41  ;;  %8174 = vmatprep.mubr.msk.bf16.mxu1 %vm677_vm1, %v10353_v58  ;;  %v10632_v22 = vpop.f32.mrb[105].mxu0  ;;  %v11146_v58 = vpack.c.bf16 %v11145_v36, %v11134_v44  ;;  %v8772_v44 = vld [vmem:[%s11046_s4 + $0x258] sm:$0xff]   ;;  %v5287_v41 = vpack.c.bf16 %v10568_v12, %v5280_v52 }
 0x28d   : > { %8172 = vmatprep.subr.bf16.mxu1 %v8768_v49  ;;  %v7925_v59 = vpop.f32.mrb[106].mxu0  ;;  %v8784_v36 = vld [vmem:[%s11046_s4 + $0x2b8] sm:$0xff]  }
 0x28e   : > { %v10634_v40 = vpop.f32.mrb[107].mxu0  ;;  %v8783_v59 = vld [vmem:[%s11046_s4 + $0x2b0] sm:$0xff]  }
 0x290   : > { %8173 = vmatpush3.bf16.msra.mxu1 %v8768_v49  ;;  %v8782_v49 = vld [vmem:[%s11046_s4 + $0x2a8] sm:$0xff]  }
 0x291   : > { %8182 = vmatprep.subr.bf16.mxu1 %v8769_v16 }
 0x293   : > { %8175 = vmatmul.mubr.msk.bf16.vlgmr.msra.gmra.mrb[0].mxu1 %vm677_vm1, %v11146_v58  ;;  %v5410_v58 = vld [vmem:[#allocation3 + $0x81] sm:$0xff] }
 0x294   : > { %8178 = vmatprep.mubr.msk.bf16.mxu1 %vm677_vm1, %v11147_v39  ;;  %8183 = vmatpush3.bf16.msra.mxu1 %v8769_v16  ;;  %v5288_v16 = vpack.c.bf16 %v10444_v25, %v5282_v4  ;;  %v8785_v25 = vld [vmem:[%s11046_s4 + $0x2c0] sm:$0xff]   ;;  %v5416_v39 = vpack.c.bf16 %v10475_v2, %v5410_v58  ;;  %v8788_v2 = vld [vmem:[%s11046_s4 + $0x2d8] sm:$0xff]  }
 0x295   : > { %8184 = vmatprep.subr.bf16.mxu1 %v8770_v56 }
 0x298   : > { %8185 = vmatpush3.bf16.msra.mxu1 %v8770_v56  ;;  %v5285_v56 = vld [vmem:[#allocation3 + $0xb0] sm:$0xff] }
 0x299   : > { %8186 = vmatprep.subr.bf16.mxu1 %v8771_v37  ;;  %v5289_v12 = vpack.c.bf16 %v5285_v56, %v10580_v35  ;;  %v8786_v35 = vld [vmem:[%s11046_s4 + $0x2c8] sm:$0xff]  }
 0x29b   : > { %8179 = vmatmul.mubr.msk.bf16.gmra.mrb[4].mxu1 %vm677_vm1, %v4905_v33  ;;  %v5535_v33 = vld [vmem:[#allocation3 + $0x52] sm:$0xff] }
 0x29c   : > { %8187 = vmatpush3.bf16.msra.mxu1 %v8771_v37  ;;  %8190 = vmatprep.mubr.msk.bf16.mxu1 %vm677_vm1, %v11150_v13  ;;  %v5413_v37 = vld [vmem:[#allocation3 + $0xb1] sm:$0xff]  ;;  %v8790_v13 = vld [vmem:[%s11046_s4 + $0x2e8] sm:$0xff]  }
 0x29d   : > { %8188 = vmatprep.subr.bf16.mxu1 %v8772_v44 }
 0x2a0   : > { %8189 = vmatpush3.bf16.msra.mxu1 %v8772_v44  ;;  %v5417_v44 = vpack.c.bf16 %v5413_v37, %v10613_v45  ;;  %v5538_v45 = vld [vmem:[#allocation3 + $0x82] sm:$0xff] }
 0x2a1   : > { %8198 = vmatprep.subr.bf16.mxu1 %v8773_v26 }
 0x2a3   : > { %8191 = vmatmul.mubr.msk.bf16.vlgmr.msra.gmra.mrb[0].mxu1 %vm677_vm1, %v5031_v31  ;;  %v5541_v31 = vld [vmem:[#allocation3 + $0xb2] sm:$0xff] }
 0x2a4   : > { %8194 = vmatprep.mubr.msk.bf16.mxu1 %vm677_vm1, %v5032_v11  ;;  %8199 = vmatpush3.bf16.msra.mxu1 %v8773_v26  ;;  %v5544_v26 = vpack.c.bf16 %v10505_v48, %v5538_v45  ;;  %v8792_v48 = vld [vmem:[%s11046_s4 + $0x2f8] sm:$0xff]   ;;  %v5672_v11 = vpack.c.bf16 %v10532_v15, %v5666_v17 }
 0x2a5   : > { %8200 = vmatprep.subr.bf16.mxu1 %v8774_v30  ;;  %v8796_v15 = vld [vmem:[%s11046_s4 + $0x318] sm:$0xff]  }
 0x2a8   : > { %8201 = vmatpush3.bf16.msra.mxu1 %v8774_v30  ;;  %v5545_v30 = vpack.c.bf16 %v5541_v31, %v10650_v1  ;;  %v8794_v1 = vld [vmem:[%s11046_s4 + $0x308] sm:$0xff]  }
 0x2a9   : > { %8202 = vmatprep.subr.bf16.mxu1 %v8775_v32 }
 0x2ab   : > { %8195 = vmatmul.mubr.msk.bf16.gmra.mrb[4].mxu1 %vm677_vm1, %v5033_v24  ;;  %v11155_v24 = vld [vmem:[#allocation22_spill] sm:$0xff] }
 0x2ac   : > { %8203 = vmatpush3.bf16.msra.mxu1 %v8775_v32  ;;  %8206 = vmatprep.mubr.msk.bf16.mxu1 %vm677_vm1, %v5158_v6  ;;  %v11154_v32 = vld [vmem:[#allocation20_spill] sm:$0xff]  ;;  %v11157_v6 = vld [vmem:[#allocation15_spill] sm:$0xff] }
 0x2ad   : > { %8204 = vmatprep.subr.bf16.mxu1 %v8776_v3  ;;  %v11156_v0 = vpack.c.bf16 %v11154_v32, %v11155_v24 }
 0x2b0   : > { %8205 = vmatpush3.bf16.msra.mxu1 %v8776_v3  ;;  %v5669_v3 = vld [vmem:[#allocation3 + $0xb3] sm:$0xff] }
 0x2b1   : > { %8214 = vmatprep.subr.bf16.mxu1 %v8777_v9  ;;  %v5673_v19 = vpack.c.bf16 %v5669_v3, %v10675_v54  ;;  %v11161_v54 = vld [vmem:[#allocation23_spill] sm:$0xff] }
 0x2b3   : > { %8207 = vmatmul.mubr.msk.bf16.vlgmr.msra.gmra.mrb[0].mxu1 %vm677_vm1, %v5159_v60  ;;  %v5800_v60 = vpack.c.bf16 %v10555_v20, %v5794_v29  ;;  %v8798_v20 = vld [vmem:[%s11049_s7 + $0x28] sm:$0xff]  }
 0x2b4   : > { %8210 = vmatprep.mubr.msk.bf16.mxu1 %vm677_vm1, %v5160_v42  ;;  %8215 = vmatpush3.bf16.msra.mxu1 %v8777_v9  ;;  %v11158_v9 = vld [vmem:[#allocation17_spill] sm:$0xff] }
 0x2b5   : > { %8216 = vmatprep.subr.bf16.mxu1 %v8778_v46  ;;  %v11159_v51 = vpack.c.bf16 %v11157_v6, %v11158_v9  ;;  %v5797_v42 = vld [vmem:[#allocation3 + $0xb4] sm:$0xff] }
 0x2b8   : > { %8217 = vmatpush3.bf16.msra.mxu1 %v8778_v46  ;;  %v11160_v46 = vld [vmem:[#allocation21_spill] sm:$0xff] }
 0x2b9   : > { %8218 = vmatprep.subr.bf16.mxu1 %v8779_v43  ;;  %v11162_v21 = vpack.c.bf16 %v11160_v46, %v11161_v54 }
 0x2bb   : > { %8211 = vmatmul.mubr.msk.bf16.gmra.mrb[4].mxu1 %vm677_vm1, %v5161_v63  ;;  %v8797_v63 = vld [vmem:[%s11049_s7 + $0x20] sm:$0xff]  }
 0x2bc   : > { %8219 = vmatpush3.bf16.msra.mxu1 %v8779_v43  ;;  %8222 = vmatprep.mubr.msk.bf16.mxu1 %vm677_vm1, %v11153_v5  ;;  %v5801_v43 = vpack.c.bf16 %v5797_v42, %v10696_v55  ;;  %v8799_v55 = vld [vmem:[%s11049_s7 + $0x30] sm:$0xff]   ;;  %v7349_v5 = vld [vmem:[%s11047_s5] ss:$0 sm:$0xff] }
 0x2bd   : > { %8220 = vmatprep.subr.bf16.mxu1 %v8780_v50  ;;  %v8801_v42 = vld [vmem:[%s11049_s7] sm:$0xff]  }
 0x2c0   : > { %8221 = vmatpush3.bf16.msra.mxu1 %v8780_v50  ;;  %v8925_v50 = vmov 0.0  }
 0x2c1   : > { %8230 = vmatprep.subr.bf16.mxu1 %v8781_v14  ;;  %8294 = vmatprep.subr.bf16.mxu0 %v8925_v50 }
 0x2c2   : > { %8295 = vmatpush3.bf16.msra.mxu0 %v8797_v63  ;;  %8302 = vmatprep.mubr.msk.bf16.mxu0 %vm8926_vm6, %v8925_v50  ;;  %v8802_v63 = vld [vmem:[%s11049_s7 + $0x8] sm:$0xff]  }
 0x2c3   : > { %8223 = vmatmul.mubr.msk.bf16.vlgmr.msra.gmra.mrb[0].mxu1 %vm677_vm1, %v5287_v41  ;;  %8296 = vmatprep.subr.bf16.mxu0 %v8925_v50  ;;  %v7350_v41 = vld [vmem:[%s11048_s6] ss:$0 sm:$0xff] }
 0x2c4   : > { %8226 = vmatprep.mubr.msk.bf16.mxu1 %vm677_vm1, %v5288_v16  ;;  %8231 = vmatpush3.bf16.msra.mxu1 %v8781_v14 }
 0x2c5   : > { %8232 = vmatprep.subr.bf16.mxu1 %v8782_v49 }
 0x2c6   : > { %8297 = vmatpush3.bf16.msra.mxu0 %v8798_v20  ;;  %v8803_v20 = vld [vmem:[%s11049_s7 + $0x10] sm:$0xff]  }
 0x2c7   : > { %8298 = vmatprep.subr.bf16.mxu0 %v8925_v50 }
 0x2c8   : > { %8233 = vmatpush3.bf16.msra.mxu1 %v8782_v49 }
 0x2c9   : > { %8234 = vmatprep.subr.bf16.mxu1 %v8783_v59 }
 0x2ca   : > { %8299 = vmatpush3.bf16.msra.mxu0 %v8799_v55  ;;  %v8804_v55 = vld [vmem:[%s11049_s7 + $0x18] sm:$0xff]  }
 0x2cb   : > { %8227 = vmatmul.mubr.msk.bf16.gmra.mrb[4].mxu1 %vm677_vm1, %v5289_v12  ;;  %8300 = vmatprep.subr.bf16.mxu0 %v8925_v50 }
 0x2cc   : > { %8235 = vmatpush3.bf16.msra.mxu1 %v8783_v59  ;;  %8238 = vmatprep.mubr.msk.bf16.mxu1 %vm677_vm1, %v10460_v38  ;;  %v8787_v38 = vld [vmem:[%s11046_s4 + $0x2d0] sm:$0xff]  }
 0x2cd   : > { %8236 = vmatprep.subr.bf16.mxu1 %v8784_v36 }
 0x2ce   : > { %8301 = vmatpush3.bf16.msra.mxu0 %v8800_v28 }
 0x2cf   : > { %8306 = vmatprep.subr.bf16.mxu0 %v8925_v50 }
 0x2d0   : > { %8237 = vmatpush3.bf16.msra.mxu1 %v8784_v36 }
 0x2d1   : > { %8246 = vmatprep.subr.bf16.mxu1 %v8785_v25 }
 0x2d3   : > { %8239 = vmatmul.mubr.msk.bf16.vlgmr.msra.gmra.mrb[0].mxu1 %vm677_vm1, %v10466_v18  ;;  %v5542_v18 = vpack.c.bf16 %v5535_v33, %v5534_v8 }
 0x2d4   : > { %8242 = vmatprep.mubr.msk.bf16.mxu1 %vm677_vm1, %v5416_v39  ;;  %8247 = vmatpush3.bf16.msra.mxu1 %v8785_v25 }
 0x2d5   : > { %8248 = vmatprep.subr.bf16.mxu1 %v8786_v35 }
 0x2d8   : > { %8249 = vmatpush3.bf16.msra.mxu1 %v8786_v35 }
 0x2d9   : > { %8250 = vmatprep.subr.bf16.mxu1 %v8787_v38 }
 0x2db   : > { %8243 = vmatmul.mubr.msk.bf16.gmra.mrb[4].mxu1 %vm677_vm1, %v5417_v44 }
 0x2dc   : > { %8251 = vmatpush3.bf16.msra.mxu1 %v8787_v38  ;;  %8254 = vmatprep.mubr.msk.bf16.mxu1 %vm677_vm1, %v5542_v18 }
 0x2dd   : > { %8252 = vmatprep.subr.bf16.mxu1 %v8788_v2 }
 0x2e0   : > { %8253 = vmatpush3.bf16.msra.mxu1 %v8788_v2 }
 0x2e1   : > { %8262 = vmatprep.subr.bf16.mxu1 %v8789_v34 }
 0x2e3   : > { %8255 = vmatmul.mubr.msk.bf16.vlgmr.msra.gmra.mrb[0].mxu1 %vm677_vm1, %v10494_v62  ;;  %v8793_v62 = vld [vmem:[%s11046_s4 + $0x300] sm:$0xff]  }
 0x2e4   : > { %8258 = vmatprep.mubr.msk.bf16.mxu1 %vm677_vm1, %v5544_v26  ;;  %8263 = vmatpush3.bf16.msra.mxu1 %v8789_v34 }
 0x2e5   : > { %8264 = vmatprep.subr.bf16.mxu1 %v8790_v13 }
 0x2e8   : > { %8265 = vmatpush3.bf16.msra.mxu1 %v8790_v13 }
 0x2e9   : > { %8266 = vmatprep.subr.bf16.mxu1 %v8791_v61 }
 0x2eb   : > { %8259 = vmatmul.mubr.msk.bf16.gmra.mrb[4].mxu1 %vm677_vm1, %v5545_v30 }
 0x2ec   : > { %8267 = vmatpush3.bf16.msra.mxu1 %v8791_v61  ;;  %8270 = vmatprep.mubr.msk.bf16.mxu1 %vm677_vm1, %v10520_v47  ;;  %v8795_v47 = vld [vmem:[%s11046_s4 + $0x310] sm:$0xff]  }
 0x2ed   : > { %8268 = vmatprep.subr.bf16.mxu1 %v8792_v48 }
 0x2f0   : > { %8269 = vmatpush3.bf16.msra.mxu1 %v8792_v48 }
 0x2f1   : > { %8278 = vmatprep.subr.bf16.mxu1 %v8793_v62 }
 0x2f3   : > { %8271 = vmatmul.mubr.msk.bf16.vlgmr.msra.gmra.mrb[0].mxu1 %vm677_vm1, %v11156_v0 }
 0x2f4   : > { %8274 = vmatprep.mubr.msk.bf16.mxu1 %vm677_vm1, %v5672_v11  ;;  %8279 = vmatpush3.bf16.msra.mxu1 %v8793_v62 }
 0x2f5   : > { %8280 = vmatprep.subr.bf16.mxu1 %v8794_v1 }
 0x2f8   : > { %8281 = vmatpush3.bf16.msra.mxu1 %v8794_v1 }
 0x2f9   : > { %8282 = vmatprep.subr.bf16.mxu1 %v8795_v47 }
 0x2fb   : > { %8275 = vmatmul.mubr.msk.bf16.gmra.mrb[4].mxu1 %vm677_vm1, %v5673_v19 }
 0x2fc   : > { %8283 = vmatpush3.bf16.msra.mxu1 %v8795_v47  ;;  %8286 = vmatprep.mubr.msk.bf16.mxu1 %vm677_vm1, %v11159_v51 }
 0x2fd   : > { %8284 = vmatprep.subr.bf16.mxu1 %v8796_v15 }
 0x300   : > { %8285 = vmatpush3.bf16.msra.mxu1 %v8796_v15 }
 0x303   : > { %8287 = vmatmul.mubr.msk.bf16.vlgmr.msra.gmra.mrb[0].mxu1 %vm677_vm1, %v11162_v21 }
 0x304   : > { %8290 = vmatprep.mubr.msk.bf16.mxu1 %vm677_vm1, %v5800_v60 }
 0x30b   : > { %8291 = vmatmul.mubr.msk.bf16.gmra.mrb[4].mxu1 %vm677_vm1, %v5801_v43 }
 0x3d6   : > { %v8288_v53 = vpop.f32.mrb[0].mxu1 }
 0x3d7   : > { %v8402_v14 = vadd.f32 %v8288_v53, %v10606_v57  ;;  %v5881_v52 = vpop.f32.mrb[1].mxu1  ;;  %v8805_v53 = vld [vmem:[%s11049_s7 + $0x40] sm:$0xff]  }
 0x3d8   : > { %v8403_v4 = vadd.f32 %v5881_v52, %v10611_v23  ;;  %v8289_v49 = vpop.f32.mrb[2].mxu1  ;;  %v8807_v52 = vld [vmem:[%s11049_s7 + $0x50] sm:$0xff]  }
 0x3d9   : > { %v5939_v16 = vmul.f32 %v8402_v14, %v7349_v5  ;;  %v8404_v59 = vadd.f32 %v8289_v49, %v10615_v27  ;;  %v5884_v56 = vpop.f32.mrb[3].mxu1  ;;  %v8806_v14 = vld [vmem:[%s11049_s7 + $0x48] sm:$0xff]   ;;  %v8809_v49 = vld [vmem:[%s11049_s7 + $0x60] sm:$0xff]  }
 0x3da   : > { %v5926_v12 = vmul.f32 %v8403_v4, %v7349_v5  ;;  %v8405_v36 = vadd.f32 %v5884_v56, %v10617_v10  ;;  %v8811_v56 = vld [vmem:[%s11049_s7 + $0x70] sm:$0xff]  }
 0x3db   : > { %v5940_v25 = vadd.f32 %v7350_v41, %v5939_v16  ;;  %v5953_v58 = vmul.f32 %v8404_v59, %v7349_v5  ;;  %v8810_v59 = vld [vmem:[%s11049_s7 + $0x68] sm:$0xff]  }
 0x3dc   : > { %v5933_v35 = vadd.f32 %v7350_v41, %v5926_v12  ;;  %v5935_v39 = vmul.f32 %v8405_v36, %v7349_v5  ;;  %v8812_v12 = vld [vmem:[%s11049_s7 + $0x78] sm:$0xff]  }
 0x3dd   : > { %v5954_v57 = vadd.f32 %v7350_v41, %v5953_v58  ;;  %v5941_v33 = vmax.f32 %v5940_v25, 0.0  ;;  %v8813_v25 = vld [vmem:[%s11049_s7 + $0x80] sm:$0xff]  }
 0x3de   : > { %v5936_v38 = vadd.f32 %v7350_v41, %v5935_v39  ;;  %v8292_v37 = vpop.f32.mrb[4].mxu1  ;;  %v5934_v2 = vmax.f32 %v5933_v35, 0.0  ;;  %v8814_v35 = vld [vmem:[%s11049_s7 + $0x88] sm:$0xff]   ;;  %v8815_v39 = vld [vmem:[%s11049_s7 + $0x90] sm:$0xff]  }
 0x3df   : > { %v5955_v44 = vmax.f32 %v5954_v57, 0.0  ;;  %v8406_v8 = vadd.f32 %v8292_v37, %v10627_v7  ;;  %v5897_v23 = vpop.f32.mrb[5].mxu1  ;;  %v8816_v57 = vld [vmem:[%s11049_s7 + $0x98] sm:$0xff]   ;;  %v8817_v37 = vld [vmem:[%s11049_s7 + $0xa0] sm:$0xff]  }
 0x3e0   : > { %v5937_v18 = vmax.f32 %v5936_v38, 0.0  ;;  %v8407_v27 = vadd.f32 %v5897_v23, %v10632_v22  ;;  %v8293_v34 = vpop.f32.mrb[6].mxu1  ;;  %v8820_v23 = vld [vmem:[%s11049_s7 + $0xb8] sm:$0xff]  }
 0x3e1   : > { %v5956_v45 = vmax.f32 %v5941_v33, %v5955_v44  ;;  %v5900_v13 = vpop.f32.mrb[7].mxu1  ;;  %v5976_v26 = vmul.f32 %v8406_v8, %v7349_v5  ;;  %v8818_v44 = vld [vmem:[%s11049_s7 + $0xa8] sm:$0xff]   ;;  %v8819_v8 = vld [vmem:[%s11049_s7 + $0xb0] sm:$0xff]  }
 0x3e2   : > { %v5938_v10 = vmax.f32 %v5934_v2, %v5937_v18  ;;  %v5957_v61 = vmul.f32 %v8407_v27, %v7349_v5  ;;  %v8408_v31 = vadd.f32 %v5900_v13, %v10634_v40  ;;  %v8821_v18 = vld [vmem:[%s11049_s7 + $0xc0] sm:$0xff]   ;;  %v8822_v34 = vld [vmem:[%s11049_s7 + $0xc8] sm:$0xff]   ;;  %v8824_v13 = vld [vmem:[%s11049_s7 + $0xd8] sm:$0xff]  }
 0x3e3   : > { %v5977_v1 = vadd.f32 %v7350_v41, %v5976_v26  ;;  %v8825_v26 = vld [vmem:[%s11049_s7 + $0xe0] sm:$0xff]  }
 0x3e4   : > { %v5942_v30 = vmax.f32 %v5938_v10, %v5941_v33  ;;  %v5958_v48 = vadd.f32 %v7350_v41, %v5957_v61  ;;  %v5972_v62 = vmul.f32 %v8408_v31, %v7349_v5  ;;  %v8826_v31 = vld [vmem:[%s11049_s7 + $0xe8] sm:$0xff]  }
 0x3e5   : > { %v5978_v3 = vmax.f32 %v5977_v1, 0.0 }
 0x3e6   : > { %v5944_v17 = vrot.slane %v5942_v30, 1  ;;  %v5959_v11 = vmax.f32 %v5958_v48, 0.0  ;;  %v5973_v7 = vadd.f32 %v7350_v41, %v5972_v62  ;;  %v5947_v24 = vrot.slane %v5942_v30, 2  ;;  %v8808_v41 = vld [vmem:[%s11049_s7 + $0x58] sm:$0xff]  }
 0x3e7   : > { %v8828_v48 = vld [vmem:[%s11049_s7 + $0xf8] sm:$0xff]  }
 0x3e8   : > { %v5946_v32 = vmax.f32 %v5942_v30, %v5944_v17  ;;  %v5960_v0 = vmax.f32 %v5956_v45, %v5959_v11  ;;  %v5974_v47 = vmax.f32 %v5973_v7, 0.0  ;;  %v8823_v45 = vld [vmem:[%s11049_s7 + $0xd0] sm:$0xff]   ;;  %v8829_v17 = vld [vmem:[%s11049_s7 + $0x100] sm:$0xff]  }
 0x3e9   : > { %v8827_v30 = vld [vmem:[%s11049_s7 + $0xf0] sm:$0xff]  }
 0x3ea   : > { %v5949_v22 = vmax.f32 %v5946_v32, %v5947_v24  ;;  %v5962_v19 = vrot.slane %v5960_v0, 1  ;;  %v5975_v15 = vmax.f32 %v5959_v11, %v5974_v47  ;;  %v5965_v6 = vrot.slane %v5960_v0, 2  ;;  %v8830_v11 = vld [vmem:[%s11049_s7 + $0x108] sm:$0xff]   ;;  %v8831_v7 = vld [vmem:[%s11049_s7 + $0x110] sm:$0xff]   ;;  %v8832_v32 = vld [vmem:[%s11049_s7 + $0x118] sm:$0xff]  }
 0x3ec   : > { %5950 = vst.msk [vmem:[#allocation4] sm:$0x1] %vm1641_vm2, %v5949_v22  ;;  %v5964_v40 = vmax.f32 %v5960_v0, %v5962_v19  ;;  %v5979_v9 = vmax.f32 %v5975_v15, %v5978_v3 }
 0x3ed   : > { %5951 = vst.msk [vmem:[#allocation4 - $0x1] sm:$0x4] %vm1643_vm5, %v5949_v22 }
 0x3ee   : > { %5952 = vst.msk [vmem:[#allocation4 - $0x2] sm:$0x10] %vm1645_vm3, %v5949_v22  ;;  %v5967_v51 = vmax.f32 %v5964_v40, %v5965_v6  ;;  %v5981_v29 = vrot.slane %v5979_v9, 1  ;;  %v5984_v46 = vrot.slane %v5979_v9, 2 }
 0x3f0   : > { %5969 = vst.msk [vmem:[#allocation4 + $0x4] sm:$0x1] %vm1641_vm2, %v5967_v51  ;;  %v5983_v60 = vmax.f32 %v5979_v9, %v5981_v29 }
 0x3f1   : > { %5970 = vst.msk [vmem:[#allocation4 + $0x3] sm:$0x4] %vm1643_vm5, %v5967_v51 }
 0x3f2   : > { %5971 = vst.msk [vmem:[#allocation4 + $0x2] sm:$0x10] %vm1645_vm3, %v5967_v51  ;;  %v5986_v54 = vmax.f32 %v5983_v60, %v5984_v46 }
 0x3f3   : > { %v5991_v28 = vld [vmem:[#allocation4] sm:$0x1] }
 0x3f4   : > { %v6001_v21 = vld [vmem:[#allocation4 + $0x1] sm:$0x1]  ;;  %5988 = vst.msk [vmem:[#allocation4 + $0x8] sm:$0x1] %vm1641_vm2, %v5986_v54  ;;  %v5992_v5 = vpack.c.bf16 %v5991_v28, %v5991_v28 }
 0x3f5   : > { %5989 = vst.msk [vmem:[#allocation4 + $0x7] sm:$0x4] %vm1643_vm5, %v5986_v54  ;;  %v6002_v43 = vpack.c.bf16 %v6001_v21, %v6001_v21  ;;  %v6146_v4 = vld [vmem:[#allocation4 + $0x2] sm:$0x1] }
 0x3f6   : > { %5990 = vst.msk [vmem:[#allocation4 + $0x6] sm:$0x10] %vm1645_vm3, %v5986_v54  ;;  %v6147_v16 = vpack.c.bf16 %v6146_v4, %v6146_v4 }
 0x3f7   : > { %8303 = vmatmul.mubr.msk.bf16.vlgmr.msra.gmra.mrb[108].mxu0 %vm677_vm1, %v6002_v43  ;;  %v6225_v36 = vld [vmem:[#allocation4 + $0x4] sm:$0x1] }
 0x3f8   : > { %8307 = vmatpush3.bf16.msra.mxu0 %v8801_v42  ;;  %8314 = vmatprep.mubr.msk.bf16.mxu0 %vm8926_vm6, %v8925_v50  ;;  %v6226_v58 = vpack.c.bf16 %v6225_v36, %v6225_v36  ;;  %v6304_v38 = vld [vmem:[#allocation4 + $0x5] sm:$0x1] }
 0x3f9   : > { %8308 = vmatprep.subr.bf16.mxu0 %v8925_v50  ;;  %v6305_v33 = vpack.c.bf16 %v6304_v38, %v6304_v38  ;;  %v6383_v2 = vld [vmem:[#allocation4 + $0x6] sm:$0x1] }
 0x3fa   : > { %v6384_v27 = vpack.c.bf16 %v6383_v2, %v6383_v2 }
 0x3fb   : > { %v6462_v10 = vld [vmem:[#allocation4 + $0x8] sm:$0x1] }
 0x3fc   : > { %8309 = vmatpush3.bf16.msra.mxu0 %v8802_v63  ;;  %v6463_v61 = vpack.c.bf16 %v6462_v10, %v6462_v10  ;;  %v6541_v62 = vld [vmem:[#allocation4 + $0x9] sm:$0x1] }
 0x3fd   : > { %8310 = vmatprep.subr.bf16.mxu0 %v8925_v50  ;;  %v6542_v1 = vpack.c.bf16 %v6541_v62, %v6541_v62  ;;  %v6620_v24 = vld [vmem:[#allocation4 + $0xa] sm:$0x1] }
 0x3fe   : > { %v6621_v0 = vpack.c.bf16 %v6620_v24, %v6620_v24 }
 0x400   : > { %8311 = vmatpush3.bf16.msra.mxu0 %v8803_v20 }
 0x401   : > { %8312 = vmatprep.subr.bf16.mxu0 %v8925_v50 }
 0x404   : > { %8313 = vmatpush3.bf16.msra.mxu0 %v8804_v55 }
 0x405   : > { %8318 = vmatprep.subr.bf16.mxu0 %v8925_v50 }
 0x407   : > { %8315 = vmatmul.mubr.msk.bf16.vlgmr.msra.gmra.mrb[112].mxu0 %vm677_vm1, %v5992_v5 }
 0x408   : > { %8319 = vmatpush3.bf16.msra.mxu0 %v8805_v53  ;;  %8326 = vmatprep.mubr.msk.bf16.mxu0 %vm8926_vm6, %v8925_v50 }
 0x409   : > { %8320 = vmatprep.subr.bf16.mxu0 %v8925_v50 }
 0x40c   : > { %8321 = vmatpush3.bf16.msra.mxu0 %v8806_v14 }
 0x40d   : > { %8322 = vmatprep.subr.bf16.mxu0 %v8925_v50 }
 0x410   : > { %8323 = vmatpush3.bf16.msra.mxu0 %v8807_v52 }
 0x411   : > { %8324 = vmatprep.subr.bf16.mxu0 %v8925_v50 }
 0x414   : > { %8325 = vmatpush3.bf16.msra.mxu0 %v8808_v41 }
 0x415   : > { %8330 = vmatprep.subr.bf16.mxu0 %v8925_v50 }
 0x417   : > { %8327 = vmatmul.mubr.msk.bf16.vlgmr.msra.gmra.mrb[116].mxu0 %vm677_vm1, %v6147_v16 }
 0x418   : > { %8331 = vmatpush3.bf16.msra.mxu0 %v8809_v49  ;;  %8338 = vmatprep.mubr.msk.bf16.mxu0 %vm8926_vm6, %v8925_v50 }
 0x419   : > { %8332 = vmatprep.subr.bf16.mxu0 %v8925_v50 }
 0x41c   : > { %8333 = vmatpush3.bf16.msra.mxu0 %v8810_v59 }
 0x41d   : > { %8334 = vmatprep.subr.bf16.mxu0 %v8925_v50 }
 0x420   : > { %8335 = vmatpush3.bf16.msra.mxu0 %v8811_v56 }
 0x421   : > { %8336 = vmatprep.subr.bf16.mxu0 %v8925_v50 }
 0x424   : > { %8337 = vmatpush3.bf16.msra.mxu0 %v8812_v12 }
 0x425   : > { %8342 = vmatprep.subr.bf16.mxu0 %v8925_v50 }
 0x427   : > { %8339 = vmatmul.mubr.msk.bf16.vlgmr.msra.gmra.mrb[120].mxu0 %vm677_vm1, %v6226_v58 }
 0x428   : > { %8343 = vmatpush3.bf16.msra.mxu0 %v8813_v25  ;;  %8350 = vmatprep.mubr.msk.bf16.mxu0 %vm8926_vm6, %v8925_v50 }
 0x429   : > { %8344 = vmatprep.subr.bf16.mxu0 %v8925_v50 }
 0x42c   : > { %8345 = vmatpush3.bf16.msra.mxu0 %v8814_v35 }
 0x42d   : > { %8346 = vmatprep.subr.bf16.mxu0 %v8925_v50 }
 0x430   : > { %8347 = vmatpush3.bf16.msra.mxu0 %v8815_v39 }
 0x431   : > { %8348 = vmatprep.subr.bf16.mxu0 %v8925_v50 }
 0x434   : > { %8349 = vmatpush3.bf16.msra.mxu0 %v8816_v57 }
 0x435   : > { %8354 = vmatprep.subr.bf16.mxu0 %v8925_v50 }
 0x437   : > { %8351 = vmatmul.mubr.msk.bf16.vlgmr.msra.gmra.mrb[124].mxu0 %vm677_vm1, %v6305_v33  ;;  %v6699_v33 = vld [vmem:[%s11050_s8] sm:$0x1] }
 0x438   : > { %8355 = vmatpush3.bf16.msra.mxu0 %v8817_v37  ;;  %8362 = vmatprep.mubr.msk.bf16.mxu0 %vm8926_vm6, %v8925_v50 }
 0x439   : > { %8356 = vmatprep.subr.bf16.mxu0 %v8925_v50 }
 0x43c   : > { %8357 = vmatpush3.bf16.msra.mxu0 %v8818_v44 }
 0x43d   : > { %8358 = vmatprep.subr.bf16.mxu0 %v8925_v50 }
 0x440   : > { %8359 = vmatpush3.bf16.msra.mxu0 %v8819_v8 }
 0x441   : > { %8360 = vmatprep.subr.bf16.mxu0 %v8925_v50 }
 0x444   : > { %8361 = vmatpush3.bf16.msra.mxu0 %v8820_v23 }
 0x445   : > { %8366 = vmatprep.subr.bf16.mxu0 %v8925_v50 }
 0x447   : > { %8363 = vmatmul.mubr.msk.bf16.vlgmr.msra.gmra.mrb[128].mxu0 %vm677_vm1, %v6384_v27 }
 0x448   : > { %8367 = vmatpush3.bf16.msra.mxu0 %v8821_v18  ;;  %8374 = vmatprep.mubr.msk.bf16.mxu0 %vm8926_vm6, %v8925_v50 }
 0x449   : > { %8368 = vmatprep.subr.bf16.mxu0 %v8925_v50 }
 0x44c   : > { %8369 = vmatpush3.bf16.msra.mxu0 %v8822_v34 }
 0x44d   : > { %8370 = vmatprep.subr.bf16.mxu0 %v8925_v50 }
 0x450   : > { %8371 = vmatpush3.bf16.msra.mxu0 %v8823_v45 }
 0x451   : > { %8372 = vmatprep.subr.bf16.mxu0 %v8925_v50 }
 0x454   : > { %8373 = vmatpush3.bf16.msra.mxu0 %v8824_v13 }
 0x455   : > { %8378 = vmatprep.subr.bf16.mxu0 %v8925_v50 }
 0x457   : > { %8375 = vmatmul.mubr.msk.bf16.vlgmr.msra.gmra.mrb[132].mxu0 %vm677_vm1, %v6463_v61 }
 0x458   : > { %8379 = vmatpush3.bf16.msra.mxu0 %v8825_v26  ;;  %8386 = vmatprep.mubr.msk.bf16.mxu0 %vm8926_vm6, %v8925_v50 }
 0x459   : > { %8380 = vmatprep.subr.bf16.mxu0 %v8925_v50 }
 0x45c   : > { %8381 = vmatpush3.bf16.msra.mxu0 %v8826_v31 }
 0x45d   : > { %8382 = vmatprep.subr.bf16.mxu0 %v8925_v50 }
 0x460   : > { %8383 = vmatpush3.bf16.msra.mxu0 %v8827_v30 }
 0x461   : > { %8384 = vmatprep.subr.bf16.mxu0 %v8925_v50 }
 0x464   : > { %8385 = vmatpush3.bf16.msra.mxu0 %v8828_v48 }
 0x465   : > { %8390 = vmatprep.subr.bf16.mxu0 %v8925_v50 }
 0x467   : > { %8387 = vmatmul.mubr.msk.bf16.vlgmr.msra.gmra.mrb[136].mxu0 %vm677_vm1, %v6542_v1 }
 0x468   : > { %8391 = vmatpush3.bf16.msra.mxu0 %v8829_v17  ;;  %8398 = vmatprep.mubr.msk.bf16.mxu0 %vm8926_vm6, %v8925_v50 }
 0x469   : > { %8392 = vmatprep.subr.bf16.mxu0 %v8925_v50 }
 0x46c   : > { %8393 = vmatpush3.bf16.msra.mxu0 %v8830_v11 }
 0x46d   : > { %8394 = vmatprep.subr.bf16.mxu0 %v8925_v50 }
 0x470   : > { %8395 = vmatpush3.bf16.msra.mxu0 %v8831_v7 }
 0x471   : > { %8396 = vmatprep.subr.bf16.mxu0 %v8925_v50 }
 0x474   : > { %8397 = vmatpush3.bf16.msra.mxu0 %v8832_v32 }
 0x477   : > { %8399 = vmatmul.mubr.msk.bf16.vlgmr.msra.gmra.mrb[140].mxu0 %vm677_vm1, %v6621_v0 }
 0x4ca   : > { %v6073_v47 = vpop.f32.mrb[108].mxu0 }
 0x4cb   : > { %v8304_v22 = vpop.f32.mrb[109].mxu0 }
 0x4cc   : > { %v6076_v3 = vpop.f32.mrb[110].mxu0 }
 0x4cd   : > { %v8305_v19 = vpop.f32.mrb[111].mxu0 }
 0x4da   : > { %v6140_v15 = vpop.f32.mrb[112].mxu0 }
 0x4db   : > { %v6141_v40 = vadd.f32 %v6140_v15, %v6073_v47  ;;  %v8316_v6 = vpop.f32.mrb[113].mxu0 }
 0x4dc   : > { %v6143_v9 = vpop.f32.mrb[114].mxu0 }
 0x4dd   : > { %v8317_v51 = vpop.f32.mrb[115].mxu0 }
 0x4ea   : > { %v6218_v29 = vpop.f32.mrb[116].mxu0 }
 0x4eb   : > { %v6224_v60 = vadd.f32 %v6218_v29, %v6141_v40  ;;  %v8328_v46 = vpop.f32.mrb[117].mxu0 }
 0x4ec   : > { %v6221_v54 = vpop.f32.mrb[118].mxu0 }
 0x4ed   : > { %v8329_v21 = vpop.f32.mrb[119].mxu0 }
 0x4fa   : > { %v6297_v50 = vpop.f32.mrb[120].mxu0 }
 0x4fb   : > { %v6303_v42 = vadd.f32 %v6297_v50, %v6224_v60  ;;  %v8340_v43 = vpop.f32.mrb[121].mxu0 }
 0x4fc   : > { %v6300_v63 = vpop.f32.mrb[122].mxu0 }
 0x4fd   : > { %v8341_v20 = vpop.f32.mrb[123].mxu0 }
 0x50a   : > { %v6376_v55 = vpop.f32.mrb[124].mxu0 }
 0x50b   : > { %v6382_v28 = vadd.f32 %v6376_v55, %v6303_v42  ;;  %v8352_v53 = vpop.f32.mrb[125].mxu0 }
 0x50c   : > { %v6379_v5 = vpop.f32.mrb[126].mxu0 }
 0x50d   : > { %v8353_v14 = vpop.f32.mrb[127].mxu0 }
 0x51a   : > { %v6455_v52 = vpop.f32.mrb[128].mxu0 }
 0x51b   : > { %v6461_v41 = vadd.f32 %v6455_v52, %v6382_v28  ;;  %v8364_v4 = vpop.f32.mrb[129].mxu0 }
 0x51c   : > { %v6458_v49 = vpop.f32.mrb[130].mxu0 }
 0x51d   : > { %v8365_v16 = vpop.f32.mrb[131].mxu0 }
 0x52a   : > { %v6534_v59 = vpop.f32.mrb[132].mxu0 }
 0x52b   : > { %v6540_v56 = vadd.f32 %v6534_v59, %v6461_v41  ;;  %v8376_v12 = vpop.f32.mrb[133].mxu0 }
 0x52c   : > { %v6537_v36 = vpop.f32.mrb[134].mxu0 }
 0x52d   : > { %v8377_v25 = vpop.f32.mrb[135].mxu0 }
 0x53a   : > { %v6613_v58 = vpop.f32.mrb[136].mxu0 }
 0x53b   : > { %v6619_v35 = vadd.f32 %v6613_v58, %v6540_v56  ;;  %v8388_v39 = vpop.f32.mrb[137].mxu0 }
 0x53c   : > { %v6616_v57 = vpop.f32.mrb[138].mxu0 }
 0x53d   : > { %v8389_v38 = vpop.f32.mrb[139].mxu0 }
 0x54a   : > { %v6692_v37 = vpop.f32.mrb[140].mxu0 }
 0x54b   : > { %v6698_v44 = vadd.f32 %v6692_v37, %v6619_v35  ;;  %v8400_v8 = vpop.f32.mrb[141].mxu0 }
 0x54c   : > { %v6695_v23 = vpop.f32.mrb[142].mxu0 }
 0x54d   : > { %v6700_v2 = vadd.f32 %v6699_v33, %v6698_v44  ;;  %v8401_v18 = vpop.f32.mrb[143].mxu0 }
 0x54f   : > { %6701 = vst [vmem:[%s324_s16] sm:$0x1] %v6700_v2 }
 0x550   : > { %8874 = shalt.err (!%p8871_p3)
}
 0x551   : > { %s8875_s28 = scalar_lea.hbm %s11000_s24, 16  ;;  %s8879_s16 = scalar_lea.hbm %s11051_s9, 32 }
 0x552   : > { %p8876_p4 = scmp.ne.s32.totalorder %s11000_s24, %s8875_s28  ;;  %p8880_p9 = scmp.lt.u32.totalorder %s11000_s24, %s11051_s9 }
 0x553   : > { %p8881_p10 = scmp.lt.u32.totalorder %s8879_s16, %s8875_s28  ;;  %p8883_p12 = scmp.lt.u32.totalorder %s8875_s28, %s11000_s24 }
 0x554   : > { %p8877_p7 = pnand %p8876_p4, %p9016_p5 }
 0x555   : > { %p8882_p11 = por %p8881_p10, %p8880_p9 }
 0x556   : > { %p8878_p8 = pneg %p8877_p7 }
 0x557   : > { %p8884_p13 = por %p8883_p12, %p8882_p11 }
 0x559   : > { %p8885_p0 = pnand %p8884_p13, %p8878_p8 }
 0x55b   : > { %8888 = shalt.err (!%p8885_p0)
}
 0x55c   : > { %8594 = dma.vmem_to_hbm [thread:$0]  (%p9016_p5), %s11002_s21, 16, %s11000_s24, %s6703_s25  }
 0x55d PF: > { %p8600_p1 = scmp.ge.s32.totalorder %s8923_s12, 2  ;;  %s6727_s13 = sand.u32 1, %s8911_s30  }
 0x55e   : > { %s6728_s26 = scalar_lea.sflag [#allocation6], %s6727_s13 }
 0x55f   : > { %p8597_p2 = pnand %p8600_p1, %p9020_p6 }
 0x561   : > { %8906 = dma.done.wait (!%p8597_p2), %s6728_s26, 16  }
 0x562   : > { %8908 = vsyncadd (!%p8597_p2), %s6728_s26, 4294967280  ;;  %p19_p3 = scmp.ge.s32.totalorder %s9003_s15, 4   ;;  %s11163_s30 = smov %s8915_s10 }
 0x563   : > { %s11164_s10 = smov %s8919_s11  ;;  %s11165_s11 = smov %s9014_s18 }
 0x564   : > { %s11166_s12 = smov %s9003_s15  ;;  %21 = sbr.rel (!%p19_p3) target bundleno = 3 (0x3), region = 139 }
 0x56b   :  { %6732 = vsyncpa [#allocation6], 1 }
 0x56c   :  { %6734 = vsyncpa [#allocation6 + $0x1], 1 }

</bundles_post_ra>
